<compile_context>
chip_gen: v6e
topology: v6e:2x2x1
jax: 0.10.0
libtpu: 0.0.40
codegen_flags: <defaults>
</compile_context>

<pallas_src>
import functools

import jax
import jax.numpy as jnp
from jax import lax
from jax.experimental import pallas as pl
from jax.experimental.pallas import tpu as pltpu


_LANE = 128
_VMEM_LIMIT_BYTES = 48 * 1024 * 1024   # actual footprint is ~2 MiB; 48 MiB is safe
                                        # on v5e/v6e (128 MiB) and v7x (64 MiB)
_CHUNK_CAP = 1024                       # output columns (lanes) per inner GEMM


def _round_up(x, m):
    return (x + m - 1) // m * m


def _pick_chunk(s, cap=_CHUNK_CAP):
    """Largest multiple of 128 that divides `s` and is <= cap (fallback: s)."""
    if s <= cap:
        return s
    for c in range(cap, _LANE - 1, -_LANE):
        if s % c == 0:
            return c
    return s


# ----------------------------------------------------------------------------
# Pallas kernel: lane-dense fused im2col GEMM + bias + ELU
# ----------------------------------------------------------------------------
def _conv_gemm_kernel(x_ref, w_ref, b_ref, o_ref, *, ntaps, tap_stride,
                      chunk, n_chunks, apply_elu):
    """One batch element per grid step.

    x_ref : (Kp, Stot)        bf16  im2col rows (kh,kw,cin); flat padded volume on
                                    lanes, Stot = (D + ntaps - 1) * HWp
    w_ref : (ntaps, Cout, Kp) bf16  one (Cout, Kp) matrix per depth tap
    b_ref : (Cout, 1)         f32
    o_ref : (Cout, D * HWp)         lane-dense output (flat spatial on lanes)
    """
    for c in range(n_chunks):
        base = c * chunk
        acc = jnp.dot(w_ref[0], x_ref[:, base:base + chunk],
                      preferred_element_type=jnp.float32)
        for t in range(1, ntaps):
            lo = base + t * tap_stride           # multiple of 128 -> aligned slice
            acc = acc + jnp.dot(w_ref[t], x_ref[:, lo:lo + chunk],
                                preferred_element_type=jnp.float32)
        acc = acc + b_ref[...]
        if apply_elu:
            # ELU(alpha=1); clamp before exp so the unselected branch stays finite.
            acc = jnp.where(acc > 0, acc, jnp.exp(jnp.minimum(acc, 0.0)) - 1.0)
        o_ref[:, base:base + chunk] = acc.astype(o_ref.dtype)


def _conv_gemm(xcol, wmat, bvec, *, ntaps, hwp, d_out, apply_elu, out_dtype):
    """xcol: (N, Kp, Stot) bf16; wmat: (ntaps, Cout, Kp) bf16; bvec: (Cout, 1) f32."""
    N, Kp, Stot = xcol.shape
    _, Cout, _ = wmat.shape
    s_out = d_out * hwp
    chunk = _pick_chunk(s_out)
    n_chunks = s_out // chunk

    kern = functools.partial(_conv_gemm_kernel, ntaps=ntaps, tap_stride=hwp,
                             chunk=chunk, n_chunks=n_chunks, apply_elu=apply_elu)
    return pl.pallas_call(
        kern,
        out_shape=jax.ShapeDtypeStruct((N, Cout, s_out), out_dtype),
        grid=(N,),
        in_specs=[
            pl.BlockSpec((None, Kp, Stot), lambda n: (n, 0, 0)),
            pl.BlockSpec((ntaps, Cout, Kp), lambda n: (0, 0, 0)),
            pl.BlockSpec((Cout, 1), lambda n: (0, 0)),
        ],
        out_specs=pl.BlockSpec((None, Cout, s_out), lambda n: (n, 0, 0)),
        compiler_params=pltpu.CompilerParams(
            dimension_semantics=("parallel",),
            vmem_limit_bytes=_VMEM_LIMIT_BYTES),
    )(xcol, wmat, bvec)


# ----------------------------------------------------------------------------
# Layer ops (activations carried as NCDHW)
# ----------------------------------------------------------------------------
def conv3x3_same(x, w, b, apply_elu=True, out_dtype=jnp.bfloat16):
    """Conv3d(k=3, s=1, p=1) [+ ELU].  Dropout3d is eval-mode identity."""
    N, Cin, D, H, W = x.shape
    Cout = int(w.shape[-1])
    HW = H * W
    HWp = _round_up(HW, _LANE)
    K9 = 9 * Cin
    Kp = _round_up(K9, 16)

    xb = x.astype(jnp.bfloat16)
    xp = jnp.pad(xb, ((0, 0), (0, 0), (0, 0), (1, 1), (1, 1)))
    # 9 in-plane taps folded into the contraction dim (source order: kh, kw, cin).
    taps = [xp[:, :, :, kh:kh + H, kw:kw + W]
            for kh in range(3) for kw in range(3)]
    xcol = jnp.concatenate(taps, axis=1).reshape(N, K9, D, HW)
    # Pad: contraction rows -> Kp, depth planes -> D+2, plane columns -> HWp.
    xcol = jnp.pad(xcol, ((0, 0), (0, Kp - K9), (1, 1), (0, HWp - HW)))
    xcol = xcol.reshape(N, Kp, (D + 2) * HWp)

    # w: (kd, kh, kw, Cin, Cout) -> per depth tap (Cout, 9*Cin), rows = (kh, kw, cin).
    wk = jnp.transpose(w, (0, 4, 1, 2, 3)).reshape(3, Cout, K9)
    wk = jnp.pad(wk, ((0, 0), (0, 0), (0, Kp - K9))).astype(jnp.bfloat16)
    bvec = b.reshape(Cout, 1).astype(jnp.float32)

    out = _conv_gemm(xcol, wk, bvec, ntaps=3, hwp=HWp, d_out=D,
                     apply_elu=apply_elu, out_dtype=out_dtype)
    out = out.reshape(N, Cout, D, HWp)[:, :, :, :HW]
    return out.reshape(N, Cout, D, H, W)


def conv1x1(x, w, b, out_dtype=jnp.float32):
    """Conv3d(kernel_size=1), no activation (final projection)."""
    N, Cin, D, H, W = x.shape
    Cout = int(w.shape[-1])
    HW = H * W
    HWp = _round_up(HW, _LANE)
    Kp = _round_up(Cin, 8)

    xcol = x.astype(jnp.bfloat16).reshape(N, Cin, D, HW)
    xcol = jnp.pad(xcol, ((0, 0), (0, Kp - Cin), (0, 0), (0, HWp - HW)))
    xcol = xcol.reshape(N, Kp, D * HWp)

    wk = w.reshape(Cin, Cout).T.reshape(1, Cout, Cin)
    wk = jnp.pad(wk, ((0, 0), (0, 0), (0, Kp - Cin))).astype(jnp.bfloat16)
    bvec = b.reshape(Cout, 1).astype(jnp.float32)

    out = _conv_gemm(xcol, wk, bvec, ntaps=1, hwp=HWp, d_out=D,
                     apply_elu=False, out_dtype=out_dtype)
    out = out.reshape(N, Cout, D, HWp)[:, :, :, :HW]
    return out.reshape(N, Cout, D, H, W)


def conv_transpose3x3_s2(x, w, b, out_dtype=jnp.bfloat16):
    """ConvTranspose3d(k=3, s=2, p=1, output_padding=1) + ELU.

    Zero-stuff the input (stride-2 interior pad + 1 trailing pad per spatial dim),
    then run the same lane-dense 'same' conv with the spatially flipped kernel.
    This removes the phase-decomposition and its post-kernel un-interleave shuffle.
    """
    xb = x.astype(jnp.bfloat16)
    cfg = [(0, 0, 0), (0, 0, 0), (0, 1, 1), (0, 1, 1), (0, 1, 1)]
    u = lax.pad(xb, jnp.zeros((), xb.dtype), cfg)        # (N, C, 2D, 2H, 2W)
    wf = w[::-1, ::-1, ::-1]                             # spatial flip (trace-time)
    return conv3x3_same(u, wf, b, apply_elu=True, out_dtype=out_dtype)


def maxpool2x2x2(x):
    """MaxPool3d(2, 2, 0) as an XLA reshape+max that fuses into the next layer's
    im2col prep (standalone Pallas pool kernel dropped per performance review)."""
    N, C, D, H, W = x.shape
    return x.reshape(N, C, D // 2, 2, H // 2, 2, W // 2, 2).max(axis=(3, 5, 7))


# ----------------------------------------------------------------------------
# Model: parameters + forward
# ----------------------------------------------------------------------------
def init_params(key, in_dim, out_dim):
    def conv_p(k, ksz, cin, cout):
        kw_, kb_ = jax.random.split(k)
        fan_in = cin * ksz ** 3
        w = jax.random.normal(kw_, (ksz, ksz, ksz, cin, cout), jnp.float32)
        w = w / jnp.sqrt(jnp.float32(fan_in))
        b = 0.01 * jax.random.normal(kb_, (cout,), jnp.float32)
        return w, b

    ks = jax.random.split(key, 9)
    # TODO(synk): to load real PyTorch weights, transpose Conv3d weights
    # (Cout,Cin,kd,kh,kw)->(kd,kh,kw,Cin,Cout) and ConvTranspose3d weights
    # (Cin,Cout,kd,kh,kw)->(kd,kh,kw,Cin,Cout); the required spatial flip for
    # transpose convs is applied internally in conv_transpose3x3_s2.
    return {
        "down1":   conv_p(ks[0], 3, in_dim, 4),
        "down2":   conv_p(ks[1], 3, 4, 8),
        "bridge1": conv_p(ks[2], 3, 8, 16),
        "bridge2": conv_p(ks[3], 3, 16, 16),
        "trans1":  conv_p(ks[4], 3, 16, 8),
        "up1":     conv_p(ks[5], 3, 8, 8),
        "trans2":  conv_p(ks[6], 3, 8, 4),
        "up2":     conv_p(ks[7], 3, 8, 4),
        "out":     conv_p(ks[8], 1, 4, out_dim),
    }


def sunet3d_forward(x_ncdhw, params):
    """Forward pass; input/output use the PyTorch NCDHW convention."""
    # TODO(synk): Dropout3d layers are treated as eval-mode identity.
    down_1 = conv3x3_same(x_ncdhw, *params["down1"])          # Conv + ELU
    pool_1 = maxpool2x2x2(down_1)
    down_2 = conv3x3_same(pool_1, *params["down2"])
    pool_2 = maxpool2x2x2(down_2)
    bridge = conv3x3_same(pool_2, *params["bridge1"])
    bridge = conv3x3_same(bridge, *params["bridge2"])
    trans_1 = conv_transpose3x3_s2(bridge, *params["trans1"])
    up_1 = conv3x3_same(trans_1, *params["up1"])
    trans_2 = conv_transpose3x3_s2(up_1, *params["trans2"])
    concat_2 = jnp.concatenate([trans_2, down_1.astype(trans_2.dtype)], axis=1)
    up_2 = conv3x3_same(concat_2, *params["up2"])
    out = conv1x1(up_2, *params["out"], out_dtype=jnp.float32)
    return out                                                 # NCDHW


# ----------------------------------------------------------------------------
if __name__ == "__main__":
    key = jax.random.PRNGKey(0)
    kx, kp = jax.random.split(key)

    in_dim, out_dim = 3, 2
    N, D, H, W = 2, 16, 16, 16                                 # /4-divisible

    x = jax.random.normal(kx, (N, in_dim, D, H, W), jnp.float32)
    params = init_params(kp, in_dim, out_dim)

    fwd = jax.jit(sunet3d_forward)
    y = fwd(x, params)
    jax.block_until_ready(y)

    assert y.shape == (N, out_dim, D, H, W), y.shape
    assert bool(jnp.all(jnp.isfinite(y)))
    print("KERNEL_OK")
</pallas_src>

<mosaic_0001>
module attributes {stable_mosaic.version = 11 : i64} {
  func.func @_conv_gemm_kernel(%arg0: i32, %arg1: memref<1x32x4608xbf16, #tpu.memory_space<vmem>>, %arg2: memref<3x4x32xbf16, #tpu.memory_space<vmem>>, %arg3: memref<4x1xf32, #tpu.memory_space<vmem>>, %arg4: memref<1x4x4096xbf16, #tpu.memory_space<vmem>>) attributes {dimension_semantics = [#tpu.dimension_semantics<parallel>], iteration_bounds = array<i64: 2>, scalar_prefetch = 0 : i64, scratch_operands = 0 : i64, tpu.core_type = #tpu.core_type<tc>, window_params = [{transform_indices = @transform_0, window_bounds = array<i64: 1, 32, 4608>}, {pipeline_mode = #tpu.pipeline_mode<synchronous>, transform_indices = @transform_1, window_bounds = array<i64: 3, 4, 32>}, {pipeline_mode = #tpu.pipeline_mode<synchronous>, transform_indices = @transform_2, window_bounds = array<i64: 4, 1>}, {transform_indices = @transform_3, window_bounds = array<i64: 1, 4, 4096>}]} {
    %c0 = arith.constant 0 : index
    %c0_0 = arith.constant 0 : index
    %c0_1 = arith.constant 0 : index
    %0 = vector.load %arg2[%c0, %c0_0, %c0_1] : memref<3x4x32xbf16, #tpu.memory_space<vmem>>, vector<1x4x32xbf16>
    %1 = vector.shape_cast %0 : vector<1x4x32xbf16> to vector<4x32xbf16>
    %c0_2 = arith.constant 0 : index
    %c0_3 = arith.constant 0 : index
    %c0_4 = arith.constant 0 : index
    %2 = vector.load %arg1[%c0_2, %c0_3, %c0_4] : memref<1x32x4608xbf16, #tpu.memory_space<vmem>>, vector<1x32x1024xbf16>
    %3 = vector.shape_cast %2 : vector<1x32x1024xbf16> to vector<32x1024xbf16>
    %cst = arith.constant dense<0.000000e+00> : vector<4x1024xf32>
    %4 = tpu.matmul %1, %3, %cst {dimension_numbers = #tpu.dot_dimension_numbers<[1], [0], [0], [1], [0, 0, 1, 1], [], []>} : vector<4x32xbf16>, vector<32x1024xbf16>, vector<4x1024xf32> -> vector<4x1024xf32>
    %c1 = arith.constant 1 : index
    %c0_5 = arith.constant 0 : index
    %c0_6 = arith.constant 0 : index
    %5 = vector.load %arg2[%c1, %c0_5, %c0_6] : memref<3x4x32xbf16, #tpu.memory_space<vmem>>, vector<1x4x32xbf16>
    %6 = vector.shape_cast %5 : vector<1x4x32xbf16> to vector<4x32xbf16>
    %c0_7 = arith.constant 0 : index
    %c0_8 = arith.constant 0 : index
    %c256 = arith.constant 256 : index
    %7 = vector.load %arg1[%c0_7, %c0_8, %c256] : memref<1x32x4608xbf16, #tpu.memory_space<vmem>>, vector<1x32x1024xbf16>
    %8 = vector.shape_cast %7 : vector<1x32x1024xbf16> to vector<32x1024xbf16>
    %cst_9 = arith.constant dense<0.000000e+00> : vector<4x1024xf32>
    %9 = tpu.matmul %6, %8, %cst_9 {dimension_numbers = #tpu.dot_dimension_numbers<[1], [0], [0], [1], [0, 0, 1, 1], [], []>} : vector<4x32xbf16>, vector<32x1024xbf16>, vector<4x1024xf32> -> vector<4x1024xf32>
    %10 = arith.addf %4, %9 : vector<4x1024xf32>
    %c2 = arith.constant 2 : index
    %c0_10 = arith.constant 0 : index
    %c0_11 = arith.constant 0 : index
    %11 = vector.load %arg2[%c2, %c0_10, %c0_11] : memref<3x4x32xbf16, #tpu.memory_space<vmem>>, vector<1x4x32xbf16>
    %12 = vector.shape_cast %11 : vector<1x4x32xbf16> to vector<4x32xbf16>
    %c0_12 = arith.constant 0 : index
    %c0_13 = arith.constant 0 : index
    %c512 = arith.constant 512 : index
    %13 = vector.load %arg1[%c0_12, %c0_13, %c512] : memref<1x32x4608xbf16, #tpu.memory_space<vmem>>, vector<1x32x1024xbf16>
    %14 = vector.shape_cast %13 : vector<1x32x1024xbf16> to vector<32x1024xbf16>
    %cst_14 = arith.constant dense<0.000000e+00> : vector<4x1024xf32>
    %15 = tpu.matmul %12, %14, %cst_14 {dimension_numbers = #tpu.dot_dimension_numbers<[1], [0], [0], [1], [0, 0, 1, 1], [], []>} : vector<4x32xbf16>, vector<32x1024xbf16>, vector<4x1024xf32> -> vector<4x1024xf32>
    %16 = arith.addf %10, %15 : vector<4x1024xf32>
    %c0_15 = arith.constant 0 : index
    %c0_16 = arith.constant 0 : index
    %17 = vector.load %arg3[%c0_15, %c0_16] : memref<4x1xf32, #tpu.memory_space<vmem>>, vector<4x1xf32>
    %18 = vector.broadcast %17 : vector<4x1xf32> to vector<4x1024xf32>
    %19 = arith.addf %16, %18 : vector<4x1024xf32>
    %cst_17 = arith.constant 0.000000e+00 : f32
    %20 = vector.broadcast %cst_17 : f32 to vector<4x1024xf32>
    %21 = arith.cmpf ogt, %19, %20 : vector<4x1024xf32>
    %cst_18 = arith.constant 0.000000e+00 : f32
    %22 = vector.broadcast %cst_18 : f32 to vector<4x1024xf32>
    %23 = arith.minimumf %19, %22 : vector<4x1024xf32>
    %24 = math.exp %23 : vector<4x1024xf32>
    %cst_19 = arith.constant 1.000000e+00 : f32
    %25 = vector.broadcast %cst_19 : f32 to vector<4x1024xf32>
    %26 = arith.subf %24, %25 : vector<4x1024xf32>
    %27 = arith.select %21, %19, %26 : vector<4x1024xi1>, vector<4x1024xf32>
    %28 = arith.truncf %27 : vector<4x1024xf32> to vector<4x1024xbf16>
    %c0_20 = arith.constant 0 : index
    %c0_21 = arith.constant 0 : index
    %c0_22 = arith.constant 0 : index
    %29 = vector.load %arg4[%c0_20, %c0_21, %c0_22] : memref<1x4x4096xbf16, #tpu.memory_space<vmem>>, vector<1x4x1024xbf16>
    %30 = vector.shape_cast %29 : vector<1x4x1024xbf16> to vector<4x1024xbf16>
    %31 = vector.shape_cast %28 : vector<4x1024xbf16> to vector<1x4x1024xbf16>
    tpu.vector_store %arg4[%c0_20, %c0_21, %c0_22], %31 {strides = array<i32>} : memref<1x4x4096xbf16, #tpu.memory_space<vmem>>, vector<1x4x1024xbf16>,
    %c0_23 = arith.constant 0 : index
    %c0_24 = arith.constant 0 : index
    %c0_25 = arith.constant 0 : index
    %32 = vector.load %arg2[%c0_23, %c0_24, %c0_25] : memref<3x4x32xbf16, #tpu.memory_space<vmem>>, vector<1x4x32xbf16>
    %33 = vector.shape_cast %32 : vector<1x4x32xbf16> to vector<4x32xbf16>
    %c0_26 = arith.constant 0 : index
    %c0_27 = arith.constant 0 : index
    %c1024 = arith.constant 1024 : index
    %34 = vector.load %arg1[%c0_26, %c0_27, %c1024] : memref<1x32x4608xbf16, #tpu.memory_space<vmem>>, vector<1x32x1024xbf16>
    %35 = vector.shape_cast %34 : vector<1x32x1024xbf16> to vector<32x1024xbf16>
    %cst_28 = arith.constant dense<0.000000e+00> : vector<4x1024xf32>
    %36 = tpu.matmul %33, %35, %cst_28 {dimension_numbers = #tpu.dot_dimension_numbers<[1], [0], [0], [1], [0, 0, 1, 1], [], []>} : vector<4x32xbf16>, vector<32x1024xbf16>, vector<4x1024xf32> -> vector<4x1024xf32>
    %c1_29 = arith.constant 1 : index
    %c0_30 = arith.constant 0 : index
    %c0_31 = arith.constant 0 : index
    %37 = vector.load %arg2[%c1_29, %c0_30, %c0_31] : memref<3x4x32xbf16, #tpu.memory_space<vmem>>, vector<1x4x32xbf16>
    %38 = vector.shape_cast %37 : vector<1x4x32xbf16> to vector<4x32xbf16>
    %c0_32 = arith.constant 0 : index
    %c0_33 = arith.constant 0 : index
    %c1280 = arith.constant 1280 : index
    %39 = vector.load %arg1[%c0_32, %c0_33, %c1280] : memref<1x32x4608xbf16, #tpu.memory_space<vmem>>, vector<1x32x1024xbf16>
    %40 = vector.shape_cast %39 : vector<1x32x1024xbf16> to vector<32x1024xbf16>
    %cst_34 = arith.constant dense<0.000000e+00> : vector<4x1024xf32>
    %41 = tpu.matmul %38, %40, %cst_34 {dimension_numbers = #tpu.dot_dimension_numbers<[1], [0], [0], [1], [0, 0, 1, 1], [], []>} : vector<4x32xbf16>, vector<32x1024xbf16>, vector<4x1024xf32> -> vector<4x1024xf32>
    %42 = arith.addf %36, %41 : vector<4x1024xf32>
    %c2_35 = arith.constant 2 : index
    %c0_36 = arith.constant 0 : index
    %c0_37 = arith.constant 0 : index
    %43 = vector.load %arg2[%c2_35, %c0_36, %c0_37] : memref<3x4x32xbf16, #tpu.memory_space<vmem>>, vector<1x4x32xbf16>
    %44 = vector.shape_cast %43 : vector<1x4x32xbf16> to vector<4x32xbf16>
    %c0_38 = arith.constant 0 : index
    %c0_39 = arith.constant 0 : index
    %c1536 = arith.constant 1536 : index
    %45 = vector.load %arg1[%c0_38, %c0_39, %c1536] : memref<1x32x4608xbf16, #tpu.memory_space<vmem>>, vector<1x32x1024xbf16>
    %46 = vector.shape_cast %45 : vector<1x32x1024xbf16> to vector<32x1024xbf16>
    %cst_40 = arith.constant dense<0.000000e+00> : vector<4x1024xf32>
    %47 = tpu.matmul %44, %46, %cst_40 {dimension_numbers = #tpu.dot_dimension_numbers<[1], [0], [0], [1], [0, 0, 1, 1], [], []>} : vector<4x32xbf16>, vector<32x1024xbf16>, vector<4x1024xf32> -> vector<4x1024xf32>
    %48 = arith.addf %42, %47 : vector<4x1024xf32>
    %c0_41 = arith.constant 0 : index
    %c0_42 = arith.constant 0 : index
    %49 = vector.load %arg3[%c0_41, %c0_42] : memref<4x1xf32, #tpu.memory_space<vmem>>, vector<4x1xf32>
    %50 = vector.broadcast %49 : vector<4x1xf32> to vector<4x1024xf32>
    %51 = arith.addf %48, %50 : vector<4x1024xf32>
    %cst_43 = arith.constant 0.000000e+00 : f32
    %52 = vector.broadcast %cst_43 : f32 to vector<4x1024xf32>
    %53 = arith.cmpf ogt, %51, %52 : vector<4x1024xf32>
    %cst_44 = arith.constant 0.000000e+00 : f32
    %54 = vector.broadcast %cst_44 : f32 to vector<4x1024xf32>
    %55 = arith.minimumf %51, %54 : vector<4x1024xf32>
    %56 = math.exp %55 : vector<4x1024xf32>
    %cst_45 = arith.constant 1.000000e+00 : f32
    %57 = vector.broadcast %cst_45 : f32 to vector<4x1024xf32>
    %58 = arith.subf %56, %57 : vector<4x1024xf32>
    %59 = arith.select %53, %51, %58 : vector<4x1024xi1>, vector<4x1024xf32>
    %60 = arith.truncf %59 : vector<4x1024xf32> to vector<4x1024xbf16>
    %c0_46 = arith.constant 0 : index
    %c0_47 = arith.constant 0 : index
    %c1024_48 = arith.constant 1024 : index
    %61 = vector.load %arg4[%c0_46, %c0_47, %c1024_48] : memref<1x4x4096xbf16, #tpu.memory_space<vmem>>, vector<1x4x1024xbf16>
    %62 = vector.shape_cast %61 : vector<1x4x1024xbf16> to vector<4x1024xbf16>
    %63 = vector.shape_cast %60 : vector<4x1024xbf16> to vector<1x4x1024xbf16>
    tpu.vector_store %arg4[%c0_46, %c0_47, %c1024_48], %63 {strides = array<i32>} : memref<1x4x4096xbf16, #tpu.memory_space<vmem>>, vector<1x4x1024xbf16>,
    %c0_49 = arith.constant 0 : index
    %c0_50 = arith.constant 0 : index
    %c0_51 = arith.constant 0 : index
    %64 = vector.load %arg2[%c0_49, %c0_50, %c0_51] : memref<3x4x32xbf16, #tpu.memory_space<vmem>>, vector<1x4x32xbf16>
    %65 = vector.shape_cast %64 : vector<1x4x32xbf16> to vector<4x32xbf16>
    %c0_52 = arith.constant 0 : index
    %c0_53 = arith.constant 0 : index
    %c2048 = arith.constant 2048 : index
    %66 = vector.load %arg1[%c0_52, %c0_53, %c2048] : memref<1x32x4608xbf16, #tpu.memory_space<vmem>>, vector<1x32x1024xbf16>
    %67 = vector.shape_cast %66 : vector<1x32x1024xbf16> to vector<32x1024xbf16>
    %cst_54 = arith.constant dense<0.000000e+00> : vector<4x1024xf32>
    %68 = tpu.matmul %65, %67, %cst_54 {dimension_numbers = #tpu.dot_dimension_numbers<[1], [0], [0], [1], [0, 0, 1, 1], [], []>} : vector<4x32xbf16>, vector<32x1024xbf16>, vector<4x1024xf32> -> vector<4x1024xf32>
    %c1_55 = arith.constant 1 : index
    %c0_56 = arith.constant 0 : index
    %c0_57 = arith.constant 0 : index
    %69 = vector.load %arg2[%c1_55, %c0_56, %c0_57] : memref<3x4x32xbf16, #tpu.memory_space<vmem>>, vector<1x4x32xbf16>
    %70 = vector.shape_cast %69 : vector<1x4x32xbf16> to vector<4x32xbf16>
    %c0_58 = arith.constant 0 : index
    %c0_59 = arith.constant 0 : index
    %c2304 = arith.constant 2304 : index
    %71 = vector.load %arg1[%c0_58, %c0_59, %c2304] : memref<1x32x4608xbf16, #tpu.memory_space<vmem>>, vector<1x32x1024xbf16>
    %72 = vector.shape_cast %71 : vector<1x32x1024xbf16> to vector<32x1024xbf16>
    %cst_60 = arith.constant dense<0.000000e+00> : vector<4x1024xf32>
    %73 = tpu.matmul %70, %72, %cst_60 {dimension_numbers = #tpu.dot_dimension_numbers<[1], [0], [0], [1], [0, 0, 1, 1], [], []>} : vector<4x32xbf16>, vector<32x1024xbf16>, vector<4x1024xf32> -> vector<4x1024xf32>
    %74 = arith.addf %68, %73 : vector<4x1024xf32>
    %c2_61 = arith.constant 2 : index
    %c0_62 = arith.constant 0 : index
    %c0_63 = arith.constant 0 : index
    %75 = vector.load %arg2[%c2_61, %c0_62, %c0_63] : memref<3x4x32xbf16, #tpu.memory_space<vmem>>, vector<1x4x32xbf16>
    %76 = vector.shape_cast %75 : vector<1x4x32xbf16> to vector<4x32xbf16>
    %c0_64 = arith.constant 0 : index
    %c0_65 = arith.constant 0 : index
    %c2560 = arith.constant 2560 : index
    %77 = vector.load %arg1[%c0_64, %c0_65, %c2560] : memref<1x32x4608xbf16, #tpu.memory_space<vmem>>, vector<1x32x1024xbf16>
    %78 = vector.shape_cast %77 : vector<1x32x1024xbf16> to vector<32x1024xbf16>
    %cst_66 = arith.constant dense<0.000000e+00> : vector<4x1024xf32>
    %79 = tpu.matmul %76, %78, %cst_66 {dimension_numbers = #tpu.dot_dimension_numbers<[1], [0], [0], [1], [0, 0, 1, 1], [], []>} : vector<4x32xbf16>, vector<32x1024xbf16>, vector<4x1024xf32> -> vector<4x1024xf32>
    %80 = arith.addf %74, %79 : vector<4x1024xf32>
    %c0_67 = arith.constant 0 : index
    %c0_68 = arith.constant 0 : index
    %81 = vector.load %arg3[%c0_67, %c0_68] : memref<4x1xf32, #tpu.memory_space<vmem>>, vector<4x1xf32>
    %82 = vector.broadcast %81 : vector<4x1xf32> to vector<4x1024xf32>
    %83 = arith.addf %80, %82 : vector<4x1024xf32>
    %cst_69 = arith.constant 0.000000e+00 : f32
    %84 = vector.broadcast %cst_69 : f32 to vector<4x1024xf32>
    %85 = arith.cmpf ogt, %83, %84 : vector<4x1024xf32>
    %cst_70 = arith.constant 0.000000e+00 : f32
    %86 = vector.broadcast %cst_70 : f32 to vector<4x1024xf32>
    %87 = arith.minimumf %83, %86 : vector<4x1024xf32>
    %88 = math.exp %87 : vector<4x1024xf32>
    %cst_71 = arith.constant 1.000000e+00 : f32
    %89 = vector.broadcast %cst_71 : f32 to vector<4x1024xf32>
    %90 = arith.subf %88, %89 : vector<4x1024xf32>
    %91 = arith.select %85, %83, %90 : vector<4x1024xi1>, vector<4x1024xf32>
    %92 = arith.truncf %91 : vector<4x1024xf32> to vector<4x1024xbf16>
    %c0_72 = arith.constant 0 : index
    %c0_73 = arith.constant 0 : index
    %c2048_74 = arith.constant 2048 : index
    %93 = vector.load %arg4[%c0_72, %c0_73, %c2048_74] : memref<1x4x4096xbf16, #tpu.memory_space<vmem>>, vector<1x4x1024xbf16>
    %94 = vector.shape_cast %93 : vector<1x4x1024xbf16> to vector<4x1024xbf16>
    %95 = vector.shape_cast %92 : vector<4x1024xbf16> to vector<1x4x1024xbf16>
    tpu.vector_store %arg4[%c0_72, %c0_73, %c2048_74], %95 {strides = array<i32>} : memref<1x4x4096xbf16, #tpu.memory_space<vmem>>, vector<1x4x1024xbf16>,
    %c0_75 = arith.constant 0 : index
    %c0_76 = arith.constant 0 : index
    %c0_77 = arith.constant 0 : index
    %96 = vector.load %arg2[%c0_75, %c0_76, %c0_77] : memref<3x4x32xbf16, #tpu.memory_space<vmem>>, vector<1x4x32xbf16>
    %97 = vector.shape_cast %96 : vector<1x4x32xbf16> to vector<4x32xbf16>
    %c0_78 = arith.constant 0 : index
    %c0_79 = arith.constant 0 : index
    %c3072 = arith.constant 3072 : index
    %98 = vector.load %arg1[%c0_78, %c0_79, %c3072] : memref<1x32x4608xbf16, #tpu.memory_space<vmem>>, vector<1x32x1024xbf16>
    %99 = vector.shape_cast %98 : vector<1x32x1024xbf16> to vector<32x1024xbf16>
    %cst_80 = arith.constant dense<0.000000e+00> : vector<4x1024xf32>
    %100 = tpu.matmul %97, %99, %cst_80 {dimension_numbers = #tpu.dot_dimension_numbers<[1], [0], [0], [1], [0, 0, 1, 1], [], []>} : vector<4x32xbf16>, vector<32x1024xbf16>, vector<4x1024xf32> -> vector<4x1024xf32>
    %c1_81 = arith.constant 1 : index
    %c0_82 = arith.constant 0 : index
    %c0_83 = arith.constant 0 : index
    %101 = vector.load %arg2[%c1_81, %c0_82, %c0_83] : memref<3x4x32xbf16, #tpu.memory_space<vmem>>, vector<1x4x32xbf16>
    %102 = vector.shape_cast %101 : vector<1x4x32xbf16> to vector<4x32xbf16>
    %c0_84 = arith.constant 0 : index
    %c0_85 = arith.constant 0 : index
    %c3328 = arith.constant 3328 : index
    %103 = vector.load %arg1[%c0_84, %c0_85, %c3328] : memref<1x32x4608xbf16, #tpu.memory_space<vmem>>, vector<1x32x1024xbf16>
    %104 = vector.shape_cast %103 : vector<1x32x1024xbf16> to vector<32x1024xbf16>
    %cst_86 = arith.constant dense<0.000000e+00> : vector<4x1024xf32>
    %105 = tpu.matmul %102, %104, %cst_86 {dimension_numbers = #tpu.dot_dimension_numbers<[1], [0], [0], [1], [0, 0, 1, 1], [], []>} : vector<4x32xbf16>, vector<32x1024xbf16>, vector<4x1024xf32> -> vector<4x1024xf32>
    %106 = arith.addf %100, %105 : vector<4x1024xf32>
    %c2_87 = arith.constant 2 : index
    %c0_88 = arith.constant 0 : index
    %c0_89 = arith.constant 0 : index
    %107 = vector.load %arg2[%c2_87, %c0_88, %c0_89] : memref<3x4x32xbf16, #tpu.memory_space<vmem>>, vector<1x4x32xbf16>
    %108 = vector.shape_cast %107 : vector<1x4x32xbf16> to vector<4x32xbf16>
    %c0_90 = arith.constant 0 : index
    %c0_91 = arith.constant 0 : index
    %c3584 = arith.constant 3584 : index
    %109 = vector.load %arg1[%c0_90, %c0_91, %c3584] : memref<1x32x4608xbf16, #tpu.memory_space<vmem>>, vector<1x32x1024xbf16>
    %110 = vector.shape_cast %109 : vector<1x32x1024xbf16> to vector<32x1024xbf16>
    %cst_92 = arith.constant dense<0.000000e+00> : vector<4x1024xf32>
    %111 = tpu.matmul %108, %110, %cst_92 {dimension_numbers = #tpu.dot_dimension_numbers<[1], [0], [0], [1], [0, 0, 1, 1], [], []>} : vector<4x32xbf16>, vector<32x1024xbf16>, vector<4x1024xf32> -> vector<4x1024xf32>
    %112 = arith.addf %106, %111 : vector<4x1024xf32>
    %c0_93 = arith.constant 0 : index
    %c0_94 = arith.constant 0 : index
    %113 = vector.load %arg3[%c0_93, %c0_94] : memref<4x1xf32, #tpu.memory_space<vmem>>, vector<4x1xf32>
    %114 = vector.broadcast %113 : vector<4x1xf32> to vector<4x1024xf32>
    %115 = arith.addf %112, %114 : vector<4x1024xf32>
    %cst_95 = arith.constant 0.000000e+00 : f32
    %116 = vector.broadcast %cst_95 : f32 to vector<4x1024xf32>
    %117 = arith.cmpf ogt, %115, %116 : vector<4x1024xf32>
    %cst_96 = arith.constant 0.000000e+00 : f32
    %118 = vector.broadcast %cst_96 : f32 to vector<4x1024xf32>
    %119 = arith.minimumf %115, %118 : vector<4x1024xf32>
    %120 = math.exp %119 : vector<4x1024xf32>
    %cst_97 = arith.constant 1.000000e+00 : f32
    %121 = vector.broadcast %cst_97 : f32 to vector<4x1024xf32>
    %122 = arith.subf %120, %121 : vector<4x1024xf32>
    %123 = arith.select %117, %115, %122 : vector<4x1024xi1>, vector<4x1024xf32>
    %124 = arith.truncf %123 : vector<4x1024xf32> to vector<4x1024xbf16>
    %c0_98 = arith.constant 0 : index
    %c0_99 = arith.constant 0 : index
    %c3072_100 = arith.constant 3072 : index
    %125 = vector.load %arg4[%c0_98, %c0_99, %c3072_100] : memref<1x4x4096xbf16, #tpu.memory_space<vmem>>, vector<1x4x1024xbf16>
    %126 = vector.shape_cast %125 : vector<1x4x1024xbf16> to vector<4x1024xbf16>
    %127 = vector.shape_cast %124 : vector<4x1024xbf16> to vector<1x4x1024xbf16>
    tpu.vector_store %arg4[%c0_98, %c0_99, %c3072_100], %127 {strides = array<i32>} : memref<1x4x4096xbf16, #tpu.memory_space<vmem>>, vector<1x4x1024xbf16>,
    return
  }
  func.func @transform_0(%arg0: i32) -> (i32, i32, i32) {
    %c0_i32 = arith.constant 0 : i32
    %c0_i32_0 = arith.constant 0 : i32
    %c0_i32_1 = arith.constant 0 : i32
    return %arg0, %c0_i32, %c0_i32_0 : i32, i32, i32
  }
  func.func @transform_1(%arg0: i32) -> (i32, i32, i32) {
    %c0_i32 = arith.constant 0 : i32
    %c0_i32_0 = arith.constant 0 : i32
    %c0_i32_1 = arith.constant 0 : i32
    %c0_i32_2 = arith.constant 0 : i32
    return %c0_i32, %c0_i32_0, %c0_i32_1 : i32, i32, i32
  }
  func.func @transform_2(%arg0: i32) -> (i32, i32) {
    %c0_i32 = arith.constant 0 : i32
    %c0_i32_0 = arith.constant 0 : i32
    %c0_i32_1 = arith.constant 0 : i32
    return %c0_i32, %c0_i32_0 : i32, i32
  }
  func.func @transform_3(%arg0: i32) -> (i32, i32, i32) {
    %c0_i32 = arith.constant 0 : i32
    %c0_i32_0 = arith.constant 0 : i32
    %c0_i32_1 = arith.constant 0 : i32
    return %arg0, %c0_i32, %c0_i32_0 : i32, i32, i32
  }
}

module attributes {stable_mosaic.version = 11 : i64} {
  func.func @_conv_gemm_kernel(%arg0: i32, %arg1: memref<1x48x1280xbf16, #tpu.memory_space<vmem>>, %arg2: memref<3x8x48xbf16, #tpu.memory_space<vmem>>, %arg3: memref<8x1xf32, #tpu.memory_space<vmem>>, %arg4: memref<1x8x1024xbf16, #tpu.memory_space<vmem>>) attributes {dimension_semantics = [#tpu.dimension_semantics<parallel>], iteration_bounds = array<i64: 2>, scalar_prefetch = 0 : i64, scratch_operands = 0 : i64, tpu.core_type = #tpu.core_type<tc>, window_params = [{transform_indices = @transform_0, window_bounds = array<i64: 1, 48, 1280>}, {pipeline_mode = #tpu.pipeline_mode<synchronous>, transform_indices = @transform_1, window_bounds = array<i64: 3, 8, 48>}, {pipeline_mode = #tpu.pipeline_mode<synchronous>, transform_indices = @transform_2, window_bounds = array<i64: 8, 1>}, {transform_indices = @transform_3, window_bounds = array<i64: 1, 8, 1024>}]} {
    %c0 = arith.constant 0 : index
    %c0_0 = arith.constant 0 : index
    %c0_1 = arith.constant 0 : index
    %0 = vector.load %arg2[%c0, %c0_0, %c0_1] : memref<3x8x48xbf16, #tpu.memory_space<vmem>>, vector<1x8x48xbf16>
    %1 = vector.shape_cast %0 : vector<1x8x48xbf16> to vector<8x48xbf16>
    %c0_2 = arith.constant 0 : index
    %c0_3 = arith.constant 0 : index
    %c0_4 = arith.constant 0 : index
    %2 = vector.load %arg1[%c0_2, %c0_3, %c0_4] : memref<1x48x1280xbf16, #tpu.memory_space<vmem>>, vector<1x48x1024xbf16>
    %3 = vector.shape_cast %2 : vector<1x48x1024xbf16> to vector<48x1024xbf16>
    %cst = arith.constant dense<0.000000e+00> : vector<8x1024xf32>
    %4 = tpu.matmul %1, %3, %cst {dimension_numbers = #tpu.dot_dimension_numbers<[1], [0], [0], [1], [0, 0, 1, 1], [], []>} : vector<8x48xbf16>, vector<48x1024xbf16>, vector<8x1024xf32> -> vector<8x1024xf32>
    %c1 = arith.constant 1 : index
    %c0_5 = arith.constant 0 : index
    %c0_6 = arith.constant 0 : index
    %5 = vector.load %arg2[%c1, %c0_5, %c0_6] : memref<3x8x48xbf16, #tpu.memory_space<vmem>>, vector<1x8x48xbf16>
    %6 = vector.shape_cast %5 : vector<1x8x48xbf16> to vector<8x48xbf16>
    %c0_7 = arith.constant 0 : index
    %c0_8 = arith.constant 0 : index
    %c128 = arith.constant 128 : index
    %7 = vector.load %arg1[%c0_7, %c0_8, %c128] : memref<1x48x1280xbf16, #tpu.memory_space<vmem>>, vector<1x48x1024xbf16>
    %8 = vector.shape_cast %7 : vector<1x48x1024xbf16> to vector<48x1024xbf16>
    %cst_9 = arith.constant dense<0.000000e+00> : vector<8x1024xf32>
    %9 = tpu.matmul %6, %8, %cst_9 {dimension_numbers = #tpu.dot_dimension_numbers<[1], [0], [0], [1], [0, 0, 1, 1], [], []>} : vector<8x48xbf16>, vector<48x1024xbf16>, vector<8x1024xf32> -> vector<8x1024xf32>
    %10 = arith.addf %4, %9 : vector<8x1024xf32>
    %c2 = arith.constant 2 : index
    %c0_10 = arith.constant 0 : index
    %c0_11 = arith.constant 0 : index
    %11 = vector.load %arg2[%c2, %c0_10, %c0_11] : memref<3x8x48xbf16, #tpu.memory_space<vmem>>, vector<1x8x48xbf16>
    %12 = vector.shape_cast %11 : vector<1x8x48xbf16> to vector<8x48xbf16>
    %c0_12 = arith.constant 0 : index
    %c0_13 = arith.constant 0 : index
    %c256 = arith.constant 256 : index
    %13 = vector.load %arg1[%c0_12, %c0_13, %c256] : memref<1x48x1280xbf16, #tpu.memory_space<vmem>>, vector<1x48x1024xbf16>
    %14 = vector.shape_cast %13 : vector<1x48x1024xbf16> to vector<48x1024xbf16>
    %cst_14 = arith.constant dense<0.000000e+00> : vector<8x1024xf32>
    %15 = tpu.matmul %12, %14, %cst_14 {dimension_numbers = #tpu.dot_dimension_numbers<[1], [0], [0], [1], [0, 0, 1, 1], [], []>} : vector<8x48xbf16>, vector<48x1024xbf16>, vector<8x1024xf32> -> vector<8x1024xf32>
    %16 = arith.addf %10, %15 : vector<8x1024xf32>
    %c0_15 = arith.constant 0 : index
    %c0_16 = arith.constant 0 : index
    %17 = vector.load %arg3[%c0_15, %c0_16] : memref<8x1xf32, #tpu.memory_space<vmem>>, vector<8x1xf32>
    %18 = vector.broadcast %17 : vector<8x1xf32> to vector<8x1024xf32>
    %19 = arith.addf %16, %18 : vector<8x1024xf32>
    %cst_17 = arith.constant 0.000000e+00 : f32
    %20 = vector.broadcast %cst_17 : f32 to vector<8x1024xf32>
    %21 = arith.cmpf ogt, %19, %20 : vector<8x1024xf32>
    %cst_18 = arith.constant 0.000000e+00 : f32
    %22 = vector.broadcast %cst_18 : f32 to vector<8x1024xf32>
    %23 = arith.minimumf %19, %22 : vector<8x1024xf32>
    %24 = math.exp %23 : vector<8x1024xf32>
    %cst_19 = arith.constant 1.000000e+00 : f32
    %25 = vector.broadcast %cst_19 : f32 to vector<8x1024xf32>
    %26 = arith.subf %24, %25 : vector<8x1024xf32>
    %27 = arith.select %21, %19, %26 : vector<8x1024xi1>, vector<8x1024xf32>
    %28 = arith.truncf %27 : vector<8x1024xf32> to vector<8x1024xbf16>
    %c0_20 = arith.constant 0 : index
    %c0_21 = arith.constant 0 : index
    %c0_22 = arith.constant 0 : index
    %29 = vector.load %arg4[%c0_20, %c0_21, %c0_22] : memref<1x8x1024xbf16, #tpu.memory_space<vmem>>, vector<1x8x1024xbf16>
    %30 = vector.shape_cast %29 : vector<1x8x1024xbf16> to vector<8x1024xbf16>
    %31 = vector.shape_cast %28 : vector<8x1024xbf16> to vector<1x8x1024xbf16>
    tpu.vector_store %arg4[%c0_20, %c0_21, %c0_22], %31 {strides = array<i32>} : memref<1x8x1024xbf16, #tpu.memory_space<vmem>>, vector<1x8x1024xbf16>,
    return
  }
  func.func @transform_0(%arg0: i32) -> (i32, i32, i32) {
    %c0_i32 = arith.constant 0 : i32
    %c0_i32_0 = arith.constant 0 : i32
    %c0_i32_1 = arith.constant 0 : i32
    return %arg0, %c0_i32, %c0_i32_0 : i32, i32, i32
  }
  func.func @transform_1(%arg0: i32) -> (i32, i32, i32) {
    %c0_i32 = arith.constant 0 : i32
    %c0_i32_0 = arith.constant 0 : i32
    %c0_i32_1 = arith.constant 0 : i32
    %c0_i32_2 = arith.constant 0 : i32
    return %c0_i32, %c0_i32_0, %c0_i32_1 : i32, i32, i32
  }
  func.func @transform_2(%arg0: i32) -> (i32, i32) {
    %c0_i32 = arith.constant 0 : i32
    %c0_i32_0 = arith.constant 0 : i32
    %c0_i32_1 = arith.constant 0 : i32
    return %c0_i32, %c0_i32_0 : i32, i32
  }
  func.func @transform_3(%arg0: i32) -> (i32, i32, i32) {
    %c0_i32 = arith.constant 0 : i32
    %c0_i32_0 = arith.constant 0 : i32
    %c0_i32_1 = arith.constant 0 : i32
    return %arg0, %c0_i32, %c0_i32_0 : i32, i32, i32
  }
}

module attributes {stable_mosaic.version = 11 : i64} {
  func.func @_conv_gemm_kernel(%arg0: i32, %arg1: memref<1x80x768xbf16, #tpu.memory_space<vmem>>, %arg2: memref<3x16x80xbf16, #tpu.memory_space<vmem>>, %arg3: memref<16x1xf32, #tpu.memory_space<vmem>>, %arg4: memref<1x16x512xbf16, #tpu.memory_space<vmem>>) attributes {dimension_semantics = [#tpu.dimension_semantics<parallel>], iteration_bounds = array<i64: 2>, scalar_prefetch = 0 : i64, scratch_operands = 0 : i64, tpu.core_type = #tpu.core_type<tc>, window_params = [{transform_indices = @transform_0, window_bounds = array<i64: 1, 80, 768>}, {pipeline_mode = #tpu.pipeline_mode<synchronous>, transform_indices = @transform_1, window_bounds = array<i64: 3, 16, 80>}, {pipeline_mode = #tpu.pipeline_mode<synchronous>, transform_indices = @transform_2, window_bounds = array<i64: 16, 1>}, {transform_indices = @transform_3, window_bounds = array<i64: 1, 16, 512>}]} {
    %c0 = arith.constant 0 : index
    %c0_0 = arith.constant 0 : index
    %c0_1 = arith.constant 0 : index
    %0 = vector.load %arg2[%c0, %c0_0, %c0_1] : memref<3x16x80xbf16, #tpu.memory_space<vmem>>, vector<1x16x80xbf16>
    %1 = vector.shape_cast %0 : vector<1x16x80xbf16> to vector<16x80xbf16>
    %c0_2 = arith.constant 0 : index
    %c0_3 = arith.constant 0 : index
    %c0_4 = arith.constant 0 : index
    %2 = vector.load %arg1[%c0_2, %c0_3, %c0_4] : memref<1x80x768xbf16, #tpu.memory_space<vmem>>, vector<1x80x512xbf16>
    %3 = vector.shape_cast %2 : vector<1x80x512xbf16> to vector<80x512xbf16>
    %cst = arith.constant dense<0.000000e+00> : vector<16x512xf32>
    %4 = tpu.matmul %1, %3, %cst {dimension_numbers = #tpu.dot_dimension_numbers<[1], [0], [0], [1], [0, 0, 1, 1], [], []>} : vector<16x80xbf16>, vector<80x512xbf16>, vector<16x512xf32> -> vector<16x512xf32>
    %c1 = arith.constant 1 : index
    %c0_5 = arith.constant 0 : index
    %c0_6 = arith.constant 0 : index
    %5 = vector.load %arg2[%c1, %c0_5, %c0_6] : memref<3x16x80xbf16, #tpu.memory_space<vmem>>, vector<1x16x80xbf16>
    %6 = vector.shape_cast %5 : vector<1x16x80xbf16> to vector<16x80xbf16>
    %c0_7 = arith.constant 0 : index
    %c0_8 = arith.constant 0 : index
    %c128 = arith.constant 128 : index
    %7 = vector.load %arg1[%c0_7, %c0_8, %c128] : memref<1x80x768xbf16, #tpu.memory_space<vmem>>, vector<1x80x512xbf16>
    %8 = vector.shape_cast %7 : vector<1x80x512xbf16> to vector<80x512xbf16>
    %cst_9 = arith.constant dense<0.000000e+00> : vector<16x512xf32>
    %9 = tpu.matmul %6, %8, %cst_9 {dimension_numbers = #tpu.dot_dimension_numbers<[1], [0], [0], [1], [0, 0, 1, 1], [], []>} : vector<16x80xbf16>, vector<80x512xbf16>, vector<16x512xf32> -> vector<16x512xf32>
    %10 = arith.addf %4, %9 : vector<16x512xf32>
    %c2 = arith.constant 2 : index
    %c0_10 = arith.constant 0 : index
    %c0_11 = arith.constant 0 : index
    %11 = vector.load %arg2[%c2, %c0_10, %c0_11] : memref<3x16x80xbf16, #tpu.memory_space<vmem>>, vector<1x16x80xbf16>
    %12 = vector.shape_cast %11 : vector<1x16x80xbf16> to vector<16x80xbf16>
    %c0_12 = arith.constant 0 : index
    %c0_13 = arith.constant 0 : index
    %c256 = arith.constant 256 : index
    %13 = vector.load %arg1[%c0_12, %c0_13, %c256] : memref<1x80x768xbf16, #tpu.memory_space<vmem>>, vector<1x80x512xbf16>
    %14 = vector.shape_cast %13 : vector<1x80x512xbf16> to vector<80x512xbf16>
    %cst_14 = arith.constant dense<0.000000e+00> : vector<16x512xf32>
    %15 = tpu.matmul %12, %14, %cst_14 {dimension_numbers = #tpu.dot_dimension_numbers<[1], [0], [0], [1], [0, 0, 1, 1], [], []>} : vector<16x80xbf16>, vector<80x512xbf16>, vector<16x512xf32> -> vector<16x512xf32>
    %16 = arith.addf %10, %15 : vector<16x512xf32>
    %c0_15 = arith.constant 0 : index
    %c0_16 = arith.constant 0 : index
    %17 = vector.load %arg3[%c0_15, %c0_16] : memref<16x1xf32, #tpu.memory_space<vmem>>, vector<16x1xf32>
    %18 = vector.broadcast %17 : vector<16x1xf32> to vector<16x512xf32>
    %19 = arith.addf %16, %18 : vector<16x512xf32>
    %cst_17 = arith.constant 0.000000e+00 : f32
    %20 = vector.broadcast %cst_17 : f32 to vector<16x512xf32>
    %21 = arith.cmpf ogt, %19, %20 : vector<16x512xf32>
    %cst_18 = arith.constant 0.000000e+00 : f32
    %22 = vector.broadcast %cst_18 : f32 to vector<16x512xf32>
    %23 = arith.minimumf %19, %22 : vector<16x512xf32>
    %24 = math.exp %23 : vector<16x512xf32>
    %cst_19 = arith.constant 1.000000e+00 : f32
    %25 = vector.broadcast %cst_19 : f32 to vector<16x512xf32>
    %26 = arith.subf %24, %25 : vector<16x512xf32>
    %27 = arith.select %21, %19, %26 : vector<16x512xi1>, vector<16x512xf32>
    %28 = arith.truncf %27 : vector<16x512xf32> to vector<16x512xbf16>
    %c0_20 = arith.constant 0 : index
    %c0_21 = arith.constant 0 : index
    %c0_22 = arith.constant 0 : index
    %29 = vector.load %arg4[%c0_20, %c0_21, %c0_22] : memref<1x16x512xbf16, #tpu.memory_space<vmem>>, vector<1x16x512xbf16>
    %30 = vector.shape_cast %29 : vector<1x16x512xbf16> to vector<16x512xbf16>
    %31 = vector.shape_cast %28 : vector<16x512xbf16> to vector<1x16x512xbf16>
    tpu.vector_store %arg4[%c0_20, %c0_21, %c0_22], %31 {strides = array<i32>} : memref<1x16x512xbf16, #tpu.memory_space<vmem>>, vector<1x16x512xbf16>,
    return
  }
  func.func @transform_0(%arg0: i32) -> (i32, i32, i32) {
    %c0_i32 = arith.constant 0 : i32
    %c0_i32_0 = arith.constant 0 : i32
    %c0_i32_1 = arith.constant 0 : i32
    return %arg0, %c0_i32, %c0_i32_0 : i32, i32, i32
  }
  func.func @transform_1(%arg0: i32) -> (i32, i32, i32) {
    %c0_i32 = arith.constant 0 : i32
    %c0_i32_0 = arith.constant 0 : i32
    %c0_i32_1 = arith.constant 0 : i32
    %c0_i32_2 = arith.constant 0 : i32
    return %c0_i32, %c0_i32_0, %c0_i32_1 : i32, i32, i32
  }
  func.func @transform_2(%arg0: i32) -> (i32, i32) {
    %c0_i32 = arith.constant 0 : i32
    %c0_i32_0 = arith.constant 0 : i32
    %c0_i32_1 = arith.constant 0 : i32
    return %c0_i32, %c0_i32_0 : i32, i32
  }
  func.func @transform_3(%arg0: i32) -> (i32, i32, i32) {
    %c0_i32 = arith.constant 0 : i32
    %c0_i32_0 = arith.constant 0 : i32
    %c0_i32_1 = arith.constant 0 : i32
    return %arg0, %c0_i32, %c0_i32_0 : i32, i32, i32
  }
}

module attributes {stable_mosaic.version = 11 : i64} {
  func.func @_conv_gemm_kernel(%arg0: i32, %arg1: memref<1x144x768xbf16, #tpu.memory_space<vmem>>, %arg2: memref<3x16x144xbf16, #tpu.memory_space<vmem>>, %arg3: memref<16x1xf32, #tpu.memory_space<vmem>>, %arg4: memref<1x16x512xbf16, #tpu.memory_space<vmem>>) attributes {dimension_semantics = [#tpu.dimension_semantics<parallel>], iteration_bounds = array<i64: 2>, scalar_prefetch = 0 : i64, scratch_operands = 0 : i64, tpu.core_type = #tpu.core_type<tc>, window_params = [{transform_indices = @transform_0, window_bounds = array<i64: 1, 144, 768>}, {pipeline_mode = #tpu.pipeline_mode<synchronous>, transform_indices = @transform_1, window_bounds = array<i64: 3, 16, 144>}, {pipeline_mode = #tpu.pipeline_mode<synchronous>, transform_indices = @transform_2, window_bounds = array<i64: 16, 1>}, {transform_indices = @transform_3, window_bounds = array<i64: 1, 16, 512>}]} {
    %c0 = arith.constant 0 : index
    %c0_0 = arith.constant 0 : index
    %c0_1 = arith.constant 0 : index
    %0 = vector.load %arg2[%c0, %c0_0, %c0_1] : memref<3x16x144xbf16, #tpu.memory_space<vmem>>, vector<1x16x144xbf16>
    %1 = vector.shape_cast %0 : vector<1x16x144xbf16> to vector<16x144xbf16>
    %c0_2 = arith.constant 0 : index
    %c0_3 = arith.constant 0 : index
    %c0_4 = arith.constant 0 : index
    %2 = vector.load %arg1[%c0_2, %c0_3, %c0_4] : memref<1x144x768xbf16, #tpu.memory_space<vmem>>, vector<1x144x512xbf16>
    %3 = vector.shape_cast %2 : vector<1x144x512xbf16> to vector<144x512xbf16>
    %cst = arith.constant dense<0.000000e+00> : vector<16x512xf32>
    %4 = tpu.matmul %1, %3, %cst {dimension_numbers = #tpu.dot_dimension_numbers<[1], [0], [0], [1], [0, 0, 1, 1], [], []>} : vector<16x144xbf16>, vector<144x512xbf16>, vector<16x512xf32> -> vector<16x512xf32>
    %c1 = arith.constant 1 : index
    %c0_5 = arith.constant 0 : index
    %c0_6 = arith.constant 0 : index
    %5 = vector.load %arg2[%c1, %c0_5, %c0_6] : memref<3x16x144xbf16, #tpu.memory_space<vmem>>, vector<1x16x144xbf16>
    %6 = vector.shape_cast %5 : vector<1x16x144xbf16> to vector<16x144xbf16>
    %c0_7 = arith.constant 0 : index
    %c0_8 = arith.constant 0 : index
    %c128 = arith.constant 128 : index
    %7 = vector.load %arg1[%c0_7, %c0_8, %c128] : memref<1x144x768xbf16, #tpu.memory_space<vmem>>, vector<1x144x512xbf16>
    %8 = vector.shape_cast %7 : vector<1x144x512xbf16> to vector<144x512xbf16>
    %cst_9 = arith.constant dense<0.000000e+00> : vector<16x512xf32>
    %9 = tpu.matmul %6, %8, %cst_9 {dimension_numbers = #tpu.dot_dimension_numbers<[1], [0], [0], [1], [0, 0, 1, 1], [], []>} : vector<16x144xbf16>, vector<144x512xbf16>, vector<16x512xf32> -> vector<16x512xf32>
    %10 = arith.addf %4, %9 : vector<16x512xf32>
    %c2 = arith.constant 2 : index
    %c0_10 = arith.constant 0 : index
    %c0_11 = arith.constant 0 : index
    %11 = vector.load %arg2[%c2, %c0_10, %c0_11] : memref<3x16x144xbf16, #tpu.memory_space<vmem>>, vector<1x16x144xbf16>
    %12 = vector.shape_cast %11 : vector<1x16x144xbf16> to vector<16x144xbf16>
    %c0_12 = arith.constant 0 : index
    %c0_13 = arith.constant 0 : index
    %c256 = arith.constant 256 : index
    %13 = vector.load %arg1[%c0_12, %c0_13, %c256] : memref<1x144x768xbf16, #tpu.memory_space<vmem>>, vector<1x144x512xbf16>
    %14 = vector.shape_cast %13 : vector<1x144x512xbf16> to vector<144x512xbf16>
    %cst_14 = arith.constant dense<0.000000e+00> : vector<16x512xf32>
    %15 = tpu.matmul %12, %14, %cst_14 {dimension_numbers = #tpu.dot_dimension_numbers<[1], [0], [0], [1], [0, 0, 1, 1], [], []>} : vector<16x144xbf16>, vector<144x512xbf16>, vector<16x512xf32> -> vector<16x512xf32>
    %16 = arith.addf %10, %15 : vector<16x512xf32>
    %c0_15 = arith.constant 0 : index
    %c0_16 = arith.constant 0 : index
    %17 = vector.load %arg3[%c0_15, %c0_16] : memref<16x1xf32, #tpu.memory_space<vmem>>, vector<16x1xf32>
    %18 = vector.broadcast %17 : vector<16x1xf32> to vector<16x512xf32>
    %19 = arith.addf %16, %18 : vector<16x512xf32>
    %cst_17 = arith.constant 0.000000e+00 : f32
    %20 = vector.broadcast %cst_17 : f32 to vector<16x512xf32>
    %21 = arith.cmpf ogt, %19, %20 : vector<16x512xf32>
    %cst_18 = arith.constant 0.000000e+00 : f32
    %22 = vector.broadcast %cst_18 : f32 to vector<16x512xf32>
    %23 = arith.minimumf %19, %22 : vector<16x512xf32>
    %24 = math.exp %23 : vector<16x512xf32>
    %cst_19 = arith.constant 1.000000e+00 : f32
    %25 = vector.broadcast %cst_19 : f32 to vector<16x512xf32>
    %26 = arith.subf %24, %25 : vector<16x512xf32>
    %27 = arith.select %21, %19, %26 : vector<16x512xi1>, vector<16x512xf32>
    %28 = arith.truncf %27 : vector<16x512xf32> to vector<16x512xbf16>
    %c0_20 = arith.constant 0 : index
    %c0_21 = arith.constant 0 : index
    %c0_22 = arith.constant 0 : index
    %29 = vector.load %arg4[%c0_20, %c0_21, %c0_22] : memref<1x16x512xbf16, #tpu.memory_space<vmem>>, vector<1x16x512xbf16>
    %30 = vector.shape_cast %29 : vector<1x16x512xbf16> to vector<16x512xbf16>
    %31 = vector.shape_cast %28 : vector<16x512xbf16> to vector<1x16x512xbf16>
    tpu.vector_store %arg4[%c0_20, %c0_21, %c0_22], %31 {strides = array<i32>} : memref<1x16x512xbf16, #tpu.memory_space<vmem>>, vector<1x16x512xbf16>,
    return
  }
  func.func @transform_0(%arg0: i32) -> (i32, i32, i32) {
    %c0_i32 = arith.constant 0 : i32
    %c0_i32_0 = arith.constant 0 : i32
    %c0_i32_1 = arith.constant 0 : i32
    return %arg0, %c0_i32, %c0_i32_0 : i32, i32, i32
  }
  func.func @transform_1(%arg0: i32) -> (i32, i32, i32) {
    %c0_i32 = arith.constant 0 : i32
    %c0_i32_0 = arith.constant 0 : i32
    %c0_i32_1 = arith.constant 0 : i32
    %c0_i32_2 = arith.constant 0 : i32
    return %c0_i32, %c0_i32_0, %c0_i32_1 : i32, i32, i32
  }
  func.func @transform_2(%arg0: i32) -> (i32, i32) {
    %c0_i32 = arith.constant 0 : i32
    %c0_i32_0 = arith.constant 0 : i32
    %c0_i32_1 = arith.constant 0 : i32
    return %c0_i32, %c0_i32_0 : i32, i32
  }
  func.func @transform_3(%arg0: i32) -> (i32, i32, i32) {
    %c0_i32 = arith.constant 0 : i32
    %c0_i32_0 = arith.constant 0 : i32
    %c0_i32_1 = arith.constant 0 : i32
    return %arg0, %c0_i32, %c0_i32_0 : i32, i32, i32
  }
}

module attributes {stable_mosaic.version = 11 : i64} {
  func.func @_conv_gemm_kernel(%arg0: i32, %arg1: memref<1x144x1280xbf16, #tpu.memory_space<vmem>>, %arg2: memref<3x8x144xbf16, #tpu.memory_space<vmem>>, %arg3: memref<8x1xf32, #tpu.memory_space<vmem>>, %arg4: memref<1x8x1024xbf16, #tpu.memory_space<vmem>>) attributes {dimension_semantics = [#tpu.dimension_semantics<parallel>], iteration_bounds = array<i64: 2>, scalar_prefetch = 0 : i64, scratch_operands = 0 : i64, tpu.core_type = #tpu.core_type<tc>, window_params = [{transform_indices = @transform_0, window_bounds = array<i64: 1, 144, 1280>}, {pipeline_mode = #tpu.pipeline_mode<synchronous>, transform_indices = @transform_1, window_bounds = array<i64: 3, 8, 144>}, {pipeline_mode = #tpu.pipeline_mode<synchronous>, transform_indices = @transform_2, window_bounds = array<i64: 8, 1>}, {transform_indices = @transform_3, window_bounds = array<i64: 1, 8, 1024>}]} {
    %c0 = arith.constant 0 : index
    %c0_0 = arith.constant 0 : index
    %c0_1 = arith.constant 0 : index
    %0 = vector.load %arg2[%c0, %c0_0, %c0_1] : memref<3x8x144xbf16, #tpu.memory_space<vmem>>, vector<1x8x144xbf16>
    %1 = vector.shape_cast %0 : vector<1x8x144xbf16> to vector<8x144xbf16>
    %c0_2 = arith.constant 0 : index
    %c0_3 = arith.constant 0 : index
    %c0_4 = arith.constant 0 : index
    %2 = vector.load %arg1[%c0_2, %c0_3, %c0_4] : memref<1x144x1280xbf16, #tpu.memory_space<vmem>>, vector<1x144x1024xbf16>
    %3 = vector.shape_cast %2 : vector<1x144x1024xbf16> to vector<144x1024xbf16>
    %cst = arith.constant dense<0.000000e+00> : vector<8x1024xf32>
    %4 = tpu.matmul %1, %3, %cst {dimension_numbers = #tpu.dot_dimension_numbers<[1], [0], [0], [1], [0, 0, 1, 1], [], []>} : vector<8x144xbf16>, vector<144x1024xbf16>, vector<8x1024xf32> -> vector<8x1024xf32>
    %c1 = arith.constant 1 : index
    %c0_5 = arith.constant 0 : index
    %c0_6 = arith.constant 0 : index
    %5 = vector.load %arg2[%c1, %c0_5, %c0_6] : memref<3x8x144xbf16, #tpu.memory_space<vmem>>, vector<1x8x144xbf16>
    %6 = vector.shape_cast %5 : vector<1x8x144xbf16> to vector<8x144xbf16>
    %c0_7 = arith.constant 0 : index
    %c0_8 = arith.constant 0 : index
    %c128 = arith.constant 128 : index
    %7 = vector.load %arg1[%c0_7, %c0_8, %c128] : memref<1x144x1280xbf16, #tpu.memory_space<vmem>>, vector<1x144x1024xbf16>
    %8 = vector.shape_cast %7 : vector<1x144x1024xbf16> to vector<144x1024xbf16>
    %cst_9 = arith.constant dense<0.000000e+00> : vector<8x1024xf32>
    %9 = tpu.matmul %6, %8, %cst_9 {dimension_numbers = #tpu.dot_dimension_numbers<[1], [0], [0], [1], [0, 0, 1, 1], [], []>} : vector<8x144xbf16>, vector<144x1024xbf16>, vector<8x1024xf32> -> vector<8x1024xf32>
    %10 = arith.addf %4, %9 : vector<8x1024xf32>
    %c2 = arith.constant 2 : index
    %c0_10 = arith.constant 0 : index
    %c0_11 = arith.constant 0 : index
    %11 = vector.load %arg2[%c2, %c0_10, %c0_11] : memref<3x8x144xbf16, #tpu.memory_space<vmem>>, vector<1x8x144xbf16>
    %12 = vector.shape_cast %11 : vector<1x8x144xbf16> to vector<8x144xbf16>
    %c0_12 = arith.constant 0 : index
    %c0_13 = arith.constant 0 : index
    %c256 = arith.constant 256 : index
    %13 = vector.load %arg1[%c0_12, %c0_13, %c256] : memref<1x144x1280xbf16, #tpu.memory_space<vmem>>, vector<1x144x1024xbf16>
    %14 = vector.shape_cast %13 : vector<1x144x1024xbf16> to vector<144x1024xbf16>
    %cst_14 = arith.constant dense<0.000000e+00> : vector<8x1024xf32>
    %15 = tpu.matmul %12, %14, %cst_14 {dimension_numbers = #tpu.dot_dimension_numbers<[1], [0], [0], [1], [0, 0, 1, 1], [], []>} : vector<8x144xbf16>, vector<144x1024xbf16>, vector<8x1024xf32> -> vector<8x1024xf32>
    %16 = arith.addf %10, %15 : vector<8x1024xf32>
    %c0_15 = arith.constant 0 : index
    %c0_16 = arith.constant 0 : index
    %17 = vector.load %arg3[%c0_15, %c0_16] : memref<8x1xf32, #tpu.memory_space<vmem>>, vector<8x1xf32>
    %18 = vector.broadcast %17 : vector<8x1xf32> to vector<8x1024xf32>
    %19 = arith.addf %16, %18 : vector<8x1024xf32>
    %cst_17 = arith.constant 0.000000e+00 : f32
    %20 = vector.broadcast %cst_17 : f32 to vector<8x1024xf32>
    %21 = arith.cmpf ogt, %19, %20 : vector<8x1024xf32>
    %cst_18 = arith.constant 0.000000e+00 : f32
    %22 = vector.broadcast %cst_18 : f32 to vector<8x1024xf32>
    %23 = arith.minimumf %19, %22 : vector<8x1024xf32>
    %24 = math.exp %23 : vector<8x1024xf32>
    %cst_19 = arith.constant 1.000000e+00 : f32
    %25 = vector.broadcast %cst_19 : f32 to vector<8x1024xf32>
    %26 = arith.subf %24, %25 : vector<8x1024xf32>
    %27 = arith.select %21, %19, %26 : vector<8x1024xi1>, vector<8x1024xf32>
    %28 = arith.truncf %27 : vector<8x1024xf32> to vector<8x1024xbf16>
    %c0_20 = arith.constant 0 : index
    %c0_21 = arith.constant 0 : index
    %c0_22 = arith.constant 0 : index
    %29 = vector.load %arg4[%c0_20, %c0_21, %c0_22] : memref<1x8x1024xbf16, #tpu.memory_space<vmem>>, vector<1x8x1024xbf16>
    %30 = vector.shape_cast %29 : vector<1x8x1024xbf16> to vector<8x1024xbf16>
    %31 = vector.shape_cast %28 : vector<8x1024xbf16> to vector<1x8x1024xbf16>
    tpu.vector_store %arg4[%c0_20, %c0_21, %c0_22], %31 {strides = array<i32>} : memref<1x8x1024xbf16, #tpu.memory_space<vmem>>, vector<1x8x1024xbf16>,
    return
  }
  func.func @transform_0(%arg0: i32) -> (i32, i32, i32) {
    %c0_i32 = arith.constant 0 : i32
    %c0_i32_0 = arith.constant 0 : i32
    %c0_i32_1 = arith.constant 0 : i32
    return %arg0, %c0_i32, %c0_i32_0 : i32, i32, i32
  }
  func.func @transform_1(%arg0: i32) -> (i32, i32, i32) {
    %c0_i32 = arith.constant 0 : i32
    %c0_i32_0 = arith.constant 0 : i32
    %c0_i32_1 = arith.constant 0 : i32
    %c0_i32_2 = arith.constant 0 : i32
    return %c0_i32, %c0_i32_0, %c0_i32_1 : i32, i32, i32
  }
  func.func @transform_2(%arg0: i32) -> (i32, i32) {
    %c0_i32 = arith.constant 0 : i32
    %c0_i32_0 = arith.constant 0 : i32
    %c0_i32_1 = arith.constant 0 : i32
    return %c0_i32, %c0_i32_0 : i32, i32
  }
  func.func @transform_3(%arg0: i32) -> (i32, i32, i32) {
    %c0_i32 = arith.constant 0 : i32
    %c0_i32_0 = arith.constant 0 : i32
    %c0_i32_1 = arith.constant 0 : i32
    return %arg0, %c0_i32, %c0_i32_0 : i32, i32, i32
  }
}

module attributes {stable_mosaic.version = 11 : i64} {
  func.func @_conv_gemm_kernel(%arg0: i32, %arg1: memref<1x80x1280xbf16, #tpu.memory_space<vmem>>, %arg2: memref<3x8x80xbf16, #tpu.memory_space<vmem>>, %arg3: memref<8x1xf32, #tpu.memory_space<vmem>>, %arg4: memref<1x8x1024xbf16, #tpu.memory_space<vmem>>) attributes {dimension_semantics = [#tpu.dimension_semantics<parallel>], iteration_bounds = array<i64: 2>, scalar_prefetch = 0 : i64, scratch_operands = 0 : i64, tpu.core_type = #tpu.core_type<tc>, window_params = [{transform_indices = @transform_0, window_bounds = array<i64: 1, 80, 1280>}, {pipeline_mode = #tpu.pipeline_mode<synchronous>, transform_indices = @transform_1, window_bounds = array<i64: 3, 8, 80>}, {pipeline_mode = #tpu.pipeline_mode<synchronous>, transform_indices = @transform_2, window_bounds = array<i64: 8, 1>}, {transform_indices = @transform_3, window_bounds = array<i64: 1, 8, 1024>}]} {
    %c0 = arith.constant 0 : index
    %c0_0 = arith.constant 0 : index
    %c0_1 = arith.constant 0 : index
    %0 = vector.load %arg2[%c0, %c0_0, %c0_1] : memref<3x8x80xbf16, #tpu.memory_space<vmem>>, vector<1x8x80xbf16>
    %1 = vector.shape_cast %0 : vector<1x8x80xbf16> to vector<8x80xbf16>
    %c0_2 = arith.constant 0 : index
    %c0_3 = arith.constant 0 : index
    %c0_4 = arith.constant 0 : index
    %2 = vector.load %arg1[%c0_2, %c0_3, %c0_4] : memref<1x80x1280xbf16, #tpu.memory_space<vmem>>, vector<1x80x1024xbf16>
    %3 = vector.shape_cast %2 : vector<1x80x1024xbf16> to vector<80x1024xbf16>
    %cst = arith.constant dense<0.000000e+00> : vector<8x1024xf32>
    %4 = tpu.matmul %1, %3, %cst {dimension_numbers = #tpu.dot_dimension_numbers<[1], [0], [0], [1], [0, 0, 1, 1], [], []>} : vector<8x80xbf16>, vector<80x1024xbf16>, vector<8x1024xf32> -> vector<8x1024xf32>
    %c1 = arith.constant 1 : index
    %c0_5 = arith.constant 0 : index
    %c0_6 = arith.constant 0 : index
    %5 = vector.load %arg2[%c1, %c0_5, %c0_6] : memref<3x8x80xbf16, #tpu.memory_space<vmem>>, vector<1x8x80xbf16>
    %6 = vector.shape_cast %5 : vector<1x8x80xbf16> to vector<8x80xbf16>
    %c0_7 = arith.constant 0 : index
    %c0_8 = arith.constant 0 : index
    %c128 = arith.constant 128 : index
    %7 = vector.load %arg1[%c0_7, %c0_8, %c128] : memref<1x80x1280xbf16, #tpu.memory_space<vmem>>, vector<1x80x1024xbf16>
    %8 = vector.shape_cast %7 : vector<1x80x1024xbf16> to vector<80x1024xbf16>
    %cst_9 = arith.constant dense<0.000000e+00> : vector<8x1024xf32>
    %9 = tpu.matmul %6, %8, %cst_9 {dimension_numbers = #tpu.dot_dimension_numbers<[1], [0], [0], [1], [0, 0, 1, 1], [], []>} : vector<8x80xbf16>, vector<80x1024xbf16>, vector<8x1024xf32> -> vector<8x1024xf32>
    %10 = arith.addf %4, %9 : vector<8x1024xf32>
    %c2 = arith.constant 2 : index
    %c0_10 = arith.constant 0 : index
    %c0_11 = arith.constant 0 : index
    %11 = vector.load %arg2[%c2, %c0_10, %c0_11] : memref<3x8x80xbf16, #tpu.memory_space<vmem>>, vector<1x8x80xbf16>
    %12 = vector.shape_cast %11 : vector<1x8x80xbf16> to vector<8x80xbf16>
    %c0_12 = arith.constant 0 : index
    %c0_13 = arith.constant 0 : index
    %c256 = arith.constant 256 : index
    %13 = vector.load %arg1[%c0_12, %c0_13, %c256] : memref<1x80x1280xbf16, #tpu.memory_space<vmem>>, vector<1x80x1024xbf16>
    %14 = vector.shape_cast %13 : vector<1x80x1024xbf16> to vector<80x1024xbf16>
    %cst_14 = arith.constant dense<0.000000e+00> : vector<8x1024xf32>
    %15 = tpu.matmul %12, %14, %cst_14 {dimension_numbers = #tpu.dot_dimension_numbers<[1], [0], [0], [1], [0, 0, 1, 1], [], []>} : vector<8x80xbf16>, vector<80x1024xbf16>, vector<8x1024xf32> -> vector<8x1024xf32>
    %16 = arith.addf %10, %15 : vector<8x1024xf32>
    %c0_15 = arith.constant 0 : index
    %c0_16 = arith.constant 0 : index
    %17 = vector.load %arg3[%c0_15, %c0_16] : memref<8x1xf32, #tpu.memory_space<vmem>>, vector<8x1xf32>
    %18 = vector.broadcast %17 : vector<8x1xf32> to vector<8x1024xf32>
    %19 = arith.addf %16, %18 : vector<8x1024xf32>
    %cst_17 = arith.constant 0.000000e+00 : f32
    %20 = vector.broadcast %cst_17 : f32 to vector<8x1024xf32>
    %21 = arith.cmpf ogt, %19, %20 : vector<8x1024xf32>
    %cst_18 = arith.constant 0.000000e+00 : f32
    %22 = vector.broadcast %cst_18 : f32 to vector<8x1024xf32>
    %23 = arith.minimumf %19, %22 : vector<8x1024xf32>
    %24 = math.exp %23 : vector<8x1024xf32>
    %cst_19 = arith.constant 1.000000e+00 : f32
    %25 = vector.broadcast %cst_19 : f32 to vector<8x1024xf32>
    %26 = arith.subf %24, %25 : vector<8x1024xf32>
    %27 = arith.select %21, %19, %26 : vector<8x1024xi1>, vector<8x1024xf32>
    %28 = arith.truncf %27 : vector<8x1024xf32> to vector<8x1024xbf16>
    %c0_20 = arith.constant 0 : index
    %c0_21 = arith.constant 0 : index
    %c0_22 = arith.constant 0 : index
    %29 = vector.load %arg4[%c0_20, %c0_21, %c0_22] : memref<1x8x1024xbf16, #tpu.memory_space<vmem>>, vector<1x8x1024xbf16>
    %30 = vector.shape_cast %29 : vector<1x8x1024xbf16> to vector<8x1024xbf16>
    %31 = vector.shape_cast %28 : vector<8x1024xbf16> to vector<1x8x1024xbf16>
    tpu.vector_store %arg4[%c0_20, %c0_21, %c0_22], %31 {strides = array<i32>} : memref<1x8x1024xbf16, #tpu.memory_space<vmem>>, vector<1x8x1024xbf16>,
    return
  }
  func.func @transform_0(%arg0: i32) -> (i32, i32, i32) {
    %c0_i32 = arith.constant 0 : i32
    %c0_i32_0 = arith.constant 0 : i32
    %c0_i32_1 = arith.constant 0 : i32
    return %arg0, %c0_i32, %c0_i32_0 : i32, i32, i32
  }
  func.func @transform_1(%arg0: i32) -> (i32, i32, i32) {
    %c0_i32 = arith.constant 0 : i32
    %c0_i32_0 = arith.constant 0 : i32
    %c0_i32_1 = arith.constant 0 : i32
    %c0_i32_2 = arith.constant 0 : i32
    return %c0_i32, %c0_i32_0, %c0_i32_1 : i32, i32, i32
  }
  func.func @transform_2(%arg0: i32) -> (i32, i32) {
    %c0_i32 = arith.constant 0 : i32
    %c0_i32_0 = arith.constant 0 : i32
    %c0_i32_1 = arith.constant 0 : i32
    return %c0_i32, %c0_i32_0 : i32, i32
  }
  func.func @transform_3(%arg0: i32) -> (i32, i32, i32) {
    %c0_i32 = arith.constant 0 : i32
    %c0_i32_0 = arith.constant 0 : i32
    %c0_i32_1 = arith.constant 0 : i32
    return %arg0, %c0_i32, %c0_i32_0 : i32, i32, i32
  }
}

module attributes {stable_mosaic.version = 11 : i64} {
  func.func @_conv_gemm_kernel(%arg0: i32, %arg1: memref<1x80x4608xbf16, #tpu.memory_space<vmem>>, %arg2: memref<3x4x80xbf16, #tpu.memory_space<vmem>>, %arg3: memref<4x1xf32, #tpu.memory_space<vmem>>, %arg4: memref<1x4x4096xbf16, #tpu.memory_space<vmem>>) attributes {dimension_semantics = [#tpu.dimension_semantics<parallel>], iteration_bounds = array<i64: 2>, scalar_prefetch = 0 : i64, scratch_operands = 0 : i64, tpu.core_type = #tpu.core_type<tc>, window_params = [{transform_indices = @transform_0, window_bounds = array<i64: 1, 80, 4608>}, {pipeline_mode = #tpu.pipeline_mode<synchronous>, transform_indices = @transform_1, window_bounds = array<i64: 3, 4, 80>}, {pipeline_mode = #tpu.pipeline_mode<synchronous>, transform_indices = @transform_2, window_bounds = array<i64: 4, 1>}, {transform_indices = @transform_3, window_bounds = array<i64: 1, 4, 4096>}]} {
    %c0 = arith.constant 0 : index
    %c0_0 = arith.constant 0 : index
    %c0_1 = arith.constant 0 : index
    %0 = vector.load %arg2[%c0, %c0_0, %c0_1] : memref<3x4x80xbf16, #tpu.memory_space<vmem>>, vector<1x4x80xbf16>
    %1 = vector.shape_cast %0 : vector<1x4x80xbf16> to vector<4x80xbf16>
    %c0_2 = arith.constant 0 : index
    %c0_3 = arith.constant 0 : index
    %c0_4 = arith.constant 0 : index
    %2 = vector.load %arg1[%c0_2, %c0_3, %c0_4] : memref<1x80x4608xbf16, #tpu.memory_space<vmem>>, vector<1x80x1024xbf16>
    %3 = vector.shape_cast %2 : vector<1x80x1024xbf16> to vector<80x1024xbf16>
    %cst = arith.constant dense<0.000000e+00> : vector<4x1024xf32>
    %4 = tpu.matmul %1, %3, %cst {dimension_numbers = #tpu.dot_dimension_numbers<[1], [0], [0], [1], [0, 0, 1, 1], [], []>} : vector<4x80xbf16>, vector<80x1024xbf16>, vector<4x1024xf32> -> vector<4x1024xf32>
    %c1 = arith.constant 1 : index
    %c0_5 = arith.constant 0 : index
    %c0_6 = arith.constant 0 : index
    %5 = vector.load %arg2[%c1, %c0_5, %c0_6] : memref<3x4x80xbf16, #tpu.memory_space<vmem>>, vector<1x4x80xbf16>
    %6 = vector.shape_cast %5 : vector<1x4x80xbf16> to vector<4x80xbf16>
    %c0_7 = arith.constant 0 : index
    %c0_8 = arith.constant 0 : index
    %c256 = arith.constant 256 : index
    %7 = vector.load %arg1[%c0_7, %c0_8, %c256] : memref<1x80x4608xbf16, #tpu.memory_space<vmem>>, vector<1x80x1024xbf16>
    %8 = vector.shape_cast %7 : vector<1x80x1024xbf16> to vector<80x1024xbf16>
    %cst_9 = arith.constant dense<0.000000e+00> : vector<4x1024xf32>
    %9 = tpu.matmul %6, %8, %cst_9 {dimension_numbers = #tpu.dot_dimension_numbers<[1], [0], [0], [1], [0, 0, 1, 1], [], []>} : vector<4x80xbf16>, vector<80x1024xbf16>, vector<4x1024xf32> -> vector<4x1024xf32>
    %10 = arith.addf %4, %9 : vector<4x1024xf32>
    %c2 = arith.constant 2 : index
    %c0_10 = arith.constant 0 : index
    %c0_11 = arith.constant 0 : index
    %11 = vector.load %arg2[%c2, %c0_10, %c0_11] : memref<3x4x80xbf16, #tpu.memory_space<vmem>>, vector<1x4x80xbf16>
    %12 = vector.shape_cast %11 : vector<1x4x80xbf16> to vector<4x80xbf16>
    %c0_12 = arith.constant 0 : index
    %c0_13 = arith.constant 0 : index
    %c512 = arith.constant 512 : index
    %13 = vector.load %arg1[%c0_12, %c0_13, %c512] : memref<1x80x4608xbf16, #tpu.memory_space<vmem>>, vector<1x80x1024xbf16>
    %14 = vector.shape_cast %13 : vector<1x80x1024xbf16> to vector<80x1024xbf16>
    %cst_14 = arith.constant dense<0.000000e+00> : vector<4x1024xf32>
    %15 = tpu.matmul %12, %14, %cst_14 {dimension_numbers = #tpu.dot_dimension_numbers<[1], [0], [0], [1], [0, 0, 1, 1], [], []>} : vector<4x80xbf16>, vector<80x1024xbf16>, vector<4x1024xf32> -> vector<4x1024xf32>
    %16 = arith.addf %10, %15 : vector<4x1024xf32>
    %c0_15 = arith.constant 0 : index
    %c0_16 = arith.constant 0 : index
    %17 = vector.load %arg3[%c0_15, %c0_16] : memref<4x1xf32, #tpu.memory_space<vmem>>, vector<4x1xf32>
    %18 = vector.broadcast %17 : vector<4x1xf32> to vector<4x1024xf32>
    %19 = arith.addf %16, %18 : vector<4x1024xf32>
    %cst_17 = arith.constant 0.000000e+00 : f32
    %20 = vector.broadcast %cst_17 : f32 to vector<4x1024xf32>
    %21 = arith.cmpf ogt, %19, %20 : vector<4x1024xf32>
    %cst_18 = arith.constant 0.000000e+00 : f32
    %22 = vector.broadcast %cst_18 : f32 to vector<4x1024xf32>
    %23 = arith.minimumf %19, %22 : vector<4x1024xf32>
    %24 = math.exp %23 : vector<4x1024xf32>
    %cst_19 = arith.constant 1.000000e+00 : f32
    %25 = vector.broadcast %cst_19 : f32 to vector<4x1024xf32>
    %26 = arith.subf %24, %25 : vector<4x1024xf32>
    %27 = arith.select %21, %19, %26 : vector<4x1024xi1>, vector<4x1024xf32>
    %28 = arith.truncf %27 : vector<4x1024xf32> to vector<4x1024xbf16>
    %c0_20 = arith.constant 0 : index
    %c0_21 = arith.constant 0 : index
    %c0_22 = arith.constant 0 : index
    %29 = vector.load %arg4[%c0_20, %c0_21, %c0_22] : memref<1x4x4096xbf16, #tpu.memory_space<vmem>>, vector<1x4x1024xbf16>
    %30 = vector.shape_cast %29 : vector<1x4x1024xbf16> to vector<4x1024xbf16>
    %31 = vector.shape_cast %28 : vector<4x1024xbf16> to vector<1x4x1024xbf16>
    tpu.vector_store %arg4[%c0_20, %c0_21, %c0_22], %31 {strides = array<i32>} : memref<1x4x4096xbf16, #tpu.memory_space<vmem>>, vector<1x4x1024xbf16>,
    %c0_23 = arith.constant 0 : index
    %c0_24 = arith.constant 0 : index
    %c0_25 = arith.constant 0 : index
    %32 = vector.load %arg2[%c0_23, %c0_24, %c0_25] : memref<3x4x80xbf16, #tpu.memory_space<vmem>>, vector<1x4x80xbf16>
    %33 = vector.shape_cast %32 : vector<1x4x80xbf16> to vector<4x80xbf16>
    %c0_26 = arith.constant 0 : index
    %c0_27 = arith.constant 0 : index
    %c1024 = arith.constant 1024 : index
    %34 = vector.load %arg1[%c0_26, %c0_27, %c1024] : memref<1x80x4608xbf16, #tpu.memory_space<vmem>>, vector<1x80x1024xbf16>
    %35 = vector.shape_cast %34 : vector<1x80x1024xbf16> to vector<80x1024xbf16>
    %cst_28 = arith.constant dense<0.000000e+00> : vector<4x1024xf32>
    %36 = tpu.matmul %33, %35, %cst_28 {dimension_numbers = #tpu.dot_dimension_numbers<[1], [0], [0], [1], [0, 0, 1, 1], [], []>} : vector<4x80xbf16>, vector<80x1024xbf16>, vector<4x1024xf32> -> vector<4x1024xf32>
    %c1_29 = arith.constant 1 : index
    %c0_30 = arith.constant 0 : index
    %c0_31 = arith.constant 0 : index
    %37 = vector.load %arg2[%c1_29, %c0_30, %c0_31] : memref<3x4x80xbf16, #tpu.memory_space<vmem>>, vector<1x4x80xbf16>
    %38 = vector.shape_cast %37 : vector<1x4x80xbf16> to vector<4x80xbf16>
    %c0_32 = arith.constant 0 : index
    %c0_33 = arith.constant 0 : index
    %c1280 = arith.constant 1280 : index
    %39 = vector.load %arg1[%c0_32, %c0_33, %c1280] : memref<1x80x4608xbf16, #tpu.memory_space<vmem>>, vector<1x80x1024xbf16>
    %40 = vector.shape_cast %39 : vector<1x80x1024xbf16> to vector<80x1024xbf16>
    %cst_34 = arith.constant dense<0.000000e+00> : vector<4x1024xf32>
    %41 = tpu.matmul %38, %40, %cst_34 {dimension_numbers = #tpu.dot_dimension_numbers<[1], [0], [0], [1], [0, 0, 1, 1], [], []>} : vector<4x80xbf16>, vector<80x1024xbf16>, vector<4x1024xf32> -> vector<4x1024xf32>
    %42 = arith.addf %36, %41 : vector<4x1024xf32>
    %c2_35 = arith.constant 2 : index
    %c0_36 = arith.constant 0 : index
    %c0_37 = arith.constant 0 : index
    %43 = vector.load %arg2[%c2_35, %c0_36, %c0_37] : memref<3x4x80xbf16, #tpu.memory_space<vmem>>, vector<1x4x80xbf16>
    %44 = vector.shape_cast %43 : vector<1x4x80xbf16> to vector<4x80xbf16>
    %c0_38 = arith.constant 0 : index
    %c0_39 = arith.constant 0 : index
    %c1536 = arith.constant 1536 : index
    %45 = vector.load %arg1[%c0_38, %c0_39, %c1536] : memref<1x80x4608xbf16, #tpu.memory_space<vmem>>, vector<1x80x1024xbf16>
    %46 = vector.shape_cast %45 : vector<1x80x1024xbf16> to vector<80x1024xbf16>
    %cst_40 = arith.constant dense<0.000000e+00> : vector<4x1024xf32>
    %47 = tpu.matmul %44, %46, %cst_40 {dimension_numbers = #tpu.dot_dimension_numbers<[1], [0], [0], [1], [0, 0, 1, 1], [], []>} : vector<4x80xbf16>, vector<80x1024xbf16>, vector<4x1024xf32> -> vector<4x1024xf32>
    %48 = arith.addf %42, %47 : vector<4x1024xf32>
    %c0_41 = arith.constant 0 : index
    %c0_42 = arith.constant 0 : index
    %49 = vector.load %arg3[%c0_41, %c0_42] : memref<4x1xf32, #tpu.memory_space<vmem>>, vector<4x1xf32>
    %50 = vector.broadcast %49 : vector<4x1xf32> to vector<4x1024xf32>
    %51 = arith.addf %48, %50 : vector<4x1024xf32>
    %cst_43 = arith.constant 0.000000e+00 : f32
    %52 = vector.broadcast %cst_43 : f32 to vector<4x1024xf32>
    %53 = arith.cmpf ogt, %51, %52 : vector<4x1024xf32>
    %cst_44 = arith.constant 0.000000e+00 : f32
    %54 = vector.broadcast %cst_44 : f32 to vector<4x1024xf32>
    %55 = arith.minimumf %51, %54 : vector<4x1024xf32>
    %56 = math.exp %55 : vector<4x1024xf32>
    %cst_45 = arith.constant 1.000000e+00 : f32
    %57 = vector.broadcast %cst_45 : f32 to vector<4x1024xf32>
    %58 = arith.subf %56, %57 : vector<4x1024xf32>
    %59 = arith.select %53, %51, %58 : vector<4x1024xi1>, vector<4x1024xf32>
    %60 = arith.truncf %59 : vector<4x1024xf32> to vector<4x1024xbf16>
    %c0_46 = arith.constant 0 : index
    %c0_47 = arith.constant 0 : index
    %c1024_48 = arith.constant 1024 : index
    %61 = vector.load %arg4[%c0_46, %c0_47, %c1024_48] : memref<1x4x4096xbf16, #tpu.memory_space<vmem>>, vector<1x4x1024xbf16>
    %62 = vector.shape_cast %61 : vector<1x4x1024xbf16> to vector<4x1024xbf16>
    %63 = vector.shape_cast %60 : vector<4x1024xbf16> to vector<1x4x1024xbf16>
    tpu.vector_store %arg4[%c0_46, %c0_47, %c1024_48], %63 {strides = array<i32>} : memref<1x4x4096xbf16, #tpu.memory_space<vmem>>, vector<1x4x1024xbf16>,
    %c0_49 = arith.constant 0 : index
    %c0_50 = arith.constant 0 : index
    %c0_51 = arith.constant 0 : index
    %64 = vector.load %arg2[%c0_49, %c0_50, %c0_51] : memref<3x4x80xbf16, #tpu.memory_space<vmem>>, vector<1x4x80xbf16>
    %65 = vector.shape_cast %64 : vector<1x4x80xbf16> to vector<4x80xbf16>
    %c0_52 = arith.constant 0 : index
    %c0_53 = arith.constant 0 : index
    %c2048 = arith.constant 2048 : index
    %66 = vector.load %arg1[%c0_52, %c0_53, %c2048] : memref<1x80x4608xbf16, #tpu.memory_space<vmem>>, vector<1x80x1024xbf16>
    %67 = vector.shape_cast %66 : vector<1x80x1024xbf16> to vector<80x1024xbf16>
    %cst_54 = arith.constant dense<0.000000e+00> : vector<4x1024xf32>
    %68 = tpu.matmul %65, %67, %cst_54 {dimension_numbers = #tpu.dot_dimension_numbers<[1], [0], [0], [1], [0, 0, 1, 1], [], []>} : vector<4x80xbf16>, vector<80x1024xbf16>, vector<4x1024xf32> -> vector<4x1024xf32>
    %c1_55 = arith.constant 1 : index
    %c0_56 = arith.constant 0 : index
    %c0_57 = arith.constant 0 : index
    %69 = vector.load %arg2[%c1_55, %c0_56, %c0_57] : memref<3x4x80xbf16, #tpu.memory_space<vmem>>, vector<1x4x80xbf16>
    %70 = vector.shape_cast %69 : vector<1x4x80xbf16> to vector<4x80xbf16>
    %c0_58 = arith.constant 0 : index
    %c0_59 = arith.constant 0 : index
    %c2304 = arith.constant 2304 : index
    %71 = vector.load %arg1[%c0_58, %c0_59, %c2304] : memref<1x80x4608xbf16, #tpu.memory_space<vmem>>, vector<1x80x1024xbf16>
    %72 = vector.shape_cast %71 : vector<1x80x1024xbf16> to vector<80x1024xbf16>
    %cst_60 = arith.constant dense<0.000000e+00> : vector<4x1024xf32>
    %73 = tpu.matmul %70, %72, %cst_60 {dimension_numbers = #tpu.dot_dimension_numbers<[1], [0], [0], [1], [0, 0, 1, 1], [], []>} : vector<4x80xbf16>, vector<80x1024xbf16>, vector<4x1024xf32> -> vector<4x1024xf32>
    %74 = arith.addf %68, %73 : vector<4x1024xf32>
    %c2_61 = arith.constant 2 : index
    %c0_62 = arith.constant 0 : index
    %c0_63 = arith.constant 0 : index
    %75 = vector.load %arg2[%c2_61, %c0_62, %c0_63] : memref<3x4x80xbf16, #tpu.memory_space<vmem>>, vector<1x4x80xbf16>
    %76 = vector.shape_cast %75 : vector<1x4x80xbf16> to vector<4x80xbf16>
    %c0_64 = arith.constant 0 : index
    %c0_65 = arith.constant 0 : index
    %c2560 = arith.constant 2560 : index
    %77 = vector.load %arg1[%c0_64, %c0_65, %c2560] : memref<1x80x4608xbf16, #tpu.memory_space<vmem>>, vector<1x80x1024xbf16>
    %78 = vector.shape_cast %77 : vector<1x80x1024xbf16> to vector<80x1024xbf16>
    %cst_66 = arith.constant dense<0.000000e+00> : vector<4x1024xf32>
    %79 = tpu.matmul %76, %78, %cst_66 {dimension_numbers = #tpu.dot_dimension_numbers<[1], [0], [0], [1], [0, 0, 1, 1], [], []>} : vector<4x80xbf16>, vector<80x1024xbf16>, vector<4x1024xf32> -> vector<4x1024xf32>
    %80 = arith.addf %74, %79 : vector<4x1024xf32>
    %c0_67 = arith.constant 0 : index
    %c0_68 = arith.constant 0 : index
    %81 = vector.load %arg3[%c0_67, %c0_68] : memref<4x1xf32, #tpu.memory_space<vmem>>, vector<4x1xf32>
    %82 = vector.broadcast %81 : vector<4x1xf32> to vector<4x1024xf32>
    %83 = arith.addf %80, %82 : vector<4x1024xf32>
    %cst_69 = arith.constant 0.000000e+00 : f32
    %84 = vector.broadcast %cst_69 : f32 to vector<4x1024xf32>
    %85 = arith.cmpf ogt, %83, %84 : vector<4x1024xf32>
    %cst_70 = arith.constant 0.000000e+00 : f32
    %86 = vector.broadcast %cst_70 : f32 to vector<4x1024xf32>
    %87 = arith.minimumf %83, %86 : vector<4x1024xf32>
    %88 = math.exp %87 : vector<4x1024xf32>
    %cst_71 = arith.constant 1.000000e+00 : f32
    %89 = vector.broadcast %cst_71 : f32 to vector<4x1024xf32>
    %90 = arith.subf %88, %89 : vector<4x1024xf32>
    %91 = arith.select %85, %83, %90 : vector<4x1024xi1>, vector<4x1024xf32>
    %92 = arith.truncf %91 : vector<4x1024xf32> to vector<4x1024xbf16>
    %c0_72 = arith.constant 0 : index
    %c0_73 = arith.constant 0 : index
    %c2048_74 = arith.constant 2048 : index
    %93 = vector.load %arg4[%c0_72, %c0_73, %c2048_74] : memref<1x4x4096xbf16, #tpu.memory_space<vmem>>, vector<1x4x1024xbf16>
    %94 = vector.shape_cast %93 : vector<1x4x1024xbf16> to vector<4x1024xbf16>
    %95 = vector.shape_cast %92 : vector<4x1024xbf16> to vector<1x4x1024xbf16>
    tpu.vector_store %arg4[%c0_72, %c0_73, %c2048_74], %95 {strides = array<i32>} : memref<1x4x4096xbf16, #tpu.memory_space<vmem>>, vector<1x4x1024xbf16>,
    %c0_75 = arith.constant 0 : index
    %c0_76 = arith.constant 0 : index
    %c0_77 = arith.constant 0 : index
    %96 = vector.load %arg2[%c0_75, %c0_76, %c0_77] : memref<3x4x80xbf16, #tpu.memory_space<vmem>>, vector<1x4x80xbf16>
    %97 = vector.shape_cast %96 : vector<1x4x80xbf16> to vector<4x80xbf16>
    %c0_78 = arith.constant 0 : index
    %c0_79 = arith.constant 0 : index
    %c3072 = arith.constant 3072 : index
    %98 = vector.load %arg1[%c0_78, %c0_79, %c3072] : memref<1x80x4608xbf16, #tpu.memory_space<vmem>>, vector<1x80x1024xbf16>
    %99 = vector.shape_cast %98 : vector<1x80x1024xbf16> to vector<80x1024xbf16>
    %cst_80 = arith.constant dense<0.000000e+00> : vector<4x1024xf32>
    %100 = tpu.matmul %97, %99, %cst_80 {dimension_numbers = #tpu.dot_dimension_numbers<[1], [0], [0], [1], [0, 0, 1, 1], [], []>} : vector<4x80xbf16>, vector<80x1024xbf16>, vector<4x1024xf32> -> vector<4x1024xf32>
    %c1_81 = arith.constant 1 : index
    %c0_82 = arith.constant 0 : index
    %c0_83 = arith.constant 0 : index
    %101 = vector.load %arg2[%c1_81, %c0_82, %c0_83] : memref<3x4x80xbf16, #tpu.memory_space<vmem>>, vector<1x4x80xbf16>
    %102 = vector.shape_cast %101 : vector<1x4x80xbf16> to vector<4x80xbf16>
    %c0_84 = arith.constant 0 : index
    %c0_85 = arith.constant 0 : index
    %c3328 = arith.constant 3328 : index
    %103 = vector.load %arg1[%c0_84, %c0_85, %c3328] : memref<1x80x4608xbf16, #tpu.memory_space<vmem>>, vector<1x80x1024xbf16>
    %104 = vector.shape_cast %103 : vector<1x80x1024xbf16> to vector<80x1024xbf16>
    %cst_86 = arith.constant dense<0.000000e+00> : vector<4x1024xf32>
    %105 = tpu.matmul %102, %104, %cst_86 {dimension_numbers = #tpu.dot_dimension_numbers<[1], [0], [0], [1], [0, 0, 1, 1], [], []>} : vector<4x80xbf16>, vector<80x1024xbf16>, vector<4x1024xf32> -> vector<4x1024xf32>
    %106 = arith.addf %100, %105 : vector<4x1024xf32>
    %c2_87 = arith.constant 2 : index
    %c0_88 = arith.constant 0 : index
    %c0_89 = arith.constant 0 : index
    %107 = vector.load %arg2[%c2_87, %c0_88, %c0_89] : memref<3x4x80xbf16, #tpu.memory_space<vmem>>, vector<1x4x80xbf16>
    %108 = vector.shape_cast %107 : vector<1x4x80xbf16> to vector<4x80xbf16>
    %c0_90 = arith.constant 0 : index
    %c0_91 = arith.constant 0 : index
    %c3584 = arith.constant 3584 : index
    %109 = vector.load %arg1[%c0_90, %c0_91, %c3584] : memref<1x80x4608xbf16, #tpu.memory_space<vmem>>, vector<1x80x1024xbf16>
    %110 = vector.shape_cast %109 : vector<1x80x1024xbf16> to vector<80x1024xbf16>
    %cst_92 = arith.constant dense<0.000000e+00> : vector<4x1024xf32>
    %111 = tpu.matmul %108, %110, %cst_92 {dimension_numbers = #tpu.dot_dimension_numbers<[1], [0], [0], [1], [0, 0, 1, 1], [], []>} : vector<4x80xbf16>, vector<80x1024xbf16>, vector<4x1024xf32> -> vector<4x1024xf32>
    %112 = arith.addf %106, %111 : vector<4x1024xf32>
    %c0_93 = arith.constant 0 : index
    %c0_94 = arith.constant 0 : index
    %113 = vector.load %arg3[%c0_93, %c0_94] : memref<4x1xf32, #tpu.memory_space<vmem>>, vector<4x1xf32>
    %114 = vector.broadcast %113 : vector<4x1xf32> to vector<4x1024xf32>
    %115 = arith.addf %112, %114 : vector<4x1024xf32>
    %cst_95 = arith.constant 0.000000e+00 : f32
    %116 = vector.broadcast %cst_95 : f32 to vector<4x1024xf32>
    %117 = arith.cmpf ogt, %115, %116 : vector<4x1024xf32>
    %cst_96 = arith.constant 0.000000e+00 : f32
    %118 = vector.broadcast %cst_96 : f32 to vector<4x1024xf32>
    %119 = arith.minimumf %115, %118 : vector<4x1024xf32>
    %120 = math.exp %119 : vector<4x1024xf32>
    %cst_97 = arith.constant 1.000000e+00 : f32
    %121 = vector.broadcast %cst_97 : f32 to vector<4x1024xf32>
    %122 = arith.subf %120, %121 : vector<4x1024xf32>
    %123 = arith.select %117, %115, %122 : vector<4x1024xi1>, vector<4x1024xf32>
    %124 = arith.truncf %123 : vector<4x1024xf32> to vector<4x1024xbf16>
    %c0_98 = arith.constant 0 : index
    %c0_99 = arith.constant 0 : index
    %c3072_100 = arith.constant 3072 : index
    %125 = vector.load %arg4[%c0_98, %c0_99, %c3072_100] : memref<1x4x4096xbf16, #tpu.memory_space<vmem>>, vector<1x4x1024xbf16>
    %126 = vector.shape_cast %125 : vector<1x4x1024xbf16> to vector<4x1024xbf16>
    %127 = vector.shape_cast %124 : vector<4x1024xbf16> to vector<1x4x1024xbf16>
    tpu.vector_store %arg4[%c0_98, %c0_99, %c3072_100], %127 {strides = array<i32>} : memref<1x4x4096xbf16, #tpu.memory_space<vmem>>, vector<1x4x1024xbf16>,
    return
  }
  func.func @transform_0(%arg0: i32) -> (i32, i32, i32) {
    %c0_i32 = arith.constant 0 : i32
    %c0_i32_0 = arith.constant 0 : i32
    %c0_i32_1 = arith.constant 0 : i32
    return %arg0, %c0_i32, %c0_i32_0 : i32, i32, i32
  }
  func.func @transform_1(%arg0: i32) -> (i32, i32, i32) {
    %c0_i32 = arith.constant 0 : i32
    %c0_i32_0 = arith.constant 0 : i32
    %c0_i32_1 = arith.constant 0 : i32
    %c0_i32_2 = arith.constant 0 : i32
    return %c0_i32, %c0_i32_0, %c0_i32_1 : i32, i32, i32
  }
  func.func @transform_2(%arg0: i32) -> (i32, i32) {
    %c0_i32 = arith.constant 0 : i32
    %c0_i32_0 = arith.constant 0 : i32
    %c0_i32_1 = arith.constant 0 : i32
    return %c0_i32, %c0_i32_0 : i32, i32
  }
  func.func @transform_3(%arg0: i32) -> (i32, i32, i32) {
    %c0_i32 = arith.constant 0 : i32
    %c0_i32_0 = arith.constant 0 : i32
    %c0_i32_1 = arith.constant 0 : i32
    return %arg0, %c0_i32, %c0_i32_0 : i32, i32, i32
  }
}

module attributes {stable_mosaic.version = 11 : i64} {
  func.func @_conv_gemm_kernel(%arg0: i32, %arg1: memref<1x8x4096xbf16, #tpu.memory_space<vmem>>, %arg2: memref<1x2x8xbf16, #tpu.memory_space<vmem>>, %arg3: memref<2x1xf32, #tpu.memory_space<vmem>>, %arg4: memref<1x2x4096xf32, #tpu.memory_space<vmem>>) attributes {dimension_semantics = [#tpu.dimension_semantics<parallel>], iteration_bounds = array<i64: 2>, scalar_prefetch = 0 : i64, scratch_operands = 0 : i64, tpu.core_type = #tpu.core_type<tc>, window_params = [{transform_indices = @transform_0, window_bounds = array<i64: 1, 8, 4096>}, {pipeline_mode = #tpu.pipeline_mode<synchronous>, transform_indices = @transform_1, window_bounds = array<i64: 1, 2, 8>}, {pipeline_mode = #tpu.pipeline_mode<synchronous>, transform_indices = @transform_2, window_bounds = array<i64: 2, 1>}, {transform_indices = @transform_3, window_bounds = array<i64: 1, 2, 4096>}]} {
    %c0 = arith.constant 0 : index
    %c0_0 = arith.constant 0 : index
    %c0_1 = arith.constant 0 : index
    %0 = vector.load %arg2[%c0, %c0_0, %c0_1] : memref<1x2x8xbf16, #tpu.memory_space<vmem>>, vector<1x2x8xbf16>
    %1 = vector.shape_cast %0 : vector<1x2x8xbf16> to vector<2x8xbf16>
    %c0_2 = arith.constant 0 : index
    %c0_3 = arith.constant 0 : index
    %c0_4 = arith.constant 0 : index
    %2 = vector.load %arg1[%c0_2, %c0_3, %c0_4] : memref<1x8x4096xbf16, #tpu.memory_space<vmem>>, vector<1x8x1024xbf16>
    %3 = vector.shape_cast %2 : vector<1x8x1024xbf16> to vector<8x1024xbf16>
    %cst = arith.constant dense<0.000000e+00> : vector<2x1024xf32>
    %4 = tpu.matmul %1, %3, %cst {dimension_numbers = #tpu.dot_dimension_numbers<[1], [0], [0], [1], [0, 0, 1, 1], [], []>} : vector<2x8xbf16>, vector<8x1024xbf16>, vector<2x1024xf32> -> vector<2x1024xf32>
    %c0_5 = arith.constant 0 : index
    %c0_6 = arith.constant 0 : index
    %5 = vector.load %arg3[%c0_5, %c0_6] : memref<2x1xf32, #tpu.memory_space<vmem>>, vector<2x1xf32>
    %6 = vector.broadcast %5 : vector<2x1xf32> to vector<2x1024xf32>
    %7 = arith.addf %4, %6 : vector<2x1024xf32>
    %c0_7 = arith.constant 0 : index
    %c0_8 = arith.constant 0 : index
    %c0_9 = arith.constant 0 : index
    %8 = vector.load %arg4[%c0_7, %c0_8, %c0_9] : memref<1x2x4096xf32, #tpu.memory_space<vmem>>, vector<1x2x1024xf32>
    %9 = vector.shape_cast %8 : vector<1x2x1024xf32> to vector<2x1024xf32>
    %10 = vector.shape_cast %7 : vector<2x1024xf32> to vector<1x2x1024xf32>
    tpu.vector_store %arg4[%c0_7, %c0_8, %c0_9], %10 {strides = array<i32>} : memref<1x2x4096xf32, #tpu.memory_space<vmem>>, vector<1x2x1024xf32>,
    %c0_10 = arith.constant 0 : index
    %c0_11 = arith.constant 0 : index
    %c0_12 = arith.constant 0 : index
    %11 = vector.load %arg2[%c0_10, %c0_11, %c0_12] : memref<1x2x8xbf16, #tpu.memory_space<vmem>>, vector<1x2x8xbf16>
    %12 = vector.shape_cast %11 : vector<1x2x8xbf16> to vector<2x8xbf16>
    %c0_13 = arith.constant 0 : index
    %c0_14 = arith.constant 0 : index
    %c1024 = arith.constant 1024 : index
    %13 = vector.load %arg1[%c0_13, %c0_14, %c1024] : memref<1x8x4096xbf16, #tpu.memory_space<vmem>>, vector<1x8x1024xbf16>
    %14 = vector.shape_cast %13 : vector<1x8x1024xbf16> to vector<8x1024xbf16>
    %cst_15 = arith.constant dense<0.000000e+00> : vector<2x1024xf32>
    %15 = tpu.matmul %12, %14, %cst_15 {dimension_numbers = #tpu.dot_dimension_numbers<[1], [0], [0], [1], [0, 0, 1, 1], [], []>} : vector<2x8xbf16>, vector<8x1024xbf16>, vector<2x1024xf32> -> vector<2x1024xf32>
    %c0_16 = arith.constant 0 : index
    %c0_17 = arith.constant 0 : index
    %16 = vector.load %arg3[%c0_16, %c0_17] : memref<2x1xf32, #tpu.memory_space<vmem>>, vector<2x1xf32>
    %17 = vector.broadcast %16 : vector<2x1xf32> to vector<2x1024xf32>
    %18 = arith.addf %15, %17 : vector<2x1024xf32>
    %c0_18 = arith.constant 0 : index
    %c0_19 = arith.constant 0 : index
    %c1024_20 = arith.constant 1024 : index
    %19 = vector.load %arg4[%c0_18, %c0_19, %c1024_20] : memref<1x2x4096xf32, #tpu.memory_space<vmem>>, vector<1x2x1024xf32>
    %20 = vector.shape_cast %19 : vector<1x2x1024xf32> to vector<2x1024xf32>
    %21 = vector.shape_cast %18 : vector<2x1024xf32> to vector<1x2x1024xf32>
    tpu.vector_store %arg4[%c0_18, %c0_19, %c1024_20], %21 {strides = array<i32>} : memref<1x2x4096xf32, #tpu.memory_space<vmem>>, vector<1x2x1024xf32>,
    %c0_21 = arith.constant 0 : index
    %c0_22 = arith.constant 0 : index
    %c0_23 = arith.constant 0 : index
    %22 = vector.load %arg2[%c0_21, %c0_22, %c0_23] : memref<1x2x8xbf16, #tpu.memory_space<vmem>>, vector<1x2x8xbf16>
    %23 = vector.shape_cast %22 : vector<1x2x8xbf16> to vector<2x8xbf16>
    %c0_24 = arith.constant 0 : index
    %c0_25 = arith.constant 0 : index
    %c2048 = arith.constant 2048 : index
    %24 = vector.load %arg1[%c0_24, %c0_25, %c2048] : memref<1x8x4096xbf16, #tpu.memory_space<vmem>>, vector<1x8x1024xbf16>
    %25 = vector.shape_cast %24 : vector<1x8x1024xbf16> to vector<8x1024xbf16>
    %cst_26 = arith.constant dense<0.000000e+00> : vector<2x1024xf32>
    %26 = tpu.matmul %23, %25, %cst_26 {dimension_numbers = #tpu.dot_dimension_numbers<[1], [0], [0], [1], [0, 0, 1, 1], [], []>} : vector<2x8xbf16>, vector<8x1024xbf16>, vector<2x1024xf32> -> vector<2x1024xf32>
    %c0_27 = arith.constant 0 : index
    %c0_28 = arith.constant 0 : index
    %27 = vector.load %arg3[%c0_27, %c0_28] : memref<2x1xf32, #tpu.memory_space<vmem>>, vector<2x1xf32>
    %28 = vector.broadcast %27 : vector<2x1xf32> to vector<2x1024xf32>
    %29 = arith.addf %26, %28 : vector<2x1024xf32>
    %c0_29 = arith.constant 0 : index
    %c0_30 = arith.constant 0 : index
    %c2048_31 = arith.constant 2048 : index
    %30 = vector.load %arg4[%c0_29, %c0_30, %c2048_31] : memref<1x2x4096xf32, #tpu.memory_space<vmem>>, vector<1x2x1024xf32>
    %31 = vector.shape_cast %30 : vector<1x2x1024xf32> to vector<2x1024xf32>
    %32 = vector.shape_cast %29 : vector<2x1024xf32> to vector<1x2x1024xf32>
    tpu.vector_store %arg4[%c0_29, %c0_30, %c2048_31], %32 {strides = array<i32>} : memref<1x2x4096xf32, #tpu.memory_space<vmem>>, vector<1x2x1024xf32>,
    %c0_32 = arith.constant 0 : index
    %c0_33 = arith.constant 0 : index
    %c0_34 = arith.constant 0 : index
    %33 = vector.load %arg2[%c0_32, %c0_33, %c0_34] : memref<1x2x8xbf16, #tpu.memory_space<vmem>>, vector<1x2x8xbf16>
    %34 = vector.shape_cast %33 : vector<1x2x8xbf16> to vector<2x8xbf16>
    %c0_35 = arith.constant 0 : index
    %c0_36 = arith.constant 0 : index
    %c3072 = arith.constant 3072 : index
    %35 = vector.load %arg1[%c0_35, %c0_36, %c3072] : memref<1x8x4096xbf16, #tpu.memory_space<vmem>>, vector<1x8x1024xbf16>
    %36 = vector.shape_cast %35 : vector<1x8x1024xbf16> to vector<8x1024xbf16>
    %cst_37 = arith.constant dense<0.000000e+00> : vector<2x1024xf32>
    %37 = tpu.matmul %34, %36, %cst_37 {dimension_numbers = #tpu.dot_dimension_numbers<[1], [0], [0], [1], [0, 0, 1, 1], [], []>} : vector<2x8xbf16>, vector<8x1024xbf16>, vector<2x1024xf32> -> vector<2x1024xf32>
    %c0_38 = arith.constant 0 : index
    %c0_39 = arith.constant 0 : index
    %38 = vector.load %arg3[%c0_38, %c0_39] : memref<2x1xf32, #tpu.memory_space<vmem>>, vector<2x1xf32>
    %39 = vector.broadcast %38 : vector<2x1xf32> to vector<2x1024xf32>
    %40 = arith.addf %37, %39 : vector<2x1024xf32>
    %c0_40 = arith.constant 0 : index
    %c0_41 = arith.constant 0 : index
    %c3072_42 = arith.constant 3072 : index
    %41 = vector.load %arg4[%c0_40, %c0_41, %c3072_42] : memref<1x2x4096xf32, #tpu.memory_space<vmem>>, vector<1x2x1024xf32>
    %42 = vector.shape_cast %41 : vector<1x2x1024xf32> to vector<2x1024xf32>
    %43 = vector.shape_cast %40 : vector<2x1024xf32> to vector<1x2x1024xf32>
    tpu.vector_store %arg4[%c0_40, %c0_41, %c3072_42], %43 {strides = array<i32>} : memref<1x2x4096xf32, #tpu.memory_space<vmem>>, vector<1x2x1024xf32>,
    return
  }
  func.func @transform_0(%arg0: i32) -> (i32, i32, i32) {
    %c0_i32 = arith.constant 0 : i32
    %c0_i32_0 = arith.constant 0 : i32
    %c0_i32_1 = arith.constant 0 : i32
    return %arg0, %c0_i32, %c0_i32_0 : i32, i32, i32
  }
  func.func @transform_1(%arg0: i32) -> (i32, i32, i32) {
    %c0_i32 = arith.constant 0 : i32
    %c0_i32_0 = arith.constant 0 : i32
    %c0_i32_1 = arith.constant 0 : i32
    %c0_i32_2 = arith.constant 0 : i32
    return %c0_i32, %c0_i32_0, %c0_i32_1 : i32, i32, i32
  }
  func.func @transform_2(%arg0: i32) -> (i32, i32) {
    %c0_i32 = arith.constant 0 : i32
    %c0_i32_0 = arith.constant 0 : i32
    %c0_i32_1 = arith.constant 0 : i32
    return %c0_i32, %c0_i32_0 : i32, i32
  }
  func.func @transform_3(%arg0: i32) -> (i32, i32, i32) {
    %c0_i32 = arith.constant 0 : i32
    %c0_i32_0 = arith.constant 0 : i32
    %c0_i32_1 = arith.constant 0 : i32
    return %arg0, %c0_i32, %c0_i32_0 : i32, i32, i32
  }
}

</mosaic_0001>

<bundles_post_ra>
// kernel: sunet3d_forward.9
= control target key start
LH: loop header
LB: loop body
LE: loop exit
PB: predicated region body
PF: predicated region fallthrough
CT: control target
= control target key end

     0   :  { %s4080_s12 = smov 0   ;;  %s4700_s0 = inlined_call_operand.vmem [shape: bf16[2,32,4608], index: 0, kind: input, shape index: {}]   ;;  %s4701_s1 = inlined_call_operand.vmem [shape: bf16[3,4,32], index: 1, kind: input, shape index: {}]   ;;  %s4702_s2 = inlined_call_operand.vmem [shape: f32[4,1], index: 2, kind: input, shape index: {}]   ;;  %s4703_s3 = inlined_call_operand.vmem [shape: bf16[2,4,4096], index: 3, kind: output, shape index: {}]  }
   0x1 LB: > { %s3606_s13 = sadd.s32 4294967295, %s4056_s12   ;;  %p3610_p0 = scmp.ge.s32.totalorder %s4056_s12, 1  ;;  %s4056_s12 = sphi %s4080_s12, %s13_s12  }
   0x2   : > { %p137_p1 = scmp.lt.s32.totalorder %s4056_s12, 3 }
   0x4   : > { %p138_p2 = pnand %p3610_p0, %p137_p1 }
   0x5   : > { %p161_p3 = scmp.lt.s32.totalorder (!%p138_p2), %s3606_s13, 1 }
   0x6   : > { %141 = sbr.rel (%p138_p2) target bundleno = 436 (0x1b4), region = 32 }
   0xb   : > { %v4058_v0 = vmov 0   ;;  %s4705_s13 = smov (!%p161_p3, %s3606_s13), 1  ;;  %v903_v1 = vld [vmem:[%s4702_s2] sm:$0xf]  ;;  %vm275_vm0 = vcmask 261120  }
   0xc   : > { %311 = vmatprep.mubr.bf16.mxu0 %v4058_v0  ;;  %352 = vmatprep.mubr.bf16.mxu1 %v4058_v0  ;;  %s3865_s16 = smul.u32 576, %s4705_s13  ;;  %v3614_v10 = vld [vmem:[%s4701_s1 + $0x2] sm:$0x3]  ;;  %v172_v23 = vld [vmem:[%s4701_s1] sm:$0x3] }
   0xd   : > { %3876 = vset.pattern.permute.xlu0 %v4058_v0  ;;  %3877 = vset.pattern.permute.xlu1 %v4058_v0  ;;  %v3643_v25 = vld [vmem:[%s4701_s1 + $0x4] sm:$0x3]  ;;  %v1747_v30 = vld [vmem:[%s4702_s2] sm:$0xf] }
   0xe   : > { %906 = vperm.xlu0 %3876, %v903_v1   ;;  %s4101_s19 = scalar_lea.vmem %s4700_s0, %s3865_s16  ;;  %v3676_v36 = vld [vmem:[%s4701_s1 + $0x2] sm:$0x3]  ;;  %v1019_v43 = vld [vmem:[%s4701_s1] sm:$0x3]  ;;  %v3705_v46 = vld [vmem:[%s4701_s1 + $0x4] sm:$0x3] }
   0xf   : > { %v3878_v2 = vld [vmem:[%s4101_s19 + $0x12c] ss:$144 sps:$4 sm:$0xff]   ;;  %v4105_v3 = vld [vmem:[%s4101_s19 + $0x134] ss:$144 sps:$4 sm:$0xff]   ;;  %v3882_v4 = vld [vmem:[%s4101_s19 + $0x128] ss:$144 sps:$4 sm:$0xff]  }
  0x10   : > { %291 = vmatprep.subr.bf16.mxu0 %v3878_v2  ;;  %v4109_v5 = vld [vmem:[%s4101_s19 + $0x130] ss:$144 sps:$4 sm:$0xff]   ;;  %332 = vmatprep.subr.bf16.mxu1 %v4105_v3  ;;  %v3884_v6 = vld [vmem:[%s4101_s19 + $0xc] ss:$144 sps:$4 sm:$0xff]   ;;  %v4115_v7 = vld [vmem:[%s4101_s19 + $0x14] ss:$144 sps:$4 sm:$0xff]  }
  0x11   : > { %292 = vmatpush1.bf16.msra.mxu0 %v3882_v4  ;;  %333 = vmatpush1.bf16.msra.mxu1 %v4109_v5  ;;  %v3888_v8 = vld [vmem:[%s4101_s19 + $0x8] ss:$144 sps:$4 sm:$0xff]   ;;  %v4119_v9 = vld [vmem:[%s4101_s19 + $0x10] ss:$144 sps:$4 sm:$0xff]   ;;  %v3892_v11 = vld [vmem:[%s4101_s19 + $0x13c] ss:$144 sps:$4 sm:$0xff]  }
  0x12   : > { %293 = vmatprep.subr.bf16.mxu0 %v3884_v6  ;;  %334 = vmatprep.subr.bf16.mxu1 %v4115_v7  ;;  %v3890_v12 = vld [vmem:[%s4101_s19 + $0x138] ss:$144 sps:$4 sm:$0xff]   ;;  %v4128_v13 = vld [vmem:[%s4101_s19 + $0x144] ss:$144 sps:$4 sm:$0xff]   ;;  %v4132_v14 = vld [vmem:[%s4101_s19 + $0x140] ss:$144 sps:$4 sm:$0xff]  }
  0x13   : > { %v3898_v15 = vld [vmem:[%s4101_s19 + $0x1c] ss:$144 sps:$4 sm:$0xff]   ;;  %v4137_v16 = vld [vmem:[%s4101_s19 + $0x24] ss:$144 sps:$4 sm:$0xff]   ;;  %v3896_v17 = vld [vmem:[%s4101_s19 + $0x18] ss:$144 sps:$4 sm:$0xff]   ;;  %1750 = vperm.xlu0 %3876, %v1747_v30  }
  0x14   : > { %v4144_v18 = vld [vmem:[%s4101_s19 + $0x20] ss:$144 sps:$4 sm:$0xff]   ;;  %v3904_v19 = vld [vmem:[%s4101_s19 + $0x124] ss:$144 sps:$4 sm:$0xff]   ;;  %v3910_v24 = vld [vmem:[%s4101_s19 + $0x14c] ss:$144 sps:$4 sm:$0xff]  }
  0x15   : > { %294 = vmatpush1.bf16.msra.mxu0 %v3888_v8  ;;  %335 = vmatpush1.bf16.msra.mxu1 %v4119_v9  ;;  %v3902_v20 = vld [vmem:[%s4101_s19 + $0x120] ss:$144 sps:$4 sm:$0xff]   ;;  %v3907_v21 = vld [vmem:[%s4101_s19 + $0x4] ss:$144 sps:$4 sm:$0xff]   ;;  %v3908_v26 = vld [vmem:[%s4101_s19 + $0x148] ss:$144 sps:$4 sm:$0xff]  }
  0x16   : > { %373 = vmatprep.subr.bf16.mxu0 %v3892_v11  ;;  %414 = vmatprep.subr.bf16.mxu1 %v4128_v13  ;;  %v3905_v22 = vld [vmem:[%s4101_s19] ss:$144 sps:$4 sm:$0xff]   ;;  %v3913_v27 = vld [vmem:[%s4101_s19 + $0x2c] ss:$144 sps:$4 sm:$0xff]   ;;  %v3911_v28 = vld [vmem:[%s4101_s19 + $0x28] ss:$144 sps:$4 sm:$0xff]  }
  0x17   : > { %v4190_v29 = vld [vmem:[%s4101_s19 + $0x154] ss:$144 sps:$4 sm:$0xff]   ;;  %v4199_v31 = vld [vmem:[%s4101_s19 + $0x150] ss:$144 sps:$4 sm:$0xff]   ;;  %v3922_v34 = vld [vmem:[%s4101_s19 + $0x15c] ss:$144 sps:$4 sm:$0xff]  }
  0x18   : > { %3631 = vmatmul.mubr.msk.bf16.vlgmr.msra.gmra.mxu0 %vm275_vm0, %v3614_v10  ;;  %3632 = vmatmul.mubr.msk.bf16.vlgmr.msra.gmra.mxu1 %vm275_vm0, %v3614_v10  ;;  %v4203_v32 = vld [vmem:[%s4101_s19 + $0x34] ss:$144 sps:$4 sm:$0xff]   ;;  %v4209_v33 = vld [vmem:[%s4101_s19 + $0x30] ss:$144 sps:$4 sm:$0xff]   ;;  %v3920_v37 = vld [vmem:[%s4101_s19 + $0x158] ss:$144 sps:$4 sm:$0xff]  }
  0x19   : > { %374 = vmatpush1.bf16.msra.mxu0 %v3890_v12  ;;  %415 = vmatpush1.bf16.msra.mxu1 %v4132_v14  ;;  %v4214_v35 = vld [vmem:[%s4101_s19 + $0x164] ss:$144 sps:$4 sm:$0xff]   ;;  %v4224_v38 = vld [vmem:[%s4101_s19 + $0x160] ss:$144 sps:$4 sm:$0xff]   ;;  %v3928_v39 = vld [vmem:[%s4101_s19 + $0x3c] ss:$144 sps:$4 sm:$0xff]  }
  0x1a   : > { %375 = vmatprep.subr.bf16.mxu0 %v3898_v15  ;;  %416 = vmatprep.subr.bf16.mxu1 %v4137_v16  ;;  %v4229_v40 = vld [vmem:[%s4101_s19 + $0x44] ss:$144 sps:$4 sm:$0xff]   ;;  %v3926_v41 = vld [vmem:[%s4101_s19 + $0x38] ss:$144 sps:$4 sm:$0xff]   ;;  %v4236_v42 = vld [vmem:[%s4101_s19 + $0x40] ss:$144 sps:$4 sm:$0xff]  }
  0x1b   : > { %393 = vmatprep.mubr.bf16.mxu0 %v4058_v0  ;;  %434 = vmatprep.mubr.bf16.mxu1 %v4058_v0  ;;  %v2591_v44 = vld [vmem:[%s4702_s2] sm:$0xf]  ;;  %v3934_v45 = vld [vmem:[%s4101_s19 + $0x16c] ss:$144 sps:$4 sm:$0xff]   ;;  %v3932_v47 = vld [vmem:[%s4101_s19 + $0x168] ss:$144 sps:$4 sm:$0xff]  }
  0x1c   : > { %2594 = vperm.xlu1 %3877, %v2591_v44   ;;  %v3937_v48 = vld [vmem:[%s4101_s19 + $0x4c] ss:$144 sps:$4 sm:$0xff]   ;;  %v3935_v49 = vld [vmem:[%s4101_s19 + $0x48] ss:$144 sps:$4 sm:$0xff]   ;;  %v4285_v50 = vld [vmem:[%s4101_s19 + $0x174] ss:$144 sps:$4 sm:$0xff]  }
  0x1d   : > { %376 = vmatpush1.bf16.msra.mxu0 %v3896_v17  ;;  %417 = vmatpush1.bf16.msra.mxu1 %v4144_v18  ;;  %v4291_v51 = vld [vmem:[%s4101_s19 + $0x170] ss:$144 sps:$4 sm:$0xff]   ;;  %v4295_v52 = vld [vmem:[%s4101_s19 + $0x54] ss:$144 sps:$4 sm:$0xff]   ;;  %v3946_v54 = vld [vmem:[%s4101_s19 + $0x17c] ss:$144 sps:$4 sm:$0xff]  }
  0x1e   : > { %478 = vmatprep.subr.bf16.mxu0 %v3904_v19  ;;  %519 = vmatprep.subr.bf16.mxu1 %v3878_v2  ;;  %v4301_v53 = vld [vmem:[%s4101_s19 + $0x50] ss:$144 sps:$4 sm:$0xff]   ;;  %v4306_v55 = vld [vmem:[%s4101_s19 + $0x184] ss:$144 sps:$4 sm:$0xff]   ;;  %v3944_v57 = vld [vmem:[%s4101_s19 + $0x178] ss:$144 sps:$4 sm:$0xff]  }
  0x1f   : > { %v3738_v56 = vld [vmem:[%s4701_s1 + $0x2] sm:$0x3]  ;;  %v3952_v59 = vld [vmem:[%s4101_s19 + $0x5c] ss:$144 sps:$4 sm:$0xff]   ;;  %v4321_v60 = vld [vmem:[%s4101_s19 + $0x64] ss:$144 sps:$4 sm:$0xff]  }
  0x20   : > { %3633 = vmatmul.mubr.msk.bf16.vlgmr.msra.gmra.mxu0 %vm275_vm0, %v3614_v10  ;;  %3634 = vmatmul.mubr.msk.bf16.vlgmr.msra.gmra.mxu1 %vm275_vm0, %v3614_v10  ;;  %v4316_v58 = vld [vmem:[%s4101_s19 + $0x180] ss:$144 sps:$4 sm:$0xff]   ;;  %v3950_v61 = vld [vmem:[%s4101_s19 + $0x58] ss:$144 sps:$4 sm:$0xff]   ;;  %v3958_v2 = vld [vmem:[%s4101_s19 + $0x18c] ss:$144 sps:$4 sm:$0xff]  }
  0x21   : > { %479 = vmatpush1.bf16.msra.mxu0 %v3902_v20  ;;  %520 = vmatpush1.bf16.msra.mxu1 %v3882_v4  ;;  %v4328_v62 = vld [vmem:[%s4101_s19 + $0x60] ss:$144 sps:$4 sm:$0xff]   ;;  %v3956_v4 = vld [vmem:[%s4101_s19 + $0x188] ss:$144 sps:$4 sm:$0xff]  }
  0x22   : > { %480 = vmatprep.subr.bf16.mxu0 %v3907_v21  ;;  %521 = vmatprep.subr.bf16.mxu1 %v3884_v6  ;;  %v1863_v63 = vld [vmem:[%s4701_s1] sm:$0x3]  ;;  %v3959_v6 = vld [vmem:[%s4101_s19 + $0x68] ss:$144 sps:$4 sm:$0xff]   ;;  %v3982_v21 = vld [vmem:[%s4101_s19 + $0x1ac] ss:$144 sps:$4 sm:$0xff]  }
  0x23   : > { %498 = vmatprep.mubr.bf16.mxu0 %v4058_v0  ;;  %539 = vmatprep.mubr.bf16.mxu1 %v4058_v0  ;;  %v3435_v1 = vld [vmem:[%s4702_s2] sm:$0xf] }
  0x24   : > { %3438 = vperm.xlu1 %3877, %v3435_v1   ;;  %v4393_v10 = vld [vmem:[%s4101_s19 + $0x70] ss:$144 sps:$4 sm:$0xff]  }
  0x25   : > { %481 = vmatpush1.bf16.msra.mxu0 %v3905_v22  ;;  %522 = vmatpush1.bf16.msra.mxu1 %v3888_v8  ;;  %v4383_v8 = vld [vmem:[%s4101_s19 + $0x190] ss:$144 sps:$4 sm:$0xff]   ;;  %v3829_v22 = vld [vmem:[%s4701_s1 + $0x4] sm:$0x3] }
  0x26   : > { %560 = vmatprep.subr.bf16.mxu0 %v4105_v3  ;;  %601 = vmatprep.subr.bf16.mxu1 %v3892_v11  ;;  %v3977_v19 = vld [vmem:[%s4101_s19 + $0x80] ss:$144 sps:$4 sm:$0xff]  }
  0x27   : > { %v2707_v20 = vld [vmem:[%s4701_s1] sm:$0x3] }
  0x28   : > { %3639 = vmatmul.mubr.msk.bf16.vlgmr.msra.gmra.mxu0 %vm275_vm0, %v172_v23  ;;  %3640 = vmatmul.mubr.msk.bf16.vlgmr.msra.gmra.mxu1 %vm275_vm0, %v172_v23 }
  0x29   : > { %561 = vmatpush1.bf16.msra.mxu0 %v4109_v5  ;;  %602 = vmatpush1.bf16.msra.mxu1 %v3890_v12 }
  0x2a   : > { %562 = vmatprep.subr.bf16.mxu0 %v4115_v7  ;;  %603 = vmatprep.subr.bf16.mxu1 %v3898_v15 }
  0x2b   : > { %580 = vmatprep.mubr.bf16.mxu0 %v4058_v0  ;;  %621 = vmatprep.mubr.bf16.mxu1 %v4058_v0 }
  0x2d   : > { %563 = vmatpush1.bf16.msra.mxu0 %v4119_v9  ;;  %604 = vmatpush1.bf16.msra.mxu1 %v3896_v17 }
  0x2e   : > { %743 = vmatprep.subr.bf16.mxu0 %v4105_v3  ;;  %784 = vmatprep.subr.bf16.mxu1 %v3892_v11  ;;  %v3767_v3 = vld [vmem:[%s4701_s1 + $0x4] sm:$0x3]  ;;  %v3970_v11 = vld [vmem:[%s4101_s19 + $0x19c] ss:$144 sps:$4 sm:$0xff]  }
  0x30   : > { %3641 = vmatmul.mubr.msk.bf16.vlgmr.msra.gmra.mxu0 %vm275_vm0, %v172_v23  ;;  %3642 = vmatmul.mubr.msk.bf16.vlgmr.msra.gmra.mxu1 %vm275_vm0, %v172_v23  ;;  %v3980_v23 = vld [vmem:[%s4101_s19 + $0x1a8] ss:$144 sps:$4 sm:$0xff]  }
  0x31   : > { %744 = vmatpush1.bf16.msra.mxu0 %v4109_v5  ;;  %785 = vmatpush1.bf16.msra.mxu1 %v3890_v12  ;;  %v3961_v5 = vld [vmem:[%s4101_s19 + $0x6c] ss:$144 sps:$4 sm:$0xff]   ;;  %v4398_v12 = vld [vmem:[%s4101_s19 + $0x1a4] ss:$144 sps:$4 sm:$0xff]  }
  0x32   : > { %745 = vmatprep.subr.bf16.mxu0 %v4115_v7  ;;  %786 = vmatprep.subr.bf16.mxu1 %v3898_v15  ;;  %v4377_v7 = vld [vmem:[%s4101_s19 + $0x194] ss:$144 sps:$4 sm:$0xff]   ;;  %v3971_v15 = vld [vmem:[%s4101_s19 + $0x1a0] ss:$144 sps:$4 sm:$0xff]  }
  0x33   : > { %763 = vmatprep.mubr.bf16.mxu0 %v4058_v0  ;;  %804 = vmatprep.mubr.bf16.mxu1 %v4058_v0 }
  0x35   : > { %746 = vmatpush1.bf16.msra.mxu0 %v4119_v9  ;;  %787 = vmatpush1.bf16.msra.mxu1 %v3896_v17  ;;  %v4387_v9 = vld [vmem:[%s4101_s19 + $0x74] ss:$144 sps:$4 sm:$0xff]  }
  0x36   : > { %825 = vmatprep.subr.bf16.mxu0 %v4128_v13  ;;  %866 = vmatprep.subr.bf16.mxu1 %v3910_v24  ;;  %v3979_v17 = vld [vmem:[%s4101_s19 + $0x84] ss:$144 sps:$4 sm:$0xff]  }
  0x38   : > { %3660 = vmatmul.mubr.msk.bf16.vlgmr.msra.gmra.mxu0 %vm275_vm0, %v3643_v25  ;;  %3661 = vmatmul.mubr.msk.bf16.vlgmr.msra.gmra.mxu1 %vm275_vm0, %v3643_v25 }
  0x39   : > { %826 = vmatpush1.bf16.msra.mxu0 %v4132_v14  ;;  %867 = vmatpush1.bf16.msra.mxu1 %v3908_v26 }
  0x3a   : > { %827 = vmatprep.subr.bf16.mxu0 %v4137_v16  ;;  %868 = vmatprep.subr.bf16.mxu1 %v3913_v27 }
  0x3b   : > { %845 = vmatprep.mubr.bf16.mxu0 %v4058_v0  ;;  %886 = vmatprep.mubr.bf16.mxu1 %v4058_v0 }
  0x3d   : > { %828 = vmatpush1.bf16.msra.mxu0 %v4144_v18  ;;  %869 = vmatpush1.bf16.msra.mxu1 %v3911_v28 }
  0x3e   : > { %1136 = vmatprep.subr.bf16.mxu0 %v3910_v24  ;;  %1177 = vmatprep.subr.bf16.mxu1 %v4190_v29 }
  0x40   : > { %3662 = vmatmul.mubr.msk.bf16.vlgmr.msra.gmra.mxu0 %vm275_vm0, %v3643_v25  ;;  %3663 = vmatmul.mubr.msk.bf16.vlgmr.msra.gmra.mxu1 %vm275_vm0, %v3643_v25  ;;  %v3983_v25 = vld [vmem:[%s4101_s19 + $0x88] ss:$144 sps:$4 sm:$0xff]  }
  0x41   : > { %1137 = vmatpush1.bf16.msra.mxu0 %v3908_v26  ;;  %1178 = vmatpush1.bf16.msra.mxu1 %v4199_v31 }
  0x42   : > { %1138 = vmatprep.subr.bf16.mxu0 %v3913_v27  ;;  %1179 = vmatprep.subr.bf16.mxu1 %v4203_v32 }
  0x43   : > { %1156 = vmatprep.mubr.bf16.mxu0 %v4058_v0  ;;  %1197 = vmatprep.mubr.bf16.mxu1 %v4058_v0 }
  0x45   : > { %1139 = vmatpush1.bf16.msra.mxu0 %v3911_v28  ;;  %1180 = vmatpush1.bf16.msra.mxu1 %v4209_v33 }
  0x46   : > { %1218 = vmatprep.subr.bf16.mxu0 %v3922_v34  ;;  %1259 = vmatprep.subr.bf16.mxu1 %v4214_v35 }
  0x48   : > { %3693 = vmatmul.mubr.msk.bf16.vlgmr.msra.gmra.mxu0 %vm275_vm0, %v3676_v36  ;;  %3694 = vmatmul.mubr.msk.bf16.vlgmr.msra.gmra.mxu1 %vm275_vm0, %v3676_v36 }
  0x49   : > { %1219 = vmatpush1.bf16.msra.mxu0 %v3920_v37  ;;  %1260 = vmatpush1.bf16.msra.mxu1 %v4224_v38 }
  0x4a   : > { %1220 = vmatprep.subr.bf16.mxu0 %v3928_v39  ;;  %1261 = vmatprep.subr.bf16.mxu1 %v4229_v40 }
  0x4b   : > { %1238 = vmatprep.mubr.bf16.mxu0 %v4058_v0  ;;  %1279 = vmatprep.mubr.bf16.mxu1 %v4058_v0 }
  0x4d   : > { %1221 = vmatpush1.bf16.msra.mxu0 %v3926_v41  ;;  %1262 = vmatpush1.bf16.msra.mxu1 %v4236_v42 }
  0x4e   : > { %1323 = vmatprep.subr.bf16.mxu0 %v4128_v13  ;;  %1364 = vmatprep.subr.bf16.mxu1 %v3910_v24  ;;  %v3800_v13 = vld [vmem:[%s4701_s1 + $0x2] sm:$0x3]  ;;  %v3985_v24 = vld [vmem:[%s4101_s19 + $0x8c] ss:$144 sps:$4 sm:$0xff]  }
  0x50   : > { %3695 = vmatmul.mubr.msk.bf16.vlgmr.msra.gmra.mxu0 %vm275_vm0, %v3676_v36  ;;  %3696 = vmatmul.mubr.msk.bf16.vlgmr.msra.gmra.mxu1 %vm275_vm0, %v3676_v36 }
  0x51   : > { %1324 = vmatpush1.bf16.msra.mxu0 %v4132_v14  ;;  %1365 = vmatpush1.bf16.msra.mxu1 %v3908_v26  ;;  %v3968_v14 = vld [vmem:[%s4101_s19 + $0x198] ss:$144 sps:$4 sm:$0xff]  }
  0x52   : > { %1325 = vmatprep.subr.bf16.mxu0 %v4137_v16  ;;  %1366 = vmatprep.subr.bf16.mxu1 %v3913_v27  ;;  %v3976_v16 = vld [vmem:[%s4101_s19 + $0x7c] ss:$144 sps:$4 sm:$0xff]  }
  0x53   : > { %1343 = vmatprep.mubr.bf16.mxu0 %v4058_v0  ;;  %1384 = vmatprep.mubr.bf16.mxu1 %v4058_v0 }
  0x55   : > { %1326 = vmatpush1.bf16.msra.mxu0 %v4144_v18  ;;  %1367 = vmatpush1.bf16.msra.mxu1 %v3911_v28  ;;  %v3974_v18 = vld [vmem:[%s4101_s19 + $0x78] ss:$144 sps:$4 sm:$0xff]   ;;  %s3864_s19 = sshll.u32 %s4705_s13, 6 }
  0x56   : > { %1405 = vmatprep.subr.bf16.mxu0 %v4190_v29  ;;  %1446 = vmatprep.subr.bf16.mxu1 %v3922_v34  ;;  %s4514_s28 = scalar_lea.vmem %s4703_s3, %s3864_s19 }
  0x58   : > { %3701 = vmatmul.mubr.msk.bf16.vlgmr.msra.gmra.mxu0 %vm275_vm0, %v1019_v43  ;;  %3702 = vmatmul.mubr.msk.bf16.vlgmr.msra.gmra.mxu1 %vm275_vm0, %v1019_v43 }
  0x59   : > { %1406 = vmatpush1.bf16.msra.mxu0 %v4199_v31  ;;  %1447 = vmatpush1.bf16.msra.mxu1 %v3920_v37 }
  0x5a   : > { %1407 = vmatprep.subr.bf16.mxu0 %v4203_v32  ;;  %1448 = vmatprep.subr.bf16.mxu1 %v3928_v39 }
  0x5b   : > { %1425 = vmatprep.mubr.bf16.mxu0 %v4058_v0  ;;  %1466 = vmatprep.mubr.bf16.mxu1 %v4058_v0 }
  0x5d   : > { %1408 = vmatpush1.bf16.msra.mxu0 %v4209_v33  ;;  %1449 = vmatpush1.bf16.msra.mxu1 %v3926_v41 }
  0x5e   : > { %1587 = vmatprep.subr.bf16.mxu0 %v4190_v29  ;;  %1628 = vmatprep.subr.bf16.mxu1 %v3922_v34 }
  0x60   : > { %3703 = vmatmul.mubr.msk.bf16.vlgmr.msra.gmra.mxu0 %vm275_vm0, %v1019_v43  ;;  %3704 = vmatmul.mubr.msk.bf16.vlgmr.msra.gmra.mxu1 %vm275_vm0, %v1019_v43 }
  0x61   : > { %1588 = vmatpush1.bf16.msra.mxu0 %v4199_v31  ;;  %1629 = vmatpush1.bf16.msra.mxu1 %v3920_v37 }
  0x62   : > { %1589 = vmatprep.subr.bf16.mxu0 %v4203_v32  ;;  %1630 = vmatprep.subr.bf16.mxu1 %v3928_v39 }
  0x63   : > { %1607 = vmatprep.mubr.bf16.mxu0 %v4058_v0  ;;  %1648 = vmatprep.mubr.bf16.mxu1 %v4058_v0 }
  0x65   : > { %1590 = vmatpush1.bf16.msra.mxu0 %v4209_v33  ;;  %1631 = vmatpush1.bf16.msra.mxu1 %v3926_v41 }
  0x66   : > { %1669 = vmatprep.subr.bf16.mxu0 %v4214_v35  ;;  %1710 = vmatprep.subr.bf16.mxu1 %v3934_v45 }
  0x68   : > { %3722 = vmatmul.mubr.msk.bf16.vlgmr.msra.gmra.mxu0 %vm275_vm0, %v3705_v46  ;;  %3723 = vmatmul.mubr.msk.bf16.vlgmr.msra.gmra.mxu1 %vm275_vm0, %v3705_v46 }
  0x69   : > { %1670 = vmatpush1.bf16.msra.mxu0 %v4224_v38  ;;  %1711 = vmatpush1.bf16.msra.mxu1 %v3932_v47 }
  0x6a   : > { %1671 = vmatprep.subr.bf16.mxu0 %v4229_v40  ;;  %1712 = vmatprep.subr.bf16.mxu1 %v3937_v48 }
  0x6b   : > { %1689 = vmatprep.mubr.bf16.mxu0 %v4058_v0  ;;  %1730 = vmatprep.mubr.bf16.mxu1 %v4058_v0 }
  0x6d   : > { %1672 = vmatpush1.bf16.msra.mxu0 %v4236_v42  ;;  %1713 = vmatpush1.bf16.msra.mxu1 %v3935_v49 }
  0x6e   : > { %1980 = vmatprep.subr.bf16.mxu0 %v3934_v45  ;;  %2021 = vmatprep.subr.bf16.mxu1 %v4285_v50 }
  0x70   : > { %3724 = vmatmul.mubr.msk.bf16.vlgmr.msra.gmra.mxu0 %vm275_vm0, %v3705_v46  ;;  %3725 = vmatmul.mubr.msk.bf16.vlgmr.msra.gmra.mxu1 %vm275_vm0, %v3705_v46 }
  0x71   : > { %1981 = vmatpush1.bf16.msra.mxu0 %v3932_v47  ;;  %2022 = vmatpush1.bf16.msra.mxu1 %v4291_v51 }
  0x72   : > { %1982 = vmatprep.subr.bf16.mxu0 %v3937_v48  ;;  %2023 = vmatprep.subr.bf16.mxu1 %v4295_v52 }
  0x73   : > { %2000 = vmatprep.mubr.bf16.mxu0 %v4058_v0  ;;  %2041 = vmatprep.mubr.bf16.mxu1 %v4058_v0 }
  0x75   : > { %1983 = vmatpush1.bf16.msra.mxu0 %v3935_v49  ;;  %2024 = vmatpush1.bf16.msra.mxu1 %v4301_v53 }
  0x76   : > { %2062 = vmatprep.subr.bf16.mxu0 %v3946_v54  ;;  %2103 = vmatprep.subr.bf16.mxu1 %v4306_v55 }
  0x78   : > { %3755 = vmatmul.mubr.msk.bf16.vlgmr.msra.gmra.mxu0 %vm275_vm0, %v3738_v56  ;;  %3756 = vmatmul.mubr.msk.bf16.vlgmr.msra.gmra.mxu1 %vm275_vm0, %v3738_v56 }
  0x79   : > { %2063 = vmatpush1.bf16.msra.mxu0 %v3944_v57  ;;  %2104 = vmatpush1.bf16.msra.mxu1 %v4316_v58 }
  0x7a   : > { %2064 = vmatprep.subr.bf16.mxu0 %v3952_v59  ;;  %2105 = vmatprep.subr.bf16.mxu1 %v4321_v60 }
  0x7b   : > { %2082 = vmatprep.mubr.bf16.mxu0 %v4058_v0  ;;  %2123 = vmatprep.mubr.bf16.mxu1 %v4058_v0 }
  0x7d   : > { %2065 = vmatpush1.bf16.msra.mxu0 %v3950_v61  ;;  %2106 = vmatpush1.bf16.msra.mxu1 %v4328_v62 }
  0x7e   : > { %2167 = vmatprep.subr.bf16.mxu0 %v4214_v35  ;;  %2208 = vmatprep.subr.bf16.mxu1 %v3934_v45 }
  0x80   : > { %3757 = vmatmul.mubr.msk.bf16.vlgmr.msra.gmra.mxu0 %vm275_vm0, %v3738_v56  ;;  %3758 = vmatmul.mubr.msk.bf16.vlgmr.msra.gmra.mxu1 %vm275_vm0, %v3738_v56 }
  0x81   : > { %2168 = vmatpush1.bf16.msra.mxu0 %v4224_v38  ;;  %2209 = vmatpush1.bf16.msra.mxu1 %v3932_v47 }
  0x82   : > { %2169 = vmatprep.subr.bf16.mxu0 %v4229_v40  ;;  %2210 = vmatprep.subr.bf16.mxu1 %v3937_v48 }
  0x83   : > { %2187 = vmatprep.mubr.bf16.mxu0 %v4058_v0  ;;  %2228 = vmatprep.mubr.bf16.mxu1 %v4058_v0 }
  0x85   : > { %2170 = vmatpush1.bf16.msra.mxu0 %v4236_v42  ;;  %2211 = vmatpush1.bf16.msra.mxu1 %v3935_v49 }
  0x86   : > { %2249 = vmatprep.subr.bf16.mxu0 %v4285_v50  ;;  %2290 = vmatprep.subr.bf16.mxu1 %v3946_v54 }
  0x88   : > { %3763 = vmatmul.mubr.msk.bf16.vlgmr.msra.gmra.mxu0 %vm275_vm0, %v1863_v63  ;;  %3764 = vmatmul.mubr.msk.bf16.vlgmr.msra.gmra.mxu1 %vm275_vm0, %v1863_v63 }
  0x89   : > { %2250 = vmatpush1.bf16.msra.mxu0 %v4291_v51  ;;  %2291 = vmatpush1.bf16.msra.mxu1 %v3944_v57 }
  0x8a   : > { %2251 = vmatprep.subr.bf16.mxu0 %v4295_v52  ;;  %2292 = vmatprep.subr.bf16.mxu1 %v3952_v59 }
  0x8b   : > { %2269 = vmatprep.mubr.bf16.mxu0 %v4058_v0  ;;  %2310 = vmatprep.mubr.bf16.mxu1 %v4058_v0 }
  0x8d   : > { %2252 = vmatpush1.bf16.msra.mxu0 %v4301_v53  ;;  %2293 = vmatpush1.bf16.msra.mxu1 %v3950_v61 }
  0x8e   : > { %2431 = vmatprep.subr.bf16.mxu0 %v4285_v50  ;;  %2472 = vmatprep.subr.bf16.mxu1 %v3946_v54 }
  0x90   : > { %3765 = vmatmul.mubr.msk.bf16.vlgmr.msra.gmra.mxu0 %vm275_vm0, %v1863_v63  ;;  %3766 = vmatmul.mubr.msk.bf16.vlgmr.msra.gmra.mxu1 %vm275_vm0, %v1863_v63 }
  0x91   : > { %2432 = vmatpush1.bf16.msra.mxu0 %v4291_v51  ;;  %2473 = vmatpush1.bf16.msra.mxu1 %v3944_v57 }
  0x92   : > { %2433 = vmatprep.subr.bf16.mxu0 %v4295_v52  ;;  %2474 = vmatprep.subr.bf16.mxu1 %v3952_v59  ;;  %v907_v59 = vpop.permute.xlu0 %906 }
  0x93   : > { %2451 = vmatprep.mubr.bf16.mxu0 %v4058_v0  ;;  %2492 = vmatprep.mubr.bf16.mxu1 %v4058_v0 }
  0x95   : > { %2434 = vmatpush1.bf16.msra.mxu0 %v4301_v53  ;;  %2475 = vmatpush1.bf16.msra.mxu1 %v3950_v61 }
  0x96   : > { %2513 = vmatprep.subr.bf16.mxu0 %v4306_v55  ;;  %2554 = vmatprep.subr.bf16.mxu1 %v3958_v2 }
  0x98   : > { %3784 = vmatmul.mubr.msk.bf16.vlgmr.msra.gmra.mxu0 %vm275_vm0, %v3767_v3  ;;  %3785 = vmatmul.mubr.msk.bf16.vlgmr.msra.gmra.mxu1 %vm275_vm0, %v3767_v3 }
  0x99   : > { %2514 = vmatpush1.bf16.msra.mxu0 %v4316_v58  ;;  %2555 = vmatpush1.bf16.msra.mxu1 %v3956_v4 }
  0x9a   : > { %2515 = vmatprep.subr.bf16.mxu0 %v4321_v60  ;;  %2556 = vmatprep.subr.bf16.mxu1 %v3961_v5 }
  0x9b   : > { %2533 = vmatprep.mubr.bf16.mxu0 %v4058_v0  ;;  %2574 = vmatprep.mubr.bf16.mxu1 %v4058_v0 }
  0x9d   : > { %2516 = vmatpush1.bf16.msra.mxu0 %v4328_v62  ;;  %2557 = vmatpush1.bf16.msra.mxu1 %v3959_v6 }
  0x9e   : > { %2824 = vmatprep.subr.bf16.mxu0 %v3958_v2  ;;  %2865 = vmatprep.subr.bf16.mxu1 %v4377_v7 }
  0xa0   : > { %3786 = vmatmul.mubr.msk.bf16.vlgmr.msra.gmra.mxu0 %vm275_vm0, %v3767_v3  ;;  %3787 = vmatmul.mubr.msk.bf16.vlgmr.msra.gmra.mxu1 %vm275_vm0, %v3767_v3 }
  0xa1   : > { %2825 = vmatpush1.bf16.msra.mxu0 %v3956_v4  ;;  %2866 = vmatpush1.bf16.msra.mxu1 %v4383_v8 }
  0xa2   : > { %2826 = vmatprep.subr.bf16.mxu0 %v3961_v5  ;;  %2867 = vmatprep.subr.bf16.mxu1 %v4387_v9 }
  0xa3   : > { %2844 = vmatprep.mubr.bf16.mxu0 %v4058_v0  ;;  %2885 = vmatprep.mubr.bf16.mxu1 %v4058_v0 }
  0xa5   : > { %2827 = vmatpush1.bf16.msra.mxu0 %v3959_v6  ;;  %2868 = vmatpush1.bf16.msra.mxu1 %v4393_v10 }
  0xa6   : > { %2906 = vmatprep.subr.bf16.mxu0 %v3970_v11  ;;  %2947 = vmatprep.subr.bf16.mxu1 %v4398_v12 }
  0xa8   : > { %3817 = vmatmul.mubr.msk.bf16.vlgmr.msra.gmra.mxu0 %vm275_vm0, %v3800_v13  ;;  %3818 = vmatmul.mubr.msk.bf16.vlgmr.msra.gmra.mxu1 %vm275_vm0, %v3800_v13 }
  0xa9   : > { %2907 = vmatpush1.bf16.msra.mxu0 %v3968_v14  ;;  %2948 = vmatpush1.bf16.msra.mxu1 %v3971_v15 }
  0xaa   : > { %2908 = vmatprep.subr.bf16.mxu0 %v3976_v16  ;;  %2949 = vmatprep.subr.bf16.mxu1 %v3979_v17 }
  0xab   : > { %2926 = vmatprep.mubr.bf16.mxu0 %v4058_v0  ;;  %2967 = vmatprep.mubr.bf16.mxu1 %v4058_v0 }
  0xad   : > { %2909 = vmatpush1.bf16.msra.mxu0 %v3974_v18  ;;  %2950 = vmatpush1.bf16.msra.mxu1 %v3977_v19 }
  0xae   : > { %3011 = vmatprep.subr.bf16.mxu0 %v4306_v55  ;;  %3052 = vmatprep.subr.bf16.mxu1 %v3958_v2 }
  0xb0   : > { %3819 = vmatmul.mubr.msk.bf16.vlgmr.msra.gmra.mxu0 %vm275_vm0, %v3800_v13  ;;  %3820 = vmatmul.mubr.msk.bf16.vlgmr.msra.gmra.mxu1 %vm275_vm0, %v3800_v13 }
  0xb1   : > { %3012 = vmatpush1.bf16.msra.mxu0 %v4316_v58  ;;  %3053 = vmatpush1.bf16.msra.mxu1 %v3956_v4 }
  0xb2   : > { %3013 = vmatprep.subr.bf16.mxu0 %v4321_v60  ;;  %3054 = vmatprep.subr.bf16.mxu1 %v3961_v5 }
  0xb3   : > { %3031 = vmatprep.mubr.bf16.mxu0 %v4058_v0  ;;  %3072 = vmatprep.mubr.bf16.mxu1 %v4058_v0 }
  0xb5   : > { %3014 = vmatpush1.bf16.msra.mxu0 %v4328_v62  ;;  %3055 = vmatpush1.bf16.msra.mxu1 %v3959_v6 }
  0xb6   : > { %3093 = vmatprep.subr.bf16.mxu0 %v4377_v7  ;;  %3134 = vmatprep.subr.bf16.mxu1 %v3970_v11 }
  0xb8   : > { %3825 = vmatmul.mubr.msk.bf16.vlgmr.msra.gmra.mxu0 %vm275_vm0, %v2707_v20  ;;  %3826 = vmatmul.mubr.msk.bf16.vlgmr.msra.gmra.mxu1 %vm275_vm0, %v2707_v20 }
  0xb9   : > { %3094 = vmatpush1.bf16.msra.mxu0 %v4383_v8  ;;  %3135 = vmatpush1.bf16.msra.mxu1 %v3968_v14 }
  0xba   : > { %3095 = vmatprep.subr.bf16.mxu0 %v4387_v9  ;;  %3136 = vmatprep.subr.bf16.mxu1 %v3976_v16 }
  0xbb   : > { %3113 = vmatprep.mubr.bf16.mxu0 %v4058_v0  ;;  %3154 = vmatprep.mubr.bf16.mxu1 %v4058_v0 }
  0xbd   : > { %3096 = vmatpush1.bf16.msra.mxu0 %v4393_v10  ;;  %3137 = vmatpush1.bf16.msra.mxu1 %v3974_v18 }
  0xbe   : > { %3275 = vmatprep.subr.bf16.mxu0 %v4377_v7  ;;  %3316 = vmatprep.subr.bf16.mxu1 %v3970_v11 }
  0xc0   : > { %3827 = vmatmul.mubr.msk.bf16.vlgmr.msra.gmra.mxu0 %vm275_vm0, %v2707_v20  ;;  %3828 = vmatmul.mubr.msk.bf16.vlgmr.msra.gmra.mxu1 %vm275_vm0, %v2707_v20 }
  0xc1   : > { %3276 = vmatpush1.bf16.msra.mxu0 %v4383_v8  ;;  %3317 = vmatpush1.bf16.msra.mxu1 %v3968_v14 }
  0xc2   : > { %3277 = vmatprep.subr.bf16.mxu0 %v4387_v9  ;;  %3318 = vmatprep.subr.bf16.mxu1 %v3976_v16 }
  0xc3   : > { %3295 = vmatprep.mubr.bf16.mxu0 %v4058_v0  ;;  %3336 = vmatprep.mubr.bf16.mxu1 %v4058_v0 }
  0xc5   : > { %3278 = vmatpush1.bf16.msra.mxu0 %v4393_v10  ;;  %3319 = vmatpush1.bf16.msra.mxu1 %v3974_v18 }
  0xc6   : > { %3357 = vmatprep.subr.bf16.mxu0 %v4398_v12  ;;  %3398 = vmatprep.subr.bf16.mxu1 %v3982_v21 }
  0xc8   : > { %3846 = vmatmul.mubr.msk.bf16.vlgmr.msra.gmra.mxu0 %vm275_vm0, %v3829_v22  ;;  %3847 = vmatmul.mubr.msk.bf16.vlgmr.msra.gmra.mxu1 %vm275_vm0, %v3829_v22 }
  0xc9   : > { %3358 = vmatpush1.bf16.msra.mxu0 %v3971_v15  ;;  %3399 = vmatpush1.bf16.msra.mxu1 %v3980_v23 }
  0xca   : > { %3359 = vmatprep.subr.bf16.mxu0 %v3979_v17  ;;  %3400 = vmatprep.subr.bf16.mxu1 %v3985_v24 }
  0xcb   : > { %3377 = vmatprep.mubr.bf16.mxu0 %v4058_v0  ;;  %3418 = vmatprep.mubr.bf16.mxu1 %v4058_v0 }
  0xcd   : > { %3360 = vmatpush1.bf16.msra.mxu0 %v3977_v19  ;;  %3401 = vmatpush1.bf16.msra.mxu1 %v3983_v25 }
  0xd0   : > { %3848 = vmatmul.mubr.msk.bf16.vlgmr.msra.gmra.mxu0 %vm275_vm0, %v3829_v22  ;;  %3849 = vmatmul.mubr.msk.bf16.vlgmr.msra.gmra.mxu1 %vm275_vm0, %v3829_v22 }
  0xd8   : > { %v313_v26 = vpop.f32.mrf.mxu0  ;;  %v354_v27 = vpop.f32.mrf.mxu1 }
  0xda   : > { %v315_v28 = vpop.f32.mrf.mxu0  ;;  %v356_v29 = vpop.f32.mrf.mxu1 }
  0xdc   : > { %v317_v30 = vpop.f32.mrf.mxu0  ;;  %v358_v31 = vpop.f32.mrf.mxu1 }
  0xde   : > { %v318_v32 = vpop.f32.mrf.mxu0  ;;  %v359_v33 = vpop.f32.mrf.mxu1 }
  0xe0   : > { %v395_v34 = vpop.f32.mrf.mxu0  ;;  %v436_v35 = vpop.f32.mrf.mxu1 }
  0xe2   : > { %v397_v36 = vpop.f32.mrf.mxu0  ;;  %v438_v37 = vpop.f32.mrf.mxu1 }
  0xe4   : > { %v399_v38 = vpop.f32.mrf.mxu0  ;;  %v440_v0 = vpop.f32.mrf.mxu1 }
  0xe6   : > { %v400_v39 = vpop.f32.mrf.mxu0  ;;  %v441_v40 = vpop.f32.mrf.mxu1 }
  0xe8   : > { %v500_v41 = vpop.f32.mrf.mxu0  ;;  %v541_v42 = vpop.f32.mrf.mxu1 }
  0xe9   : > { %v501_v57 = vadd.f32 %v500_v41, %v313_v26  ;;  %v542_v58 = vadd.f32 %v541_v42, %v354_v27 }
  0xea   : > { %v502_v43 = vpop.f32.mrf.mxu0  ;;  %v543_v44 = vpop.f32.mrf.mxu1 }
  0xeb   : > { %v503_v62 = vadd.f32 %v502_v43, %v315_v28  ;;  %v544_v63 = vadd.f32 %v543_v44, %v356_v29 }
  0xec   : > { %v504_v45 = vpop.f32.mrf.mxu0  ;;  %v545_v46 = vpop.f32.mrf.mxu1 }
  0xee   : > { %v505_v47 = vpop.f32.mrf.mxu0  ;;  %v546_v48 = vpop.f32.mrf.mxu1 }
  0xf0   : > { %v582_v49 = vpop.f32.mrf.mxu0  ;;  %v623_v50 = vpop.f32.mrf.mxu1 }
  0xf1   : > { %v583_v17 = vadd.f32 %v582_v49, %v395_v34  ;;  %v624_v18 = vadd.f32 %v623_v50, %v436_v35  ;;  %v4059_v50 = vmov 1983009808  }
  0xf2   : > { %v584_v51 = vpop.f32.mrf.mxu0  ;;  %v625_v52 = vpop.f32.mrf.mxu1 }
  0xf3   : > { %v585_v21 = vadd.f32 %v584_v51, %v397_v36  ;;  %v626_v29 = vadd.f32 %v625_v52, %v438_v37  ;;  %v984_v51 = vunpack.c.l.s4 %v4059_v50  ;;  %v986_v52 = vlaneseq }
  0xf4   : > { %v586_v53 = vpop.f32.mrf.mxu0  ;;  %v627_v54 = vpop.f32.mrf.mxu1 }
  0xf6   : > { %v587_v55 = vpop.f32.mrf.mxu0  ;;  %v628_v56 = vpop.f32.mrf.mxu1 }
  0xf8   : > { %v765_v60 = vpop.f32.mrf.mxu0  ;;  %v806_v61 = vpop.f32.mrf.mxu1 }
  0xf9   : > { %v895_v1 = vadd.f32 %v765_v60, %v501_v57  ;;  %v897_v2 = vadd.f32 %v806_v61, %v542_v58  ;;  %v985_v60 = vunpack.c.0.s8 %v984_v51  ;;  %v987_v61 = vshrl.u32 %v986_v52, 7 }
  0xfa   : > { %v767_v3 = vpop.f32.mrf.mxu0  ;;  %v808_v4 = vpop.f32.mrf.mxu1 }
  0xfb   : > { %v896_v5 = vadd.f32 %v767_v3, %v503_v62  ;;  %v4458_v6 = vadd.f32 %v907_v59, %v895_v1  ;;  %v898_v7 = vadd.f32 %v808_v4, %v544_v63  ;;  %v4460_v8 = vadd.f32 %v907_v59, %v897_v2 }
  0xfc   : > { %v769_v9 = vpop.f32.mrf.mxu0  ;;  %v810_v10 = vpop.f32.mrf.mxu1 }
  0xfd   : > { %v4462_v11 = vadd.f32 %v907_v59, %v896_v5  ;;  %v925_v12 = vmin.f32 %v4458_v6, 0.0  ;;  %v4465_v13 = vadd.f32 %v907_v59, %v898_v7  ;;  %v927_v14 = vmin.f32 %v4460_v8, 0.0 }
  0xfe   : > { %v770_v15 = vpop.f32.mrf.mxu0  ;;  %v811_v16 = vpop.f32.mrf.mxu1  ;;  %vm917_vm1 = vcmp.gt.f32.partialorder %v4458_v6, 0.0  ;;  %vm919_vm3 = vcmp.gt.f32.partialorder %v4460_v8, 0.0 }
  0xff   : > { %v926_v19 = vmin.f32 %v4462_v11, 0.0  ;;  %v933_v20 = vmul.f32 1.442695, %v925_v12  ;;  %v928_v22 = vmin.f32 %v4465_v13, 0.0  ;;  %v937_v23 = vmul.f32 1.442695, %v927_v14 }
 0x100   : > { %v847_v24 = vpop.f32.mrf.mxu0  ;;  %v888_v25 = vpop.f32.mrf.mxu1  ;;  %vm918_vm2 = vcmp.gt.f32.partialorder %v4462_v11, 0.0  ;;  %v4496_v12 = vsub.s32 %v985_v60, %v987_v61  ;;  %vm920_vm4 = vcmp.gt.f32.partialorder %v4465_v13, 0.0 }
 0x101   : > { %3986 = vpow2.f32 %v933_v20  ;;  %v935_v26 = vmul.f32 1.442695, %v926_v19  ;;  %v899_v27 = vadd.f32 %v847_v24, %v583_v17  ;;  %v901_v28 = vadd.f32 %v888_v25, %v624_v18 }
 0x102   : > { %3988 = vpow2.f32 %v937_v23  ;;  %v939_v30 = vmul.f32 1.442695, %v928_v22  ;;  %v849_v31 = vpop.f32.mrf.mxu0  ;;  %v890_v32 = vpop.f32.mrf.mxu1 }
 0x103   : > { %3990 = vpow2.f32 %v935_v26  ;;  %v4470_v33 = vadd.f32 %v907_v59, %v899_v27  ;;  %v4472_v34 = vadd.f32 %v907_v59, %v901_v28  ;;  %v900_v35 = vadd.f32 %v849_v31, %v585_v21 }
 0x104   : > { %3992 = vpow2.f32 %v939_v30  ;;  %v902_v36 = vadd.f32 %v890_v32, %v626_v29  ;;  %v851_v38 = vpop.f32.mrf.mxu0  ;;  %v892_v0 = vpop.f32.mrf.mxu1 }
 0x105   : > { %v929_v39 = vmin.f32 %v4470_v33, 0.0  ;;  %v931_v40 = vmin.f32 %v4472_v34, 0.0  ;;  %v4476_v41 = vadd.f32 %v907_v59, %v900_v35  ;;  %vm921_vm5 = vcmp.gt.f32.partialorder %v4470_v33, 0.0 }
 0x106   : > { %v4478_v37 = vadd.f32 %v907_v59, %v902_v36  ;;  %v852_v42 = vpop.f32.mrf.mxu0  ;;  %v893_v43 = vpop.f32.mrf.mxu1  ;;  %vm923_vm7 = vcmp.gt.f32.partialorder %v4472_v34, 0.0 }
 0x107   : > { %v941_v44 = vmul.f32 1.442695, %v929_v39  ;;  %v945_v45 = vmul.f32 1.442695, %v931_v40  ;;  %v930_v46 = vmin.f32 %v4476_v41, 0.0  ;;  %vm922_vm6 = vcmp.gt.f32.partialorder %v4476_v41, 0.0 }
 0x108   : > { %v932_v47 = vmin.f32 %v4478_v37, 0.0  ;;  %v4482_v48 = vpop.f32.mrf.mxu0  ;;  %v4484_v49 = vpop.f32.mrf.mxu1  ;;  %vm924_vm8 = vcmp.gt.f32.partialorder %v4478_v37, 0.0 }
 0x109   : > { %3994 = vpow2.f32 %v941_v44  ;;  %v943_v53 = vmul.f32 1.442695, %v930_v46 }
 0x10a   : > { %3996 = vpow2.f32 %v945_v45  ;;  %v947_v54 = vmul.f32 1.442695, %v932_v47  ;;  %v4486_v55 = vpop.f32.mrf.mxu0  ;;  %v4488_v56 = vpop.f32.mrf.mxu1 }
 0x10b   : > { %3998 = vpow2.f32 %v943_v53 }
 0x10c   : > { %v1162_v57 = vpop.f32.mrf.mxu0  ;;  %v1203_v58 = vpop.f32.mrf.mxu1  ;;  %4000 = vpow2.f32 %v947_v54 }
 0x10e   : > { %v3987_v59 = vpop.eup %3986  ;;  %v1163_v62 = vpop.f32.mrf.mxu0 }
 0x10f   : > { %v1204_v63 = vpop.f32.mrf.mxu1  ;;  %v3989_v1 = vpop.eup %3988  ;;  %v3664_v2 = vadd.f32 -1.0, %v3987_v59 }
 0x110   : > { %v3991_v3 = vpop.eup %3990  ;;  %v3666_v4 = vadd.f32 -1.0, %v3989_v1  ;;  %v4490_v5 = vpop.f32.mrf.mxu0 }
 0x111   : > { %v4492_v7 = vpop.f32.mrf.mxu1  ;;  %v3993_v9 = vpop.eup %3992  ;;  %v3665_v10 = vadd.f32 -1.0, %v3991_v3  ;;  %v957_v17 = vsel %vm917_vm1, %v4458_v6, %v3664_v2 }
 0x112   : > { %v3667_v14 = vadd.f32 -1.0, %v3993_v9  ;;  %v4498_v15 = vpop.f32.mrf.mxu0  ;;  %v959_v20 = vsel %vm919_vm3, %v4460_v8, %v3666_v4  ;;  %v1751_v1 = vpop.permute.xlu0 %1750 }
 0x113   : > { %v4500_v16 = vpop.f32.mrf.mxu1  ;;  %v958_v18 = vsel %vm918_vm2, %v4462_v11, %v3665_v10 }
 0x114   : > { %v3672_v19 = vpack.c.bf16 %v958_v18, %v957_v17  ;;  %v960_v21 = vsel %vm920_vm4, %v4465_v13, %v3667_v14  ;;  %v1244_v22 = vpop.f32.mrf.mxu0 }
 0x115   : > { %v1285_v23 = vpop.f32.mrf.mxu1  ;;  %v3673_v24 = vpack.c.bf16 %v960_v21, %v959_v20 }
 0x116   : > { %v3995_v25 = vpop.eup %3994  ;;  %v989_v26 = vrot.slane %v3672_v19, %v4496_v12  ;;  %v1245_v27 = vpop.f32.mrf.mxu0 }
 0x117   : > { %v1286_v6 = vpop.f32.mrf.mxu1  ;;  %v3997_v28 = vpop.eup %3996  ;;  %v996_v11 = vrot.slane %v3673_v24, %v4496_v12  ;;  %v3668_v8 = vadd.f32 -1.0, %v3995_v25 }
 0x118   : > { %v1345_v13 = vpop.f32.mrf.mxu0  ;;  %v3999_v30 = vpop.eup %3998  ;;  %v3670_v32 = vadd.f32 -1.0, %v3997_v28 }
 0x119   : > { %v1386_v29 = vpop.f32.mrf.mxu1  ;;  %v997_v31 = vcombine.low %v989_v26, %v996_v11  ;;  %v4001_v35 = vpop.eup %4000  ;;  %v3669_v36 = vadd.f32 -1.0, %v3999_v30  ;;  %v961_v40 = vsel %vm921_vm5, %v4470_v33, %v3668_v8  ;;  %v1346_v63 = vadd.f32 %v1345_v13, %v4482_v48 }
 0x11a   : > { %v1347_v38 = vpop.f32.mrf.mxu0  ;;  %v3671_v39 = vadd.f32 -1.0, %v4001_v35  ;;  %v963_v45 = vsel %vm923_vm7, %v4472_v34, %v3670_v32 }
 0x11b   : > { %v1388_v0 = vpop.f32.mrf.mxu1  ;;  %1017 = vst [vmem:[%s4514_s28] sm:$0xff] %v997_v31  ;;  %v962_v42 = vsel %vm922_vm6, %v4476_v41, %v3669_v36  ;;  %v1348_v4 = vadd.f32 %v1347_v38, %v4486_v55 }
 0x11c   : > { %v1349_v43 = vpop.f32.mrf.mxu0  ;;  %v3674_v46 = vpack.c.bf16 %v962_v42, %v961_v40  ;;  %v964_v47 = vsel %vm924_vm8, %v4478_v37, %v3671_v39  ;;  %v1387_v37 = vadd.f32 %v1386_v29, %v4484_v49  ;;  %v1389_v9 = vadd.f32 %v1388_v0, %v4488_v56 }
 0x11d   : > { %v1390_v44 = vpop.f32.mrf.mxu1  ;;  %v3675_v50 = vpack.c.bf16 %v964_v47, %v963_v45 }
 0x11e   : > { %v1350_v51 = vpop.f32.mrf.mxu0  ;;  %v1006_v53 = vrot.slane %v3674_v46, %v4496_v12 }
 0x11f   : > { %v1391_v52 = vpop.f32.mrf.mxu1  ;;  %v1013_v33 = vrot.slane %v3675_v50, %v4496_v12 }
 0x120   : > { %v1427_v54 = vpop.f32.mrf.mxu0 }
 0x121   : > { %v1468_v57 = vpop.f32.mrf.mxu1  ;;  %v1014_v41 = vcombine.low %v1006_v53, %v1013_v33  ;;  %v1428_v27 = vadd.f32 %v1427_v54, %v4490_v5 }
 0x122   : > { %v1429_v58 = vpop.f32.mrf.mxu0  ;;  %v1469_v6 = vadd.f32 %v1468_v57, %v4492_v7 }
 0x123   : > { %v1470_v59 = vpop.f32.mrf.mxu1  ;;  %1018 = vst [vmem:[%s4514_s28 + $0x8] sm:$0xff] %v1014_v41  ;;  %v1430_v8 = vadd.f32 %v1429_v58, %v4498_v15 }
 0x124   : > { %v1431_v60 = vpop.f32.mrf.mxu0  ;;  %v1471_v38 = vadd.f32 %v1470_v59, %v4500_v16 }
 0x125   : > { %v1472_v61 = vpop.f32.mrf.mxu1 }
 0x126   : > { %v1432_v62 = vpop.f32.mrf.mxu0 }
 0x127   : > { %v1473_v34 = vpop.f32.mrf.mxu1 }
 0x128   : > { %v1609_v2 = vpop.f32.mrf.mxu0 }
 0x129   : > { %v1650_v3 = vpop.f32.mrf.mxu1  ;;  %v1739_v10 = vadd.f32 %v1609_v2, %v1346_v63 }
 0x12a   : > { %v1741_v14 = vadd.f32 %v1650_v3, %v1387_v37  ;;  %v1611_v17 = vpop.f32.mrf.mxu0 }
 0x12b   : > { %v1652_v18 = vpop.f32.mrf.mxu1  ;;  %v1740_v19 = vadd.f32 %v1611_v17, %v1348_v4  ;;  %v4532_v20 = vadd.f32 %v1751_v1, %v1739_v10 }
 0x12c   : > { %v1742_v21 = vadd.f32 %v1652_v18, %v1389_v9  ;;  %v4534_v22 = vadd.f32 %v1751_v1, %v1741_v14  ;;  %v1613_v48 = vpop.f32.mrf.mxu0 }
 0x12d   : > { %v1654_v23 = vpop.f32.mrf.mxu1  ;;  %v4536_v49 = vadd.f32 %v1751_v1, %v1740_v19  ;;  %v1769_v24 = vmin.f32 %v4532_v20, 0.0  ;;  %vm1761_vm9 = vcmp.gt.f32.partialorder %v4532_v20, 0.0 }
 0x12e   : > { %v4539_v25 = vadd.f32 %v1751_v1, %v1742_v21  ;;  %v1771_v55 = vmin.f32 %v4534_v22, 0.0  ;;  %v1614_v56 = vpop.f32.mrf.mxu0  ;;  %vm1763_vm11 = vcmp.gt.f32.partialorder %v4534_v22, 0.0 }
 0x12f   : > { %v1655_v26 = vpop.f32.mrf.mxu1  ;;  %v1770_v28 = vmin.f32 %v4536_v49, 0.0  ;;  %v1777_v11 = vmul.f32 1.442695, %v1769_v24  ;;  %vm1762_vm10 = vcmp.gt.f32.partialorder %v4536_v49, 0.0 }
 0x130   : > { %v1772_v13 = vmin.f32 %v4539_v25, 0.0  ;;  %v1781_v29 = vmul.f32 1.442695, %v1771_v55  ;;  %v1691_v30 = vpop.f32.mrf.mxu0  ;;  %vm1764_vm12 = vcmp.gt.f32.partialorder %v4539_v25, 0.0 }
 0x131   : > { %v1732_v31 = vpop.f32.mrf.mxu1  ;;  %4002 = vpow2.f32 %v1777_v11  ;;  %v1779_v32 = vmul.f32 1.442695, %v1770_v28  ;;  %v1743_v35 = vadd.f32 %v1691_v30, %v1428_v27 }
 0x132   : > { %v1745_v36 = vadd.f32 %v1732_v31, %v1469_v6  ;;  %4004 = vpow2.f32 %v1781_v29  ;;  %v1783_v5 = vmul.f32 1.442695, %v1772_v13  ;;  %v1693_v0 = vpop.f32.mrf.mxu0 }
 0x133   : > { %v1734_v7 = vpop.f32.mrf.mxu1  ;;  %4006 = vpow2.f32 %v1779_v32  ;;  %v4548_v39 = vadd.f32 %v1751_v1, %v1743_v35  ;;  %v1744_v15 = vadd.f32 %v1693_v0, %v1430_v8 }
 0x134   : > { %v4550_v40 = vadd.f32 %v1751_v1, %v1745_v36  ;;  %4008 = vpow2.f32 %v1783_v5  ;;  %v1746_v42 = vadd.f32 %v1734_v7, %v1471_v38  ;;  %v1695_v43 = vpop.f32.mrf.mxu0 }
 0x135   : > { %v1736_v44 = vpop.f32.mrf.mxu1  ;;  %v1773_v45 = vmin.f32 %v4548_v39, 0.0  ;;  %v4554_v47 = vadd.f32 %v1751_v1, %v1744_v15  ;;  %vm1765_vm13 = vcmp.gt.f32.partialorder %v4548_v39, 0.0 }
 0x136   : > { %v1775_v46 = vmin.f32 %v4550_v40, 0.0  ;;  %v4556_v16 = vadd.f32 %v1751_v1, %v1746_v42  ;;  %v1696_v50 = vpop.f32.mrf.mxu0  ;;  %vm1767_vm15 = vcmp.gt.f32.partialorder %v4550_v40, 0.0 }
 0x137   : > { %v1737_v51 = vpop.f32.mrf.mxu1  ;;  %v1785_v52 = vmul.f32 1.442695, %v1773_v45  ;;  %v1774_v33 = vmin.f32 %v4554_v47, 0.0  ;;  %vm1766_vm14 = vcmp.gt.f32.partialorder %v4554_v47, 0.0 }
 0x138   : > { %v1789_v53 = vmul.f32 1.442695, %v1775_v46  ;;  %v1776_v54 = vmin.f32 %v4556_v16, 0.0  ;;  %v4560_v57 = vpop.f32.mrf.mxu0  ;;  %vm1768_vm0 = vcmp.gt.f32.partialorder %v4556_v16, 0.0 }
 0x139   : > { %v4562_v41 = vpop.f32.mrf.mxu1  ;;  %4010 = vpow2.f32 %v1785_v52  ;;  %v1787_v58 = vmul.f32 1.442695, %v1774_v33 }
 0x13a   : > { %4012 = vpow2.f32 %v1789_v53  ;;  %v1791_v59 = vmul.f32 1.442695, %v1776_v54  ;;  %v4564_v60 = vpop.f32.mrf.mxu0 }
 0x13b   : > { %v4566_v61 = vpop.f32.mrf.mxu1  ;;  %4014 = vpow2.f32 %v1787_v58 }
 0x13c   : > { %v2006_v62 = vpop.f32.mrf.mxu0  ;;  %4016 = vpow2.f32 %v1791_v59 }
 0x13d   : > { %v2047_v34 = vpop.f32.mrf.mxu1 }
 0x13e   : > { %v4003_v63 = vpop.eup %4002  ;;  %v2007_v37 = vpop.f32.mrf.mxu0 }
 0x13f   : > { %v2048_v1 = vpop.f32.mrf.mxu1  ;;  %v4005_v2 = vpop.eup %4004  ;;  %v3726_v3 = vadd.f32 -1.0, %v4003_v63 }
 0x140   : > { %v4007_v4 = vpop.eup %4006  ;;  %v3728_v9 = vadd.f32 -1.0, %v4005_v2  ;;  %v4568_v10 = vpop.f32.mrf.mxu0 }
 0x141   : > { %v4570_v14 = vpop.f32.mrf.mxu1  ;;  %v4009_v17 = vpop.eup %4008  ;;  %v3727_v18 = vadd.f32 -1.0, %v4007_v4  ;;  %v1801_v23 = vsel %vm1761_vm9, %v4532_v20, %v3726_v3 }
 0x142   : > { %v3729_v19 = vadd.f32 -1.0, %v4009_v17  ;;  %v4574_v21 = vpop.f32.mrf.mxu0  ;;  %v1803_v56 = vsel %vm1763_vm11, %v4534_v22, %v3728_v9  ;;  %v2595_v2 = vpop.permute.xlu1 %2594 }
 0x143   : > { %v4576_v48 = vpop.f32.mrf.mxu1  ;;  %v1802_v24 = vsel %vm1762_vm10, %v4536_v49, %v3727_v18 }
 0x144   : > { %v3734_v55 = vpack.c.bf16 %v1802_v24, %v1801_v23  ;;  %v1804_v26 = vsel %vm1764_vm12, %v4539_v25, %v3729_v19  ;;  %v2088_v27 = vpop.f32.mrf.mxu0 }
 0x145   : > { %v2129_v6 = vpop.f32.mrf.mxu1  ;;  %v3735_v28 = vpack.c.bf16 %v1804_v26, %v1803_v56 }
 0x146   : > { %v4011_v11 = vpop.eup %4010  ;;  %v1833_v8 = vrot.slane %v3734_v55, %v4496_v12  ;;  %v2089_v13 = vpop.f32.mrf.mxu0 }
 0x147   : > { %v2130_v20 = vpop.f32.mrf.mxu1  ;;  %v4013_v29 = vpop.eup %4012  ;;  %v1840_v49 = vrot.slane %v3735_v28, %v4496_v12  ;;  %v3730_v30 = vadd.f32 -1.0, %v4011_v11 }
 0x148   : > { %v2189_v31 = vpop.f32.mrf.mxu0  ;;  %v4015_v35 = vpop.eup %4014  ;;  %v3732_v22 = vadd.f32 -1.0, %v4013_v29 }
 0x149   : > { %v2230_v32 = vpop.f32.mrf.mxu1  ;;  %v1841_v36 = vcombine.low %v1833_v8, %v1840_v49  ;;  %v4017_v38 = vpop.eup %4016  ;;  %v3731_v25 = vadd.f32 -1.0, %v4015_v35  ;;  %v1805_v15 = vsel %vm1765_vm13, %v4548_v39, %v3730_v30  ;;  %v2190_v1 = vadd.f32 %v2189_v31, %v4560_v57 }
 0x14a   : > { %v2191_v5 = vpop.f32.mrf.mxu0  ;;  %v3733_v7 = vadd.f32 -1.0, %v4017_v38  ;;  %v1807_v45 = vsel %vm1767_vm15, %v4550_v40, %v3732_v22 }
 0x14b   : > { %v2232_v0 = vpop.f32.mrf.mxu1  ;;  %1861 = vst [vmem:[%s4514_s28 + $0x10] sm:$0xff] %v1841_v36  ;;  %v1806_v42 = vsel %vm1766_vm14, %v4554_v47, %v3731_v25  ;;  %v2192_v9 = vadd.f32 %v2191_v5, %v4564_v60 }
 0x14c   : > { %v2193_v43 = vpop.f32.mrf.mxu0  ;;  %v3736_v46 = vpack.c.bf16 %v1806_v42, %v1805_v15  ;;  %v1808_v50 = vsel %vm1768_vm0, %v4556_v16, %v3733_v7  ;;  %v2231_v16 = vadd.f32 %v2230_v32, %v4562_v41  ;;  %v2233_v17 = vadd.f32 %v2232_v0, %v4566_v61 }
 0x14d   : > { %v2234_v44 = vpop.f32.mrf.mxu1  ;;  %v3737_v51 = vpack.c.bf16 %v1808_v50, %v1807_v45 }
 0x14e   : > { %v2194_v52 = vpop.f32.mrf.mxu0  ;;  %v1850_v33 = vrot.slane %v3736_v46, %v4496_v12 }
 0x14f   : > { %v2235_v53 = vpop.f32.mrf.mxu1  ;;  %v1857_v39 = vrot.slane %v3737_v51, %v4496_v12 }
 0x150   : > { %v2271_v54 = vpop.f32.mrf.mxu0 }
 0x151   : > { %v2312_v58 = vpop.f32.mrf.mxu1  ;;  %v1858_v47 = vcombine.low %v1850_v33, %v1857_v39  ;;  %v2272_v13 = vadd.f32 %v2271_v54, %v4568_v10 }
 0x152   : > { %v2273_v59 = vpop.f32.mrf.mxu0  ;;  %v2313_v20 = vadd.f32 %v2312_v58, %v4570_v14 }
 0x153   : > { %v2314_v62 = vpop.f32.mrf.mxu1  ;;  %1862 = vst [vmem:[%s4514_s28 + $0x18] sm:$0xff] %v1858_v47  ;;  %v2274_v30 = vadd.f32 %v2273_v59, %v4574_v21 }
 0x154   : > { %v2275_v34 = vpop.f32.mrf.mxu0  ;;  %v2315_v5 = vadd.f32 %v2314_v62, %v4576_v48 }
 0x155   : > { %v2316_v63 = vpop.f32.mrf.mxu1 }
 0x156   : > { %v2276_v37 = vpop.f32.mrf.mxu0 }
 0x157   : > { %v2317_v40 = vpop.f32.mrf.mxu1 }
 0x158   : > { %v2453_v3 = vpop.f32.mrf.mxu0 }
 0x159   : > { %v2494_v4 = vpop.f32.mrf.mxu1  ;;  %v2583_v18 = vadd.f32 %v2453_v3, %v2190_v1 }
 0x15a   : > { %v2585_v19 = vadd.f32 %v2494_v4, %v2231_v16  ;;  %v2455_v23 = vpop.f32.mrf.mxu0 }
 0x15b   : > { %v2496_v24 = vpop.f32.mrf.mxu1  ;;  %v2584_v55 = vadd.f32 %v2455_v23, %v2192_v9  ;;  %v4602_v56 = vadd.f32 %v2595_v2, %v2583_v18 }
 0x15c   : > { %v2586_v26 = vadd.f32 %v2496_v24, %v2233_v17  ;;  %v4604_v27 = vadd.f32 %v2595_v2, %v2585_v19  ;;  %v2457_v57 = vpop.f32.mrf.mxu0 }
 0x15d   : > { %v2498_v6 = vpop.f32.mrf.mxu1  ;;  %v4606_v41 = vadd.f32 %v2595_v2, %v2584_v55  ;;  %v2613_v28 = vmin.f32 %v4602_v56, 0.0  ;;  %vm2605_vm1 = vcmp.gt.f32.partialorder %v4602_v56, 0.0 }
 0x15e   : > { %v4609_v11 = vadd.f32 %v2595_v2, %v2586_v26  ;;  %v2615_v60 = vmin.f32 %v4604_v27, 0.0  ;;  %v2458_v61 = vpop.f32.mrf.mxu0  ;;  %vm2607_vm3 = vcmp.gt.f32.partialorder %v4604_v27, 0.0 }
 0x15f   : > { %v2499_v8 = vpop.f32.mrf.mxu1  ;;  %v2614_v29 = vmin.f32 %v4606_v41, 0.0  ;;  %v2621_v49 = vmul.f32 1.442695, %v2613_v28  ;;  %vm2606_vm2 = vcmp.gt.f32.partialorder %v4606_v41, 0.0 }
 0x160   : > { %v2616_v31 = vmin.f32 %v4609_v11, 0.0  ;;  %v2625_v32 = vmul.f32 1.442695, %v2615_v60  ;;  %v2535_v35 = vpop.f32.mrf.mxu0  ;;  %vm2608_vm4 = vcmp.gt.f32.partialorder %v4609_v11, 0.0 }
 0x161   : > { %v2576_v36 = vpop.f32.mrf.mxu1  ;;  %4018 = vpow2.f32 %v2621_v49  ;;  %v2623_v22 = vmul.f32 1.442695, %v2614_v29  ;;  %v2587_v38 = vadd.f32 %v2535_v35, %v2272_v13 }
 0x162   : > { %v2589_v25 = vadd.f32 %v2576_v36, %v2313_v20  ;;  %4020 = vpow2.f32 %v2625_v32  ;;  %v2627_v10 = vmul.f32 1.442695, %v2616_v31  ;;  %v2537_v0 = vpop.f32.mrf.mxu0 }
 0x163   : > { %v2578_v14 = vpop.f32.mrf.mxu1  ;;  %4022 = vpow2.f32 %v2623_v22  ;;  %v4618_v7 = vadd.f32 %v2595_v2, %v2587_v38  ;;  %v2588_v21 = vadd.f32 %v2537_v0, %v2274_v30 }
 0x164   : > { %v4620_v15 = vadd.f32 %v2595_v2, %v2589_v25  ;;  %4024 = vpow2.f32 %v2627_v10  ;;  %v2590_v42 = vadd.f32 %v2578_v14, %v2315_v5  ;;  %v2539_v43 = vpop.f32.mrf.mxu0 }
 0x165   : > { %v2580_v44 = vpop.f32.mrf.mxu1  ;;  %v2617_v45 = vmin.f32 %v4618_v7, 0.0  ;;  %v4624_v50 = vadd.f32 %v2595_v2, %v2588_v21  ;;  %vm2609_vm5 = vcmp.gt.f32.partialorder %v4618_v7, 0.0 }
 0x166   : > { %v2619_v46 = vmin.f32 %v4620_v15, 0.0  ;;  %v4626_v48 = vadd.f32 %v2595_v2, %v2590_v42  ;;  %v2540_v51 = vpop.f32.mrf.mxu0  ;;  %vm2611_vm7 = vcmp.gt.f32.partialorder %v4620_v15, 0.0 }
 0x167   : > { %v2581_v52 = vpop.f32.mrf.mxu1  ;;  %v2629_v53 = vmul.f32 1.442695, %v2617_v45  ;;  %v2618_v39 = vmin.f32 %v4624_v50, 0.0  ;;  %vm2610_vm6 = vcmp.gt.f32.partialorder %v4624_v50, 0.0 }
 0x168   : > { %v2633_v33 = vmul.f32 1.442695, %v2619_v46  ;;  %v2620_v54 = vmin.f32 %v4626_v48, 0.0  ;;  %v4630_v58 = vpop.f32.mrf.mxu0  ;;  %vm2612_vm8 = vcmp.gt.f32.partialorder %v4626_v48, 0.0 }
 0x169   : > { %v4632_v47 = vpop.f32.mrf.mxu1  ;;  %4026 = vpow2.f32 %v2629_v53  ;;  %v2631_v59 = vmul.f32 1.442695, %v2618_v39 }
 0x16a   : > { %4028 = vpow2.f32 %v2633_v33  ;;  %v2635_v62 = vmul.f32 1.442695, %v2620_v54  ;;  %v4634_v34 = vpop.f32.mrf.mxu0 }
 0x16b   : > { %v4636_v63 = vpop.f32.mrf.mxu1  ;;  %4030 = vpow2.f32 %v2631_v59 }
 0x16c   : > { %v2850_v37 = vpop.f32.mrf.mxu0  ;;  %4032 = vpow2.f32 %v2635_v62 }
 0x16d   : > { %v2891_v40 = vpop.f32.mrf.mxu1 }
 0x16e   : > { %v4019_v1 = vpop.eup %4018  ;;  %v2851_v16 = vpop.f32.mrf.mxu0 }
 0x16f   : > { %v2892_v2 = vpop.f32.mrf.mxu1  ;;  %v4021_v3 = vpop.eup %4020  ;;  %v3788_v4 = vadd.f32 -1.0, %v4019_v1 }
 0x170   : > { %v4023_v9 = vpop.eup %4022  ;;  %v3790_v17 = vadd.f32 -1.0, %v4021_v3  ;;  %v4638_v18 = vpop.f32.mrf.mxu0 }
 0x171   : > { %v4640_v19 = vpop.f32.mrf.mxu1  ;;  %v4025_v23 = vpop.eup %4024  ;;  %v3789_v24 = vadd.f32 -1.0, %v4023_v9  ;;  %v2645_v6 = vsel %vm2605_vm1, %v4602_v56, %v3788_v4 }
 0x172   : > { %v3791_v55 = vadd.f32 -1.0, %v4025_v23  ;;  %v4644_v26 = vpop.f32.mrf.mxu0  ;;  %v2647_v61 = vsel %vm2607_vm3, %v4604_v27, %v3790_v17  ;;  %v3439_v3 = vpop.permute.xlu1 %3438 }
 0x173   : > { %v4646_v57 = vpop.f32.mrf.mxu1  ;;  %v2646_v28 = vsel %vm2606_vm2, %v4606_v41, %v3789_v24 }
 0x174   : > { %v3796_v60 = vpack.c.bf16 %v2646_v28, %v2645_v6  ;;  %v2648_v8 = vsel %vm2608_vm4, %v4609_v11, %v3791_v55  ;;  %v2932_v13 = vpop.f32.mrf.mxu0 }
 0x175   : > { %v2973_v20 = vpop.f32.mrf.mxu1  ;;  %v3797_v29 = vpack.c.bf16 %v2648_v8, %v2647_v61 }
 0x176   : > { %v4027_v49 = vpop.eup %4026  ;;  %v2677_v30 = vrot.slane %v3796_v60, %v4496_v12  ;;  %v2933_v31 = vpop.f32.mrf.mxu0 }
 0x177   : > { %v2974_v56 = vpop.f32.mrf.mxu1  ;;  %v4029_v32 = vpop.eup %4028  ;;  %v2684_v41 = vrot.slane %v3797_v29, %v4496_v12  ;;  %v3792_v35 = vadd.f32 -1.0, %v4027_v49 }
 0x178   : > { %v3033_v36 = vpop.f32.mrf.mxu0  ;;  %v4031_v38 = vpop.eup %4030  ;;  %v3794_v27 = vadd.f32 -1.0, %v4029_v32 }
 0x179   : > { %v3074_v22 = vpop.f32.mrf.mxu1  ;;  %v2685_v25 = vcombine.low %v2677_v30, %v2684_v41  ;;  %v4033_v5 = vpop.eup %4032  ;;  %v3793_v11 = vadd.f32 -1.0, %v4031_v38  ;;  %v2649_v21 = vsel %vm2609_vm5, %v4618_v7, %v3792_v35  ;;  %v3034_v2 = vadd.f32 %v3033_v36, %v4630_v58 }
 0x17a   : > { %v3035_v10 = vpop.f32.mrf.mxu0  ;;  %v3795_v14 = vadd.f32 -1.0, %v4033_v5  ;;  %v2651_v45 = vsel %vm2611_vm7, %v4620_v15, %v3794_v27 }
 0x17b   : > { %v3076_v0 = vpop.f32.mrf.mxu1  ;;  %2705 = vst [vmem:[%s4514_s28 + $0x20] sm:$0xff] %v2685_v25  ;;  %v2650_v42 = vsel %vm2610_vm6, %v4624_v50, %v3793_v11  ;;  %v3036_v17 = vadd.f32 %v3035_v10, %v4634_v34 }
 0x17c   : > { %v3037_v43 = vpop.f32.mrf.mxu0  ;;  %v3798_v46 = vpack.c.bf16 %v2650_v42, %v2649_v21  ;;  %v2652_v51 = vsel %vm2612_vm8, %v4626_v48, %v3795_v14  ;;  %v3075_v48 = vadd.f32 %v3074_v22, %v4632_v47  ;;  %v3077_v23 = vadd.f32 %v3076_v0, %v4636_v63 }
 0x17d   : > { %v3078_v44 = vpop.f32.mrf.mxu1  ;;  %v3799_v52 = vpack.c.bf16 %v2652_v51, %v2651_v45 }
 0x17e   : > { %v3038_v53 = vpop.f32.mrf.mxu0  ;;  %v2694_v39 = vrot.slane %v3798_v46, %v4496_v12 }
 0x17f   : > { %v3079_v33 = vpop.f32.mrf.mxu1  ;;  %v2701_v7 = vrot.slane %v3799_v52, %v4496_v12 }
 0x180   : > { %v3115_v54 = vpop.f32.mrf.mxu0 }
 0x181   : > { %v3156_v59 = vpop.f32.mrf.mxu1  ;;  %v2702_v50 = vcombine.low %v2694_v39, %v2701_v7  ;;  %v3116_v31 = vadd.f32 %v3115_v54, %v4638_v18 }
 0x182   : > { %v3117_v62 = vpop.f32.mrf.mxu0  ;;  %v3157_v56 = vadd.f32 %v3156_v59, %v4640_v19 }
 0x183   : > { %v3158_v37 = vpop.f32.mrf.mxu1  ;;  %2706 = vst [vmem:[%s4514_s28 + $0x28] sm:$0xff] %v2702_v50  ;;  %v3118_v35 = vadd.f32 %v3117_v62, %v4644_v26 }
 0x184   : > { %v3119_v40 = vpop.f32.mrf.mxu0  ;;  %v3159_v10 = vadd.f32 %v3158_v37, %v4646_v57 }
 0x185   : > { %v3160_v1 = vpop.f32.mrf.mxu1 }
 0x186   : > { %v3120_v16 = vpop.f32.mrf.mxu0 }
 0x187   : > { %v3161_v15 = vpop.f32.mrf.mxu1 }
 0x188   : > { %v3297_v4 = vpop.f32.mrf.mxu0 }
 0x189   : > { %v3338_v9 = vpop.f32.mrf.mxu1  ;;  %v3427_v24 = vadd.f32 %v3297_v4, %v3034_v2 }
 0x18a   : > { %v3429_v55 = vadd.f32 %v3338_v9, %v3075_v48  ;;  %v3299_v6 = vpop.f32.mrf.mxu0 }
 0x18b   : > { %v3340_v28 = vpop.f32.mrf.mxu1  ;;  %v3428_v60 = vadd.f32 %v3299_v6, %v3036_v17  ;;  %v4672_v61 = vadd.f32 %v3439_v3, %v3427_v24 }
 0x18c   : > { %v3430_v8 = vadd.f32 %v3340_v28, %v3077_v23  ;;  %v4674_v13 = vadd.f32 %v3439_v3, %v3429_v55  ;;  %v3301_v58 = vpop.f32.mrf.mxu0 }
 0x18d   : > { %v3342_v20 = vpop.f32.mrf.mxu1  ;;  %v3442_v47 = vadd.f32 %v3439_v3, %v3428_v60  ;;  %v3457_v29 = vmin.f32 %v4672_v61, 0.0  ;;  %vm3449_vm9 = vcmp.gt.f32.partialorder %v4672_v61, 0.0 }
 0x18e   : > { %v4677_v49 = vadd.f32 %v3439_v3, %v3430_v8  ;;  %v3459_v34 = vmin.f32 %v4674_v13, 0.0  ;;  %v3302_v63 = vpop.f32.mrf.mxu0  ;;  %vm3451_vm11 = vcmp.gt.f32.partialorder %v4674_v13, 0.0 }
 0x18f   : > { %v3343_v30 = vpop.f32.mrf.mxu1  ;;  %v3458_v32 = vmin.f32 %v3442_v47, 0.0  ;;  %v3465_v41 = vmul.f32 1.442695, %v3457_v29  ;;  %vm3450_vm10 = vcmp.gt.f32.partialorder %v3442_v47, 0.0 }
 0x190   : > { %v3460_v36 = vmin.f32 %v4677_v49, 0.0  ;;  %v3469_v22 = vmul.f32 1.442695, %v3459_v34  ;;  %v3379_v38 = vpop.f32.mrf.mxu0  ;;  %vm3452_vm12 = vcmp.gt.f32.partialorder %v4677_v49, 0.0 }
 0x191   : > { %v3420_v25 = vpop.f32.mrf.mxu1  ;;  %4034 = vpow2.f32 %v3465_v41  ;;  %v3467_v27 = vmul.f32 1.442695, %v3458_v32  ;;  %v3431_v5 = vadd.f32 %v3379_v38, %v3116_v31 }
 0x192   : > { %v3433_v11 = vadd.f32 %v3420_v25, %v3157_v56  ;;  %4036 = vpow2.f32 %v3469_v22  ;;  %v3471_v0 = vmul.f32 1.442695, %v3460_v36  ;;  %v3381_v18 = vpop.f32.mrf.mxu0 }
 0x193   : > { %v3422_v14 = vpop.f32.mrf.mxu1  ;;  %4038 = vpow2.f32 %v3467_v27  ;;  %v3445_v19 = vadd.f32 %v3439_v3, %v3431_v5  ;;  %v3432_v42 = vadd.f32 %v3381_v18, %v3118_v35 }
 0x194   : > { %v3447_v21 = vadd.f32 %v3439_v3, %v3433_v11  ;;  %4040 = vpow2.f32 %v3471_v0  ;;  %v3434_v26 = vadd.f32 %v3422_v14, %v3159_v10  ;;  %v3383_v43 = vpop.f32.mrf.mxu0 }
 0x195   : > { %v3424_v44 = vpop.f32.mrf.mxu1  ;;  %v3461_v45 = vmin.f32 %v3445_v19, 0.0  ;;  %v3446_v51 = vadd.f32 %v3439_v3, %v3432_v42  ;;  %vm3453_vm13 = vcmp.gt.f32.partialorder %v3445_v19, 0.0 }
 0x196   : > { %v3463_v46 = vmin.f32 %v3447_v21, 0.0  ;;  %v3448_v52 = vadd.f32 %v3439_v3, %v3434_v26  ;;  %v3384_v53 = vpop.f32.mrf.mxu0  ;;  %vm3455_vm15 = vcmp.gt.f32.partialorder %v3447_v21, 0.0 }
 0x197   : > { %v3425_v33 = vpop.f32.mrf.mxu1  ;;  %v3473_v39 = vmul.f32 1.442695, %v3461_v45  ;;  %v3462_v7 = vmin.f32 %v3446_v51, 0.0  ;;  %vm3454_vm14 = vcmp.gt.f32.partialorder %v3446_v51, 0.0 }
 0x198   : > { %v3477_v57 = vmul.f32 1.442695, %v3463_v46  ;;  %v3464_v54 = vmin.f32 %v3448_v52, 0.0  ;;  %vm3456_vm0 = vcmp.gt.f32.partialorder %v3448_v52, 0.0 }
 0x199   : > { %4042 = vpow2.f32 %v3473_v39  ;;  %v3475_v59 = vmul.f32 1.442695, %v3462_v7 }
 0x19a   : > { %4044 = vpow2.f32 %v3477_v57  ;;  %v3479_v50 = vmul.f32 1.442695, %v3464_v54 }
 0x19b   : > { %4046 = vpow2.f32 %v3475_v59 }
 0x19c   : > { %4048 = vpow2.f32 %v3479_v50 }
 0x19e   : > { %v4035_v62 = vpop.eup %4034 }
 0x19f   : > { %v4037_v37 = vpop.eup %4036  ;;  %v3850_v40 = vadd.f32 -1.0, %v4035_v62 }
 0x1a0   : > { %v4039_v1 = vpop.eup %4038  ;;  %v3852_v16 = vadd.f32 -1.0, %v4037_v37 }
 0x1a1   : > { %v4041_v15 = vpop.eup %4040  ;;  %v3851_v2 = vadd.f32 -1.0, %v4039_v1  ;;  %v3489_v3 = vsel %vm3449_vm9, %v4672_v61, %v3850_v40 }
 0x1a2   : > { %v3853_v48 = vadd.f32 -1.0, %v4041_v15  ;;  %v3491_v17 = vsel %vm3451_vm11, %v4674_v13, %v3852_v16 }
 0x1a3   : > { %v3490_v4 = vsel %vm3450_vm10, %v3442_v47, %v3851_v2 }
 0x1a4   : > { %v3858_v9 = vpack.c.bf16 %v3490_v4, %v3489_v3  ;;  %v3492_v23 = vsel %vm3452_vm12, %v4677_v49, %v3853_v48 }
 0x1a5   : > { %v3859_v24 = vpack.c.bf16 %v3492_v23, %v3491_v17 }
 0x1a6   : > { %v4043_v55 = vpop.eup %4042  ;;  %v3521_v6 = vrot.slane %v3858_v9, %v4496_v12 }
 0x1a7   : > { %v4045_v28 = vpop.eup %4044  ;;  %v3528_v60 = vrot.slane %v3859_v24, %v4496_v12  ;;  %v3854_v8 = vadd.f32 -1.0, %v4043_v55 }
 0x1a8   : > { %v4047_v61 = vpop.eup %4046  ;;  %v3856_v20 = vadd.f32 -1.0, %v4045_v28 }
 0x1a9   : > { %v3529_v58 = vcombine.low %v3521_v6, %v3528_v60  ;;  %v4049_v47 = vpop.eup %4048  ;;  %v3855_v29 = vadd.f32 -1.0, %v4047_v61  ;;  %v3493_v34 = vsel %vm3453_vm13, %v3445_v19, %v3854_v8 }
 0x1aa   : > { %v3857_v13 = vadd.f32 -1.0, %v4049_v47  ;;  %v3495_v63 = vsel %vm3455_vm15, %v3447_v21, %v3856_v20 }
 0x1ab   : > { %3549 = vst [vmem:[%s4514_s28 + $0x30] sm:$0xff] %v3529_v58  ;;  %v3494_v49 = vsel %vm3454_vm14, %v3446_v51, %v3855_v29 }
 0x1ac   : > { %v3860_v30 = vpack.c.bf16 %v3494_v49, %v3493_v34  ;;  %v3496_v31 = vsel %vm3456_vm0, %v3448_v52, %v3857_v13 }
 0x1ad   : > { %v3861_v56 = vpack.c.bf16 %v3496_v31, %v3495_v63 }
 0x1ae   : > { %v3538_v32 = vrot.slane %v3860_v30, %v4496_v12 }
 0x1af   : > { %v3545_v41 = vrot.slane %v3861_v56, %v4496_v12 }
 0x1b1   : > { %v3546_v35 = vcombine.low %v3538_v32, %v3545_v41 }
 0x1b3   : > { %3550 = vst [vmem:[%s4514_s28 + $0x38] sm:$0xff] %v3546_v35 }
 0x1b4 PF: > { %s13_s12 = sadd.s32 1, %s4056_s12  }
 0x1b5   : > { %p10_p4 = scmp.ge.s32.totalorder %s13_s12, 4  }
 0x1b7   :  { %12 = sbr.rel (!%p10_p4) target bundleno = 1 (0x1), region = 64 }

// kernel: sunet3d_forward.10
= control target key start
LH: loop header
LB: loop body
LE: loop exit
PB: predicated region body
PF: predicated region fallthrough
CT: control target
= control target key end

     0   :  { %s1522_s12 = smov 0   ;;  %s1651_s0 = inlined_call_operand.vmem [shape: bf16[2,48,1280], index: 0, kind: input, shape index: {}]   ;;  %s1652_s1 = inlined_call_operand.vmem [shape: bf16[3,8,48], index: 1, kind: input, shape index: {}]   ;;  %s1653_s2 = inlined_call_operand.vmem [shape: f32[8,1], index: 2, kind: input, shape index: {}]   ;;  %s1654_s3 = inlined_call_operand.vmem [shape: bf16[2,8,1024], index: 3, kind: output, shape index: {}]  }
   0x1 LB: > { %s1272_s13 = sadd.s32 4294967295, %s1499_s12   ;;  %p1276_p0 = scmp.ge.s32.totalorder %s1499_s12, 1  ;;  %s1499_s12 = sphi %s1522_s12, %s13_s12  }
   0x2   : > { %p137_p1 = scmp.lt.s32.totalorder %s1499_s12, 3 }
   0x4   : > { %p138_p2 = pnand %p1276_p0, %p137_p1 }
   0x5   : > { %p161_p3 = scmp.lt.s32.totalorder (!%p138_p2), %s1272_s13, 1 }
   0x6   : > { %141 = sbr.rel (%p138_p2) target bundleno = 312 (0x138), region = 32 }
   0xb   : > { %v1119_v0 = vld [vmem:[%s1653_s2] sm:$0xff]  ;;  %v1501_v1 = vmov 0   ;;  %s1656_s13 = smov (!%p161_p3, %s1272_s13), 1  ;;  %vm343_vm0 = vcmask 392192   ;;  %v1337_v53 = vld [vmem:[%s1652_s1 + $0x8] sm:$0xf] }
   0xc   : > { %379 = vmatprep.mubr.bf16.mxu0 %v1501_v1  ;;  %420 = vmatprep.mubr.bf16.mxu1 %v1501_v1  ;;  %s1385_s16 = smul.u32 240, %s1656_s13  ;;  %v1280_v15 = vld [vmem:[%s1652_s1 + $0x4] sm:$0xf]  ;;  %v172_v41 = vld [vmem:[%s1652_s1] sm:$0xf]  ;;  %s1380_s26 = sshll.u32 %s1656_s13, 5 }
   0xd   : > { %1395 = vset.pattern.permute.xlu0 %v1501_v1  ;;  %s170_s29 = scalar_lea.vmem %s1654_s3, %s1380_s26 }
   0xe   : > { %1122 = vperm.xlu0 %1395, %v1119_v0   ;;  %s1542_s19 = scalar_lea.vmem %s1651_s0, %s1385_s16 }
   0xf   : > { %v1396_v2 = vld [vmem:[%s1542_s19 + $0xa8] ss:$40 sps:$4 sm:$0xff]   ;;  %v1400_v4 = vld [vmem:[%s1542_s19 + $0xa4] ss:$40 sps:$4 sm:$0xff]   ;;  %v1402_v6 = vld [vmem:[%s1542_s19 + $0x58] ss:$40 sps:$4 sm:$0xff]  }
  0x10   : > { %v1398_v3 = vld [vmem:[%s1542_s19 + $0xb0] ss:$40 sps:$4 sm:$0xff]   ;;  %357 = vmatprep.subr.bf16.mxu0 %v1396_v2  ;;  %v1401_v5 = vld [vmem:[%s1542_s19 + $0xac] ss:$40 sps:$4 sm:$0xff]   ;;  %v1404_v7 = vld [vmem:[%s1542_s19 + $0x60] ss:$40 sps:$4 sm:$0xff]  }
  0x11   : > { %398 = vmatprep.subr.bf16.mxu1 %v1398_v3  ;;  %358 = vmatpush1.bf16.msra.mxu0 %v1400_v4  ;;  %v1406_v8 = vld [vmem:[%s1542_s19 + $0x54] ss:$40 sps:$4 sm:$0xff]   ;;  %v1408_v10 = vld [vmem:[%s1542_s19 + $0x8] ss:$40 sps:$4 sm:$0xff]   ;;  %v1412_v12 = vld [vmem:[%s1542_s19 + $0x4] ss:$40 sps:$4 sm:$0xff]  }
  0x12   : > { %399 = vmatpush1.bf16.msra.mxu1 %v1401_v5  ;;  %359 = vmatprep.subr.bf16.mxu0 %v1402_v6  ;;  %v1407_v9 = vld [vmem:[%s1542_s19 + $0x5c] ss:$40 sps:$4 sm:$0xff]   ;;  %v1410_v11 = vld [vmem:[%s1542_s19 + $0x10] ss:$40 sps:$4 sm:$0xff]   ;;  %v1413_v13 = vld [vmem:[%s1542_s19 + $0xc] ss:$40 sps:$4 sm:$0xff]  }
  0x13   : > { %400 = vmatprep.subr.bf16.mxu1 %v1404_v7  ;;  %v1416_v14 = vld [vmem:[%s1542_s19 + $0xb8] ss:$40 sps:$4 sm:$0xff]   ;;  %v1414_v17 = vld [vmem:[%s1542_s19 + $0xb4] ss:$40 sps:$4 sm:$0xff]   ;;  %v1422_v19 = vld [vmem:[%s1542_s19 + $0x68] ss:$40 sps:$4 sm:$0xff]  }
  0x14   : > { %v1419_v16 = vld [vmem:[%s1542_s19 + $0xc0] ss:$40 sps:$4 sm:$0xff]   ;;  %v1417_v18 = vld [vmem:[%s1542_s19 + $0xbc] ss:$40 sps:$4 sm:$0xff]   ;;  %v1425_v20 = vld [vmem:[%s1542_s19 + $0x70] ss:$40 sps:$4 sm:$0xff]  }
  0x15   : > { %360 = vmatpush1.bf16.msra.mxu0 %v1406_v8  ;;  %v1420_v21 = vld [vmem:[%s1542_s19 + $0x64] ss:$40 sps:$4 sm:$0xff]   ;;  %v1428_v23 = vld [vmem:[%s1542_s19 + $0x18] ss:$40 sps:$4 sm:$0xff]   ;;  %v1426_v25 = vld [vmem:[%s1542_s19 + $0x14] ss:$40 sps:$4 sm:$0xff]  }
  0x16   : > { %401 = vmatpush1.bf16.msra.mxu1 %v1407_v9  ;;  %361 = vmatprep.subr.bf16.mxu0 %v1408_v10  ;;  %v1423_v22 = vld [vmem:[%s1542_s19 + $0x6c] ss:$40 sps:$4 sm:$0xff]   ;;  %v1431_v24 = vld [vmem:[%s1542_s19 + $0x20] ss:$40 sps:$4 sm:$0xff]   ;;  %v1429_v26 = vld [vmem:[%s1542_s19 + $0x1c] ss:$40 sps:$4 sm:$0xff]  }
  0x17   : > { %402 = vmatprep.subr.bf16.mxu1 %v1410_v11  ;;  %v1434_v27 = vld [vmem:[%s1542_s19 + $0xa4] ss:$40 sps:$4 sm:$0xff]   ;;  %v1432_v29 = vld [vmem:[%s1542_s19 + $0xa0] ss:$40 sps:$4 sm:$0xff]   ;;  %v1440_v31 = vld [vmem:[%s1542_s19 + $0x54] ss:$40 sps:$4 sm:$0xff]  }
  0x18   : > { %v1437_v28 = vld [vmem:[%s1542_s19 + $0xac] ss:$40 sps:$4 sm:$0xff]   ;;  %v1435_v30 = vld [vmem:[%s1542_s19 + $0xa8] ss:$40 sps:$4 sm:$0xff]   ;;  %v1443_v32 = vld [vmem:[%s1542_s19 + $0x5c] ss:$40 sps:$4 sm:$0xff]  }
  0x19   : > { %362 = vmatpush1.bf16.msra.mxu0 %v1412_v12  ;;  %v1438_v33 = vld [vmem:[%s1542_s19 + $0x50] ss:$40 sps:$4 sm:$0xff]   ;;  %v1446_v35 = vld [vmem:[%s1542_s19 + $0x4] ss:$40 sps:$4 sm:$0xff]   ;;  %v1444_v37 = vld [vmem:[%s1542_s19] ss:$40 sps:$4 sm:$0xff]  }
  0x1a   : > { %403 = vmatpush1.bf16.msra.mxu1 %v1413_v13  ;;  %439 = vmatprep.subr.bf16.mxu0 %v1416_v14  ;;  %v1441_v34 = vld [vmem:[%s1542_s19 + $0x58] ss:$40 sps:$4 sm:$0xff]   ;;  %v1449_v36 = vld [vmem:[%s1542_s19 + $0xc] ss:$40 sps:$4 sm:$0xff]   ;;  %v1447_v38 = vld [vmem:[%s1542_s19 + $0x8] ss:$40 sps:$4 sm:$0xff]  }
  0x1b   : > { %480 = vmatprep.subr.bf16.mxu1 %v1419_v16  ;;  %v1452_v39 = vld [vmem:[%s1542_s19 + $0xb4] ss:$40 sps:$4 sm:$0xff]   ;;  %v1450_v42 = vld [vmem:[%s1542_s19 + $0xb0] ss:$40 sps:$4 sm:$0xff]   ;;  %v1458_v44 = vld [vmem:[%s1542_s19 + $0x64] ss:$40 sps:$4 sm:$0xff]  }
  0x1c   : > { %1305 = vmatmul.mubr.msk.bf16.vlgmr.msra.gmra.mxu0 %vm343_vm0, %v1280_v15  ;;  %v1455_v40 = vld [vmem:[%s1542_s19 + $0xbc] ss:$40 sps:$4 sm:$0xff]   ;;  %v1453_v43 = vld [vmem:[%s1542_s19 + $0xb8] ss:$40 sps:$4 sm:$0xff]   ;;  %v1461_v45 = vld [vmem:[%s1542_s19 + $0x6c] ss:$40 sps:$4 sm:$0xff]  }
  0x1d   : > { %1306 = vmatmul.mubr.msk.bf16.vlgmr.msra.gmra.mxu1 %vm343_vm0, %v1280_v15  ;;  %440 = vmatpush1.bf16.msra.mxu0 %v1414_v17  ;;  %v1456_v46 = vld [vmem:[%s1542_s19 + $0x60] ss:$40 sps:$4 sm:$0xff]   ;;  %v1464_v48 = vld [vmem:[%s1542_s19 + $0x14] ss:$40 sps:$4 sm:$0xff]   ;;  %v1462_v50 = vld [vmem:[%s1542_s19 + $0x10] ss:$40 sps:$4 sm:$0xff]  }
  0x1e   : > { %481 = vmatpush1.bf16.msra.mxu1 %v1417_v18  ;;  %441 = vmatprep.subr.bf16.mxu0 %v1422_v19  ;;  %v1459_v47 = vld [vmem:[%s1542_s19 + $0x68] ss:$40 sps:$4 sm:$0xff]   ;;  %v1467_v49 = vld [vmem:[%s1542_s19 + $0x1c] ss:$40 sps:$4 sm:$0xff]   ;;  %v1465_v51 = vld [vmem:[%s1542_s19 + $0x18] ss:$40 sps:$4 sm:$0xff]  }
  0x1f   : > { %482 = vmatprep.subr.bf16.mxu1 %v1425_v20  ;;  %461 = vmatprep.mubr.bf16.mxu0 %v1501_v1  ;;  %v1470_v52 = vld [vmem:[%s1542_s19 + $0xc4] ss:$40 sps:$4 sm:$0xff]   ;;  %v1468_v54 = vld [vmem:[%s1542_s19 + $0xc0] ss:$40 sps:$4 sm:$0xff]   ;;  %v1473_v55 = vld [vmem:[%s1542_s19 + $0x74] ss:$40 sps:$4 sm:$0xff]  }
  0x20   : > { %502 = vmatprep.mubr.bf16.mxu1 %v1501_v1  ;;  %v1471_v56 = vld [vmem:[%s1542_s19 + $0x70] ss:$40 sps:$4 sm:$0xff]   ;;  %v1476_v57 = vld [vmem:[%s1542_s19 + $0x24] ss:$40 sps:$4 sm:$0xff]   ;;  %v1474_v58 = vld [vmem:[%s1542_s19 + $0x20] ss:$40 sps:$4 sm:$0xff]  }
  0x21   : > { %442 = vmatpush1.bf16.msra.mxu0 %v1420_v21 }
  0x22   : > { %483 = vmatpush1.bf16.msra.mxu1 %v1423_v22  ;;  %443 = vmatprep.subr.bf16.mxu0 %v1428_v23 }
  0x23   : > { %484 = vmatprep.subr.bf16.mxu1 %v1431_v24 }
  0x25   : > { %444 = vmatpush1.bf16.msra.mxu0 %v1426_v25 }
  0x26   : > { %485 = vmatpush1.bf16.msra.mxu1 %v1429_v26  ;;  %644 = vmatprep.subr.bf16.mxu0 %v1434_v27 }
  0x27   : > { %685 = vmatprep.subr.bf16.mxu1 %v1437_v28 }
  0x28   : > { %1307 = vmatmul.mubr.msk.bf16.vlgmr.msra.gmra.mxu0 %vm343_vm0, %v1280_v15 }
  0x29   : > { %1308 = vmatmul.mubr.msk.bf16.vlgmr.msra.gmra.mxu1 %vm343_vm0, %v1280_v15  ;;  %645 = vmatpush1.bf16.msra.mxu0 %v1432_v29 }
  0x2a   : > { %686 = vmatpush1.bf16.msra.mxu1 %v1435_v30  ;;  %646 = vmatprep.subr.bf16.mxu0 %v1440_v31 }
  0x2b   : > { %687 = vmatprep.subr.bf16.mxu1 %v1443_v32  ;;  %666 = vmatprep.mubr.bf16.mxu0 %v1501_v1 }
  0x2c   : > { %707 = vmatprep.mubr.bf16.mxu1 %v1501_v1 }
  0x2d   : > { %647 = vmatpush1.bf16.msra.mxu0 %v1438_v33 }
  0x2e   : > { %688 = vmatpush1.bf16.msra.mxu1 %v1441_v34  ;;  %648 = vmatprep.subr.bf16.mxu0 %v1446_v35 }
  0x2f   : > { %689 = vmatprep.subr.bf16.mxu1 %v1449_v36 }
  0x31   : > { %649 = vmatpush1.bf16.msra.mxu0 %v1444_v37 }
  0x32   : > { %690 = vmatpush1.bf16.msra.mxu1 %v1447_v38  ;;  %726 = vmatprep.subr.bf16.mxu0 %v1452_v39 }
  0x33   : > { %767 = vmatprep.subr.bf16.mxu1 %v1455_v40 }
  0x34   : > { %1333 = vmatmul.mubr.msk.bf16.vlgmr.msra.gmra.mxu0 %vm343_vm0, %v172_v41 }
  0x35   : > { %1334 = vmatmul.mubr.msk.bf16.vlgmr.msra.gmra.mxu1 %vm343_vm0, %v172_v41  ;;  %727 = vmatpush1.bf16.msra.mxu0 %v1450_v42 }
  0x36   : > { %768 = vmatpush1.bf16.msra.mxu1 %v1453_v43  ;;  %728 = vmatprep.subr.bf16.mxu0 %v1458_v44 }
  0x37   : > { %769 = vmatprep.subr.bf16.mxu1 %v1461_v45  ;;  %748 = vmatprep.mubr.bf16.mxu0 %v1501_v1 }
  0x38   : > { %789 = vmatprep.mubr.bf16.mxu1 %v1501_v1 }
  0x39   : > { %729 = vmatpush1.bf16.msra.mxu0 %v1456_v46 }
  0x3a   : > { %770 = vmatpush1.bf16.msra.mxu1 %v1459_v47  ;;  %730 = vmatprep.subr.bf16.mxu0 %v1464_v48 }
  0x3b   : > { %771 = vmatprep.subr.bf16.mxu1 %v1467_v49 }
  0x3d   : > { %731 = vmatpush1.bf16.msra.mxu0 %v1462_v50 }
  0x3e   : > { %772 = vmatpush1.bf16.msra.mxu1 %v1465_v51  ;;  %957 = vmatprep.subr.bf16.mxu0 %v1437_v28 }
  0x3f   : > { %998 = vmatprep.subr.bf16.mxu1 %v1452_v39 }
  0x40   : > { %1335 = vmatmul.mubr.msk.bf16.vlgmr.msra.gmra.mxu0 %vm343_vm0, %v172_v41 }
  0x41   : > { %1336 = vmatmul.mubr.msk.bf16.vlgmr.msra.gmra.mxu1 %vm343_vm0, %v172_v41  ;;  %958 = vmatpush1.bf16.msra.mxu0 %v1435_v30 }
  0x42   : > { %999 = vmatpush1.bf16.msra.mxu1 %v1450_v42  ;;  %959 = vmatprep.subr.bf16.mxu0 %v1443_v32 }
  0x43   : > { %1000 = vmatprep.subr.bf16.mxu1 %v1458_v44  ;;  %979 = vmatprep.mubr.bf16.mxu0 %v1501_v1 }
  0x44   : > { %1020 = vmatprep.mubr.bf16.mxu1 %v1501_v1 }
  0x45   : > { %960 = vmatpush1.bf16.msra.mxu0 %v1441_v34 }
  0x46   : > { %1001 = vmatpush1.bf16.msra.mxu1 %v1456_v46  ;;  %961 = vmatprep.subr.bf16.mxu0 %v1449_v36 }
  0x47   : > { %1002 = vmatprep.subr.bf16.mxu1 %v1464_v48 }
  0x49   : > { %962 = vmatpush1.bf16.msra.mxu0 %v1447_v38 }
  0x4a   : > { %1003 = vmatpush1.bf16.msra.mxu1 %v1462_v50  ;;  %1039 = vmatprep.subr.bf16.mxu0 %v1455_v40 }
  0x4b   : > { %1080 = vmatprep.subr.bf16.mxu1 %v1470_v52 }
  0x4c   : > { %1362 = vmatmul.mubr.msk.bf16.vlgmr.msra.gmra.mxu0 %vm343_vm0, %v1337_v53 }
  0x4d   : > { %1363 = vmatmul.mubr.msk.bf16.vlgmr.msra.gmra.mxu1 %vm343_vm0, %v1337_v53  ;;  %1040 = vmatpush1.bf16.msra.mxu0 %v1453_v43 }
  0x4e   : > { %1081 = vmatpush1.bf16.msra.mxu1 %v1468_v54  ;;  %1041 = vmatprep.subr.bf16.mxu0 %v1461_v45 }
  0x4f   : > { %1082 = vmatprep.subr.bf16.mxu1 %v1473_v55  ;;  %1061 = vmatprep.mubr.bf16.mxu0 %v1501_v1 }
  0x50   : > { %1102 = vmatprep.mubr.bf16.mxu1 %v1501_v1 }
  0x51   : > { %1042 = vmatpush1.bf16.msra.mxu0 %v1459_v47 }
  0x52   : > { %1083 = vmatpush1.bf16.msra.mxu1 %v1471_v56  ;;  %1043 = vmatprep.subr.bf16.mxu0 %v1467_v49 }
  0x53   : > { %1084 = vmatprep.subr.bf16.mxu1 %v1476_v57 }
  0x55   : > { %1044 = vmatpush1.bf16.msra.mxu0 %v1465_v51 }
  0x56   : > { %1085 = vmatpush1.bf16.msra.mxu1 %v1474_v58 }
  0x58   : > { %1364 = vmatmul.mubr.msk.bf16.vlgmr.msra.gmra.mxu0 %vm343_vm0, %v1337_v53 }
  0x59   : > { %1365 = vmatmul.mubr.msk.bf16.vlgmr.msra.gmra.mxu1 %vm343_vm0, %v1337_v53 }
  0x89   : > { %v1123_v29 = vpop.permute.xlu0 %1122 }
  0xdc   : > { %v381_v59 = vpop.f32.mrf.mxu0 }
  0xdd   : > { %v422_v60 = vpop.f32.mrf.mxu1 }
  0xde   : > { %v383_v61 = vpop.f32.mrf.mxu0 }
  0xdf   : > { %v424_v62 = vpop.f32.mrf.mxu1 }
  0xe0   : > { %v385_v63 = vpop.f32.mrf.mxu0 }
  0xe1   : > { %v426_v0 = vpop.f32.mrf.mxu1 }
  0xe2   : > { %v386_v2 = vpop.f32.mrf.mxu0 }
  0xe3   : > { %v427_v3 = vpop.f32.mrf.mxu1 }
  0xe8   : > { %v463_v1 = vpop.f32.mrf.mxu0 }
  0xe9   : > { %v504_v4 = vpop.f32.mrf.mxu1 }
  0xea   : > { %v465_v5 = vpop.f32.mrf.mxu0 }
  0xeb   : > { %v506_v6 = vpop.f32.mrf.mxu1 }
  0xec   : > { %v467_v7 = vpop.f32.mrf.mxu0 }
  0xed   : > { %v508_v8 = vpop.f32.mrf.mxu1 }
  0xee   : > { %v468_v9 = vpop.f32.mrf.mxu0 }
  0xef   : > { %v509_v10 = vpop.f32.mrf.mxu1 }
  0xf4   : > { %v668_v11 = vpop.f32.mrf.mxu0 }
  0xf5   : > { %v709_v12 = vpop.f32.mrf.mxu1  ;;  %v669_v27 = vadd.f32 %v668_v11, %v381_v59 }
  0xf6   : > { %v670_v13 = vpop.f32.mrf.mxu0  ;;  %v710_v28 = vadd.f32 %v709_v12, %v422_v60 }
  0xf7   : > { %v711_v14 = vpop.f32.mrf.mxu1  ;;  %v671_v32 = vadd.f32 %v670_v13, %v383_v61 }
  0xf8   : > { %v672_v15 = vpop.f32.mrf.mxu0  ;;  %v712_v33 = vadd.f32 %v711_v14, %v424_v62 }
  0xf9   : > { %v713_v16 = vpop.f32.mrf.mxu1 }
  0xfa   : > { %v673_v17 = vpop.f32.mrf.mxu0 }
  0xfb   : > { %v714_v18 = vpop.f32.mrf.mxu1 }
 0x100   : > { %v750_v19 = vpop.f32.mrf.mxu0 }
 0x101   : > { %v791_v20 = vpop.f32.mrf.mxu1  ;;  %v751_v56 = vadd.f32 %v750_v19, %v463_v1 }
 0x102   : > { %v752_v21 = vpop.f32.mrf.mxu0  ;;  %v792_v57 = vadd.f32 %v791_v20, %v504_v4 }
 0x103   : > { %v793_v22 = vpop.f32.mrf.mxu1  ;;  %v753_v60 = vadd.f32 %v752_v21, %v465_v5 }
 0x104   : > { %v754_v23 = vpop.f32.mrf.mxu0  ;;  %v794_v61 = vadd.f32 %v793_v22, %v506_v6 }
 0x105   : > { %v795_v24 = vpop.f32.mrf.mxu1 }
 0x106   : > { %v755_v25 = vpop.f32.mrf.mxu0 }
 0x107   : > { %v796_v26 = vpop.f32.mrf.mxu1 }
 0x10c   : > { %v981_v30 = vpop.f32.mrf.mxu0 }
 0x10d   : > { %v1022_v31 = vpop.f32.mrf.mxu1  ;;  %v1111_v34 = vadd.f32 %v981_v30, %v669_v27 }
 0x10e   : > { %v1113_v35 = vadd.f32 %v1022_v31, %v710_v28  ;;  %v983_v36 = vpop.f32.mrf.mxu0 }
 0x10f   : > { %v1024_v37 = vpop.f32.mrf.mxu1  ;;  %v1112_v38 = vadd.f32 %v983_v36, %v671_v32  ;;  %v1629_v39 = vadd.f32 %v1123_v29, %v1111_v34 }
 0x110   : > { %v1114_v40 = vadd.f32 %v1024_v37, %v712_v33  ;;  %v1631_v41 = vadd.f32 %v1123_v29, %v1113_v35  ;;  %v985_v42 = vpop.f32.mrf.mxu0 }
 0x111   : > { %v1026_v43 = vpop.f32.mrf.mxu1  ;;  %v1126_v44 = vadd.f32 %v1123_v29, %v1112_v38  ;;  %v1141_v45 = vmin.f32 %v1629_v39, 0.0  ;;  %vm1133_vm1 = vcmp.gt.f32.partialorder %v1629_v39, 0.0 }
 0x112   : > { %v1634_v46 = vadd.f32 %v1123_v29, %v1114_v40  ;;  %v1143_v47 = vmin.f32 %v1631_v41, 0.0  ;;  %v986_v48 = vpop.f32.mrf.mxu0  ;;  %vm1135_vm3 = vcmp.gt.f32.partialorder %v1631_v41, 0.0 }
 0x113   : > { %v1027_v49 = vpop.f32.mrf.mxu1  ;;  %v1142_v50 = vmin.f32 %v1126_v44, 0.0  ;;  %v1149_v51 = vmul.f32 1.442695, %v1141_v45  ;;  %vm1134_vm2 = vcmp.gt.f32.partialorder %v1126_v44, 0.0 }
 0x114   : > { %v1144_v52 = vmin.f32 %v1634_v46, 0.0  ;;  %v1153_v53 = vmul.f32 1.442695, %v1143_v47  ;;  %vm1136_vm4 = vcmp.gt.f32.partialorder %v1634_v46, 0.0 }
 0x115   : > { %1477 = vpow2.f32 %v1149_v51  ;;  %v1151_v54 = vmul.f32 1.442695, %v1142_v50 }
 0x116   : > { %1479 = vpow2.f32 %v1153_v53  ;;  %v1155_v55 = vmul.f32 1.442695, %v1144_v52 }
 0x117   : > { %1481 = vpow2.f32 %v1151_v54 }
 0x118   : > { %1483 = vpow2.f32 %v1155_v55  ;;  %v1063_v58 = vpop.f32.mrf.mxu0 }
 0x119   : > { %v1104_v59 = vpop.f32.mrf.mxu1  ;;  %v1115_v62 = vadd.f32 %v1063_v58, %v751_v56 }
 0x11a   : > { %v1117_v63 = vadd.f32 %v1104_v59, %v792_v57  ;;  %v1065_v0 = vpop.f32.mrf.mxu0 }
 0x11b   : > { %v1106_v2 = vpop.f32.mrf.mxu1  ;;  %v1129_v3 = vadd.f32 %v1123_v29, %v1115_v62  ;;  %v1116_v8 = vadd.f32 %v1065_v0, %v753_v60 }
 0x11c   : > { %v1131_v7 = vadd.f32 %v1123_v29, %v1117_v63  ;;  %v1118_v9 = vadd.f32 %v1106_v2, %v794_v61  ;;  %v1067_v10 = vpop.f32.mrf.mxu0 }
 0x11d   : > { %v1108_v11 = vpop.f32.mrf.mxu1  ;;  %v1145_v12 = vmin.f32 %v1129_v3, 0.0  ;;  %v1130_v1 = vadd.f32 %v1123_v29, %v1116_v8  ;;  %vm1137_vm5 = vcmp.gt.f32.partialorder %v1129_v3, 0.0 }
 0x11e   : > { %v1147_v13 = vmin.f32 %v1131_v7, 0.0  ;;  %v1132_v4 = vadd.f32 %v1123_v29, %v1118_v9  ;;  %v1068_v14 = vpop.f32.mrf.mxu0  ;;  %vm1139_vm7 = vcmp.gt.f32.partialorder %v1131_v7, 0.0 }
 0x11f   : > { %v1109_v15 = vpop.f32.mrf.mxu1  ;;  %v1157_v16 = vmul.f32 1.442695, %v1145_v12  ;;  %v1146_v6 = vmin.f32 %v1130_v1, 0.0  ;;  %vm1138_vm6 = vcmp.gt.f32.partialorder %v1130_v1, 0.0 }
 0x120   : > { %v1161_v5 = vmul.f32 1.442695, %v1147_v13  ;;  %v1148_v17 = vmin.f32 %v1132_v4, 0.0  ;;  %vm1140_vm8 = vcmp.gt.f32.partialorder %v1132_v4, 0.0 }
 0x121   : > { %1485 = vpow2.f32 %v1157_v16  ;;  %v1159_v19 = vmul.f32 1.442695, %v1146_v6 }
 0x122   : > { %v1478_v18 = vpop.eup %1477  ;;  %1487 = vpow2.f32 %v1161_v5  ;;  %v1163_v20 = vmul.f32 1.442695, %v1148_v17 }
 0x123   : > { %v1480_v21 = vpop.eup %1479  ;;  %v1366_v22 = vadd.f32 -1.0, %v1478_v18  ;;  %1489 = vpow2.f32 %v1159_v19 }
 0x124   : > { %v1482_v23 = vpop.eup %1481  ;;  %v1368_v24 = vadd.f32 -1.0, %v1480_v21  ;;  %1491 = vpow2.f32 %v1163_v20 }
 0x125   : > { %v1484_v25 = vpop.eup %1483  ;;  %v1367_v26 = vadd.f32 -1.0, %v1482_v23  ;;  %v1173_v28 = vsel %vm1133_vm1, %v1629_v39, %v1366_v22 }
 0x126   : > { %v1369_v27 = vadd.f32 -1.0, %v1484_v25  ;;  %v1175_v31 = vsel %vm1135_vm3, %v1631_v41, %v1368_v24 }
 0x127   : > { %v1174_v29 = vsel %vm1134_vm2, %v1126_v44, %v1367_v26 }
 0x128   : > { %v1381_v30 = vpack.c.bf16 %v1174_v29, %v1173_v28  ;;  %v1176_v32 = vsel %vm1136_vm4, %v1634_v46, %v1369_v27 }
 0x129   : > { %v1382_v33 = vpack.c.bf16 %v1176_v32, %v1175_v31 }
 0x12a   : > { %1213 = vst [vmem:[%s170_s29] sm:$0xff] %v1381_v30 }
 0x12b   : > { %1214 = vst [vmem:[%s170_s29 + $0x8] sm:$0xff] %v1382_v33 }
 0x12e   : > { %v1486_v34 = vpop.eup %1485 }
 0x12f   : > { %v1488_v35 = vpop.eup %1487  ;;  %v1370_v36 = vadd.f32 -1.0, %v1486_v34 }
 0x130   : > { %v1490_v37 = vpop.eup %1489  ;;  %v1372_v38 = vadd.f32 -1.0, %v1488_v35 }
 0x131   : > { %v1492_v40 = vpop.eup %1491  ;;  %v1371_v39 = vadd.f32 -1.0, %v1490_v37  ;;  %v1177_v43 = vsel %vm1137_vm5, %v1129_v3, %v1370_v36 }
 0x132   : > { %v1373_v42 = vadd.f32 -1.0, %v1492_v40  ;;  %v1179_v41 = vsel %vm1139_vm7, %v1131_v7, %v1372_v38 }
 0x133   : > { %v1178_v44 = vsel %vm1138_vm6, %v1130_v1, %v1371_v39 }
 0x134   : > { %v1383_v45 = vpack.c.bf16 %v1178_v44, %v1177_v43  ;;  %v1180_v46 = vsel %vm1140_vm8, %v1132_v4, %v1373_v42 }
 0x135   : > { %v1384_v47 = vpack.c.bf16 %v1180_v46, %v1179_v41 }
 0x136   : > { %1215 = vst [vmem:[%s170_s29 + $0x10] sm:$0xff] %v1383_v45 }
 0x137   : > { %1216 = vst [vmem:[%s170_s29 + $0x18] sm:$0xff] %v1384_v47 }
 0x138 PF: > { %s13_s12 = sadd.s32 1, %s1499_s12  }
 0x139   : > { %p10_p4 = scmp.ge.s32.totalorder %s13_s12, 4  }
 0x13b   :  { %12 = sbr.rel (!%p10_p4) target bundleno = 1 (0x1), region = 64 }

// kernel: sunet3d_forward.11
= control target key start
LH: loop header
LB: loop body
LE: loop exit
PB: predicated region body
PF: predicated region fallthrough
CT: control target
= control target key end

     0   :  { %s1216_s12 = smov 0   ;;  %s1322_s0 = inlined_call_operand.vmem [shape: bf16[2,80,768], index: 0, kind: input, shape index: {}]   ;;  %s1323_s1 = inlined_call_operand.vmem [shape: bf16[3,16,80], index: 1, kind: input, shape index: {}]   ;;  %s1324_s2 = inlined_call_operand.vmem [shape: f32[16,1], index: 2, kind: input, shape index: {}]   ;;  %s1325_s3 = inlined_call_operand.vmem [shape: bf16[2,16,512], index: 3, kind: output, shape index: {}]  }
   0x1 LB: > { %s982_s13 = sadd.s32 4294967295, %s1193_s12   ;;  %p986_p0 = scmp.ge.s32.totalorder %s1193_s12, 1  ;;  %s1193_s12 = sphi %s1216_s12, %s13_s12  }
   0x2   : > { %p137_p1 = scmp.lt.s32.totalorder %s1193_s12, 3 }
   0x4   : > { %p138_p2 = pnand %p986_p0, %p137_p1 }
   0x5   : > { %p161_p3 = scmp.lt.s32.totalorder (!%p138_p2), %s982_s13, 1 }
   0x6   : > { %141 = sbr.rel (%p138_p2) target bundleno = 304 (0x130), region = 32 }
   0xb   : > { %v1195_v0 = vmov 0   ;;  %s1327_s13 = smov (!%p161_p3, %s982_s13), 1  ;;  %v831_v1 = vld [vmem:[%s1324_s2] sm:$0xff]  ;;  %v832_v2 = vld [vmem:[%s1324_s2 + $0x8] sm:$0xff]  ;;  %vm322_vm0 = vcmask 654336   ;;  %v1170_v55 = vld [vmem:[%s1323_s1 + $0x10] sm:$0xff]  }
   0xc   : > { %358 = vmatprep.mubr.bf16.mxu0 %v1195_v0  ;;  %401 = vmatprep.mubr.bf16.mxu1 %v1195_v0  ;;  %s1082_s16 = smul.u32 240, %s1327_s13  ;;  %v1123_v25 = vld [vmem:[%s1323_s1 + $0x8] sm:$0xff]   ;;  %v1154_v45 = vld [vmem:[%s1323_s1] sm:$0xff]   ;;  %s1077_s28 = sshll.u32 %s1327_s13, 5 }
   0xd   : > { %1092 = vset.pattern.permute.xlu0 %v1195_v0  ;;  %s170_s4 = scalar_lea.vmem %s1325_s3, %s1077_s28 }
   0xe   : > { %835 = vperm.xlu0 %1092, %v831_v1   ;;  %s1239_s21 = scalar_lea.vmem %s1322_s0, %s1082_s16 }
   0xf   : > { %v1093_v3 = vld [vmem:[%s1239_s21 + $0xc8] ss:$24 sps:$4 sm:$0xff]   ;;  %v1097_v5 = vld [vmem:[%s1239_s21 + $0xc4] ss:$24 sps:$4 sm:$0xff]   ;;  %v1099_v7 = vld [vmem:[%s1239_s21 + $0x98] ss:$24 sps:$4 sm:$0xff]  }
  0x10   : > { %v1095_v4 = vld [vmem:[%s1239_s21 + $0xd0] ss:$24 sps:$4 sm:$0xff]   ;;  %332 = vmatprep.subr.bf16.mxu0 %v1093_v3  ;;  %v1098_v6 = vld [vmem:[%s1239_s21 + $0xcc] ss:$24 sps:$4 sm:$0xff]   ;;  %v1101_v8 = vld [vmem:[%s1239_s21 + $0xa0] ss:$24 sps:$4 sm:$0xff]  }
  0x11   : > { %375 = vmatprep.subr.bf16.mxu1 %v1095_v4  ;;  %333 = vmatpush1.bf16.msra.mxu0 %v1097_v5  ;;  %v1103_v9 = vld [vmem:[%s1239_s21 + $0x94] ss:$24 sps:$4 sm:$0xff]   ;;  %v1105_v11 = vld [vmem:[%s1239_s21 + $0x68] ss:$24 sps:$4 sm:$0xff]   ;;  %v1109_v13 = vld [vmem:[%s1239_s21 + $0x64] ss:$24 sps:$4 sm:$0xff]  }
  0x12   : > { %840 = vperm.xlu0 %1092, %v832_v2   ;;  %376 = vmatpush1.bf16.msra.mxu1 %v1098_v6  ;;  %v1104_v10 = vld [vmem:[%s1239_s21 + $0x9c] ss:$24 sps:$4 sm:$0xff]   ;;  %v1107_v12 = vld [vmem:[%s1239_s21 + $0x70] ss:$24 sps:$4 sm:$0xff]   ;;  %v1110_v14 = vld [vmem:[%s1239_s21 + $0x6c] ss:$24 sps:$4 sm:$0xff]  }
  0x13   : > { %334 = vmatprep.subr.bf16.mxu0 %v1099_v7  ;;  %377 = vmatprep.subr.bf16.mxu1 %v1101_v8  ;;  %v1111_v15 = vld [vmem:[%s1239_s21 + $0x38] ss:$24 sps:$4 sm:$0xff]   ;;  %v1115_v17 = vld [vmem:[%s1239_s21 + $0x34] ss:$24 sps:$4 sm:$0xff]   ;;  %v1117_v19 = vld [vmem:[%s1239_s21 + $0x8] ss:$24 sps:$4 sm:$0xff]  }
  0x14   : > { %v1113_v16 = vld [vmem:[%s1239_s21 + $0x40] ss:$24 sps:$4 sm:$0xff]   ;;  %v1116_v18 = vld [vmem:[%s1239_s21 + $0x3c] ss:$24 sps:$4 sm:$0xff]   ;;  %v1119_v20 = vld [vmem:[%s1239_s21 + $0x10] ss:$24 sps:$4 sm:$0xff]  }
  0x15   : > { %335 = vmatpush1.bf16.msra.mxu0 %v1103_v9  ;;  %v1121_v21 = vld [vmem:[%s1239_s21 + $0x4] ss:$24 sps:$4 sm:$0xff]   ;;  %v1124_v26 = vld [vmem:[%s1239_s21 + $0xc0] ss:$24 sps:$4 sm:$0xff]   ;;  %v1132_v28 = vld [vmem:[%s1239_s21 + $0x94] ss:$24 sps:$4 sm:$0xff]  }
  0x16   : > { %378 = vmatpush1.bf16.msra.mxu1 %v1104_v10  ;;  %336 = vmatprep.subr.bf16.mxu0 %v1105_v11  ;;  %v1122_v22 = vld [vmem:[%s1239_s21 + $0xc] ss:$24 sps:$4 sm:$0xff]   ;;  %v1127_v27 = vld [vmem:[%s1239_s21 + $0xc8] ss:$24 sps:$4 sm:$0xff]   ;;  %v1135_v29 = vld [vmem:[%s1239_s21 + $0x9c] ss:$24 sps:$4 sm:$0xff]  }
  0x17   : > { %379 = vmatprep.subr.bf16.mxu1 %v1107_v12  ;;  %v1126_v23 = vld [vmem:[%s1239_s21 + $0xc4] ss:$24 sps:$4 sm:$0xff]   ;;  %v1130_v30 = vld [vmem:[%s1239_s21 + $0x90] ss:$24 sps:$4 sm:$0xff]   ;;  %v1136_v34 = vld [vmem:[%s1239_s21 + $0x60] ss:$24 sps:$4 sm:$0xff]  }
  0x18   : > { %v1129_v24 = vld [vmem:[%s1239_s21 + $0xcc] ss:$24 sps:$4 sm:$0xff]   ;;  %v1133_v31 = vld [vmem:[%s1239_s21 + $0x98] ss:$24 sps:$4 sm:$0xff]   ;;  %v1139_v35 = vld [vmem:[%s1239_s21 + $0x68] ss:$24 sps:$4 sm:$0xff]  }
  0x19   : > { %337 = vmatpush1.bf16.msra.mxu0 %v1109_v13  ;;  %v1138_v32 = vld [vmem:[%s1239_s21 + $0x64] ss:$24 sps:$4 sm:$0xff]   ;;  %v1144_v36 = vld [vmem:[%s1239_s21 + $0x34] ss:$24 sps:$4 sm:$0xff]   ;;  %v1142_v38 = vld [vmem:[%s1239_s21 + $0x30] ss:$24 sps:$4 sm:$0xff]  }
  0x1a   : > { %380 = vmatpush1.bf16.msra.mxu1 %v1110_v14  ;;  %338 = vmatprep.subr.bf16.mxu0 %v1111_v15  ;;  %v1141_v33 = vld [vmem:[%s1239_s21 + $0x6c] ss:$24 sps:$4 sm:$0xff]   ;;  %v1147_v37 = vld [vmem:[%s1239_s21 + $0x3c] ss:$24 sps:$4 sm:$0xff]   ;;  %v1145_v39 = vld [vmem:[%s1239_s21 + $0x38] ss:$24 sps:$4 sm:$0xff]  }
  0x1b   : > { %381 = vmatprep.subr.bf16.mxu1 %v1113_v16  ;;  %v1150_v40 = vld [vmem:[%s1239_s21 + $0x4] ss:$24 sps:$4 sm:$0xff]   ;;  %v1148_v42 = vld [vmem:[%s1239_s21] ss:$24 sps:$4 sm:$0xff]   ;;  %v1157_v44 = vld [vmem:[%s1239_s21 + $0xd4] ss:$24 sps:$4 sm:$0xff]  }
  0x1c   : > { %v1153_v41 = vld [vmem:[%s1239_s21 + $0xc] ss:$24 sps:$4 sm:$0xff]   ;;  %v1151_v43 = vld [vmem:[%s1239_s21 + $0x8] ss:$24 sps:$4 sm:$0xff]  }
  0x1d   : > { %339 = vmatpush1.bf16.msra.mxu0 %v1115_v17  ;;  %v1155_v46 = vld [vmem:[%s1239_s21 + $0xd0] ss:$24 sps:$4 sm:$0xff]   ;;  %v1160_v47 = vld [vmem:[%s1239_s21 + $0xa4] ss:$24 sps:$4 sm:$0xff]   ;;  %v1158_v48 = vld [vmem:[%s1239_s21 + $0xa0] ss:$24 sps:$4 sm:$0xff]  }
  0x1e   : > { %382 = vmatpush1.bf16.msra.mxu1 %v1116_v18  ;;  %340 = vmatprep.subr.bf16.mxu0 %v1117_v19  ;;  %v1163_v49 = vld [vmem:[%s1239_s21 + $0x74] ss:$24 sps:$4 sm:$0xff]   ;;  %v1161_v50 = vld [vmem:[%s1239_s21 + $0x70] ss:$24 sps:$4 sm:$0xff]   ;;  %v1166_v51 = vld [vmem:[%s1239_s21 + $0x44] ss:$24 sps:$4 sm:$0xff]  }
  0x1f   : > { %383 = vmatprep.subr.bf16.mxu1 %v1119_v20  ;;  %v1164_v52 = vld [vmem:[%s1239_s21 + $0x40] ss:$24 sps:$4 sm:$0xff]   ;;  %v1169_v53 = vld [vmem:[%s1239_s21 + $0x14] ss:$24 sps:$4 sm:$0xff]   ;;  %v1167_v54 = vld [vmem:[%s1239_s21 + $0x10] ss:$24 sps:$4 sm:$0xff]  }
  0x21   : > { %341 = vmatpush1.bf16.msra.mxu0 %v1121_v21 }
  0x22   : > { %384 = vmatpush1.bf16.msra.mxu1 %v1122_v22  ;;  %526 = vmatprep.subr.bf16.mxu0 %v1126_v23 }
  0x23   : > { %569 = vmatprep.subr.bf16.mxu1 %v1129_v24 }
  0x24   : > { %1013 = vmatmul.mubr.msk.bf16.vlgmr.msra.gmra.mxu0 %vm322_vm0, %v1123_v25 }
  0x25   : > { %1014 = vmatmul.mubr.msk.bf16.vlgmr.msra.gmra.mxu1 %vm322_vm0, %v1123_v25  ;;  %527 = vmatpush1.bf16.msra.mxu0 %v1124_v26 }
  0x26   : > { %570 = vmatpush1.bf16.msra.mxu1 %v1127_v27  ;;  %528 = vmatprep.subr.bf16.mxu0 %v1132_v28 }
  0x27   : > { %571 = vmatprep.subr.bf16.mxu1 %v1135_v29  ;;  %552 = vmatprep.mubr.bf16.mxu0 %v1195_v0 }
  0x28   : > { %595 = vmatprep.mubr.bf16.mxu1 %v1195_v0 }
  0x29   : > { %529 = vmatpush1.bf16.msra.mxu0 %v1130_v30 }
  0x2a   : > { %572 = vmatpush1.bf16.msra.mxu1 %v1133_v31  ;;  %530 = vmatprep.subr.bf16.mxu0 %v1138_v32 }
  0x2b   : > { %573 = vmatprep.subr.bf16.mxu1 %v1141_v33 }
  0x2d   : > { %531 = vmatpush1.bf16.msra.mxu0 %v1136_v34 }
  0x2e   : > { %574 = vmatpush1.bf16.msra.mxu1 %v1139_v35  ;;  %532 = vmatprep.subr.bf16.mxu0 %v1144_v36 }
  0x2f   : > { %575 = vmatprep.subr.bf16.mxu1 %v1147_v37 }
  0x31   : > { %533 = vmatpush1.bf16.msra.mxu0 %v1142_v38 }
  0x32   : > { %576 = vmatpush1.bf16.msra.mxu1 %v1145_v39  ;;  %534 = vmatprep.subr.bf16.mxu0 %v1150_v40 }
  0x33   : > { %577 = vmatprep.subr.bf16.mxu1 %v1153_v41 }
  0x35   : > { %535 = vmatpush1.bf16.msra.mxu0 %v1148_v42 }
  0x36   : > { %578 = vmatpush1.bf16.msra.mxu1 %v1151_v43  ;;  %743 = vmatprep.subr.bf16.mxu0 %v1129_v24 }
  0x37   : > { %786 = vmatprep.subr.bf16.mxu1 %v1157_v44 }
  0x38   : > { %1036 = vmatmul.mubr.msk.bf16.vlgmr.msra.gmra.mxu0 %vm322_vm0, %v1154_v45 }
  0x39   : > { %1037 = vmatmul.mubr.msk.bf16.vlgmr.msra.gmra.mxu1 %vm322_vm0, %v1154_v45  ;;  %744 = vmatpush1.bf16.msra.mxu0 %v1127_v27 }
  0x3a   : > { %787 = vmatpush1.bf16.msra.mxu1 %v1155_v46  ;;  %745 = vmatprep.subr.bf16.mxu0 %v1135_v29 }
  0x3b   : > { %788 = vmatprep.subr.bf16.mxu1 %v1160_v47  ;;  %769 = vmatprep.mubr.bf16.mxu0 %v1195_v0 }
  0x3c   : > { %812 = vmatprep.mubr.bf16.mxu1 %v1195_v0 }
  0x3d   : > { %746 = vmatpush1.bf16.msra.mxu0 %v1133_v31 }
  0x3e   : > { %789 = vmatpush1.bf16.msra.mxu1 %v1158_v48  ;;  %747 = vmatprep.subr.bf16.mxu0 %v1141_v33 }
  0x3f   : > { %790 = vmatprep.subr.bf16.mxu1 %v1163_v49 }
  0x41   : > { %748 = vmatpush1.bf16.msra.mxu0 %v1139_v35 }
  0x42   : > { %791 = vmatpush1.bf16.msra.mxu1 %v1161_v50  ;;  %749 = vmatprep.subr.bf16.mxu0 %v1147_v37 }
  0x43   : > { %792 = vmatprep.subr.bf16.mxu1 %v1166_v51 }
  0x45   : > { %750 = vmatpush1.bf16.msra.mxu0 %v1145_v39 }
  0x46   : > { %793 = vmatpush1.bf16.msra.mxu1 %v1164_v52  ;;  %751 = vmatprep.subr.bf16.mxu0 %v1153_v41 }
  0x47   : > { %794 = vmatprep.subr.bf16.mxu1 %v1169_v53 }
  0x49   : > { %752 = vmatpush1.bf16.msra.mxu0 %v1151_v43 }
  0x4a   : > { %795 = vmatpush1.bf16.msra.mxu1 %v1167_v54 }
  0x4c   : > { %1061 = vmatmul.mubr.msk.bf16.vlgmr.msra.gmra.mxu0 %vm322_vm0, %v1170_v55 }
  0x4d   : > { %1062 = vmatmul.mubr.msk.bf16.vlgmr.msra.gmra.mxu1 %vm322_vm0, %v1170_v55 }
  0x89   : > { %v836_v14 = vpop.permute.xlu0 %835 }
  0x8d   : > { %v841_v43 = vpop.permute.xlu0 %840 }
  0xe4   : > { %v360_v56 = vpop.f32.mrf.mxu0 }
  0xe5   : > { %v403_v57 = vpop.f32.mrf.mxu1 }
  0xe6   : > { %v362_v58 = vpop.f32.mrf.mxu0 }
  0xe7   : > { %v405_v59 = vpop.f32.mrf.mxu1 }
  0xe8   : > { %v364_v60 = vpop.f32.mrf.mxu0 }
  0xe9   : > { %v407_v61 = vpop.f32.mrf.mxu1 }
  0xea   : > { %v366_v62 = vpop.f32.mrf.mxu0 }
  0xeb   : > { %v409_v63 = vpop.f32.mrf.mxu1 }
  0xf8   : > { %v554_v0 = vpop.f32.mrf.mxu0 }
  0xf9   : > { %v597_v1 = vpop.f32.mrf.mxu1  ;;  %v555_v8 = vadd.f32 %v554_v0, %v360_v56 }
  0xfa   : > { %v556_v2 = vpop.f32.mrf.mxu0  ;;  %v598_v9 = vadd.f32 %v597_v1, %v403_v57 }
  0xfb   : > { %v599_v3 = vpop.f32.mrf.mxu1  ;;  %v557_v12 = vadd.f32 %v556_v2, %v362_v58 }
  0xfc   : > { %v558_v4 = vpop.f32.mrf.mxu0  ;;  %v600_v13 = vadd.f32 %v599_v3, %v405_v59 }
  0xfd   : > { %v601_v5 = vpop.f32.mrf.mxu1  ;;  %v559_v23 = vadd.f32 %v558_v4, %v364_v60 }
  0xfe   : > { %v560_v6 = vpop.f32.mrf.mxu0  ;;  %v602_v24 = vadd.f32 %v601_v5, %v407_v61 }
  0xff   : > { %v603_v7 = vpop.f32.mrf.mxu1  ;;  %v561_v27 = vadd.f32 %v560_v6, %v366_v62 }
 0x100   : > { %v604_v28 = vadd.f32 %v603_v7, %v409_v63 }
 0x10c   : > { %v771_v10 = vpop.f32.mrf.mxu0 }
 0x10d   : > { %v814_v11 = vpop.f32.mrf.mxu1  ;;  %v823_v15 = vadd.f32 %v771_v10, %v555_v8 }
 0x10e   : > { %v825_v16 = vadd.f32 %v814_v11, %v598_v9  ;;  %v773_v17 = vpop.f32.mrf.mxu0 }
 0x10f   : > { %v816_v18 = vpop.f32.mrf.mxu1  ;;  %v843_v19 = vadd.f32 %v836_v14, %v823_v15  ;;  %v824_v21 = vadd.f32 %v773_v17, %v557_v12 }
 0x110   : > { %v1310_v20 = vadd.f32 %v836_v14, %v825_v16  ;;  %v826_v22 = vadd.f32 %v816_v18, %v600_v13  ;;  %v775_v25 = vpop.f32.mrf.mxu0 }
 0x111   : > { %v818_v26 = vpop.f32.mrf.mxu1  ;;  %v859_v29 = vmin.f32 %v843_v19, 0.0  ;;  %v844_v31 = vadd.f32 %v836_v14, %v824_v21  ;;  %v827_v33 = vadd.f32 %v775_v25, %v559_v23  ;;  %vm851_vm1 = vcmp.gt.f32.partialorder %v843_v19, 0.0 }
 0x112   : > { %v861_v30 = vmin.f32 %v1310_v20, 0.0  ;;  %v846_v32 = vadd.f32 %v836_v14, %v826_v22  ;;  %v829_v34 = vadd.f32 %v818_v26, %v602_v24  ;;  %v777_v35 = vpop.f32.mrf.mxu0  ;;  %vm853_vm3 = vcmp.gt.f32.partialorder %v1310_v20, 0.0 }
 0x113   : > { %v820_v36 = vpop.f32.mrf.mxu1  ;;  %v867_v37 = vmul.f32 1.442695, %v859_v29  ;;  %v828_v39 = vadd.f32 %v777_v35, %v561_v27  ;;  %v860_v41 = vmin.f32 %v844_v31, 0.0  ;;  %v847_v44 = vadd.f32 %v841_v43, %v827_v33 }
 0x114   : > { %v871_v38 = vmul.f32 1.442695, %v861_v30  ;;  %v830_v40 = vadd.f32 %v820_v36, %v604_v28  ;;  %v862_v42 = vmin.f32 %v846_v32, 0.0  ;;  %v849_v45 = vadd.f32 %v841_v43, %v829_v34 }
 0x115   : > { %1171 = vpow2.f32 %v867_v37  ;;  %v848_v46 = vadd.f32 %v841_v43, %v828_v39  ;;  %v869_v47 = vmul.f32 1.442695, %v860_v41  ;;  %v863_v50 = vmin.f32 %v847_v44, 0.0 }
 0x116   : > { %1173 = vpow2.f32 %v871_v38  ;;  %v873_v48 = vmul.f32 1.442695, %v862_v42  ;;  %v850_v49 = vadd.f32 %v841_v43, %v830_v40  ;;  %v865_v51 = vmin.f32 %v849_v45, 0.0 }
 0x117   : > { %1175 = vpow2.f32 %v869_v47  ;;  %v864_v52 = vmin.f32 %v848_v46, 0.0  ;;  %v875_v53 = vmul.f32 1.442695, %v863_v50  ;;  %vm852_vm2 = vcmp.gt.f32.partialorder %v844_v31, 0.0 }
 0x118   : > { %1177 = vpow2.f32 %v873_v48  ;;  %v879_v54 = vmul.f32 1.442695, %v865_v51  ;;  %v866_v55 = vmin.f32 %v850_v49, 0.0  ;;  %vm854_vm4 = vcmp.gt.f32.partialorder %v846_v32, 0.0 }
 0x119   : > { %v877_v56 = vmul.f32 1.442695, %v864_v52  ;;  %1179 = vpow2.f32 %v875_v53  ;;  %vm855_vm5 = vcmp.gt.f32.partialorder %v847_v44, 0.0  ;;  %vm856_vm6 = vcmp.gt.f32.partialorder %v848_v46, 0.0 }
 0x11a   : > { %v881_v57 = vmul.f32 1.442695, %v866_v55  ;;  %1181 = vpow2.f32 %v879_v54  ;;  %vm857_vm7 = vcmp.gt.f32.partialorder %v849_v45, 0.0  ;;  %vm858_vm8 = vcmp.gt.f32.partialorder %v850_v49, 0.0 }
 0x11b   : > { %1183 = vpow2.f32 %v877_v56 }
 0x11c   : > { %1185 = vpow2.f32 %v881_v57 }
 0x122   : > { %v1172_v58 = vpop.eup %1171 }
 0x123   : > { %v1174_v59 = vpop.eup %1173  ;;  %v1063_v60 = vadd.f32 -1.0, %v1172_v58 }
 0x124   : > { %v1176_v61 = vpop.eup %1175  ;;  %v1065_v62 = vadd.f32 -1.0, %v1174_v59 }
 0x125   : > { %v1178_v63 = vpop.eup %1177  ;;  %v1064_v0 = vadd.f32 -1.0, %v1176_v61  ;;  %v891_v3 = vsel %vm851_vm1, %v843_v19, %v1063_v60 }
 0x126   : > { %v1066_v1 = vadd.f32 -1.0, %v1178_v63  ;;  %v1180_v2 = vpop.eup %1179  ;;  %v893_v6 = vsel %vm853_vm3, %v1310_v20, %v1065_v62 }
 0x127   : > { %v892_v4 = vsel %vm852_vm2, %v844_v31, %v1064_v0  ;;  %v1182_v5 = vpop.eup %1181  ;;  %v1067_v9 = vadd.f32 -1.0, %v1180_v2 }
 0x128   : > { %v1078_v7 = vpack.c.bf16 %v892_v4, %v891_v3  ;;  %v894_v8 = vsel %vm854_vm4, %v846_v32, %v1066_v1  ;;  %v1184_v10 = vpop.eup %1183  ;;  %v1069_v12 = vadd.f32 -1.0, %v1182_v5 }
 0x129   : > { %v1079_v11 = vpack.c.bf16 %v894_v8, %v893_v6  ;;  %v1186_v13 = vpop.eup %1185  ;;  %v1068_v14 = vadd.f32 -1.0, %v1184_v10  ;;  %v895_v16 = vsel %vm855_vm5, %v847_v44, %v1067_v9 }
 0x12a   : > { %923 = vst [vmem:[%s170_s4] sm:$0xff] %v1078_v7  ;;  %v1070_v15 = vadd.f32 -1.0, %v1186_v13  ;;  %v897_v18 = vsel %vm857_vm7, %v849_v45, %v1069_v12 }
 0x12b   : > { %924 = vst [vmem:[%s170_s4 + $0x8] sm:$0xff] %v1079_v11  ;;  %v896_v17 = vsel %vm856_vm6, %v848_v46, %v1068_v14 }
 0x12c   : > { %v1080_v19 = vpack.c.bf16 %v896_v17, %v895_v16  ;;  %v898_v20 = vsel %vm858_vm8, %v850_v49, %v1070_v15 }
 0x12d   : > { %v1081_v21 = vpack.c.bf16 %v898_v20, %v897_v18 }
 0x12e   : > { %925 = vst [vmem:[%s170_s4 + $0x10] sm:$0xff] %v1080_v19 }
 0x12f   : > { %926 = vst [vmem:[%s170_s4 + $0x18] sm:$0xff] %v1081_v21 }
 0x130 PF: > { %s13_s12 = sadd.s32 1, %s1193_s12  }
 0x131   : > { %p10_p4 = scmp.ge.s32.totalorder %s13_s12, 4  }
 0x133   :  { %12 = sbr.rel (!%p10_p4) target bundleno = 1 (0x1), region = 64 }

// kernel: sunet3d_forward.12
= control target key start
LH: loop header
LB: loop body
LE: loop exit
PB: predicated region body
PF: predicated region fallthrough
CT: control target
= control target key end

     0   :  { %s1633_s12 = smov 0   ;;  %s1853_s0 = inlined_call_operand.vmem [shape: bf16[2,144,768], index: 0, kind: input, shape index: {}]   ;;  %s1854_s1 = inlined_call_operand.vmem [shape: bf16[3,16,144], index: 1, kind: input, shape index: {}]   ;;  %s1855_s2 = inlined_call_operand.vmem [shape: f32[16,1], index: 2, kind: input, shape index: {}]   ;;  %s1856_s3 = inlined_call_operand.vmem [shape: bf16[2,16,512], index: 3, kind: output, shape index: {}]  }
   0x1 LB: > { %s1282_s13 = sadd.s32 4294967295, %s1610_s12   ;;  %p1286_p0 = scmp.ge.s32.totalorder %s1610_s12, 1  ;;  %s1610_s12 = sphi %s1633_s12, %s13_s12  }
   0x2   : > { %p137_p1 = scmp.lt.s32.totalorder %s1610_s12, 3 }
   0x4   : > { %p138_p2 = pnand %p1286_p0, %p137_p1 }
   0x5   : > { %p161_p3 = scmp.lt.s32.totalorder (!%p138_p2), %s1282_s13, 1 }
   0x6   : > { %141 = sbr.rel (%p138_p2) target bundleno = 354 (0x162), region = 32 }
   0xb   : > { %vm438_vm0 = vcmask 130048   ;;  %v1500_v0 = vld [vmem:[%s1854_s1 + $0x14] ss:$8 sps:$4 sm:$0xff]   ;;  %s1858_s13 = smov (!%p161_p3, %s1282_s13), 1  ;;  %v1612_v1 = vmov 0   ;;  %v1131_v2 = vld [vmem:[%s1855_s2] sm:$0xff] }
   0xc   : > { %1443 = vset.pattern.permute.xlu0 %v1612_v1  ;;  %1330 = vmatprep.mubr.msk.bf16.mxu0 %vm438_vm0, %v1500_v0  ;;  %s1433_s16 = smul.u32 432, %s1858_s13  ;;  %v1132_v3 = vld [vmem:[%s1855_s2 + $0x8] sm:$0xff]  ;;  %v1498_v42 = vld [vmem:[%s1854_s1 + $0x10] ss:$8 sps:$4 sm:$0xff]   ;;  %s1428_s7 = sshll.u32 %s1858_s13, 5 }
   0xd   : > { %1331 = vmatprep.mubr.msk.bf16.mxu1 %vm438_vm0, %v1500_v0  ;;  %1135 = vperm.xlu0 %1443, %v1131_v2   ;;  %v1555_v47 = vld [vmem:[%s1854_s1 + $0x4] ss:$8 sps:$4 sm:$0xff]   ;;  %s170_s10 = scalar_lea.vmem %s1856_s3, %s1428_s7 }
   0xe   : > { %s1655_s21 = scalar_lea.vmem %s1853_s0, %s1433_s16 }
   0xf   : > { %v1444_v4 = vld [vmem:[%s1655_s21 + $0x158] ss:$24 sps:$4 sm:$0xff]   ;;  %v1448_v6 = vld [vmem:[%s1655_s21 + $0x154] ss:$24 sps:$4 sm:$0xff]   ;;  %v1450_v8 = vld [vmem:[%s1655_s21 + $0x128] ss:$24 sps:$4 sm:$0xff]  }
  0x10   : > { %v1446_v5 = vld [vmem:[%s1655_s21 + $0x160] ss:$24 sps:$4 sm:$0xff]   ;;  %442 = vmatprep.subr.bf16.mxu0 %v1444_v4  ;;  %v1449_v7 = vld [vmem:[%s1655_s21 + $0x15c] ss:$24 sps:$4 sm:$0xff]   ;;  %v1452_v9 = vld [vmem:[%s1655_s21 + $0x130] ss:$24 sps:$4 sm:$0xff]  }
  0x11   : > { %1140 = vperm.xlu0 %1443, %v1132_v3   ;;  %485 = vmatprep.subr.bf16.mxu1 %v1446_v5  ;;  %v1454_v10 = vld [vmem:[%s1655_s21 + $0x124] ss:$24 sps:$4 sm:$0xff]   ;;  %v1456_v12 = vld [vmem:[%s1655_s21 + $0xf8] ss:$24 sps:$4 sm:$0xff]   ;;  %v1460_v14 = vld [vmem:[%s1655_s21 + $0xf4] ss:$24 sps:$4 sm:$0xff]  }
  0x12   : > { %443 = vmatpush1.bf16.msra.mxu0 %v1448_v6  ;;  %486 = vmatpush1.bf16.msra.mxu1 %v1449_v7  ;;  %v1455_v11 = vld [vmem:[%s1655_s21 + $0x12c] ss:$24 sps:$4 sm:$0xff]   ;;  %v1458_v13 = vld [vmem:[%s1655_s21 + $0x100] ss:$24 sps:$4 sm:$0xff]   ;;  %v1461_v15 = vld [vmem:[%s1655_s21 + $0xfc] ss:$24 sps:$4 sm:$0xff]  }
  0x13   : > { %444 = vmatprep.subr.bf16.mxu0 %v1450_v8  ;;  %487 = vmatprep.subr.bf16.mxu1 %v1452_v9  ;;  %v1462_v16 = vld [vmem:[%s1655_s21 + $0xc8] ss:$24 sps:$4 sm:$0xff]   ;;  %v1466_v18 = vld [vmem:[%s1655_s21 + $0xc4] ss:$24 sps:$4 sm:$0xff]   ;;  %v1468_v20 = vld [vmem:[%s1655_s21 + $0x98] ss:$24 sps:$4 sm:$0xff]  }
  0x14   : > { %v1464_v17 = vld [vmem:[%s1655_s21 + $0xd0] ss:$24 sps:$4 sm:$0xff]   ;;  %v1467_v19 = vld [vmem:[%s1655_s21 + $0xcc] ss:$24 sps:$4 sm:$0xff]   ;;  %v1470_v21 = vld [vmem:[%s1655_s21 + $0xa0] ss:$24 sps:$4 sm:$0xff]  }
  0x15   : > { %v1472_v22 = vld [vmem:[%s1655_s21 + $0x94] ss:$24 sps:$4 sm:$0xff]   ;;  %v1474_v24 = vld [vmem:[%s1655_s21 + $0x68] ss:$24 sps:$4 sm:$0xff]   ;;  %v1478_v26 = vld [vmem:[%s1655_s21 + $0x64] ss:$24 sps:$4 sm:$0xff]  }
  0x16   : > { %445 = vmatpush1.bf16.msra.mxu0 %v1454_v10  ;;  %488 = vmatpush1.bf16.msra.mxu1 %v1455_v11  ;;  %v1473_v23 = vld [vmem:[%s1655_s21 + $0x9c] ss:$24 sps:$4 sm:$0xff]   ;;  %v1476_v25 = vld [vmem:[%s1655_s21 + $0x70] ss:$24 sps:$4 sm:$0xff]   ;;  %v1479_v27 = vld [vmem:[%s1655_s21 + $0x6c] ss:$24 sps:$4 sm:$0xff]  }
  0x17   : > { %446 = vmatprep.subr.bf16.mxu0 %v1456_v12  ;;  %489 = vmatprep.subr.bf16.mxu1 %v1458_v13  ;;  %v1480_v28 = vld [vmem:[%s1655_s21 + $0x38] ss:$24 sps:$4 sm:$0xff]   ;;  %v1484_v30 = vld [vmem:[%s1655_s21 + $0x34] ss:$24 sps:$4 sm:$0xff]   ;;  %v1486_v32 = vld [vmem:[%s1655_s21 + $0x8] ss:$24 sps:$4 sm:$0xff]  }
  0x18   : > { %v1482_v29 = vld [vmem:[%s1655_s21 + $0x40] ss:$24 sps:$4 sm:$0xff]   ;;  %v1485_v31 = vld [vmem:[%s1655_s21 + $0x3c] ss:$24 sps:$4 sm:$0xff]   ;;  %v1488_v33 = vld [vmem:[%s1655_s21 + $0x10] ss:$24 sps:$4 sm:$0xff]  }
  0x19   : > { %v1490_v34 = vld [vmem:[%s1655_s21 + $0x4] ss:$24 sps:$4 sm:$0xff]   ;;  %v1492_v36 = vld [vmem:[%s1655_s21 + $0x188] ss:$24 sps:$4 sm:$0xff]   ;;  %v1503_v40 = vld [vmem:[%s1655_s21 + $0x154] ss:$24 sps:$4 sm:$0xff]  }
  0x1a   : > { %447 = vmatpush1.bf16.msra.mxu0 %v1460_v14  ;;  %490 = vmatpush1.bf16.msra.mxu1 %v1461_v15  ;;  %v1491_v35 = vld [vmem:[%s1655_s21 + $0xc] ss:$24 sps:$4 sm:$0xff]   ;;  %v1494_v37 = vld [vmem:[%s1655_s21 + $0x190] ss:$24 sps:$4 sm:$0xff]   ;;  %v1698_v41 = vld [vmem:[%s1655_s21 + $0x15c] ss:$24 sps:$4 sm:$0xff]  }
  0x1b   : > { %448 = vmatprep.subr.bf16.mxu0 %v1462_v16  ;;  %491 = vmatprep.subr.bf16.mxu1 %v1464_v17  ;;  %v1496_v38 = vld [vmem:[%s1655_s21 + $0x184] ss:$24 sps:$4 sm:$0xff]   ;;  %v1501_v43 = vld [vmem:[%s1655_s21 + $0x150] ss:$24 sps:$4 sm:$0xff]   ;;  %v1507_v48 = vld [vmem:[%s1655_s21 + $0x120] ss:$24 sps:$4 sm:$0xff]  }
  0x1c   : > { %v1497_v39 = vld [vmem:[%s1655_s21 + $0x18c] ss:$24 sps:$4 sm:$0xff]   ;;  %v1705_v44 = vld [vmem:[%s1655_s21 + $0x158] ss:$24 sps:$4 sm:$0xff]   ;;  %v1717_v49 = vld [vmem:[%s1655_s21 + $0x128] ss:$24 sps:$4 sm:$0xff]  }
  0x1d   : > { %v1509_v45 = vld [vmem:[%s1655_s21 + $0x124] ss:$24 sps:$4 sm:$0xff]   ;;  %v1515_v50 = vld [vmem:[%s1655_s21 + $0xf4] ss:$24 sps:$4 sm:$0xff]   ;;  %v1513_v52 = vld [vmem:[%s1655_s21 + $0xf0] ss:$24 sps:$4 sm:$0xff]  }
  0x1e   : > { %449 = vmatpush1.bf16.msra.mxu0 %v1466_v18  ;;  %492 = vmatpush1.bf16.msra.mxu1 %v1467_v19  ;;  %v1710_v46 = vld [vmem:[%s1655_s21 + $0x12c] ss:$24 sps:$4 sm:$0xff]   ;;  %v1723_v51 = vld [vmem:[%s1655_s21 + $0xfc] ss:$24 sps:$4 sm:$0xff]   ;;  %v1729_v53 = vld [vmem:[%s1655_s21 + $0xf8] ss:$24 sps:$4 sm:$0xff]  }
  0x1f   : > { %450 = vmatprep.subr.bf16.mxu0 %v1468_v20  ;;  %493 = vmatprep.subr.bf16.mxu1 %v1470_v21  ;;  %v1521_v54 = vld [vmem:[%s1655_s21 + $0xc4] ss:$24 sps:$4 sm:$0xff]   ;;  %v1519_v56 = vld [vmem:[%s1655_s21 + $0xc0] ss:$24 sps:$4 sm:$0xff]   ;;  %v1527_v58 = vld [vmem:[%s1655_s21 + $0x94] ss:$24 sps:$4 sm:$0xff]  }
  0x20   : > { %v1735_v55 = vld [vmem:[%s1655_s21 + $0xcc] ss:$24 sps:$4 sm:$0xff]   ;;  %v1739_v57 = vld [vmem:[%s1655_s21 + $0xc8] ss:$24 sps:$4 sm:$0xff]   ;;  %v1745_v59 = vld [vmem:[%s1655_s21 + $0x9c] ss:$24 sps:$4 sm:$0xff]  }
  0x21   : > { %v1525_v60 = vld [vmem:[%s1655_s21 + $0x90] ss:$24 sps:$4 sm:$0xff]   ;;  %v1533_v62 = vld [vmem:[%s1655_s21 + $0x64] ss:$24 sps:$4 sm:$0xff]   ;;  %v1531_v0 = vld [vmem:[%s1655_s21 + $0x60] ss:$24 sps:$4 sm:$0xff]  }
  0x22   : > { %451 = vmatpush1.bf16.msra.mxu0 %v1472_v22  ;;  %494 = vmatpush1.bf16.msra.mxu1 %v1473_v23  ;;  %v1749_v61 = vld [vmem:[%s1655_s21 + $0x98] ss:$24 sps:$4 sm:$0xff]   ;;  %v1755_v63 = vld [vmem:[%s1655_s21 + $0x6c] ss:$24 sps:$4 sm:$0xff]   ;;  %v1759_v1 = vld [vmem:[%s1655_s21 + $0x68] ss:$24 sps:$4 sm:$0xff]  }
  0x23   : > { %452 = vmatprep.subr.bf16.mxu0 %v1474_v24  ;;  %495 = vmatprep.subr.bf16.mxu1 %v1476_v25  ;;  %v1539_v2 = vld [vmem:[%s1655_s21 + $0x34] ss:$24 sps:$4 sm:$0xff]   ;;  %v1537_v4 = vld [vmem:[%s1655_s21 + $0x30] ss:$24 sps:$4 sm:$0xff]   ;;  %v1545_v6 = vld [vmem:[%s1655_s21 + $0x4] ss:$24 sps:$4 sm:$0xff]  }
  0x24   : > { %v1765_v3 = vld [vmem:[%s1655_s21 + $0x3c] ss:$24 sps:$4 sm:$0xff]   ;;  %v1770_v5 = vld [vmem:[%s1655_s21 + $0x38] ss:$24 sps:$4 sm:$0xff]   ;;  %v1775_v7 = vld [vmem:[%s1655_s21 + $0xc] ss:$24 sps:$4 sm:$0xff]  }
  0x25   : > { %v1543_v8 = vld [vmem:[%s1655_s21] ss:$24 sps:$4 sm:$0xff]   ;;  %v1551_v10 = vld [vmem:[%s1655_s21 + $0x184] ss:$24 sps:$4 sm:$0xff]   ;;  %v1563_v17 = vld [vmem:[%s1655_s21 + $0x134] ss:$24 sps:$4 sm:$0xff]  }
  0x26   : > { %453 = vmatpush1.bf16.msra.mxu0 %v1478_v26  ;;  %496 = vmatpush1.bf16.msra.mxu1 %v1479_v27  ;;  %v1780_v9 = vld [vmem:[%s1655_s21 + $0x8] ss:$24 sps:$4 sm:$0xff]   ;;  %v1785_v11 = vld [vmem:[%s1655_s21 + $0x18c] ss:$24 sps:$4 sm:$0xff]  }
  0x27   : > { %454 = vmatprep.subr.bf16.mxu0 %v1480_v28  ;;  %497 = vmatprep.subr.bf16.mxu1 %v1482_v29  ;;  %v1549_v12 = vld [vmem:[%s1655_s21 + $0x180] ss:$24 sps:$4 sm:$0xff]   ;;  %v1560_v14 = vld [vmem:[%s1655_s21 + $0x164] ss:$24 sps:$4 sm:$0xff]   ;;  %v1561_v19 = vld [vmem:[%s1655_s21 + $0x130] ss:$24 sps:$4 sm:$0xff]  }
  0x28   : > { %v1790_v13 = vld [vmem:[%s1655_s21 + $0x188] ss:$24 sps:$4 sm:$0xff]   ;;  %v1585_v18 = vld [vmem:[%s1854_s1 + $0x24] ss:$8 sps:$4 sm:$0xff]  }
  0x29   : > { %v1557_v15 = vld [vmem:[%s1854_s1] ss:$8 sps:$4 sm:$0xff]   ;;  %v1566_v20 = vld [vmem:[%s1655_s21 + $0x104] ss:$24 sps:$4 sm:$0xff]   ;;  %v1569_v22 = vld [vmem:[%s1655_s21 + $0xd4] ss:$24 sps:$4 sm:$0xff]  }
  0x2a   : > { %455 = vmatpush1.bf16.msra.mxu0 %v1484_v30  ;;  %498 = vmatpush1.bf16.msra.mxu1 %v1485_v31  ;;  %v1558_v16 = vld [vmem:[%s1655_s21 + $0x160] ss:$24 sps:$4 sm:$0xff]   ;;  %v1567_v23 = vld [vmem:[%s1655_s21 + $0xd0] ss:$24 sps:$4 sm:$0xff]   ;;  %v1572_v24 = vld [vmem:[%s1655_s21 + $0xa4] ss:$24 sps:$4 sm:$0xff]  }
  0x2b   : > { %456 = vmatprep.subr.bf16.mxu0 %v1486_v32  ;;  %499 = vmatprep.subr.bf16.mxu1 %v1488_v33  ;;  %v1564_v21 = vld [vmem:[%s1655_s21 + $0x100] ss:$24 sps:$4 sm:$0xff]   ;;  %v1575_v26 = vld [vmem:[%s1655_s21 + $0x74] ss:$24 sps:$4 sm:$0xff]   ;;  %v1573_v27 = vld [vmem:[%s1655_s21 + $0x70] ss:$24 sps:$4 sm:$0xff]  }
  0x2c   : > { %v1570_v25 = vld [vmem:[%s1655_s21 + $0xa0] ss:$24 sps:$4 sm:$0xff]   ;;  %v1578_v28 = vld [vmem:[%s1655_s21 + $0x44] ss:$24 sps:$4 sm:$0xff]   ;;  %v1581_v30 = vld [vmem:[%s1655_s21 + $0x14] ss:$24 sps:$4 sm:$0xff]  }
  0x2d   : > { %v1576_v29 = vld [vmem:[%s1655_s21 + $0x40] ss:$24 sps:$4 sm:$0xff]   ;;  %v1579_v31 = vld [vmem:[%s1655_s21 + $0x10] ss:$24 sps:$4 sm:$0xff]   ;;  %v1584_v32 = vld [vmem:[%s1655_s21 + $0x194] ss:$24 sps:$4 sm:$0xff]  }
  0x2e   : > { %457 = vmatpush1.bf16.msra.mxu0 %v1490_v34  ;;  %500 = vmatpush1.bf16.msra.mxu1 %v1491_v35  ;;  %v1582_v33 = vld [vmem:[%s1655_s21 + $0x190] ss:$24 sps:$4 sm:$0xff]  }
  0x2f   : > { %472 = vmatprep.subr.bf16.mxu0 %v1492_v36  ;;  %515 = vmatprep.subr.bf16.mxu1 %v1494_v37  ;;  %v1587_v34 = vld [vmem:[%s1854_s1 + $0x20] ss:$8 sps:$4 sm:$0xff]  }
  0x32   : > { %473 = vmatpush2.bf16.msra.mxu0 %v1496_v38  ;;  %516 = vmatpush2.bf16.msra.mxu1 %v1497_v39 }
  0x33   : > { %720 = vmatprep.subr.bf16.mxu0 %v1503_v40  ;;  %763 = vmatprep.subr.bf16.mxu1 %v1698_v41 }
  0x35   : > { %475 = vmatmul.mubr.bf16.vlgmr.msra.gmra.mxu0 %v1498_v42  ;;  %518 = vmatmul.mubr.bf16.vlgmr.msra.gmra.mxu1 %v1498_v42 }
  0x36   : > { %721 = vmatpush1.bf16.msra.mxu0 %v1501_v43  ;;  %764 = vmatpush1.bf16.msra.mxu1 %v1705_v44 }
  0x37   : > { %722 = vmatprep.subr.bf16.mxu0 %v1509_v45  ;;  %765 = vmatprep.subr.bf16.mxu1 %v1710_v46 }
  0x38   : > { %1370 = vmatprep.mubr.msk.bf16.mxu0 %vm438_vm0, %v1555_v47  ;;  %1371 = vmatprep.mubr.msk.bf16.mxu1 %vm438_vm0, %v1555_v47 }
  0x3a   : > { %723 = vmatpush1.bf16.msra.mxu0 %v1507_v48  ;;  %766 = vmatpush1.bf16.msra.mxu1 %v1717_v49 }
  0x3b   : > { %724 = vmatprep.subr.bf16.mxu0 %v1515_v50  ;;  %767 = vmatprep.subr.bf16.mxu1 %v1723_v51 }
  0x3e   : > { %725 = vmatpush1.bf16.msra.mxu0 %v1513_v52  ;;  %768 = vmatpush1.bf16.msra.mxu1 %v1729_v53 }
  0x3f   : > { %726 = vmatprep.subr.bf16.mxu0 %v1521_v54  ;;  %769 = vmatprep.subr.bf16.mxu1 %v1735_v55 }
  0x42   : > { %727 = vmatpush1.bf16.msra.mxu0 %v1519_v56  ;;  %770 = vmatpush1.bf16.msra.mxu1 %v1739_v57 }
  0x43   : > { %728 = vmatprep.subr.bf16.mxu0 %v1527_v58  ;;  %771 = vmatprep.subr.bf16.mxu1 %v1745_v59 }
  0x46   : > { %729 = vmatpush1.bf16.msra.mxu0 %v1525_v60  ;;  %772 = vmatpush1.bf16.msra.mxu1 %v1749_v61 }
  0x47   : > { %730 = vmatprep.subr.bf16.mxu0 %v1533_v62  ;;  %773 = vmatprep.subr.bf16.mxu1 %v1755_v63 }
  0x4a   : > { %731 = vmatpush1.bf16.msra.mxu0 %v1531_v0  ;;  %774 = vmatpush1.bf16.msra.mxu1 %v1759_v1 }
  0x4b   : > { %732 = vmatprep.subr.bf16.mxu0 %v1539_v2  ;;  %775 = vmatprep.subr.bf16.mxu1 %v1765_v3 }
  0x4e   : > { %733 = vmatpush1.bf16.msra.mxu0 %v1537_v4  ;;  %776 = vmatpush1.bf16.msra.mxu1 %v1770_v5 }
  0x4f   : > { %734 = vmatprep.subr.bf16.mxu0 %v1545_v6  ;;  %777 = vmatprep.subr.bf16.mxu1 %v1775_v7 }
  0x52   : > { %735 = vmatpush1.bf16.msra.mxu0 %v1543_v8  ;;  %778 = vmatpush1.bf16.msra.mxu1 %v1780_v9 }
  0x53   : > { %750 = vmatprep.subr.bf16.mxu0 %v1551_v10  ;;  %793 = vmatprep.subr.bf16.mxu1 %v1785_v11 }
  0x56   : > { %751 = vmatpush2.bf16.msra.mxu0 %v1549_v12  ;;  %794 = vmatpush2.bf16.msra.mxu1 %v1790_v13 }
  0x57   : > { %1037 = vmatprep.subr.bf16.mxu0 %v1698_v41  ;;  %1080 = vmatprep.subr.bf16.mxu1 %v1560_v14 }
  0x59   : > { %753 = vmatmul.mubr.bf16.vlgmr.msra.gmra.mxu0 %v1557_v15  ;;  %796 = vmatmul.mubr.bf16.vlgmr.msra.gmra.mxu1 %v1557_v15 }
  0x5a   : > { %1038 = vmatpush1.bf16.msra.mxu0 %v1705_v44  ;;  %1081 = vmatpush1.bf16.msra.mxu1 %v1558_v16 }
  0x5b   : > { %1039 = vmatprep.subr.bf16.mxu0 %v1710_v46  ;;  %1082 = vmatprep.subr.bf16.mxu1 %v1563_v17 }
  0x5c   : > { %1412 = vmatprep.mubr.msk.bf16.mxu0 %vm438_vm0, %v1585_v18  ;;  %1413 = vmatprep.mubr.msk.bf16.mxu1 %vm438_vm0, %v1585_v18 }
  0x5e   : > { %1040 = vmatpush1.bf16.msra.mxu0 %v1717_v49  ;;  %1083 = vmatpush1.bf16.msra.mxu1 %v1561_v19 }
  0x5f   : > { %1041 = vmatprep.subr.bf16.mxu0 %v1723_v51  ;;  %1084 = vmatprep.subr.bf16.mxu1 %v1566_v20 }
  0x62   : > { %1042 = vmatpush1.bf16.msra.mxu0 %v1729_v53  ;;  %1085 = vmatpush1.bf16.msra.mxu1 %v1564_v21 }
  0x63   : > { %1043 = vmatprep.subr.bf16.mxu0 %v1735_v55  ;;  %1086 = vmatprep.subr.bf16.mxu1 %v1569_v22 }
  0x66   : > { %1044 = vmatpush1.bf16.msra.mxu0 %v1739_v57  ;;  %1087 = vmatpush1.bf16.msra.mxu1 %v1567_v23 }
  0x67   : > { %1045 = vmatprep.subr.bf16.mxu0 %v1745_v59  ;;  %1088 = vmatprep.subr.bf16.mxu1 %v1572_v24 }
  0x6a   : > { %1046 = vmatpush1.bf16.msra.mxu0 %v1749_v61  ;;  %1089 = vmatpush1.bf16.msra.mxu1 %v1570_v25 }
  0x6b   : > { %1047 = vmatprep.subr.bf16.mxu0 %v1755_v63  ;;  %1090 = vmatprep.subr.bf16.mxu1 %v1575_v26 }
  0x6e   : > { %1048 = vmatpush1.bf16.msra.mxu0 %v1759_v1  ;;  %1091 = vmatpush1.bf16.msra.mxu1 %v1573_v27 }
  0x6f   : > { %1049 = vmatprep.subr.bf16.mxu0 %v1765_v3  ;;  %1092 = vmatprep.subr.bf16.mxu1 %v1578_v28 }
  0x72   : > { %1050 = vmatpush1.bf16.msra.mxu0 %v1770_v5  ;;  %1093 = vmatpush1.bf16.msra.mxu1 %v1576_v29 }
  0x73   : > { %1051 = vmatprep.subr.bf16.mxu0 %v1775_v7  ;;  %1094 = vmatprep.subr.bf16.mxu1 %v1581_v30 }
  0x76   : > { %1052 = vmatpush1.bf16.msra.mxu0 %v1780_v9  ;;  %1095 = vmatpush1.bf16.msra.mxu1 %v1579_v31 }
  0x77   : > { %1067 = vmatprep.subr.bf16.mxu0 %v1785_v11  ;;  %1110 = vmatprep.subr.bf16.mxu1 %v1584_v32 }
  0x7a   : > { %1068 = vmatpush2.bf16.msra.mxu0 %v1790_v13  ;;  %1111 = vmatpush2.bf16.msra.mxu1 %v1582_v33 }
  0x7d   : > { %1070 = vmatmul.mubr.bf16.vlgmr.msra.gmra.mxu0 %v1587_v34  ;;  %1113 = vmatmul.mubr.bf16.vlgmr.msra.gmra.mxu1 %v1587_v34 }
  0x88   : > { %v1136_v57 = vpop.permute.xlu0 %1135 }
  0x8c   : > { %v1141_v22 = vpop.permute.xlu0 %1140 }
  0xf5   : > { %v476_v35 = vpop.f32.mrf.mxu0  ;;  %v519_v36 = vpop.f32.mrf.mxu1 }
  0xf7   : > { %v478_v37 = vpop.f32.mrf.mxu0  ;;  %v521_v38 = vpop.f32.mrf.mxu1 }
  0xf9   : > { %v480_v39 = vpop.f32.mrf.mxu0  ;;  %v523_v40 = vpop.f32.mrf.mxu1 }
  0xfb   : > { %v482_v41 = vpop.f32.mrf.mxu0  ;;  %v525_v42 = vpop.f32.mrf.mxu1 }
 0x119   : > { %v754_v43 = vpop.f32.mrf.mxu0  ;;  %v797_v44 = vpop.f32.mrf.mxu1 }
 0x11a   : > { %v755_v51 = vadd.f32 %v754_v43, %v476_v35  ;;  %v798_v52 = vadd.f32 %v797_v44, %v519_v36 }
 0x11b   : > { %v756_v45 = vpop.f32.mrf.mxu0  ;;  %v799_v46 = vpop.f32.mrf.mxu1 }
 0x11c   : > { %v757_v55 = vadd.f32 %v756_v45, %v478_v37  ;;  %v800_v56 = vadd.f32 %v799_v46, %v521_v38 }
 0x11d   : > { %v758_v47 = vpop.f32.mrf.mxu0  ;;  %v801_v48 = vpop.f32.mrf.mxu1 }
 0x11e   : > { %v759_v2 = vadd.f32 %v758_v47, %v480_v39  ;;  %v802_v3 = vadd.f32 %v801_v48, %v523_v40 }
 0x11f   : > { %v760_v49 = vpop.f32.mrf.mxu0  ;;  %v803_v50 = vpop.f32.mrf.mxu1 }
 0x120   : > { %v761_v6 = vadd.f32 %v760_v49, %v482_v41  ;;  %v804_v7 = vadd.f32 %v803_v50, %v525_v42 }
 0x13d   : > { %v1071_v53 = vpop.f32.mrf.mxu0  ;;  %v1114_v54 = vpop.f32.mrf.mxu1 }
 0x13e   : > { %v1123_v58 = vadd.f32 %v1071_v53, %v755_v51  ;;  %v1125_v59 = vadd.f32 %v1114_v54, %v798_v52 }
 0x13f   : > { %v1073_v60 = vpop.f32.mrf.mxu0  ;;  %v1116_v61 = vpop.f32.mrf.mxu1 }
 0x140   : > { %v1143_v62 = vadd.f32 %v1136_v57, %v1123_v58  ;;  %v1841_v63 = vadd.f32 %v1136_v57, %v1125_v59  ;;  %v1124_v0 = vadd.f32 %v1073_v60, %v757_v55  ;;  %v1126_v1 = vadd.f32 %v1116_v61, %v800_v56 }
 0x141   : > { %v1075_v4 = vpop.f32.mrf.mxu0  ;;  %v1118_v5 = vpop.f32.mrf.mxu1 }
 0x142   : > { %v1159_v8 = vmin.f32 %v1143_v62, 0.0  ;;  %v1161_v9 = vmin.f32 %v1841_v63, 0.0  ;;  %v1144_v10 = vadd.f32 %v1136_v57, %v1124_v0  ;;  %v1146_v11 = vadd.f32 %v1136_v57, %v1126_v1 }
 0x143   : > { %v1127_v12 = vadd.f32 %v1075_v4, %v759_v2  ;;  %v1129_v13 = vadd.f32 %v1118_v5, %v802_v3  ;;  %v1077_v14 = vpop.f32.mrf.mxu0  ;;  %v1120_v15 = vpop.f32.mrf.mxu1  ;;  %vm1151_vm1 = vcmp.gt.f32.partialorder %v1143_v62, 0.0  ;;  %vm1153_vm3 = vcmp.gt.f32.partialorder %v1841_v63, 0.0 }
 0x144   : > { %v1167_v16 = vmul.f32 1.442695, %v1159_v8  ;;  %v1171_v17 = vmul.f32 1.442695, %v1161_v9  ;;  %v1128_v18 = vadd.f32 %v1077_v14, %v761_v6  ;;  %v1130_v19 = vadd.f32 %v1120_v15, %v804_v7 }
 0x145   : > { %v1160_v20 = vmin.f32 %v1144_v10, 0.0  ;;  %v1162_v21 = vmin.f32 %v1146_v11, 0.0  ;;  %v1147_v23 = vadd.f32 %v1141_v22, %v1127_v12  ;;  %v1149_v24 = vadd.f32 %v1141_v22, %v1129_v13 }
 0x146   : > { %1588 = vpow2.f32 %v1167_v16  ;;  %v1148_v25 = vadd.f32 %v1141_v22, %v1128_v18  ;;  %v1150_v28 = vadd.f32 %v1141_v22, %v1130_v19  ;;  %vm1152_vm2 = vcmp.gt.f32.partialorder %v1144_v10, 0.0 }
 0x147   : > { %1590 = vpow2.f32 %v1171_v17  ;;  %v1169_v26 = vmul.f32 1.442695, %v1160_v20  ;;  %v1173_v27 = vmul.f32 1.442695, %v1162_v21  ;;  %v1163_v29 = vmin.f32 %v1147_v23, 0.0 }
 0x148   : > { %v1165_v30 = vmin.f32 %v1149_v24, 0.0  ;;  %v1164_v31 = vmin.f32 %v1148_v25, 0.0  ;;  %v1166_v34 = vmin.f32 %v1150_v28, 0.0  ;;  %vm1154_vm4 = vcmp.gt.f32.partialorder %v1146_v11, 0.0 }
 0x149   : > { %1592 = vpow2.f32 %v1169_v26  ;;  %v1175_v32 = vmul.f32 1.442695, %v1163_v29  ;;  %vm1155_vm5 = vcmp.gt.f32.partialorder %v1147_v23, 0.0  ;;  %vm1156_vm6 = vcmp.gt.f32.partialorder %v1148_v25, 0.0 }
 0x14a   : > { %1594 = vpow2.f32 %v1173_v27  ;;  %v1179_v33 = vmul.f32 1.442695, %v1165_v30  ;;  %v1177_v35 = vmul.f32 1.442695, %v1164_v31  ;;  %v1181_v36 = vmul.f32 1.442695, %v1166_v34 }
 0x14b   : > { %1596 = vpow2.f32 %v1175_v32  ;;  %vm1157_vm7 = vcmp.gt.f32.partialorder %v1149_v24, 0.0  ;;  %vm1158_vm8 = vcmp.gt.f32.partialorder %v1150_v28, 0.0 }
 0x14c   : > { %1598 = vpow2.f32 %v1179_v33 }
 0x14d   : > { %1600 = vpow2.f32 %v1177_v35 }
 0x14e   : > { %1602 = vpow2.f32 %v1181_v36 }
 0x153   : > { %v1589_v37 = vpop.eup %1588 }
 0x154   : > { %v1591_v38 = vpop.eup %1590  ;;  %v1414_v39 = vadd.f32 -1.0, %v1589_v37 }
 0x155   : > { %v1416_v41 = vadd.f32 -1.0, %v1591_v38 }
 0x156   : > { %v1593_v40 = vpop.eup %1592  ;;  %v1191_v46 = vsel %vm1151_vm1, %v1143_v62, %v1414_v39 }
 0x157   : > { %v1595_v42 = vpop.eup %1594  ;;  %v1415_v43 = vadd.f32 -1.0, %v1593_v40  ;;  %v1193_v49 = vsel %vm1153_vm3, %v1841_v63, %v1416_v41 }
 0x158   : > { %v1417_v44 = vadd.f32 -1.0, %v1595_v42  ;;  %v1597_v45 = vpop.eup %1596 }
 0x159   : > { %v1192_v47 = vsel %vm1152_vm2, %v1144_v10, %v1415_v43  ;;  %v1599_v48 = vpop.eup %1598  ;;  %v1418_v52 = vadd.f32 -1.0, %v1597_v45 }
 0x15a   : > { %v1429_v50 = vpack.c.bf16 %v1192_v47, %v1191_v46  ;;  %v1194_v51 = vsel %vm1154_vm4, %v1146_v11, %v1417_v44  ;;  %v1601_v53 = vpop.eup %1600  ;;  %v1420_v55 = vadd.f32 -1.0, %v1599_v48 }
 0x15b   : > { %v1430_v54 = vpack.c.bf16 %v1194_v51, %v1193_v49  ;;  %v1603_v56 = vpop.eup %1602  ;;  %v1419_v57 = vadd.f32 -1.0, %v1601_v53  ;;  %v1195_v59 = vsel %vm1155_vm5, %v1147_v23, %v1418_v52 }
 0x15c   : > { %1223 = vst [vmem:[%s170_s10] sm:$0xff] %v1429_v50  ;;  %v1421_v58 = vadd.f32 -1.0, %v1603_v56  ;;  %v1197_v61 = vsel %vm1157_vm7, %v1149_v24, %v1420_v55 }
 0x15d   : > { %1224 = vst [vmem:[%s170_s10 + $0x8] sm:$0xff] %v1430_v54  ;;  %v1196_v60 = vsel %vm1156_vm6, %v1148_v25, %v1419_v57 }
 0x15e   : > { %v1431_v62 = vpack.c.bf16 %v1196_v60, %v1195_v59  ;;  %v1198_v63 = vsel %vm1158_vm8, %v1150_v28, %v1421_v58 }
 0x15f   : > { %v1432_v0 = vpack.c.bf16 %v1198_v63, %v1197_v61 }
 0x160   : > { %1225 = vst [vmem:[%s170_s10 + $0x10] sm:$0xff] %v1431_v62 }
 0x161   : > { %1226 = vst [vmem:[%s170_s10 + $0x18] sm:$0xff] %v1432_v0 }
 0x162 PF: > { %s13_s12 = sadd.s32 1, %s1610_s12  }
 0x163   : > { %p10_p4 = scmp.ge.s32.totalorder %s13_s12, 4  }
 0x165   :  { %12 = sbr.rel (!%p10_p4) target bundleno = 1 (0x1), region = 64 }

// kernel: sunet3d_forward.13
= control target key start
LH: loop header
LB: loop body
LE: loop exit
PB: predicated region body
PF: predicated region fallthrough
CT: control target
= control target key end

     0   :  { %s2722_s12 = smov 0   ;;  %s3187_s0 = inlined_call_operand.vmem [shape: bf16[2,144,1280], index: 0, kind: input, shape index: {}]   ;;  %s3188_s1 = inlined_call_operand.vmem [shape: bf16[3,8,144], index: 1, kind: input, shape index: {}]   ;;  %s3189_s2 = inlined_call_operand.vmem [shape: f32[8,1], index: 2, kind: input, shape index: {}]   ;;  %s3190_s3 = inlined_call_operand.vmem [shape: bf16[2,8,1024], index: 3, kind: output, shape index: {}]  }
   0x1 LB: > { %s2154_s13 = sadd.s32 4294967295, %s2699_s12   ;;  %p2158_p0 = scmp.ge.s32.totalorder %s2699_s12, 1  ;;  %s2699_s12 = sphi %s2722_s12, %s13_s12  }
   0x2   : > { %p137_p1 = scmp.lt.s32.totalorder %s2699_s12, 3 }
   0x4   : > { %p138_p2 = pnand %p2158_p0, %p137_p1 }
   0x5   : > { %p161_p3 = scmp.lt.s32.totalorder (!%p138_p2), %s2154_s13, 1 }
   0x6   : > { %141 = sbr.rel (%p138_p2) target bundleno = 456 (0x1c8), region = 32 }
   0xb   : > { %v2733_v0 = vld [vmem:[%s3188_s1 + $0x8] sm:$0xff]  ;;  %vm685_vm0 = vcmask 130048   ;;  %s3192_s13 = smov (!%p161_p3, %s2154_s13), 1 }
   0xc   : > { %v2737_v1 = vcombine.high %v2733_v0, %v2733_v0  ;;  %s2417_s16 = smul.u32 720, %s3192_s13  ;;  %v2791_v40 = vcombine.low %v2733_v0, %v2733_v0  ;;  %s2412_s26 = sshll.u32 %s3192_s13, 5 }
   0xd   : > { %s3166_s29 = scalar_lea.vmem %s3190_s3, %s2412_s26 }
   0xe   : > { %2237 = vmatprep.mubr.msk.bf16.mxu0 %vm685_vm0, %v2737_v1  ;;  %2238 = vmatprep.mubr.msk.bf16.mxu1 %vm685_vm0, %v2737_v1  ;;  %s2749_s19 = scalar_lea.vmem %s3187_s0, %s2417_s16 }
   0xf   : > { %v2428_v2 = vld [vmem:[%s2749_s19 + $0x238] ss:$40 sps:$4 sm:$0xff]   ;;  %v2432_v4 = vld [vmem:[%s2749_s19 + $0x234] ss:$40 sps:$4 sm:$0xff]   ;;  %v2434_v6 = vld [vmem:[%s2749_s19 + $0x1e8] ss:$40 sps:$4 sm:$0xff]  }
  0x10   : > { %v2430_v3 = vld [vmem:[%s2749_s19 + $0x240] ss:$40 sps:$4 sm:$0xff]   ;;  %689 = vmatprep.subr.bf16.mxu0 %v2428_v2  ;;  %v2433_v5 = vld [vmem:[%s2749_s19 + $0x23c] ss:$40 sps:$4 sm:$0xff]   ;;  %v2436_v7 = vld [vmem:[%s2749_s19 + $0x1f0] ss:$40 sps:$4 sm:$0xff]  }
  0x11   : > { %730 = vmatprep.subr.bf16.mxu1 %v2430_v3  ;;  %690 = vmatpush1.bf16.msra.mxu0 %v2432_v4  ;;  %v2438_v8 = vld [vmem:[%s2749_s19 + $0x1e4] ss:$40 sps:$4 sm:$0xff]   ;;  %v2440_v10 = vld [vmem:[%s2749_s19 + $0x198] ss:$40 sps:$4 sm:$0xff]   ;;  %v2444_v12 = vld [vmem:[%s2749_s19 + $0x194] ss:$40 sps:$4 sm:$0xff]  }
  0x12   : > { %731 = vmatpush1.bf16.msra.mxu1 %v2433_v5  ;;  %691 = vmatprep.subr.bf16.mxu0 %v2434_v6  ;;  %v2439_v9 = vld [vmem:[%s2749_s19 + $0x1ec] ss:$40 sps:$4 sm:$0xff]   ;;  %v2442_v11 = vld [vmem:[%s2749_s19 + $0x1a0] ss:$40 sps:$4 sm:$0xff]   ;;  %v2445_v13 = vld [vmem:[%s2749_s19 + $0x19c] ss:$40 sps:$4 sm:$0xff]  }
  0x13   : > { %732 = vmatprep.subr.bf16.mxu1 %v2436_v7  ;;  %v2446_v14 = vld [vmem:[%s2749_s19 + $0x148] ss:$40 sps:$4 sm:$0xff]   ;;  %v2450_v16 = vld [vmem:[%s2749_s19 + $0x144] ss:$40 sps:$4 sm:$0xff]   ;;  %v2452_v18 = vld [vmem:[%s2749_s19 + $0xf8] ss:$40 sps:$4 sm:$0xff]  }
  0x14   : > { %v2448_v15 = vld [vmem:[%s2749_s19 + $0x150] ss:$40 sps:$4 sm:$0xff]   ;;  %v2451_v17 = vld [vmem:[%s2749_s19 + $0x14c] ss:$40 sps:$4 sm:$0xff]   ;;  %v2454_v19 = vld [vmem:[%s2749_s19 + $0x100] ss:$40 sps:$4 sm:$0xff]  }
  0x15   : > { %692 = vmatpush1.bf16.msra.mxu0 %v2438_v8  ;;  %v2456_v20 = vld [vmem:[%s2749_s19 + $0xf4] ss:$40 sps:$4 sm:$0xff]   ;;  %v2458_v22 = vld [vmem:[%s2749_s19 + $0xa8] ss:$40 sps:$4 sm:$0xff]   ;;  %v2462_v24 = vld [vmem:[%s2749_s19 + $0xa4] ss:$40 sps:$4 sm:$0xff]  }
  0x16   : > { %733 = vmatpush1.bf16.msra.mxu1 %v2439_v9  ;;  %693 = vmatprep.subr.bf16.mxu0 %v2440_v10  ;;  %v2457_v21 = vld [vmem:[%s2749_s19 + $0xfc] ss:$40 sps:$4 sm:$0xff]   ;;  %v2460_v23 = vld [vmem:[%s2749_s19 + $0xb0] ss:$40 sps:$4 sm:$0xff]   ;;  %v2463_v25 = vld [vmem:[%s2749_s19 + $0xac] ss:$40 sps:$4 sm:$0xff]  }
  0x17   : > { %734 = vmatprep.subr.bf16.mxu1 %v2442_v11  ;;  %v2464_v26 = vld [vmem:[%s2749_s19 + $0x58] ss:$40 sps:$4 sm:$0xff]   ;;  %v2468_v28 = vld [vmem:[%s2749_s19 + $0x54] ss:$40 sps:$4 sm:$0xff]   ;;  %v2470_v30 = vld [vmem:[%s2749_s19 + $0x8] ss:$40 sps:$4 sm:$0xff]  }
  0x18   : > { %v2466_v27 = vld [vmem:[%s2749_s19 + $0x60] ss:$40 sps:$4 sm:$0xff]   ;;  %v2469_v29 = vld [vmem:[%s2749_s19 + $0x5c] ss:$40 sps:$4 sm:$0xff]   ;;  %v2472_v31 = vld [vmem:[%s2749_s19 + $0x10] ss:$40 sps:$4 sm:$0xff]  }
  0x19   : > { %694 = vmatpush1.bf16.msra.mxu0 %v2444_v12  ;;  %v2474_v32 = vld [vmem:[%s2749_s19 + $0x4] ss:$40 sps:$4 sm:$0xff]   ;;  %v2476_v34 = vld [vmem:[%s2749_s19 + $0x288] ss:$40 sps:$4 sm:$0xff]   ;;  %v2492_v43 = vld [vmem:[%s2749_s19 + $0x1f8] ss:$40 sps:$4 sm:$0xff]  }
  0x1a   : > { %735 = vmatpush1.bf16.msra.mxu1 %v2445_v13  ;;  %695 = vmatprep.subr.bf16.mxu0 %v2446_v14  ;;  %v2475_v33 = vld [vmem:[%s2749_s19 + $0xc] ss:$40 sps:$4 sm:$0xff]   ;;  %v2478_v35 = vld [vmem:[%s2749_s19 + $0x290] ss:$40 sps:$4 sm:$0xff]   ;;  %v2495_v44 = vld [vmem:[%s2749_s19 + $0x200] ss:$40 sps:$4 sm:$0xff]  }
  0x1b   : > { %736 = vmatprep.subr.bf16.mxu1 %v2448_v15  ;;  %v2480_v36 = vld [vmem:[%s2749_s19 + $0x284] ss:$40 sps:$4 sm:$0xff]   ;;  %v2486_v38 = vld [vmem:[%s2749_s19 + $0x248] ss:$40 sps:$4 sm:$0xff]   ;;  %v2490_v45 = vld [vmem:[%s2749_s19 + $0x1f4] ss:$40 sps:$4 sm:$0xff]  }
  0x1c   : > { %v2481_v37 = vld [vmem:[%s2749_s19 + $0x28c] ss:$40 sps:$4 sm:$0xff]   ;;  %v2489_v39 = vld [vmem:[%s2749_s19 + $0x250] ss:$40 sps:$4 sm:$0xff]   ;;  %v2493_v46 = vld [vmem:[%s2749_s19 + $0x1fc] ss:$40 sps:$4 sm:$0xff]  }
  0x1d   : > { %696 = vmatpush1.bf16.msra.mxu0 %v2450_v16  ;;  %v2484_v41 = vld [vmem:[%s2749_s19 + $0x244] ss:$40 sps:$4 sm:$0xff]   ;;  %v2498_v47 = vld [vmem:[%s2749_s19 + $0x1a8] ss:$40 sps:$4 sm:$0xff]   ;;  %v2504_v51 = vld [vmem:[%s2749_s19 + $0x158] ss:$40 sps:$4 sm:$0xff]  }
  0x1e   : > { %737 = vmatpush1.bf16.msra.mxu1 %v2451_v17  ;;  %697 = vmatprep.subr.bf16.mxu0 %v2452_v18  ;;  %v2487_v42 = vld [vmem:[%s2749_s19 + $0x24c] ss:$40 sps:$4 sm:$0xff]   ;;  %v2501_v48 = vld [vmem:[%s2749_s19 + $0x1b0] ss:$40 sps:$4 sm:$0xff]   ;;  %v2507_v52 = vld [vmem:[%s2749_s19 + $0x160] ss:$40 sps:$4 sm:$0xff]  }
  0x1f   : > { %738 = vmatprep.subr.bf16.mxu1 %v2454_v19  ;;  %v2496_v49 = vld [vmem:[%s2749_s19 + $0x1a4] ss:$40 sps:$4 sm:$0xff]   ;;  %v2502_v53 = vld [vmem:[%s2749_s19 + $0x154] ss:$40 sps:$4 sm:$0xff]   ;;  %v2510_v55 = vld [vmem:[%s2749_s19 + $0x108] ss:$40 sps:$4 sm:$0xff]  }
  0x20   : > { %v2499_v50 = vld [vmem:[%s2749_s19 + $0x1ac] ss:$40 sps:$4 sm:$0xff]   ;;  %v2505_v54 = vld [vmem:[%s2749_s19 + $0x15c] ss:$40 sps:$4 sm:$0xff]   ;;  %v2513_v56 = vld [vmem:[%s2749_s19 + $0x110] ss:$40 sps:$4 sm:$0xff]  }
  0x21   : > { %698 = vmatpush1.bf16.msra.mxu0 %v2456_v20  ;;  %v2508_v57 = vld [vmem:[%s2749_s19 + $0x104] ss:$40 sps:$4 sm:$0xff]   ;;  %v2516_v59 = vld [vmem:[%s2749_s19 + $0xb8] ss:$40 sps:$4 sm:$0xff]   ;;  %v2514_v61 = vld [vmem:[%s2749_s19 + $0xb4] ss:$40 sps:$4 sm:$0xff]  }
  0x22   : > { %739 = vmatpush1.bf16.msra.mxu1 %v2457_v21  ;;  %699 = vmatprep.subr.bf16.mxu0 %v2458_v22  ;;  %v2511_v58 = vld [vmem:[%s2749_s19 + $0x10c] ss:$40 sps:$4 sm:$0xff]   ;;  %v2519_v60 = vld [vmem:[%s2749_s19 + $0xc0] ss:$40 sps:$4 sm:$0xff]   ;;  %v2517_v62 = vld [vmem:[%s2749_s19 + $0xbc] ss:$40 sps:$4 sm:$0xff]  }
  0x23   : > { %740 = vmatprep.subr.bf16.mxu1 %v2460_v23  ;;  %v2522_v63 = vld [vmem:[%s2749_s19 + $0x68] ss:$40 sps:$4 sm:$0xff]   ;;  %v2523_v2 = vld [vmem:[%s2749_s19 + $0x6c] ss:$40 sps:$4 sm:$0xff]   ;;  %v2528_v3 = vld [vmem:[%s2749_s19 + $0x18] ss:$40 sps:$4 sm:$0xff]  }
  0x24   : > { %v2525_v0 = vld [vmem:[%s2749_s19 + $0x70] ss:$40 sps:$4 sm:$0xff]   ;;  %v2531_v4 = vld [vmem:[%s2749_s19 + $0x20] ss:$40 sps:$4 sm:$0xff]   ;;  %v2526_v5 = vld [vmem:[%s2749_s19 + $0x14] ss:$40 sps:$4 sm:$0xff]  }
  0x25   : > { %700 = vmatpush1.bf16.msra.mxu0 %v2462_v24  ;;  %v2529_v6 = vld [vmem:[%s2749_s19 + $0x1c] ss:$40 sps:$4 sm:$0xff]   ;;  %v2534_v7 = vld [vmem:[%s2749_s19 + $0x298] ss:$40 sps:$4 sm:$0xff]   ;;  %v2849_v17 = vld [vmem:[%s2749_s19 + $0x1ec] ss:$40 sps:$4 sm:$0xff]  }
  0x26   : > { %741 = vmatpush1.bf16.msra.mxu1 %v2463_v25  ;;  %701 = vmatprep.subr.bf16.mxu0 %v2464_v26  ;;  %v2537_v8 = vld [vmem:[%s2749_s19 + $0x2a0] ss:$40 sps:$4 sm:$0xff]   ;;  %v2532_v9 = vld [vmem:[%s2749_s19 + $0x294] ss:$40 sps:$4 sm:$0xff]   ;;  %v2538_v14 = vld [vmem:[%s2749_s19 + $0x230] ss:$40 sps:$4 sm:$0xff]  }
  0x27   : > { %742 = vmatprep.subr.bf16.mxu1 %v2466_v27  ;;  %v2535_v10 = vld [vmem:[%s2749_s19 + $0x29c] ss:$40 sps:$4 sm:$0xff]   ;;  %v2844_v15 = vld [vmem:[%s2749_s19 + $0x238] ss:$40 sps:$4 sm:$0xff]   ;;  %v2859_v20 = vld [vmem:[%s2749_s19 + $0x1e8] ss:$40 sps:$4 sm:$0xff]  }
  0x28   : > { %v2540_v11 = vld [vmem:[%s2749_s19 + $0x234] ss:$40 sps:$4 sm:$0xff]   ;;  %v2840_v13 = vld [vmem:[%s3188_s1] sm:$0xff]  ;;  %v2550_v23 = vld [vmem:[%s2749_s19 + $0x190] ss:$40 sps:$4 sm:$0xff]  }
  0x29   : > { %702 = vmatpush1.bf16.msra.mxu0 %v2468_v28  ;;  %v2835_v12 = vld [vmem:[%s2749_s19 + $0x23c] ss:$40 sps:$4 sm:$0xff]   ;;  %v2853_v18 = vcombine.high %v2840_v13, %v2840_v13  ;;  %v2544_v19 = vld [vmem:[%s2749_s19 + $0x1e0] ss:$40 sps:$4 sm:$0xff]   ;;  %v2879_v26 = vld [vmem:[%s2749_s19 + $0x14c] ss:$40 sps:$4 sm:$0xff]  }
  0x2a   : > { %743 = vmatpush1.bf16.msra.mxu1 %v2469_v29  ;;  %703 = vmatprep.subr.bf16.mxu0 %v2470_v30  ;;  %v2546_v16 = vld [vmem:[%s2749_s19 + $0x1e4] ss:$40 sps:$4 sm:$0xff]   ;;  %v2552_v21 = vld [vmem:[%s2749_s19 + $0x194] ss:$40 sps:$4 sm:$0xff]   ;;  %v2873_v24 = vld [vmem:[%s2749_s19 + $0x198] ss:$40 sps:$4 sm:$0xff]  }
  0x2b   : > { %744 = vmatprep.subr.bf16.mxu1 %v2472_v31  ;;  %v2865_v22 = vld [vmem:[%s2749_s19 + $0x19c] ss:$40 sps:$4 sm:$0xff]   ;;  %v2556_v27 = vld [vmem:[%s2749_s19 + $0x140] ss:$40 sps:$4 sm:$0xff]   ;;  %v2562_v31 = vld [vmem:[%s2749_s19 + $0xf0] ss:$40 sps:$4 sm:$0xff]  }
  0x2c   : > { %v2558_v25 = vld [vmem:[%s2749_s19 + $0x144] ss:$40 sps:$4 sm:$0xff]   ;;  %v2883_v28 = vld [vmem:[%s2749_s19 + $0x148] ss:$40 sps:$4 sm:$0xff]   ;;  %v2564_v29 = vld [vmem:[%s2749_s19 + $0xf4] ss:$40 sps:$4 sm:$0xff]  }
  0x2d   : > { %704 = vmatpush1.bf16.msra.mxu0 %v2474_v32  ;;  %v2889_v30 = vld [vmem:[%s2749_s19 + $0xfc] ss:$40 sps:$4 sm:$0xff]   ;;  %v2893_v32 = vld [vmem:[%s2749_s19 + $0xf8] ss:$40 sps:$4 sm:$0xff]  }
  0x2e   : > { %745 = vmatpush1.bf16.msra.mxu1 %v2475_v33  ;;  %719 = vmatprep.subr.bf16.mxu0 %v2476_v34  ;;  %v2570_v33 = vld [vmem:[%s2749_s19 + $0xa4] ss:$40 sps:$4 sm:$0xff]  }
  0x2f   : > { %760 = vmatprep.subr.bf16.mxu1 %v2478_v35  ;;  %v2899_v34 = vld [vmem:[%s2749_s19 + $0xac] ss:$40 sps:$4 sm:$0xff]   ;;  %v2568_v35 = vld [vmem:[%s2749_s19 + $0xa0] ss:$40 sps:$4 sm:$0xff]  }
  0x31   : > { %720 = vmatpush2.bf16.msra.mxu0 %v2480_v36  ;;  %v2903_v36 = vld [vmem:[%s2749_s19 + $0xa8] ss:$40 sps:$4 sm:$0xff]  }
  0x32   : > { %761 = vmatpush2.bf16.msra.mxu1 %v2481_v37  ;;  %771 = vmatprep.subr.bf16.mxu0 %v2486_v38  ;;  %v2576_v37 = vld [vmem:[%s2749_s19 + $0x54] ss:$40 sps:$4 sm:$0xff]  }
  0x33   : > { %812 = vmatprep.subr.bf16.mxu1 %v2489_v39  ;;  %v2909_v38 = vld [vmem:[%s2749_s19 + $0x5c] ss:$40 sps:$4 sm:$0xff]   ;;  %v2574_v39 = vld [vmem:[%s2749_s19 + $0x50] ss:$40 sps:$4 sm:$0xff]  }
  0x34   : > { %722 = vmatmul.mubr.bf16.vlgmr.msra.gmra.mxu0 %v2791_v40 }
  0x35   : > { %763 = vmatmul.mubr.bf16.vlgmr.msra.gmra.mxu1 %v2791_v40  ;;  %772 = vmatpush1.bf16.msra.mxu0 %v2484_v41  ;;  %v2582_v41 = vld [vmem:[%s2749_s19 + $0x4] ss:$40 sps:$4 sm:$0xff]  }
  0x36   : > { %813 = vmatpush1.bf16.msra.mxu1 %v2487_v42  ;;  %773 = vmatprep.subr.bf16.mxu0 %v2492_v43  ;;  %v2919_v42 = vld [vmem:[%s2749_s19 + $0xc] ss:$40 sps:$4 sm:$0xff]   ;;  %v2580_v43 = vld [vmem:[%s2749_s19] ss:$40 sps:$4 sm:$0xff]  }
  0x37   : > { %814 = vmatprep.subr.bf16.mxu1 %v2495_v44  ;;  %2239 = vmatprep.mubr.msk.bf16.mxu0 %vm685_vm0, %v2737_v1  ;;  %v2924_v44 = vld [vmem:[%s2749_s19 + $0x8] ss:$40 sps:$4 sm:$0xff]  }
  0x38   : > { %2240 = vmatprep.mubr.msk.bf16.mxu1 %vm685_vm0, %v2737_v1  ;;  %v2520_v1 = vld [vmem:[%s2749_s19 + $0x64] ss:$40 sps:$4 sm:$0xff]  }
  0x39   : > { %774 = vmatpush1.bf16.msra.mxu0 %v2490_v45  ;;  %v2588_v45 = vld [vmem:[%s2749_s19 + $0x284] ss:$40 sps:$4 sm:$0xff]  }
  0x3a   : > { %815 = vmatpush1.bf16.msra.mxu1 %v2493_v46  ;;  %775 = vmatprep.subr.bf16.mxu0 %v2498_v47  ;;  %v2929_v46 = vld [vmem:[%s2749_s19 + $0x28c] ss:$40 sps:$4 sm:$0xff]   ;;  %v2586_v47 = vld [vmem:[%s2749_s19 + $0x280] ss:$40 sps:$4 sm:$0xff]  }
  0x3b   : > { %816 = vmatprep.subr.bf16.mxu1 %v2501_v48  ;;  %v2934_v48 = vld [vmem:[%s2749_s19 + $0x288] ss:$40 sps:$4 sm:$0xff]  }
  0x3d   : > { %776 = vmatpush1.bf16.msra.mxu0 %v2496_v49  ;;  %v2938_v49 = vld [vmem:[%s2749_s19 + $0x244] ss:$40 sps:$4 sm:$0xff]  }
  0x3e   : > { %817 = vmatpush1.bf16.msra.mxu1 %v2499_v50  ;;  %777 = vmatprep.subr.bf16.mxu0 %v2504_v51  ;;  %v2941_v50 = vld [vmem:[%s2749_s19 + $0x24c] ss:$40 sps:$4 sm:$0xff]   ;;  %v2945_v51 = vcombine.low %v2840_v13, %v2840_v13 }
  0x3f   : > { %818 = vmatprep.subr.bf16.mxu1 %v2507_v52  ;;  %v2949_v52 = vld [vmem:[%s2749_s19 + $0x240] ss:$40 sps:$4 sm:$0xff]   ;;  %v2632_v13 = vld [vmem:[%s2749_s19 + $0x64] ss:$40 sps:$4 sm:$0xff]  }
  0x41   : > { %778 = vmatpush1.bf16.msra.mxu0 %v2502_v53  ;;  %v2952_v53 = vld [vmem:[%s2749_s19 + $0x248] ss:$40 sps:$4 sm:$0xff]  }
  0x42   : > { %819 = vmatpush1.bf16.msra.mxu1 %v2505_v54  ;;  %779 = vmatprep.subr.bf16.mxu0 %v2510_v55  ;;  %v2957_v54 = vld [vmem:[%s2749_s19 + $0x1f4] ss:$40 sps:$4 sm:$0xff]  }
  0x43   : > { %820 = vmatprep.subr.bf16.mxu1 %v2513_v56  ;;  %v2960_v55 = vld [vmem:[%s2749_s19 + $0x1fc] ss:$40 sps:$4 sm:$0xff]   ;;  %v2701_v56 = vmov 0  }
  0x44   : > { %2427 = vset.pattern.permute.xlu0 %v2701_v56 }
  0x45   : > { %780 = vmatpush1.bf16.msra.mxu0 %v2508_v57  ;;  %v2967_v57 = vld [vmem:[%s2749_s19 + $0x1f0] ss:$40 sps:$4 sm:$0xff]  }
  0x46   : > { %821 = vmatpush1.bf16.msra.mxu1 %v2511_v58  ;;  %781 = vmatprep.subr.bf16.mxu0 %v2516_v59  ;;  %v2970_v58 = vld [vmem:[%s2749_s19 + $0x1f8] ss:$40 sps:$4 sm:$0xff]  }
  0x47   : > { %822 = vmatprep.subr.bf16.mxu1 %v2519_v60  ;;  %v2001_v59 = vld [vmem:[%s3189_s2] sm:$0xff] }
  0x48   : > { %v2978_v60 = vld [vmem:[%s2749_s19 + $0x1a4] ss:$40 sps:$4 sm:$0xff]   ;;  %2004 = vperm.xlu0 %2427, %v2001_v59  }
  0x49   : > { %782 = vmatpush1.bf16.msra.mxu0 %v2514_v61  ;;  %v2981_v61 = vld [vmem:[%s2749_s19 + $0x1ac] ss:$40 sps:$4 sm:$0xff]  }
  0x4a   : > { %823 = vmatpush1.bf16.msra.mxu1 %v2517_v62  ;;  %783 = vmatprep.subr.bf16.mxu0 %v2522_v63  ;;  %v2990_v62 = vld [vmem:[%s2749_s19 + $0x1a0] ss:$40 sps:$4 sm:$0xff]  }
  0x4b   : > { %824 = vmatprep.subr.bf16.mxu1 %v2525_v0  ;;  %v2993_v63 = vld [vmem:[%s2749_s19 + $0x1a8] ss:$40 sps:$4 sm:$0xff]   ;;  %v2998_v0 = vld [vmem:[%s2749_s19 + $0x154] ss:$40 sps:$4 sm:$0xff]  }
  0x4d   : > { %784 = vmatpush1.bf16.msra.mxu0 %v2520_v1  ;;  %v3001_v1 = vld [vmem:[%s2749_s19 + $0x15c] ss:$40 sps:$4 sm:$0xff]  }
  0x4e   : > { %825 = vmatpush1.bf16.msra.mxu1 %v2523_v2  ;;  %785 = vmatprep.subr.bf16.mxu0 %v2528_v3  ;;  %v3006_v2 = vld [vmem:[%s2749_s19 + $0x150] ss:$40 sps:$4 sm:$0xff]  }
  0x4f   : > { %826 = vmatprep.subr.bf16.mxu1 %v2531_v4  ;;  %v3009_v3 = vld [vmem:[%s2749_s19 + $0x158] ss:$40 sps:$4 sm:$0xff]   ;;  %v3014_v4 = vld [vmem:[%s2749_s19 + $0x104] ss:$40 sps:$4 sm:$0xff]  }
  0x51   : > { %786 = vmatpush1.bf16.msra.mxu0 %v2526_v5  ;;  %v3017_v5 = vld [vmem:[%s2749_s19 + $0x10c] ss:$40 sps:$4 sm:$0xff]  }
  0x52   : > { %827 = vmatpush1.bf16.msra.mxu1 %v2529_v6  ;;  %801 = vmatprep.subr.bf16.mxu0 %v2534_v7  ;;  %v2618_v6 = vld [vmem:[%s2749_s19 + $0x100] ss:$40 sps:$4 sm:$0xff]  }
  0x53   : > { %842 = vmatprep.subr.bf16.mxu1 %v2537_v8  ;;  %v3023_v7 = vld [vmem:[%s2749_s19 + $0x108] ss:$40 sps:$4 sm:$0xff]   ;;  %v2626_v8 = vld [vmem:[%s2749_s19 + $0xb4] ss:$40 sps:$4 sm:$0xff]  }
  0x55   : > { %802 = vmatpush2.bf16.msra.mxu0 %v2532_v9  ;;  %v3029_v9 = vld [vmem:[%s2749_s19 + $0xbc] ss:$40 sps:$4 sm:$0xff]  }
  0x56   : > { %843 = vmatpush2.bf16.msra.mxu1 %v2535_v10  ;;  %1222 = vmatprep.subr.bf16.mxu0 %v2540_v11  ;;  %v2624_v10 = vld [vmem:[%s2749_s19 + $0xb0] ss:$40 sps:$4 sm:$0xff]  }
  0x57   : > { %1263 = vmatprep.subr.bf16.mxu1 %v2835_v12  ;;  %v3034_v11 = vld [vmem:[%s2749_s19 + $0xb8] ss:$40 sps:$4 sm:$0xff]  }
  0x58   : > { %804 = vmatmul.mubr.bf16.vlgmr.msra.gmra.mxu0 %v2791_v40 }
  0x59   : > { %845 = vmatmul.mubr.bf16.vlgmr.msra.gmra.mxu1 %v2791_v40  ;;  %1223 = vmatpush1.bf16.msra.mxu0 %v2538_v14  ;;  %v2914_v40 = vld [vmem:[%s2749_s19 + $0x58] ss:$40 sps:$4 sm:$0xff]   ;;  %v3039_v14 = vld [vmem:[%s2749_s19 + $0x6c] ss:$40 sps:$4 sm:$0xff]  }
  0x5a   : > { %1264 = vmatpush1.bf16.msra.mxu1 %v2844_v15  ;;  %1224 = vmatprep.subr.bf16.mxu0 %v2546_v16  ;;  %v2630_v16 = vld [vmem:[%s2749_s19 + $0x60] ss:$40 sps:$4 sm:$0xff]  }
  0x5b   : > { %1265 = vmatprep.subr.bf16.mxu1 %v2849_v17  ;;  %2315 = vmatprep.mubr.msk.bf16.mxu0 %vm685_vm0, %v2853_v18 }
  0x5c   : > { %2316 = vmatprep.mubr.msk.bf16.mxu1 %vm685_vm0, %v2853_v18 }
  0x5d   : > { %1225 = vmatpush1.bf16.msra.mxu0 %v2544_v19  ;;  %v2638_v19 = vld [vmem:[%s2749_s19 + $0x14] ss:$40 sps:$4 sm:$0xff]  }
  0x5e   : > { %1266 = vmatpush1.bf16.msra.mxu1 %v2859_v20  ;;  %1226 = vmatprep.subr.bf16.mxu0 %v2552_v21  ;;  %v3049_v21 = vld [vmem:[%s2749_s19 + $0x1c] ss:$40 sps:$4 sm:$0xff]  }
  0x5f   : > { %1267 = vmatprep.subr.bf16.mxu1 %v2865_v22 }
  0x61   : > { %1227 = vmatpush1.bf16.msra.mxu0 %v2550_v23  ;;  %v2636_v23 = vld [vmem:[%s2749_s19 + $0x10] ss:$40 sps:$4 sm:$0xff]  }
  0x62   : > { %1268 = vmatpush1.bf16.msra.mxu1 %v2873_v24  ;;  %1228 = vmatprep.subr.bf16.mxu0 %v2558_v25  ;;  %v3054_v25 = vld [vmem:[%s2749_s19 + $0x18] ss:$40 sps:$4 sm:$0xff]  }
  0x63   : > { %1269 = vmatprep.subr.bf16.mxu1 %v2879_v26 }
  0x65   : > { %1229 = vmatpush1.bf16.msra.mxu0 %v2556_v27  ;;  %v2644_v27 = vld [vmem:[%s2749_s19 + $0x294] ss:$40 sps:$4 sm:$0xff]  }
  0x66   : > { %1270 = vmatpush1.bf16.msra.mxu1 %v2883_v28  ;;  %1230 = vmatprep.subr.bf16.mxu0 %v2564_v29  ;;  %v3059_v29 = vld [vmem:[%s2749_s19 + $0x29c] ss:$40 sps:$4 sm:$0xff]  }
  0x67   : > { %1271 = vmatprep.subr.bf16.mxu1 %v2889_v30 }
  0x69   : > { %1231 = vmatpush1.bf16.msra.mxu0 %v2562_v31  ;;  %v2642_v31 = vld [vmem:[%s2749_s19 + $0x290] ss:$40 sps:$4 sm:$0xff]  }
  0x6a   : > { %1272 = vmatpush1.bf16.msra.mxu1 %v2893_v32  ;;  %1232 = vmatprep.subr.bf16.mxu0 %v2570_v33  ;;  %v3064_v33 = vld [vmem:[%s2749_s19 + $0x298] ss:$40 sps:$4 sm:$0xff]  }
  0x6b   : > { %1273 = vmatprep.subr.bf16.mxu1 %v2899_v34 }
  0x6d   : > { %1233 = vmatpush1.bf16.msra.mxu0 %v2568_v35  ;;  %v2319_v35 = vld [vmem:[%s3188_s1 + $0x10] sm:$0xff] }
  0x6e   : > { %1274 = vmatpush1.bf16.msra.mxu1 %v2903_v36  ;;  %1234 = vmatprep.subr.bf16.mxu0 %v2576_v37  ;;  %v2321_v37 = vcombine.high %v2319_v35, %v2319_v35 }
  0x6f   : > { %1275 = vmatprep.subr.bf16.mxu1 %v2909_v38 }
  0x71   : > { %1235 = vmatpush1.bf16.msra.mxu0 %v2574_v39  ;;  %v2670_v39 = vld [vmem:[%s2749_s19 + $0x74] ss:$40 sps:$4 sm:$0xff]  }
  0x72   : > { %1276 = vmatpush1.bf16.msra.mxu1 %v2914_v40  ;;  %1236 = vmatprep.subr.bf16.mxu0 %v2582_v41  ;;  %v2673_v41 = vld [vmem:[%s2749_s19 + $0x24] ss:$40 sps:$4 sm:$0xff]  }
  0x73   : > { %1277 = vmatprep.subr.bf16.mxu1 %v2919_v42 }
  0x75   : > { %1237 = vmatpush1.bf16.msra.mxu0 %v2580_v43  ;;  %v2676_v43 = vld [vmem:[%s2749_s19 + $0x2a4] ss:$40 sps:$4 sm:$0xff]  }
  0x76   : > { %1278 = vmatpush1.bf16.msra.mxu1 %v2924_v44  ;;  %1252 = vmatprep.subr.bf16.mxu0 %v2588_v45 }
  0x77   : > { %1293 = vmatprep.subr.bf16.mxu1 %v2929_v46 }
  0x79   : > { %1253 = vmatpush2.bf16.msra.mxu0 %v2586_v47 }
  0x7a   : > { %1294 = vmatpush2.bf16.msra.mxu1 %v2934_v48  ;;  %1304 = vmatprep.subr.bf16.mxu0 %v2938_v49 }
  0x7b   : > { %1345 = vmatprep.subr.bf16.mxu1 %v2941_v50 }
  0x7c   : > { %1255 = vmatmul.mubr.bf16.vlgmr.msra.gmra.mxu0 %v2945_v51 }
  0x7d   : > { %1296 = vmatmul.mubr.bf16.vlgmr.msra.gmra.mxu1 %v2945_v51  ;;  %1305 = vmatpush1.bf16.msra.mxu0 %v2949_v52 }
  0x7e   : > { %1346 = vmatpush1.bf16.msra.mxu1 %v2952_v53  ;;  %1306 = vmatprep.subr.bf16.mxu0 %v2957_v54 }
  0x7f   : > { %1347 = vmatprep.subr.bf16.mxu1 %v2960_v55  ;;  %2317 = vmatprep.mubr.msk.bf16.mxu0 %vm685_vm0, %v2853_v18 }
  0x80   : > { %2318 = vmatprep.mubr.msk.bf16.mxu1 %vm685_vm0, %v2853_v18  ;;  %v3044_v18 = vld [vmem:[%s2749_s19 + $0x68] ss:$40 sps:$4 sm:$0xff]  }
  0x81   : > { %1307 = vmatpush1.bf16.msra.mxu0 %v2967_v57 }
  0x82   : > { %1348 = vmatpush1.bf16.msra.mxu1 %v2970_v58  ;;  %1308 = vmatprep.subr.bf16.mxu0 %v2978_v60 }
  0x83   : > { %1349 = vmatprep.subr.bf16.mxu1 %v2981_v61 }
  0x85   : > { %1309 = vmatpush1.bf16.msra.mxu0 %v2990_v62 }
  0x86   : > { %1350 = vmatpush1.bf16.msra.mxu1 %v2993_v63  ;;  %1310 = vmatprep.subr.bf16.mxu0 %v2998_v0 }
  0x87   : > { %1351 = vmatprep.subr.bf16.mxu1 %v3001_v1 }
  0x89   : > { %1311 = vmatpush1.bf16.msra.mxu0 %v3006_v2 }
  0x8a   : > { %1352 = vmatpush1.bf16.msra.mxu1 %v3009_v3  ;;  %1312 = vmatprep.subr.bf16.mxu0 %v3014_v4 }
  0x8b   : > { %1353 = vmatprep.subr.bf16.mxu1 %v3017_v5 }
  0x8d   : > { %1313 = vmatpush1.bf16.msra.mxu0 %v2618_v6 }
  0x8e   : > { %1354 = vmatpush1.bf16.msra.mxu1 %v3023_v7  ;;  %1314 = vmatprep.subr.bf16.mxu0 %v2626_v8 }
  0x8f   : > { %1355 = vmatprep.subr.bf16.mxu1 %v3029_v9 }
  0x91   : > { %1315 = vmatpush1.bf16.msra.mxu0 %v2624_v10 }
  0x92   : > { %1356 = vmatpush1.bf16.msra.mxu1 %v3034_v11  ;;  %1316 = vmatprep.subr.bf16.mxu0 %v2632_v13 }
  0x93   : > { %1357 = vmatprep.subr.bf16.mxu1 %v3039_v14 }
  0x95   : > { %1317 = vmatpush1.bf16.msra.mxu0 %v2630_v16 }
  0x96   : > { %1358 = vmatpush1.bf16.msra.mxu1 %v3044_v18  ;;  %1318 = vmatprep.subr.bf16.mxu0 %v2638_v19 }
  0x97   : > { %1359 = vmatprep.subr.bf16.mxu1 %v3049_v21 }
  0x99   : > { %1319 = vmatpush1.bf16.msra.mxu0 %v2636_v23 }
  0x9a   : > { %1360 = vmatpush1.bf16.msra.mxu1 %v3054_v25  ;;  %1334 = vmatprep.subr.bf16.mxu0 %v2644_v27 }
  0x9b   : > { %1375 = vmatprep.subr.bf16.mxu1 %v3059_v29 }
  0x9d   : > { %1335 = vmatpush2.bf16.msra.mxu0 %v2642_v31 }
  0x9e   : > { %1376 = vmatpush2.bf16.msra.mxu1 %v3064_v33  ;;  %1829 = vmatprep.subr.bf16.mxu0 %v2835_v12  ;;  %v2652_v12 = vld [vmem:[%s2749_s19 + $0x254] ss:$40 sps:$4 sm:$0xff]  }
  0x9f   : > { %1870 = vmatprep.subr.bf16.mxu1 %v2938_v49 }
  0xa0   : > { %1337 = vmatmul.mubr.bf16.vlgmr.msra.gmra.mxu0 %v2945_v51 }
  0xa1   : > { %1378 = vmatmul.mubr.bf16.vlgmr.msra.gmra.mxu1 %v2945_v51  ;;  %1830 = vmatpush1.bf16.msra.mxu0 %v2844_v15  ;;  %v2320_v15 = vcombine.low %v2319_v35, %v2319_v35 }
  0xa2   : > { %1871 = vmatpush1.bf16.msra.mxu1 %v2949_v52  ;;  %1831 = vmatprep.subr.bf16.mxu0 %v2849_v17  ;;  %v2650_v17 = vld [vmem:[%s2749_s19 + $0x250] ss:$40 sps:$4 sm:$0xff]  }
  0xa3   : > { %1872 = vmatprep.subr.bf16.mxu1 %v2957_v54  ;;  %2394 = vmatprep.mubr.msk.bf16.mxu0 %vm685_vm0, %v2321_v37 }
  0xa4   : > { %2395 = vmatprep.mubr.msk.bf16.mxu1 %vm685_vm0, %v2321_v37 }
  0xa5   : > { %1832 = vmatpush1.bf16.msra.mxu0 %v2859_v20  ;;  %v2655_v20 = vld [vmem:[%s2749_s19 + $0x204] ss:$40 sps:$4 sm:$0xff]  }
  0xa6   : > { %1873 = vmatpush1.bf16.msra.mxu1 %v2967_v57  ;;  %1833 = vmatprep.subr.bf16.mxu0 %v2865_v22  ;;  %v2653_v22 = vld [vmem:[%s2749_s19 + $0x200] ss:$40 sps:$4 sm:$0xff]  }
  0xa7   : > { %1874 = vmatprep.subr.bf16.mxu1 %v2978_v60 }
  0xa9   : > { %1834 = vmatpush1.bf16.msra.mxu0 %v2873_v24  ;;  %v2658_v24 = vld [vmem:[%s2749_s19 + $0x1b4] ss:$40 sps:$4 sm:$0xff]  }
  0xaa   : > { %1875 = vmatpush1.bf16.msra.mxu1 %v2990_v62  ;;  %1835 = vmatprep.subr.bf16.mxu0 %v2879_v26  ;;  %v2656_v26 = vld [vmem:[%s2749_s19 + $0x1b0] ss:$40 sps:$4 sm:$0xff]  }
  0xab   : > { %1876 = vmatprep.subr.bf16.mxu1 %v2998_v0 }
  0xad   : > { %1836 = vmatpush1.bf16.msra.mxu0 %v2883_v28  ;;  %v2661_v28 = vld [vmem:[%s2749_s19 + $0x164] ss:$40 sps:$4 sm:$0xff]  }
  0xae   : > { %1877 = vmatpush1.bf16.msra.mxu1 %v3006_v2  ;;  %1837 = vmatprep.subr.bf16.mxu0 %v2889_v30  ;;  %v2659_v30 = vld [vmem:[%s2749_s19 + $0x160] ss:$40 sps:$4 sm:$0xff]  }
  0xaf   : > { %1878 = vmatprep.subr.bf16.mxu1 %v3014_v4 }
  0xb1   : > { %1838 = vmatpush1.bf16.msra.mxu0 %v2893_v32  ;;  %v2664_v32 = vld [vmem:[%s2749_s19 + $0x114] ss:$40 sps:$4 sm:$0xff]  }
  0xb2   : > { %1879 = vmatpush1.bf16.msra.mxu1 %v2618_v6  ;;  %1839 = vmatprep.subr.bf16.mxu0 %v2899_v34  ;;  %v2662_v34 = vld [vmem:[%s2749_s19 + $0x110] ss:$40 sps:$4 sm:$0xff]  }
  0xb3   : > { %1880 = vmatprep.subr.bf16.mxu1 %v2626_v8 }
  0xb5   : > { %1840 = vmatpush1.bf16.msra.mxu0 %v2903_v36  ;;  %v2667_v36 = vld [vmem:[%s2749_s19 + $0xc4] ss:$40 sps:$4 sm:$0xff]  }
  0xb6   : > { %1881 = vmatpush1.bf16.msra.mxu1 %v2624_v10  ;;  %1841 = vmatprep.subr.bf16.mxu0 %v2909_v38  ;;  %v2665_v38 = vld [vmem:[%s2749_s19 + $0xc0] ss:$40 sps:$4 sm:$0xff]  }
  0xb7   : > { %1882 = vmatprep.subr.bf16.mxu1 %v2632_v13 }
  0xb9   : > { %1842 = vmatpush1.bf16.msra.mxu0 %v2914_v40  ;;  %v2668_v40 = vld [vmem:[%s2749_s19 + $0x70] ss:$40 sps:$4 sm:$0xff]  }
  0xba   : > { %1883 = vmatpush1.bf16.msra.mxu1 %v2630_v16  ;;  %1843 = vmatprep.subr.bf16.mxu0 %v2919_v42  ;;  %v2671_v42 = vld [vmem:[%s2749_s19 + $0x20] ss:$40 sps:$4 sm:$0xff]  }
  0xbb   : > { %1884 = vmatprep.subr.bf16.mxu1 %v2638_v19 }
  0xbd   : > { %1844 = vmatpush1.bf16.msra.mxu0 %v2924_v44  ;;  %v2674_v44 = vld [vmem:[%s2749_s19 + $0x2a0] ss:$40 sps:$4 sm:$0xff]  }
  0xbe   : > { %1885 = vmatpush1.bf16.msra.mxu1 %v2636_v23  ;;  %1859 = vmatprep.subr.bf16.mxu0 %v2929_v46 }
  0xbf   : > { %1900 = vmatprep.subr.bf16.mxu1 %v2644_v27 }
  0xc1   : > { %1860 = vmatpush2.bf16.msra.mxu0 %v2934_v48 }
  0xc2   : > { %1901 = vmatpush2.bf16.msra.mxu1 %v2642_v31  ;;  %1911 = vmatprep.subr.bf16.mxu0 %v2941_v50 }
  0xc3   : > { %1952 = vmatprep.subr.bf16.mxu1 %v2652_v12 }
  0xc4   : > { %1862 = vmatmul.mubr.bf16.vlgmr.msra.gmra.mxu0 %v2320_v15 }
  0xc5   : > { %1903 = vmatmul.mubr.bf16.vlgmr.msra.gmra.mxu1 %v2320_v15  ;;  %1912 = vmatpush1.bf16.msra.mxu0 %v2952_v53 }
  0xc6   : > { %1953 = vmatpush1.bf16.msra.mxu1 %v2650_v17  ;;  %1913 = vmatprep.subr.bf16.mxu0 %v2960_v55 }
  0xc7   : > { %1954 = vmatprep.subr.bf16.mxu1 %v2655_v20  ;;  %2396 = vmatprep.mubr.msk.bf16.mxu0 %vm685_vm0, %v2321_v37 }
  0xc8   : > { %2397 = vmatprep.mubr.msk.bf16.mxu1 %vm685_vm0, %v2321_v37 }
  0xc9   : > { %1914 = vmatpush1.bf16.msra.mxu0 %v2970_v58 }
  0xca   : > { %1955 = vmatpush1.bf16.msra.mxu1 %v2653_v22  ;;  %1915 = vmatprep.subr.bf16.mxu0 %v2981_v61 }
  0xcb   : > { %1956 = vmatprep.subr.bf16.mxu1 %v2658_v24 }
  0xcd   : > { %1916 = vmatpush1.bf16.msra.mxu0 %v2993_v63 }
  0xce   : > { %1957 = vmatpush1.bf16.msra.mxu1 %v2656_v26  ;;  %1917 = vmatprep.subr.bf16.mxu0 %v3001_v1 }
  0xcf   : > { %1958 = vmatprep.subr.bf16.mxu1 %v2661_v28 }
  0xd1   : > { %1918 = vmatpush1.bf16.msra.mxu0 %v3009_v3 }
  0xd2   : > { %1959 = vmatpush1.bf16.msra.mxu1 %v2659_v30  ;;  %1919 = vmatprep.subr.bf16.mxu0 %v3017_v5 }
  0xd3   : > { %1960 = vmatprep.subr.bf16.mxu1 %v2664_v32 }
  0xd5   : > { %1920 = vmatpush1.bf16.msra.mxu0 %v3023_v7 }
  0xd6   : > { %1961 = vmatpush1.bf16.msra.mxu1 %v2662_v34  ;;  %1921 = vmatprep.subr.bf16.mxu0 %v3029_v9 }
  0xd7   : > { %1962 = vmatprep.subr.bf16.mxu1 %v2667_v36 }
  0xd9   : > { %1922 = vmatpush1.bf16.msra.mxu0 %v3034_v11 }
  0xda   : > { %1963 = vmatpush1.bf16.msra.mxu1 %v2665_v38  ;;  %1923 = vmatprep.subr.bf16.mxu0 %v3039_v14 }
  0xdb   : > { %1964 = vmatprep.subr.bf16.mxu1 %v2670_v39 }
  0xdd   : > { %1924 = vmatpush1.bf16.msra.mxu0 %v3044_v18  ;;  %v3156_v18 = vpop.permute.xlu0 %2004 }
  0xde   : > { %1965 = vmatpush1.bf16.msra.mxu1 %v2668_v40  ;;  %1925 = vmatprep.subr.bf16.mxu0 %v3049_v21 }
  0xdf   : > { %1966 = vmatprep.subr.bf16.mxu1 %v2673_v41 }
  0xe1   : > { %1926 = vmatpush1.bf16.msra.mxu0 %v3054_v25 }
  0xe2   : > { %1967 = vmatpush1.bf16.msra.mxu1 %v2671_v42  ;;  %1941 = vmatprep.subr.bf16.mxu0 %v3059_v29 }
  0xe3   : > { %1982 = vmatprep.subr.bf16.mxu1 %v2676_v43 }
  0xe5   : > { %1942 = vmatpush2.bf16.msra.mxu0 %v3064_v33 }
  0xe6   : > { %1983 = vmatpush2.bf16.msra.mxu1 %v2674_v44 }
  0xe8   : > { %1944 = vmatmul.mubr.bf16.vlgmr.msra.gmra.mxu0 %v2320_v15 }
  0xe9   : > { %1985 = vmatmul.mubr.bf16.vlgmr.msra.gmra.mxu1 %v2320_v15 }
  0xf4   : > { %v723_v45 = vpop.f32.mrf.mxu0 }
  0xf5   : > { %v764_v46 = vpop.f32.mrf.mxu1 }
  0xf6   : > { %v725_v47 = vpop.f32.mrf.mxu0 }
  0xf7   : > { %v766_v48 = vpop.f32.mrf.mxu1 }
  0xf8   : > { %v727_v49 = vpop.f32.mrf.mxu0 }
  0xf9   : > { %v768_v50 = vpop.f32.mrf.mxu1 }
  0xfa   : > { %v728_v51 = vpop.f32.mrf.mxu0 }
  0xfb   : > { %v769_v52 = vpop.f32.mrf.mxu1 }
 0x118   : > { %v3140_v53 = vpop.f32.mrf.mxu0 }
 0x119   : > { %v3142_v54 = vpop.f32.mrf.mxu1 }
 0x11a   : > { %v3144_v55 = vpop.f32.mrf.mxu0 }
 0x11b   : > { %v3146_v56 = vpop.f32.mrf.mxu1 }
 0x11c   : > { %v809_v57 = vpop.f32.mrf.mxu0 }
 0x11d   : > { %v850_v58 = vpop.f32.mrf.mxu1 }
 0x11e   : > { %v810_v59 = vpop.f32.mrf.mxu0 }
 0x11f   : > { %v851_v60 = vpop.f32.mrf.mxu1 }
 0x13c   : > { %v1256_v61 = vpop.f32.mrf.mxu0 }
 0x13d   : > { %v1297_v62 = vpop.f32.mrf.mxu1  ;;  %v1257_v14 = vadd.f32 %v1256_v61, %v723_v45 }
 0x13e   : > { %v1258_v63 = vpop.f32.mrf.mxu0  ;;  %v1298_v16 = vadd.f32 %v1297_v62, %v764_v46 }
 0x13f   : > { %v1299_v0 = vpop.f32.mrf.mxu1  ;;  %v1259_v23 = vadd.f32 %v1258_v63, %v725_v47 }
 0x140   : > { %v1260_v1 = vpop.f32.mrf.mxu0  ;;  %v1300_v25 = vadd.f32 %v1299_v0, %v766_v48 }
 0x141   : > { %v1301_v2 = vpop.f32.mrf.mxu1 }
 0x142   : > { %v1261_v3 = vpop.f32.mrf.mxu0 }
 0x143   : > { %v1302_v4 = vpop.f32.mrf.mxu1 }
 0x160   : > { %v3148_v5 = vpop.f32.mrf.mxu0 }
 0x161   : > { %v3150_v6 = vpop.f32.mrf.mxu1  ;;  %v1339_v60 = vadd.f32 %v3148_v5, %v3140_v53 }
 0x162   : > { %v3152_v7 = vpop.f32.mrf.mxu0  ;;  %v1380_v61 = vadd.f32 %v3150_v6, %v3142_v54 }
 0x163   : > { %v3154_v8 = vpop.f32.mrf.mxu1  ;;  %v1341_v0 = vadd.f32 %v3152_v7, %v3144_v55 }
 0x164   : > { %v1342_v9 = vpop.f32.mrf.mxu0  ;;  %v1382_v1 = vadd.f32 %v3154_v8, %v3146_v56 }
 0x165   : > { %v1383_v10 = vpop.f32.mrf.mxu1 }
 0x166   : > { %v1343_v11 = vpop.f32.mrf.mxu0 }
 0x167   : > { %v1384_v13 = vpop.f32.mrf.mxu1 }
 0x184   : > { %v1863_v19 = vpop.f32.mrf.mxu0 }
 0x185   : > { %v1904_v21 = vpop.f32.mrf.mxu1  ;;  %v1993_v27 = vadd.f32 %v1863_v19, %v1257_v14 }
 0x186   : > { %v1995_v29 = vadd.f32 %v1904_v21, %v1298_v16  ;;  %v1865_v31 = vpop.f32.mrf.mxu0 }
 0x187   : > { %v1906_v33 = vpop.f32.mrf.mxu1  ;;  %v1994_v35 = vadd.f32 %v1865_v31, %v1259_v23  ;;  %v2007_v37 = vadd.f32 %v3156_v18, %v1993_v27 }
 0x188   : > { %v1996_v12 = vadd.f32 %v1906_v33, %v1300_v25  ;;  %v2009_v15 = vadd.f32 %v3156_v18, %v1995_v29  ;;  %v1867_v17 = vpop.f32.mrf.mxu0 }
 0x189   : > { %v1908_v20 = vpop.f32.mrf.mxu1  ;;  %v2008_v22 = vadd.f32 %v3156_v18, %v1994_v35  ;;  %v2023_v24 = vmin.f32 %v2007_v37, 0.0  ;;  %vm2015_vm1 = vcmp.gt.f32.partialorder %v2007_v37, 0.0 }
 0x18a   : > { %v2010_v26 = vadd.f32 %v3156_v18, %v1996_v12  ;;  %v2025_v28 = vmin.f32 %v2009_v15, 0.0  ;;  %v1868_v30 = vpop.f32.mrf.mxu0  ;;  %vm2017_vm3 = vcmp.gt.f32.partialorder %v2009_v15, 0.0 }
 0x18b   : > { %v1909_v32 = vpop.f32.mrf.mxu1  ;;  %v2024_v34 = vmin.f32 %v2008_v22, 0.0  ;;  %v2031_v36 = vmul.f32 1.442695, %v2023_v24  ;;  %vm2016_vm2 = vcmp.gt.f32.partialorder %v2008_v22, 0.0 }
 0x18c   : > { %v2026_v38 = vmin.f32 %v2010_v26, 0.0  ;;  %v2035_v39 = vmul.f32 1.442695, %v2025_v28  ;;  %vm2018_vm4 = vcmp.gt.f32.partialorder %v2010_v26, 0.0 }
 0x18d   : > { %2677 = vpow2.f32 %v2031_v36  ;;  %v2033_v40 = vmul.f32 1.442695, %v2024_v34 }
 0x18e   : > { %2679 = vpow2.f32 %v2035_v39  ;;  %v2037_v41 = vmul.f32 1.442695, %v2026_v38 }
 0x18f   : > { %2681 = vpow2.f32 %v2033_v40 }
 0x190   : > { %2683 = vpow2.f32 %v2037_v41 }
 0x19a   : > { %v2678_v42 = vpop.eup %2677 }
 0x19b   : > { %v2680_v43 = vpop.eup %2679  ;;  %v2398_v44 = vadd.f32 -1.0, %v2678_v42 }
 0x19c   : > { %v2682_v45 = vpop.eup %2681  ;;  %v2400_v46 = vadd.f32 -1.0, %v2680_v43 }
 0x19d   : > { %v2684_v47 = vpop.eup %2683  ;;  %v2399_v48 = vadd.f32 -1.0, %v2682_v45  ;;  %v2055_v50 = vsel %vm2015_vm1, %v2007_v37, %v2398_v44 }
 0x19e   : > { %v2401_v49 = vadd.f32 -1.0, %v2684_v47  ;;  %v2057_v57 = vsel %vm2017_vm3, %v2009_v15, %v2400_v46 }
 0x19f   : > { %v2056_v51 = vsel %vm2016_vm2, %v2008_v22, %v2399_v48 }
 0x1a0   : > { %v2413_v52 = vpack.c.bf16 %v2056_v51, %v2055_v50  ;;  %v2058_v58 = vsel %vm2018_vm4, %v2010_v26, %v2401_v49 }
 0x1a1   : > { %v2414_v59 = vpack.c.bf16 %v2058_v58, %v2057_v57 }
 0x1a2   : > { %2095 = vst [vmem:[%s3166_s29] sm:$0xff] %v2413_v52 }
 0x1a3   : > { %2096 = vst [vmem:[%s3166_s29 + $0x8] sm:$0xff] %v2414_v59 }
 0x1a8   : > { %v1945_v62 = vpop.f32.mrf.mxu0 }
 0x1a9   : > { %v1986_v63 = vpop.f32.mrf.mxu1  ;;  %v1997_v2 = vadd.f32 %v1945_v62, %v1339_v60 }
 0x1aa   : > { %v1999_v3 = vadd.f32 %v1986_v63, %v1380_v61  ;;  %v1947_v4 = vpop.f32.mrf.mxu0 }
 0x1ab   : > { %v1988_v9 = vpop.f32.mrf.mxu1  ;;  %v2011_v10 = vadd.f32 %v3156_v18, %v1997_v2  ;;  %v1998_v53 = vadd.f32 %v1947_v4, %v1341_v0 }
 0x1ac   : > { %v2013_v11 = vadd.f32 %v3156_v18, %v1999_v3  ;;  %v2000_v5 = vadd.f32 %v1988_v9, %v1382_v1  ;;  %v1949_v13 = vpop.f32.mrf.mxu0 }
 0x1ad   : > { %v1990_v54 = vpop.f32.mrf.mxu1  ;;  %v2027_v6 = vmin.f32 %v2011_v10, 0.0  ;;  %v2012_v16 = vadd.f32 %v3156_v18, %v1998_v53  ;;  %vm2019_vm5 = vcmp.gt.f32.partialorder %v2011_v10, 0.0 }
 0x1ae   : > { %v2029_v14 = vmin.f32 %v2013_v11, 0.0  ;;  %v2014_v55 = vadd.f32 %v3156_v18, %v2000_v5  ;;  %v1950_v7 = vpop.f32.mrf.mxu0  ;;  %vm2021_vm7 = vcmp.gt.f32.partialorder %v2013_v11, 0.0 }
 0x1af   : > { %v1991_v56 = vpop.f32.mrf.mxu1  ;;  %v2039_v8 = vmul.f32 1.442695, %v2027_v6  ;;  %v2028_v21 = vmin.f32 %v2012_v16, 0.0  ;;  %vm2020_vm6 = vcmp.gt.f32.partialorder %v2012_v16, 0.0 }
 0x1b0   : > { %v2043_v19 = vmul.f32 1.442695, %v2029_v14  ;;  %v2030_v23 = vmin.f32 %v2014_v55, 0.0  ;;  %vm2022_vm8 = vcmp.gt.f32.partialorder %v2014_v55, 0.0 }
 0x1b1   : > { %2685 = vpow2.f32 %v2039_v8  ;;  %v2041_v25 = vmul.f32 1.442695, %v2028_v21 }
 0x1b2   : > { %2687 = vpow2.f32 %v2043_v19  ;;  %v2045_v27 = vmul.f32 1.442695, %v2030_v23 }
 0x1b3   : > { %2689 = vpow2.f32 %v2041_v25 }
 0x1b4   : > { %2691 = vpow2.f32 %v2045_v27 }
 0x1be   : > { %v2686_v29 = vpop.eup %2685 }
 0x1bf   : > { %v2688_v31 = vpop.eup %2687  ;;  %v2402_v33 = vadd.f32 -1.0, %v2686_v29 }
 0x1c0   : > { %v2690_v35 = vpop.eup %2689  ;;  %v2404_v37 = vadd.f32 -1.0, %v2688_v31 }
 0x1c1   : > { %v2692_v18 = vpop.eup %2691  ;;  %v2403_v12 = vadd.f32 -1.0, %v2690_v35  ;;  %v2059_v17 = vsel %vm2019_vm5, %v2011_v10, %v2402_v33 }
 0x1c2   : > { %v2405_v15 = vadd.f32 -1.0, %v2692_v18  ;;  %v2061_v22 = vsel %vm2021_vm7, %v2013_v11, %v2404_v37 }
 0x1c3   : > { %v2060_v20 = vsel %vm2020_vm6, %v2012_v16, %v2403_v12 }
 0x1c4   : > { %v2415_v24 = vpack.c.bf16 %v2060_v20, %v2059_v17  ;;  %v2062_v26 = vsel %vm2022_vm8, %v2014_v55, %v2405_v15 }
 0x1c5   : > { %v2416_v28 = vpack.c.bf16 %v2062_v26, %v2061_v22 }
 0x1c6   : > { %2097 = vst [vmem:[%s3166_s29 + $0x10] sm:$0xff] %v2415_v24 }
 0x1c7   : > { %2098 = vst [vmem:[%s3166_s29 + $0x18] sm:$0xff] %v2416_v28 }
 0x1c8 PF: > { %s13_s12 = sadd.s32 1, %s2699_s12  }
 0x1c9   : > { %p10_p4 = scmp.ge.s32.totalorder %s13_s12, 4  }
 0x1cb   :  { %12 = sbr.rel (!%p10_p4) target bundleno = 1 (0x1), region = 64 }

// kernel: sunet3d_forward.14
= control target key start
LH: loop header
LB: loop body
LE: loop exit
PB: predicated region body
PF: predicated region fallthrough
CT: control target
= control target key end

     0   :  { %s1912_s12 = smov 0   ;;  %s2154_s0 = inlined_call_operand.vmem [shape: bf16[2,80,1280], index: 0, kind: input, shape index: {}]   ;;  %s2155_s1 = inlined_call_operand.vmem [shape: bf16[3,8,80], index: 1, kind: input, shape index: {}]   ;;  %s2156_s2 = inlined_call_operand.vmem [shape: f32[8,1], index: 2, kind: input, shape index: {}]   ;;  %s2157_s3 = inlined_call_operand.vmem [shape: bf16[2,8,1024], index: 3, kind: output, shape index: {}]  }
   0x1 LB: > { %s1560_s13 = sadd.s32 4294967295, %s1889_s12   ;;  %p1564_p0 = scmp.ge.s32.totalorder %s1889_s12, 1  ;;  %s1889_s12 = sphi %s1912_s12, %s13_s12  }
   0x2   : > { %p137_p1 = scmp.lt.s32.totalorder %s1889_s12, 3 }
   0x4   : > { %p138_p2 = pnand %p1564_p0, %p137_p1 }
   0x5   : > { %p161_p3 = scmp.lt.s32.totalorder (!%p138_p2), %s1560_s13, 1 }
   0x6   : > { %141 = sbr.rel (%p138_p2) target bundleno = 360 (0x168), region = 32 }
   0xb   : > { %v1891_v0 = vmov 0   ;;  %s2159_s13 = smov (!%p161_p3, %s1560_s13), 1  ;;  %v1407_v1 = vld [vmem:[%s2156_s2] sm:$0xff]  ;;  %vm455_vm0 = vcmask 654336  }
   0xc   : > { %491 = vmatprep.mubr.bf16.mxu0 %v1891_v0  ;;  %532 = vmatprep.mubr.bf16.mxu1 %v1891_v0  ;;  %s1721_s16 = smul.u32 400, %s2159_s13  ;;  %v1568_v24 = vld [vmem:[%s2155_s1 + $0x4] sm:$0xf]  ;;  %s1716_s26 = sshll.u32 %s2159_s13, 5 }
   0xd   : > { %1731 = vset.pattern.permute.xlu0 %v1891_v0  ;;  %s2143_s29 = scalar_lea.vmem %s2157_s3, %s1716_s26 }
   0xe   : > { %1410 = vperm.xlu0 %1731, %v1407_v1   ;;  %s1932_s19 = scalar_lea.vmem %s2154_s0, %s1721_s16 }
   0xf   : > { %v1732_v2 = vld [vmem:[%s1932_s19 + $0x148] ss:$40 sps:$4 sm:$0xff]   ;;  %v1736_v4 = vld [vmem:[%s1932_s19 + $0x144] ss:$40 sps:$4 sm:$0xff]   ;;  %v1738_v6 = vld [vmem:[%s1932_s19 + $0xf8] ss:$40 sps:$4 sm:$0xff]  }
  0x10   : > { %v1734_v3 = vld [vmem:[%s1932_s19 + $0x150] ss:$40 sps:$4 sm:$0xff]   ;;  %465 = vmatprep.subr.bf16.mxu0 %v1732_v2  ;;  %v1737_v5 = vld [vmem:[%s1932_s19 + $0x14c] ss:$40 sps:$4 sm:$0xff]   ;;  %v1740_v7 = vld [vmem:[%s1932_s19 + $0x100] ss:$40 sps:$4 sm:$0xff]  }
  0x11   : > { %506 = vmatprep.subr.bf16.mxu1 %v1734_v3  ;;  %466 = vmatpush1.bf16.msra.mxu0 %v1736_v4  ;;  %v1742_v8 = vld [vmem:[%s1932_s19 + $0xf4] ss:$40 sps:$4 sm:$0xff]   ;;  %v1744_v10 = vld [vmem:[%s1932_s19 + $0xa8] ss:$40 sps:$4 sm:$0xff]   ;;  %v1748_v12 = vld [vmem:[%s1932_s19 + $0xa4] ss:$40 sps:$4 sm:$0xff]  }
  0x12   : > { %507 = vmatpush1.bf16.msra.mxu1 %v1737_v5  ;;  %467 = vmatprep.subr.bf16.mxu0 %v1738_v6  ;;  %v1743_v9 = vld [vmem:[%s1932_s19 + $0xfc] ss:$40 sps:$4 sm:$0xff]   ;;  %v1746_v11 = vld [vmem:[%s1932_s19 + $0xb0] ss:$40 sps:$4 sm:$0xff]   ;;  %v1749_v13 = vld [vmem:[%s1932_s19 + $0xac] ss:$40 sps:$4 sm:$0xff]  }
  0x13   : > { %508 = vmatprep.subr.bf16.mxu1 %v1740_v7  ;;  %v1750_v14 = vld [vmem:[%s1932_s19 + $0x58] ss:$40 sps:$4 sm:$0xff]   ;;  %v1754_v16 = vld [vmem:[%s1932_s19 + $0x54] ss:$40 sps:$4 sm:$0xff]   ;;  %v1756_v18 = vld [vmem:[%s1932_s19 + $0x8] ss:$40 sps:$4 sm:$0xff]  }
  0x14   : > { %v1752_v15 = vld [vmem:[%s1932_s19 + $0x60] ss:$40 sps:$4 sm:$0xff]   ;;  %v1755_v17 = vld [vmem:[%s1932_s19 + $0x5c] ss:$40 sps:$4 sm:$0xff]   ;;  %v1758_v19 = vld [vmem:[%s1932_s19 + $0x10] ss:$40 sps:$4 sm:$0xff]  }
  0x15   : > { %468 = vmatpush1.bf16.msra.mxu0 %v1742_v8  ;;  %v1760_v20 = vld [vmem:[%s1932_s19 + $0x4] ss:$40 sps:$4 sm:$0xff]   ;;  %v1764_v22 = vld [vmem:[%s1932_s19 + $0x158] ss:$40 sps:$4 sm:$0xff]   ;;  %v1762_v25 = vld [vmem:[%s1932_s19 + $0x154] ss:$40 sps:$4 sm:$0xff]  }
  0x16   : > { %509 = vmatpush1.bf16.msra.mxu1 %v1743_v9  ;;  %469 = vmatprep.subr.bf16.mxu0 %v1744_v10  ;;  %v1761_v21 = vld [vmem:[%s1932_s19 + $0xc] ss:$40 sps:$4 sm:$0xff]   ;;  %v1767_v23 = vld [vmem:[%s1932_s19 + $0x160] ss:$40 sps:$4 sm:$0xff]   ;;  %v1765_v26 = vld [vmem:[%s1932_s19 + $0x15c] ss:$40 sps:$4 sm:$0xff]  }
  0x17   : > { %510 = vmatprep.subr.bf16.mxu1 %v1746_v11  ;;  %v1770_v27 = vld [vmem:[%s1932_s19 + $0x108] ss:$40 sps:$4 sm:$0xff]   ;;  %v1768_v29 = vld [vmem:[%s1932_s19 + $0x104] ss:$40 sps:$4 sm:$0xff]   ;;  %v1776_v31 = vld [vmem:[%s1932_s19 + $0xb8] ss:$40 sps:$4 sm:$0xff]  }
  0x18   : > { %v1773_v28 = vld [vmem:[%s1932_s19 + $0x110] ss:$40 sps:$4 sm:$0xff]   ;;  %v1771_v30 = vld [vmem:[%s1932_s19 + $0x10c] ss:$40 sps:$4 sm:$0xff]   ;;  %v1779_v32 = vld [vmem:[%s1932_s19 + $0xc0] ss:$40 sps:$4 sm:$0xff]  }
  0x19   : > { %470 = vmatpush1.bf16.msra.mxu0 %v1748_v12  ;;  %v1774_v33 = vld [vmem:[%s1932_s19 + $0xb4] ss:$40 sps:$4 sm:$0xff]   ;;  %v1782_v35 = vld [vmem:[%s1932_s19 + $0x68] ss:$40 sps:$4 sm:$0xff]   ;;  %v1780_v37 = vld [vmem:[%s1932_s19 + $0x64] ss:$40 sps:$4 sm:$0xff]  }
  0x1a   : > { %511 = vmatpush1.bf16.msra.mxu1 %v1749_v13  ;;  %471 = vmatprep.subr.bf16.mxu0 %v1750_v14  ;;  %v1777_v34 = vld [vmem:[%s1932_s19 + $0xbc] ss:$40 sps:$4 sm:$0xff]   ;;  %v1785_v36 = vld [vmem:[%s1932_s19 + $0x70] ss:$40 sps:$4 sm:$0xff]   ;;  %v1783_v38 = vld [vmem:[%s1932_s19 + $0x6c] ss:$40 sps:$4 sm:$0xff]  }
  0x1b   : > { %512 = vmatprep.subr.bf16.mxu1 %v1752_v15  ;;  %v1788_v39 = vld [vmem:[%s1932_s19 + $0x18] ss:$40 sps:$4 sm:$0xff]   ;;  %v1786_v41 = vld [vmem:[%s1932_s19 + $0x14] ss:$40 sps:$4 sm:$0xff]   ;;  %v1794_v43 = vld [vmem:[%s1932_s19 + $0x144] ss:$40 sps:$4 sm:$0xff]  }
  0x1c   : > { %v1791_v40 = vld [vmem:[%s1932_s19 + $0x20] ss:$40 sps:$4 sm:$0xff]   ;;  %v1789_v42 = vld [vmem:[%s1932_s19 + $0x1c] ss:$40 sps:$4 sm:$0xff]   ;;  %v1983_v44 = vld [vmem:[%s1932_s19 + $0x14c] ss:$40 sps:$4 sm:$0xff]  }
  0x1d   : > { %472 = vmatpush1.bf16.msra.mxu0 %v1754_v16  ;;  %v1792_v45 = vld [vmem:[%s1932_s19 + $0x140] ss:$40 sps:$4 sm:$0xff]   ;;  %v1800_v47 = vld [vmem:[%s1932_s19 + $0xf4] ss:$40 sps:$4 sm:$0xff]   ;;  %v1798_v49 = vld [vmem:[%s1932_s19 + $0xf0] ss:$40 sps:$4 sm:$0xff]  }
  0x1e   : > { %513 = vmatpush1.bf16.msra.mxu1 %v1755_v17  ;;  %473 = vmatprep.subr.bf16.mxu0 %v1756_v18  ;;  %v1987_v46 = vld [vmem:[%s1932_s19 + $0x148] ss:$40 sps:$4 sm:$0xff]   ;;  %v1992_v48 = vld [vmem:[%s1932_s19 + $0xfc] ss:$40 sps:$4 sm:$0xff]   ;;  %v1998_v50 = vld [vmem:[%s1932_s19 + $0xf8] ss:$40 sps:$4 sm:$0xff]  }
  0x1f   : > { %514 = vmatprep.subr.bf16.mxu1 %v1758_v19  ;;  %v1806_v51 = vld [vmem:[%s1932_s19 + $0xa4] ss:$40 sps:$4 sm:$0xff]   ;;  %v1804_v53 = vld [vmem:[%s1932_s19 + $0xa0] ss:$40 sps:$4 sm:$0xff]   ;;  %v1812_v55 = vld [vmem:[%s1932_s19 + $0x54] ss:$40 sps:$4 sm:$0xff]  }
  0x20   : > { %v2004_v52 = vld [vmem:[%s1932_s19 + $0xac] ss:$40 sps:$4 sm:$0xff]   ;;  %v2010_v54 = vld [vmem:[%s1932_s19 + $0xa8] ss:$40 sps:$4 sm:$0xff]   ;;  %v2016_v56 = vld [vmem:[%s1932_s19 + $0x5c] ss:$40 sps:$4 sm:$0xff]  }
  0x21   : > { %474 = vmatpush1.bf16.msra.mxu0 %v1760_v20  ;;  %v1810_v57 = vld [vmem:[%s1932_s19 + $0x50] ss:$40 sps:$4 sm:$0xff]   ;;  %v1818_v59 = vld [vmem:[%s1932_s19 + $0x4] ss:$40 sps:$4 sm:$0xff]   ;;  %v1816_v61 = vld [vmem:[%s1932_s19] ss:$40 sps:$4 sm:$0xff]  }
  0x22   : > { %515 = vmatpush1.bf16.msra.mxu1 %v1761_v21  ;;  %547 = vmatprep.subr.bf16.mxu0 %v1764_v22  ;;  %v2020_v58 = vld [vmem:[%s1932_s19 + $0x58] ss:$40 sps:$4 sm:$0xff]   ;;  %v2026_v60 = vld [vmem:[%s1932_s19 + $0xc] ss:$40 sps:$4 sm:$0xff]   ;;  %v2030_v62 = vld [vmem:[%s1932_s19 + $0x8] ss:$40 sps:$4 sm:$0xff]  }
  0x23   : > { %588 = vmatprep.subr.bf16.mxu1 %v1767_v23  ;;  %v1824_v63 = vld [vmem:[%s1932_s19 + $0x154] ss:$40 sps:$4 sm:$0xff]   ;;  %v172_v2 = vld [vmem:[%s2155_s1] sm:$0xf]  ;;  %v1822_v3 = vld [vmem:[%s1932_s19 + $0x150] ss:$40 sps:$4 sm:$0xff]  }
  0x24   : > { %1609 = vmatmul.mubr.msk.bf16.vlgmr.msra.gmra.mxu0 %vm455_vm0, %v1568_v24  ;;  %v2036_v1 = vld [vmem:[%s1932_s19 + $0x15c] ss:$40 sps:$4 sm:$0xff]   ;;  %v2044_v4 = vld [vmem:[%s1932_s19 + $0x158] ss:$40 sps:$4 sm:$0xff]   ;;  %v2049_v6 = vld [vmem:[%s1932_s19 + $0x10c] ss:$40 sps:$4 sm:$0xff]  }
  0x25   : > { %1610 = vmatmul.mubr.msk.bf16.vlgmr.msra.gmra.mxu1 %vm455_vm0, %v1568_v24  ;;  %548 = vmatpush1.bf16.msra.mxu0 %v1762_v25  ;;  %v1830_v5 = vld [vmem:[%s1932_s19 + $0x104] ss:$40 sps:$4 sm:$0xff]   ;;  %v1828_v7 = vld [vmem:[%s1932_s19 + $0x100] ss:$40 sps:$4 sm:$0xff]   ;;  %v1836_v9 = vld [vmem:[%s1932_s19 + $0xb4] ss:$40 sps:$4 sm:$0xff]  }
  0x26   : > { %589 = vmatpush1.bf16.msra.mxu1 %v1765_v26  ;;  %549 = vmatprep.subr.bf16.mxu0 %v1770_v27  ;;  %v2056_v8 = vld [vmem:[%s1932_s19 + $0x108] ss:$40 sps:$4 sm:$0xff]   ;;  %v2061_v10 = vld [vmem:[%s1932_s19 + $0xbc] ss:$40 sps:$4 sm:$0xff]   ;;  %v2068_v12 = vld [vmem:[%s1932_s19 + $0xb8] ss:$40 sps:$4 sm:$0xff]  }
  0x27   : > { %590 = vmatprep.subr.bf16.mxu1 %v1773_v28  ;;  %573 = vmatprep.mubr.bf16.mxu0 %v1891_v0  ;;  %v1834_v11 = vld [vmem:[%s1932_s19 + $0xb0] ss:$40 sps:$4 sm:$0xff]   ;;  %v1842_v13 = vld [vmem:[%s1932_s19 + $0x64] ss:$40 sps:$4 sm:$0xff]   ;;  %v1840_v15 = vld [vmem:[%s1932_s19 + $0x60] ss:$40 sps:$4 sm:$0xff]  }
  0x28   : > { %614 = vmatprep.mubr.bf16.mxu1 %v1891_v0  ;;  %v2073_v14 = vld [vmem:[%s1932_s19 + $0x6c] ss:$40 sps:$4 sm:$0xff]   ;;  %v2078_v16 = vld [vmem:[%s1932_s19 + $0x68] ss:$40 sps:$4 sm:$0xff]   ;;  %v2083_v18 = vld [vmem:[%s1932_s19 + $0x1c] ss:$40 sps:$4 sm:$0xff]  }
  0x29   : > { %550 = vmatpush1.bf16.msra.mxu0 %v1768_v29  ;;  %v1848_v17 = vld [vmem:[%s1932_s19 + $0x14] ss:$40 sps:$4 sm:$0xff]   ;;  %v1846_v19 = vld [vmem:[%s1932_s19 + $0x10] ss:$40 sps:$4 sm:$0xff]   ;;  %v1854_v21 = vld [vmem:[%s1932_s19 + $0x164] ss:$40 sps:$4 sm:$0xff]  }
  0x2a   : > { %591 = vmatpush1.bf16.msra.mxu1 %v1771_v30  ;;  %551 = vmatprep.subr.bf16.mxu0 %v1776_v31  ;;  %v1849_v20 = vld [vmem:[%s1932_s19 + $0x18] ss:$40 sps:$4 sm:$0xff]   ;;  %v1657_v22 = vld [vmem:[%s2155_s1 + $0x8] sm:$0xf]  ;;  %v1860_v26 = vld [vmem:[%s1932_s19 + $0xc4] ss:$40 sps:$4 sm:$0xff]  }
  0x2b   : > { %592 = vmatprep.subr.bf16.mxu1 %v1779_v32  ;;  %v1852_v23 = vld [vmem:[%s1932_s19 + $0x160] ss:$40 sps:$4 sm:$0xff]   ;;  %v1855_v25 = vld [vmem:[%s1932_s19 + $0x110] ss:$40 sps:$4 sm:$0xff]   ;;  %v1863_v28 = vld [vmem:[%s1932_s19 + $0x74] ss:$40 sps:$4 sm:$0xff]  }
  0x2c   : > { %v1858_v27 = vld [vmem:[%s1932_s19 + $0xc0] ss:$40 sps:$4 sm:$0xff]   ;;  %v1861_v29 = vld [vmem:[%s1932_s19 + $0x70] ss:$40 sps:$4 sm:$0xff]   ;;  %v1866_v30 = vld [vmem:[%s1932_s19 + $0x24] ss:$40 sps:$4 sm:$0xff]  }
  0x2d   : > { %552 = vmatpush1.bf16.msra.mxu0 %v1774_v33 }
  0x2e   : > { %593 = vmatpush1.bf16.msra.mxu1 %v1777_v34  ;;  %553 = vmatprep.subr.bf16.mxu0 %v1782_v35 }
  0x2f   : > { %594 = vmatprep.subr.bf16.mxu1 %v1785_v36 }
  0x31   : > { %554 = vmatpush1.bf16.msra.mxu0 %v1780_v37 }
  0x32   : > { %595 = vmatpush1.bf16.msra.mxu1 %v1783_v38  ;;  %555 = vmatprep.subr.bf16.mxu0 %v1788_v39 }
  0x33   : > { %596 = vmatprep.subr.bf16.mxu1 %v1791_v40 }
  0x35   : > { %556 = vmatpush1.bf16.msra.mxu0 %v1786_v41 }
  0x36   : > { %597 = vmatpush1.bf16.msra.mxu1 %v1789_v42  ;;  %832 = vmatprep.subr.bf16.mxu0 %v1794_v43 }
  0x37   : > { %873 = vmatprep.subr.bf16.mxu1 %v1983_v44 }
  0x38   : > { %1611 = vmatmul.mubr.msk.bf16.vlgmr.msra.gmra.mxu0 %vm455_vm0, %v1568_v24 }
  0x39   : > { %1612 = vmatmul.mubr.msk.bf16.vlgmr.msra.gmra.mxu1 %vm455_vm0, %v1568_v24  ;;  %833 = vmatpush1.bf16.msra.mxu0 %v1792_v45  ;;  %v1857_v24 = vld [vmem:[%s1932_s19 + $0x114] ss:$40 sps:$4 sm:$0xff]  }
  0x3a   : > { %874 = vmatpush1.bf16.msra.mxu1 %v1987_v46  ;;  %834 = vmatprep.subr.bf16.mxu0 %v1800_v47 }
  0x3b   : > { %875 = vmatprep.subr.bf16.mxu1 %v1992_v48  ;;  %858 = vmatprep.mubr.bf16.mxu0 %v1891_v0 }
  0x3c   : > { %899 = vmatprep.mubr.bf16.mxu1 %v1891_v0 }
  0x3d   : > { %835 = vmatpush1.bf16.msra.mxu0 %v1798_v49 }
  0x3e   : > { %876 = vmatpush1.bf16.msra.mxu1 %v1998_v50  ;;  %836 = vmatprep.subr.bf16.mxu0 %v1806_v51 }
  0x3f   : > { %877 = vmatprep.subr.bf16.mxu1 %v2004_v52 }
  0x41   : > { %837 = vmatpush1.bf16.msra.mxu0 %v1804_v53 }
  0x42   : > { %878 = vmatpush1.bf16.msra.mxu1 %v2010_v54  ;;  %838 = vmatprep.subr.bf16.mxu0 %v1812_v55 }
  0x43   : > { %879 = vmatprep.subr.bf16.mxu1 %v2016_v56 }
  0x45   : > { %839 = vmatpush1.bf16.msra.mxu0 %v1810_v57 }
  0x46   : > { %880 = vmatpush1.bf16.msra.mxu1 %v2020_v58  ;;  %840 = vmatprep.subr.bf16.mxu0 %v1818_v59 }
  0x47   : > { %881 = vmatprep.subr.bf16.mxu1 %v2026_v60 }
  0x49   : > { %841 = vmatpush1.bf16.msra.mxu0 %v1816_v61 }
  0x4a   : > { %882 = vmatpush1.bf16.msra.mxu1 %v2030_v62  ;;  %914 = vmatprep.subr.bf16.mxu0 %v1824_v63 }
  0x4b   : > { %955 = vmatprep.subr.bf16.mxu1 %v2036_v1 }
  0x4c   : > { %1653 = vmatmul.mubr.msk.bf16.vlgmr.msra.gmra.mxu0 %vm455_vm0, %v172_v2 }
  0x4d   : > { %1654 = vmatmul.mubr.msk.bf16.vlgmr.msra.gmra.mxu1 %vm455_vm0, %v172_v2  ;;  %915 = vmatpush1.bf16.msra.mxu0 %v1822_v3 }
  0x4e   : > { %956 = vmatpush1.bf16.msra.mxu1 %v2044_v4  ;;  %916 = vmatprep.subr.bf16.mxu0 %v1830_v5 }
  0x4f   : > { %957 = vmatprep.subr.bf16.mxu1 %v2049_v6  ;;  %940 = vmatprep.mubr.bf16.mxu0 %v1891_v0 }
  0x50   : > { %981 = vmatprep.mubr.bf16.mxu1 %v1891_v0 }
  0x51   : > { %917 = vmatpush1.bf16.msra.mxu0 %v1828_v7 }
  0x52   : > { %958 = vmatpush1.bf16.msra.mxu1 %v2056_v8  ;;  %918 = vmatprep.subr.bf16.mxu0 %v1836_v9 }
  0x53   : > { %959 = vmatprep.subr.bf16.mxu1 %v2061_v10 }
  0x55   : > { %919 = vmatpush1.bf16.msra.mxu0 %v1834_v11 }
  0x56   : > { %960 = vmatpush1.bf16.msra.mxu1 %v2068_v12  ;;  %920 = vmatprep.subr.bf16.mxu0 %v1842_v13 }
  0x57   : > { %961 = vmatprep.subr.bf16.mxu1 %v2073_v14 }
  0x59   : > { %921 = vmatpush1.bf16.msra.mxu0 %v1840_v15 }
  0x5a   : > { %962 = vmatpush1.bf16.msra.mxu1 %v2078_v16  ;;  %922 = vmatprep.subr.bf16.mxu0 %v1848_v17 }
  0x5b   : > { %963 = vmatprep.subr.bf16.mxu1 %v2083_v18 }
  0x5d   : > { %923 = vmatpush1.bf16.msra.mxu0 %v1846_v19 }
  0x5e   : > { %964 = vmatpush1.bf16.msra.mxu1 %v1849_v20  ;;  %1241 = vmatprep.subr.bf16.mxu0 %v1983_v44 }
  0x5f   : > { %1282 = vmatprep.subr.bf16.mxu1 %v1824_v63 }
  0x60   : > { %1655 = vmatmul.mubr.msk.bf16.vlgmr.msra.gmra.mxu0 %vm455_vm0, %v172_v2 }
  0x61   : > { %1656 = vmatmul.mubr.msk.bf16.vlgmr.msra.gmra.mxu1 %vm455_vm0, %v172_v2  ;;  %1242 = vmatpush1.bf16.msra.mxu0 %v1987_v46 }
  0x62   : > { %1283 = vmatpush1.bf16.msra.mxu1 %v1822_v3  ;;  %1243 = vmatprep.subr.bf16.mxu0 %v1992_v48 }
  0x63   : > { %1284 = vmatprep.subr.bf16.mxu1 %v1830_v5  ;;  %1267 = vmatprep.mubr.bf16.mxu0 %v1891_v0 }
  0x64   : > { %1308 = vmatprep.mubr.bf16.mxu1 %v1891_v0 }
  0x65   : > { %1244 = vmatpush1.bf16.msra.mxu0 %v1998_v50 }
  0x66   : > { %1285 = vmatpush1.bf16.msra.mxu1 %v1828_v7  ;;  %1245 = vmatprep.subr.bf16.mxu0 %v2004_v52 }
  0x67   : > { %1286 = vmatprep.subr.bf16.mxu1 %v1836_v9 }
  0x69   : > { %1246 = vmatpush1.bf16.msra.mxu0 %v2010_v54 }
  0x6a   : > { %1287 = vmatpush1.bf16.msra.mxu1 %v1834_v11  ;;  %1247 = vmatprep.subr.bf16.mxu0 %v2016_v56 }
  0x6b   : > { %1288 = vmatprep.subr.bf16.mxu1 %v1842_v13 }
  0x6d   : > { %1248 = vmatpush1.bf16.msra.mxu0 %v2020_v58 }
  0x6e   : > { %1289 = vmatpush1.bf16.msra.mxu1 %v1840_v15  ;;  %1249 = vmatprep.subr.bf16.mxu0 %v2026_v60 }
  0x6f   : > { %1290 = vmatprep.subr.bf16.mxu1 %v1848_v17 }
  0x71   : > { %1250 = vmatpush1.bf16.msra.mxu0 %v2030_v62 }
  0x72   : > { %1291 = vmatpush1.bf16.msra.mxu1 %v1846_v19  ;;  %1323 = vmatprep.subr.bf16.mxu0 %v2036_v1 }
  0x73   : > { %1364 = vmatprep.subr.bf16.mxu1 %v1854_v21 }
  0x74   : > { %1698 = vmatmul.mubr.msk.bf16.vlgmr.msra.gmra.mxu0 %vm455_vm0, %v1657_v22 }
  0x75   : > { %1699 = vmatmul.mubr.msk.bf16.vlgmr.msra.gmra.mxu1 %vm455_vm0, %v1657_v22  ;;  %1324 = vmatpush1.bf16.msra.mxu0 %v2044_v4 }
  0x76   : > { %1365 = vmatpush1.bf16.msra.mxu1 %v1852_v23  ;;  %1325 = vmatprep.subr.bf16.mxu0 %v2049_v6 }
  0x77   : > { %1366 = vmatprep.subr.bf16.mxu1 %v1857_v24  ;;  %1349 = vmatprep.mubr.bf16.mxu0 %v1891_v0 }
  0x78   : > { %1390 = vmatprep.mubr.bf16.mxu1 %v1891_v0  ;;  %v1864_v0 = vld [vmem:[%s1932_s19 + $0x20] ss:$40 sps:$4 sm:$0xff]  }
  0x79   : > { %1326 = vmatpush1.bf16.msra.mxu0 %v2056_v8 }
  0x7a   : > { %1367 = vmatpush1.bf16.msra.mxu1 %v1855_v25  ;;  %1327 = vmatprep.subr.bf16.mxu0 %v2061_v10 }
  0x7b   : > { %1368 = vmatprep.subr.bf16.mxu1 %v1860_v26 }
  0x7d   : > { %1328 = vmatpush1.bf16.msra.mxu0 %v2068_v12 }
  0x7e   : > { %1369 = vmatpush1.bf16.msra.mxu1 %v1858_v27  ;;  %1329 = vmatprep.subr.bf16.mxu0 %v2073_v14 }
  0x7f   : > { %1370 = vmatprep.subr.bf16.mxu1 %v1863_v28 }
  0x81   : > { %1330 = vmatpush1.bf16.msra.mxu0 %v2078_v16 }
  0x82   : > { %1371 = vmatpush1.bf16.msra.mxu1 %v1861_v29  ;;  %1331 = vmatprep.subr.bf16.mxu0 %v2083_v18 }
  0x83   : > { %1372 = vmatprep.subr.bf16.mxu1 %v1866_v30 }
  0x85   : > { %1332 = vmatpush1.bf16.msra.mxu0 %v1849_v20 }
  0x86   : > { %1373 = vmatpush1.bf16.msra.mxu1 %v1864_v0 }
  0x88   : > { %1700 = vmatmul.mubr.msk.bf16.vlgmr.msra.gmra.mxu0 %vm455_vm0, %v1657_v22 }
  0x89   : > { %1701 = vmatmul.mubr.msk.bf16.vlgmr.msra.gmra.mxu1 %vm455_vm0, %v1657_v22  ;;  %v2131_v2 = vpop.permute.xlu0 %1410 }
  0xe4   : > { %v493_v31 = vpop.f32.mrf.mxu0 }
  0xe5   : > { %v534_v32 = vpop.f32.mrf.mxu1 }
  0xe6   : > { %v495_v33 = vpop.f32.mrf.mxu0 }
  0xe7   : > { %v536_v34 = vpop.f32.mrf.mxu1 }
  0xe8   : > { %v497_v35 = vpop.f32.mrf.mxu0 }
  0xe9   : > { %v538_v36 = vpop.f32.mrf.mxu1 }
  0xea   : > { %v498_v37 = vpop.f32.mrf.mxu0 }
  0xeb   : > { %v539_v38 = vpop.f32.mrf.mxu1 }
  0xf8   : > { %v575_v39 = vpop.f32.mrf.mxu0 }
  0xf9   : > { %v616_v40 = vpop.f32.mrf.mxu1 }
  0xfa   : > { %v577_v41 = vpop.f32.mrf.mxu0 }
  0xfb   : > { %v618_v42 = vpop.f32.mrf.mxu1 }
  0xfc   : > { %v579_v43 = vpop.f32.mrf.mxu0 }
  0xfd   : > { %v620_v44 = vpop.f32.mrf.mxu1 }
  0xfe   : > { %v580_v45 = vpop.f32.mrf.mxu0 }
  0xff   : > { %v621_v46 = vpop.f32.mrf.mxu1 }
 0x10c   : > { %v860_v47 = vpop.f32.mrf.mxu0 }
 0x10d   : > { %v901_v48 = vpop.f32.mrf.mxu1  ;;  %v861_v63 = vadd.f32 %v860_v47, %v493_v31 }
 0x10e   : > { %v862_v49 = vpop.f32.mrf.mxu0  ;;  %v902_v1 = vadd.f32 %v901_v48, %v534_v32 }
 0x10f   : > { %v903_v50 = vpop.f32.mrf.mxu1  ;;  %v863_v5 = vadd.f32 %v862_v49, %v495_v33 }
 0x110   : > { %v864_v51 = vpop.f32.mrf.mxu0  ;;  %v904_v6 = vadd.f32 %v903_v50, %v536_v34 }
 0x111   : > { %v905_v52 = vpop.f32.mrf.mxu1 }
 0x112   : > { %v865_v53 = vpop.f32.mrf.mxu0 }
 0x113   : > { %v906_v54 = vpop.f32.mrf.mxu1 }
 0x120   : > { %v942_v55 = vpop.f32.mrf.mxu0 }
 0x121   : > { %v983_v56 = vpop.f32.mrf.mxu1  ;;  %v943_v29 = vadd.f32 %v942_v55, %v575_v39 }
 0x122   : > { %v944_v57 = vpop.f32.mrf.mxu0  ;;  %v984_v30 = vadd.f32 %v983_v56, %v616_v40 }
 0x123   : > { %v985_v58 = vpop.f32.mrf.mxu1  ;;  %v945_v32 = vadd.f32 %v944_v57, %v577_v41 }
 0x124   : > { %v946_v59 = vpop.f32.mrf.mxu0  ;;  %v986_v36 = vadd.f32 %v985_v58, %v618_v42 }
 0x125   : > { %v987_v60 = vpop.f32.mrf.mxu1 }
 0x126   : > { %v947_v61 = vpop.f32.mrf.mxu0 }
 0x127   : > { %v988_v62 = vpop.f32.mrf.mxu1 }
 0x134   : > { %v1269_v3 = vpop.f32.mrf.mxu0 }
 0x135   : > { %v1310_v4 = vpop.f32.mrf.mxu1  ;;  %v1399_v7 = vadd.f32 %v1269_v3, %v861_v63 }
 0x136   : > { %v1401_v8 = vadd.f32 %v1310_v4, %v902_v1  ;;  %v1271_v9 = vpop.f32.mrf.mxu0 }
 0x137   : > { %v1312_v10 = vpop.f32.mrf.mxu1  ;;  %v1400_v11 = vadd.f32 %v1271_v9, %v863_v5  ;;  %v1413_v12 = vadd.f32 %v2131_v2, %v1399_v7 }
 0x138   : > { %v1402_v13 = vadd.f32 %v1312_v10, %v904_v6  ;;  %v1415_v14 = vadd.f32 %v2131_v2, %v1401_v8  ;;  %v1273_v15 = vpop.f32.mrf.mxu0 }
 0x139   : > { %v1314_v16 = vpop.f32.mrf.mxu1  ;;  %v1414_v17 = vadd.f32 %v2131_v2, %v1400_v11  ;;  %v1429_v18 = vmin.f32 %v1413_v12, 0.0  ;;  %vm1421_vm1 = vcmp.gt.f32.partialorder %v1413_v12, 0.0 }
 0x13a   : > { %v1416_v19 = vadd.f32 %v2131_v2, %v1402_v13  ;;  %v1431_v20 = vmin.f32 %v1415_v14, 0.0  ;;  %v1274_v21 = vpop.f32.mrf.mxu0  ;;  %vm1423_vm3 = vcmp.gt.f32.partialorder %v1415_v14, 0.0 }
 0x13b   : > { %v1315_v22 = vpop.f32.mrf.mxu1  ;;  %v1430_v23 = vmin.f32 %v1414_v17, 0.0  ;;  %v1437_v24 = vmul.f32 1.442695, %v1429_v18  ;;  %vm1422_vm2 = vcmp.gt.f32.partialorder %v1414_v17, 0.0 }
 0x13c   : > { %v1432_v25 = vmin.f32 %v1416_v19, 0.0  ;;  %v1441_v26 = vmul.f32 1.442695, %v1431_v20  ;;  %vm1424_vm4 = vcmp.gt.f32.partialorder %v1416_v19, 0.0 }
 0x13d   : > { %1867 = vpow2.f32 %v1437_v24  ;;  %v1439_v27 = vmul.f32 1.442695, %v1430_v23 }
 0x13e   : > { %1869 = vpow2.f32 %v1441_v26  ;;  %v1443_v28 = vmul.f32 1.442695, %v1432_v25 }
 0x13f   : > { %1871 = vpow2.f32 %v1439_v27 }
 0x140   : > { %1873 = vpow2.f32 %v1443_v28 }
 0x148   : > { %v1351_v0 = vpop.f32.mrf.mxu0 }
 0x149   : > { %v1392_v31 = vpop.f32.mrf.mxu1  ;;  %v1403_v33 = vadd.f32 %v1351_v0, %v943_v29 }
 0x14a   : > { %v1405_v34 = vadd.f32 %v1392_v31, %v984_v30  ;;  %v1868_v35 = vpop.eup %1867  ;;  %v1353_v37 = vpop.f32.mrf.mxu0 }
 0x14b   : > { %v1394_v38 = vpop.f32.mrf.mxu1  ;;  %v1870_v43 = vpop.eup %1869  ;;  %v1702_v44 = vadd.f32 -1.0, %v1868_v35  ;;  %v1417_v45 = vadd.f32 %v2131_v2, %v1403_v33  ;;  %v1404_v47 = vadd.f32 %v1353_v37, %v945_v32 }
 0x14c   : > { %v1419_v46 = vadd.f32 %v2131_v2, %v1405_v34  ;;  %v1872_v48 = vpop.eup %1871  ;;  %v1704_v39 = vadd.f32 -1.0, %v1870_v43  ;;  %v1406_v40 = vadd.f32 %v1394_v38, %v986_v36  ;;  %v1355_v49 = vpop.f32.mrf.mxu0 }
 0x14d   : > { %v1396_v41 = vpop.f32.mrf.mxu1  ;;  %v1874_v50 = vpop.eup %1873  ;;  %v1703_v51 = vadd.f32 -1.0, %v1872_v48  ;;  %v1433_v42 = vmin.f32 %v1417_v45, 0.0  ;;  %v1461_v52 = vsel %vm1421_vm1, %v1413_v12, %v1702_v44  ;;  %v1418_v59 = vadd.f32 %v2131_v2, %v1404_v47 }
 0x14e   : > { %v1705_v53 = vadd.f32 -1.0, %v1874_v50  ;;  %v1435_v54 = vmin.f32 %v1419_v46, 0.0  ;;  %v1356_v55 = vpop.f32.mrf.mxu0  ;;  %v1420_v60 = vadd.f32 %v2131_v2, %v1406_v40  ;;  %v1463_v62 = vsel %vm1423_vm3, %v1415_v14, %v1704_v39 }
 0x14f   : > { %v1397_v56 = vpop.f32.mrf.mxu1  ;;  %v1462_v57 = vsel %vm1422_vm2, %v1414_v17, %v1703_v51  ;;  %v1445_v58 = vmul.f32 1.442695, %v1433_v42  ;;  %v1434_v4 = vmin.f32 %v1418_v59, 0.0  ;;  %vm1425_vm5 = vcmp.gt.f32.partialorder %v1417_v45, 0.0 }
 0x150   : > { %v1717_v61 = vpack.c.bf16 %v1462_v57, %v1461_v52  ;;  %v1464_v63 = vsel %vm1424_vm4, %v1416_v19, %v1705_v53  ;;  %v1449_v1 = vmul.f32 1.442695, %v1435_v54  ;;  %v1436_v5 = vmin.f32 %v1420_v60, 0.0 }
 0x151   : > { %v1718_v3 = vpack.c.bf16 %v1464_v63, %v1463_v62  ;;  %1875 = vpow2.f32 %v1445_v58  ;;  %v1447_v6 = vmul.f32 1.442695, %v1434_v4  ;;  %vm1426_vm6 = vcmp.gt.f32.partialorder %v1418_v59, 0.0 }
 0x152   : > { %1501 = vst [vmem:[%s2143_s29] sm:$0xff] %v1717_v61  ;;  %1877 = vpow2.f32 %v1449_v1  ;;  %v1451_v7 = vmul.f32 1.442695, %v1436_v5  ;;  %vm1427_vm7 = vcmp.gt.f32.partialorder %v1419_v46, 0.0  ;;  %vm1428_vm8 = vcmp.gt.f32.partialorder %v1420_v60, 0.0 }
 0x153   : > { %1502 = vst [vmem:[%s2143_s29 + $0x8] sm:$0xff] %v1718_v3  ;;  %1879 = vpow2.f32 %v1447_v6 }
 0x154   : > { %1881 = vpow2.f32 %v1451_v7 }
 0x15e   : > { %v1876_v8 = vpop.eup %1875 }
 0x15f   : > { %v1878_v9 = vpop.eup %1877  ;;  %v1706_v10 = vadd.f32 -1.0, %v1876_v8 }
 0x160   : > { %v1880_v2 = vpop.eup %1879  ;;  %v1708_v11 = vadd.f32 -1.0, %v1878_v9 }
 0x161   : > { %v1882_v12 = vpop.eup %1881  ;;  %v1707_v13 = vadd.f32 -1.0, %v1880_v2  ;;  %v1465_v15 = vsel %vm1425_vm5, %v1417_v45, %v1706_v10 }
 0x162   : > { %v1709_v14 = vadd.f32 -1.0, %v1882_v12  ;;  %v1467_v17 = vsel %vm1427_vm7, %v1419_v46, %v1708_v11 }
 0x163   : > { %v1466_v16 = vsel %vm1426_vm6, %v1418_v59, %v1707_v13 }
 0x164   : > { %v1719_v18 = vpack.c.bf16 %v1466_v16, %v1465_v15  ;;  %v1468_v19 = vsel %vm1428_vm8, %v1420_v60, %v1709_v14 }
 0x165   : > { %v1720_v20 = vpack.c.bf16 %v1468_v19, %v1467_v17 }
 0x166   : > { %1503 = vst [vmem:[%s2143_s29 + $0x10] sm:$0xff] %v1719_v18 }
 0x167   : > { %1504 = vst [vmem:[%s2143_s29 + $0x18] sm:$0xff] %v1720_v20 }
 0x168 PF: > { %s13_s12 = sadd.s32 1, %s1889_s12  }
 0x169   : > { %p10_p4 = scmp.ge.s32.totalorder %s13_s12, 4  }
 0x16b   :  { %12 = sbr.rel (!%p10_p4) target bundleno = 1 (0x1), region = 64 }

// kernel: sunet3d_forward.15
= control target key start
LH: loop header
LB: loop body
LE: loop exit
PB: predicated region body
PF: predicated region fallthrough
CT: control target
= control target key end

     0   :  { %s5769_s12 = smov 0   ;;  %s7199_s0 = inlined_call_operand.vmem [shape: bf16[2,80,4608], index: 0, kind: input, shape index: {}]   ;;  %s7200_s1 = inlined_call_operand.vmem [shape: bf16[3,4,80], index: 1, kind: input, shape index: {}]   ;;  %s7201_s2 = inlined_call_operand.vmem [shape: f32[4,1], index: 2, kind: input, shape index: {}]   ;;  %s7202_s3 = inlined_call_operand.vmem [shape: bf16[2,4,4096], index: 3, kind: output, shape index: {}]  }
   0x1 LB: > { %s4902_s13 = sadd.s32 4294967295, %s5745_s12   ;;  %p4906_p0 = scmp.ge.s32.totalorder %s5745_s12, 1  ;;  %s5745_s12 = sphi %s5769_s12, %s13_s12  }
   0x2   : > { %p137_p1 = scmp.lt.s32.totalorder %s5745_s12, 3 }
   0x4   : > { %p138_p2 = pnand %p4906_p0, %p137_p1 }
   0x6   : > { %141 = sbr.rel (%p138_p2) target bundleno = 727 (0x2d7), region = 32 }
   0xb   : > { %p161_p3 = scmp.lt.s32.totalorder %s4902_s13, 1  ;;  %v7203_v0 = vmov 0   ;;  %v4910_v23 = vld [vmem:[%s7200_s1 + $0x2] sm:$0x3]  ;;  %vm425_vm0 = vcmask 654336  }
   0xc   : > { %461 = vmatprep.mubr.bf16.mxu0 %v7203_v0  ;;  %502 = vmatprep.mubr.bf16.mxu1 %v7203_v0  ;;  %v172_v52 = vld [vmem:[%s7200_s1] sm:$0x3]  ;;  %v4969_v55 = vld [vmem:[%s7200_s1 + $0x4] sm:$0x3] }
   0xd   : > { %s7234_s13 = smov (!%p161_p3, %s4902_s13), 1  ;;  %5388 = vset.pattern.permute.xlu0 %v7203_v0  ;;  %5389 = vset.pattern.permute.xlu1 %v7203_v0  ;;  %v1227_v53 = vld [vmem:[%s7201_s2] sm:$0xf] }
   0xe   : > { %s5377_s14 = smul.u32 1440, %s7234_s13  ;;  %1230 = vperm.xlu0 %5388, %v1227_v53   ;;  %s5376_s15 = sshll.u32 %s7234_s13, 6 }
   0xf   : > { %s6678_s18 = scalar_lea.vmem %s7202_s3, %s5376_s15 }
  0x10   : > { %s5787_s17 = scalar_lea.vmem %s7199_s0, %s5377_s14 }
  0x11   : > { %v5790_v1 = vld [vmem:[%s5787_s17 + $0x48c] ss:$144 sps:$4 sm:$0xff]   ;;  %v5793_v2 = vld [vmem:[%s5787_s17 + $0x494] ss:$144 sps:$4 sm:$0xff]   ;;  %v5797_v3 = vld [vmem:[%s5787_s17 + $0x488] ss:$144 sps:$4 sm:$0xff]  }
  0x12   : > { %435 = vmatprep.subr.bf16.mxu0 %v5790_v1  ;;  %v5800_v4 = vld [vmem:[%s5787_s17 + $0x490] ss:$144 sps:$4 sm:$0xff]   ;;  %476 = vmatprep.subr.bf16.mxu1 %v5793_v2  ;;  %v5804_v5 = vld [vmem:[%s5787_s17 + $0x36c] ss:$144 sps:$4 sm:$0xff]   ;;  %v5809_v6 = vld [vmem:[%s5787_s17 + $0x374] ss:$144 sps:$4 sm:$0xff]  }
  0x13   : > { %436 = vmatpush1.bf16.msra.mxu0 %v5797_v3  ;;  %477 = vmatpush1.bf16.msra.mxu1 %v5800_v4  ;;  %v5812_v7 = vld [vmem:[%s5787_s17 + $0x368] ss:$144 sps:$4 sm:$0xff]   ;;  %v5816_v8 = vld [vmem:[%s5787_s17 + $0x370] ss:$144 sps:$4 sm:$0xff]   ;;  %v5820_v9 = vld [vmem:[%s5787_s17 + $0x24c] ss:$144 sps:$4 sm:$0xff]  }
  0x14   : > { %437 = vmatprep.subr.bf16.mxu0 %v5804_v5  ;;  %478 = vmatprep.subr.bf16.mxu1 %v5809_v6  ;;  %v5823_v10 = vld [vmem:[%s5787_s17 + $0x254] ss:$144 sps:$4 sm:$0xff]   ;;  %v5826_v11 = vld [vmem:[%s5787_s17 + $0x248] ss:$144 sps:$4 sm:$0xff]   ;;  %v5829_v12 = vld [vmem:[%s5787_s17 + $0x250] ss:$144 sps:$4 sm:$0xff]  }
  0x15   : > { %v5834_v13 = vld [vmem:[%s5787_s17 + $0x12c] ss:$144 sps:$4 sm:$0xff]   ;;  %v5839_v14 = vld [vmem:[%s5787_s17 + $0x134] ss:$144 sps:$4 sm:$0xff]   ;;  %v5842_v15 = vld [vmem:[%s5787_s17 + $0x128] ss:$144 sps:$4 sm:$0xff]  }
  0x16   : > { %v5847_v16 = vld [vmem:[%s5787_s17 + $0x130] ss:$144 sps:$4 sm:$0xff]   ;;  %v5850_v17 = vld [vmem:[%s5787_s17 + $0xc] ss:$144 sps:$4 sm:$0xff]   ;;  %v5855_v18 = vld [vmem:[%s5787_s17 + $0x14] ss:$144 sps:$4 sm:$0xff]  }
  0x17   : > { %438 = vmatpush1.bf16.msra.mxu0 %v5812_v7  ;;  %479 = vmatpush1.bf16.msra.mxu1 %v5816_v8  ;;  %v5858_v19 = vld [vmem:[%s5787_s17 + $0x8] ss:$144 sps:$4 sm:$0xff]   ;;  %v5861_v20 = vld [vmem:[%s5787_s17 + $0x10] ss:$144 sps:$4 sm:$0xff]   ;;  %v5866_v21 = vld [vmem:[%s5787_s17 + $0x49c] ss:$144 sps:$4 sm:$0xff]  }
  0x18   : > { %439 = vmatprep.subr.bf16.mxu0 %v5820_v9  ;;  %480 = vmatprep.subr.bf16.mxu1 %v5823_v10  ;;  %v5871_v22 = vld [vmem:[%s5787_s17 + $0x4a4] ss:$144 sps:$4 sm:$0xff]   ;;  %v5877_v24 = vld [vmem:[%s5787_s17 + $0x498] ss:$144 sps:$4 sm:$0xff]   ;;  %v5880_v25 = vld [vmem:[%s5787_s17 + $0x4a0] ss:$144 sps:$4 sm:$0xff]  }
  0x19   : > { %v5885_v26 = vld [vmem:[%s5787_s17 + $0x37c] ss:$144 sps:$4 sm:$0xff]   ;;  %v5890_v27 = vld [vmem:[%s5787_s17 + $0x384] ss:$144 sps:$4 sm:$0xff]   ;;  %v5895_v28 = vld [vmem:[%s5787_s17 + $0x378] ss:$144 sps:$4 sm:$0xff]  }
  0x1a   : > { %v5898_v29 = vld [vmem:[%s5787_s17 + $0x380] ss:$144 sps:$4 sm:$0xff]   ;;  %v5903_v30 = vld [vmem:[%s5787_s17 + $0x25c] ss:$144 sps:$4 sm:$0xff]   ;;  %v5908_v31 = vld [vmem:[%s5787_s17 + $0x264] ss:$144 sps:$4 sm:$0xff]  }
  0x1b   : > { %440 = vmatpush1.bf16.msra.mxu0 %v5826_v11  ;;  %481 = vmatpush1.bf16.msra.mxu1 %v5829_v12  ;;  %v5913_v32 = vld [vmem:[%s5787_s17 + $0x258] ss:$144 sps:$4 sm:$0xff]   ;;  %v5916_v33 = vld [vmem:[%s5787_s17 + $0x260] ss:$144 sps:$4 sm:$0xff]   ;;  %v5921_v34 = vld [vmem:[%s5787_s17 + $0x13c] ss:$144 sps:$4 sm:$0xff]  }
  0x1c   : > { %441 = vmatprep.subr.bf16.mxu0 %v5834_v13  ;;  %482 = vmatprep.subr.bf16.mxu1 %v5839_v14  ;;  %v5926_v35 = vld [vmem:[%s5787_s17 + $0x144] ss:$144 sps:$4 sm:$0xff]   ;;  %v5929_v36 = vld [vmem:[%s5787_s17 + $0x138] ss:$144 sps:$4 sm:$0xff]   ;;  %v5932_v37 = vld [vmem:[%s5787_s17 + $0x140] ss:$144 sps:$4 sm:$0xff]  }
  0x1d   : > { %v5937_v38 = vld [vmem:[%s5787_s17 + $0x1c] ss:$144 sps:$4 sm:$0xff]   ;;  %v5942_v39 = vld [vmem:[%s5787_s17 + $0x24] ss:$144 sps:$4 sm:$0xff]   ;;  %v5945_v40 = vld [vmem:[%s5787_s17 + $0x18] ss:$144 sps:$4 sm:$0xff]  }
  0x1e   : > { %v5950_v41 = vld [vmem:[%s5787_s17 + $0x20] ss:$144 sps:$4 sm:$0xff]   ;;  %v5452_v42 = vld [vmem:[%s5787_s17 + $0x484] ss:$144 sps:$4 sm:$0xff]   ;;  %v6033_v54 = vld [vmem:[%s5787_s17 + $0x4ac] ss:$144 sps:$4 sm:$0xff]  }
  0x1f   : > { %442 = vmatpush1.bf16.msra.mxu0 %v5842_v15  ;;  %483 = vmatpush1.bf16.msra.mxu1 %v5847_v16  ;;  %v5450_v43 = vld [vmem:[%s5787_s17 + $0x480] ss:$144 sps:$4 sm:$0xff]   ;;  %v5455_v44 = vld [vmem:[%s5787_s17 + $0x364] ss:$144 sps:$4 sm:$0xff]   ;;  %v6041_v56 = vld [vmem:[%s5787_s17 + $0x4a8] ss:$144 sps:$4 sm:$0xff]  }
  0x20   : > { %443 = vmatprep.subr.bf16.mxu0 %v5850_v17  ;;  %484 = vmatprep.subr.bf16.mxu1 %v5855_v18  ;;  %v5453_v45 = vld [vmem:[%s5787_s17 + $0x360] ss:$144 sps:$4 sm:$0xff]   ;;  %v5458_v46 = vld [vmem:[%s5787_s17 + $0x244] ss:$144 sps:$4 sm:$0xff]   ;;  %v6046_v57 = vld [vmem:[%s5787_s17 + $0x38c] ss:$144 sps:$4 sm:$0xff]  }
  0x21   : > { %v5456_v47 = vld [vmem:[%s5787_s17 + $0x240] ss:$144 sps:$4 sm:$0xff]   ;;  %v5461_v48 = vld [vmem:[%s5787_s17 + $0x124] ss:$144 sps:$4 sm:$0xff]   ;;  %v6053_v58 = vld [vmem:[%s5787_s17 + $0x388] ss:$144 sps:$4 sm:$0xff]  }
  0x22   : > { %v5459_v49 = vld [vmem:[%s5787_s17 + $0x120] ss:$144 sps:$4 sm:$0xff]   ;;  %v5464_v50 = vld [vmem:[%s5787_s17 + $0x4] ss:$144 sps:$4 sm:$0xff]   ;;  %v6058_v59 = vld [vmem:[%s5787_s17 + $0x26c] ss:$144 sps:$4 sm:$0xff]  }
  0x23   : > { %444 = vmatpush1.bf16.msra.mxu0 %v5858_v19  ;;  %485 = vmatpush1.bf16.msra.mxu1 %v5861_v20  ;;  %v5462_v51 = vld [vmem:[%s5787_s17] ss:$144 sps:$4 sm:$0xff]   ;;  %v6065_v60 = vld [vmem:[%s5787_s17 + $0x268] ss:$144 sps:$4 sm:$0xff]   ;;  %v6070_v61 = vld [vmem:[%s5787_s17 + $0x14c] ss:$144 sps:$4 sm:$0xff]  }
  0x24   : > { %517 = vmatprep.subr.bf16.mxu0 %v5866_v21  ;;  %558 = vmatprep.subr.bf16.mxu1 %v5871_v22  ;;  %v6075_v62 = vld [vmem:[%s5787_s17 + $0x148] ss:$144 sps:$4 sm:$0xff]   ;;  %v6080_v63 = vld [vmem:[%s5787_s17 + $0x2c] ss:$144 sps:$4 sm:$0xff]  }
  0x26   : > { %4951 = vmatmul.mubr.msk.bf16.vlgmr.msra.gmra.mxu0 %vm425_vm0, %v4910_v23  ;;  %4952 = vmatmul.mubr.msk.bf16.vlgmr.msra.gmra.mxu1 %vm425_vm0, %v4910_v23 }
  0x27   : > { %518 = vmatpush1.bf16.msra.mxu0 %v5877_v24  ;;  %559 = vmatpush1.bf16.msra.mxu1 %v5880_v25 }
  0x28   : > { %519 = vmatprep.subr.bf16.mxu0 %v5885_v26  ;;  %560 = vmatprep.subr.bf16.mxu1 %v5890_v27 }
  0x29   : > { %543 = vmatprep.mubr.bf16.mxu0 %v7203_v0  ;;  %584 = vmatprep.mubr.bf16.mxu1 %v7203_v0 }
  0x2b   : > { %520 = vmatpush1.bf16.msra.mxu0 %v5895_v28  ;;  %561 = vmatpush1.bf16.msra.mxu1 %v5898_v29 }
  0x2c   : > { %521 = vmatprep.subr.bf16.mxu0 %v5903_v30  ;;  %562 = vmatprep.subr.bf16.mxu1 %v5908_v31 }
  0x2f   : > { %522 = vmatpush1.bf16.msra.mxu0 %v5913_v32  ;;  %563 = vmatpush1.bf16.msra.mxu1 %v5916_v33 }
  0x30   : > { %523 = vmatprep.subr.bf16.mxu0 %v5921_v34  ;;  %564 = vmatprep.subr.bf16.mxu1 %v5926_v35 }
  0x33   : > { %524 = vmatpush1.bf16.msra.mxu0 %v5929_v36  ;;  %565 = vmatpush1.bf16.msra.mxu1 %v5932_v37 }
  0x34   : > { %525 = vmatprep.subr.bf16.mxu0 %v5937_v38  ;;  %566 = vmatprep.subr.bf16.mxu1 %v5942_v39 }
  0x37   : > { %526 = vmatpush1.bf16.msra.mxu0 %v5945_v40  ;;  %567 = vmatpush1.bf16.msra.mxu1 %v5950_v41 }
  0x38   : > { %652 = vmatprep.subr.bf16.mxu0 %v5452_v42  ;;  %693 = vmatprep.subr.bf16.mxu1 %v5790_v1  ;;  %v6085_v1 = vld [vmem:[%s5787_s17 + $0x28] ss:$144 sps:$4 sm:$0xff]   ;;  %v6226_v42 = vld [vmem:[%s5787_s17 + $0x40] ss:$144 sps:$4 sm:$0xff]  }
  0x3a   : > { %4953 = vmatmul.mubr.msk.bf16.vlgmr.msra.gmra.mxu0 %vm425_vm0, %v4910_v23  ;;  %4954 = vmatmul.mubr.msk.bf16.vlgmr.msra.gmra.mxu1 %vm425_vm0, %v4910_v23  ;;  %v6184_v23 = vld [vmem:[%s5787_s17 + $0x284] ss:$144 sps:$4 sm:$0xff]  }
  0x3b   : > { %653 = vmatpush1.bf16.msra.mxu0 %v5450_v43  ;;  %694 = vmatpush1.bf16.msra.mxu1 %v5797_v3  ;;  %v6095_v3 = vld [vmem:[%s5787_s17 + $0x4b0] ss:$144 sps:$4 sm:$0xff]  }
  0x3c   : > { %654 = vmatprep.subr.bf16.mxu0 %v5455_v44  ;;  %695 = vmatprep.subr.bf16.mxu1 %v5804_v5  ;;  %v6107_v5 = vld [vmem:[%s5787_s17 + $0x390] ss:$144 sps:$4 sm:$0xff]  }
  0x3d   : > { %678 = vmatprep.mubr.bf16.mxu0 %v7203_v0  ;;  %719 = vmatprep.mubr.bf16.mxu1 %v7203_v0  ;;  %v2395_v43 = vld [vmem:[%s7201_s2] sm:$0xf] }
  0x3e   : > { %2398 = vperm.xlu0 %5388, %v2395_v43   ;;  %v6466_v43 = vld [vmem:[%s5787_s17 + $0x3c4] ss:$144 sps:$4 sm:$0xff]  }
  0x3f   : > { %655 = vmatpush1.bf16.msra.mxu0 %v5453_v45  ;;  %696 = vmatpush1.bf16.msra.mxu1 %v5812_v7  ;;  %v6119_v7 = vld [vmem:[%s5787_s17 + $0x270] ss:$144 sps:$4 sm:$0xff]   ;;  %7215 = vst [vmem:[#allocation3_spill] sm:$0xff] %v6466_v43 }
  0x40   : > { %656 = vmatprep.subr.bf16.mxu0 %v5458_v46  ;;  %697 = vmatprep.subr.bf16.mxu1 %v5820_v9  ;;  %v6129_v9 = vld [vmem:[%s5787_s17 + $0x150] ss:$144 sps:$4 sm:$0xff]   ;;  %v6330_v46 = vld [vmem:[%s5787_s17 + $0x3ac] ss:$144 sps:$4 sm:$0xff]  }
  0x43   : > { %657 = vmatpush1.bf16.msra.mxu0 %v5456_v47  ;;  %698 = vmatpush1.bf16.msra.mxu1 %v5826_v11  ;;  %v6139_v11 = vld [vmem:[%s5787_s17 + $0x30] ss:$144 sps:$4 sm:$0xff]   ;;  %v6337_v47 = vld [vmem:[%s5787_s17 + $0x3a8] ss:$144 sps:$4 sm:$0xff]  }
  0x44   : > { %658 = vmatprep.subr.bf16.mxu0 %v5461_v48  ;;  %699 = vmatprep.subr.bf16.mxu1 %v5834_v13  ;;  %v6147_v13 = vld [vmem:[%s5787_s17 + $0x4c4] ss:$144 sps:$4 sm:$0xff]   ;;  %v6342_v48 = vld [vmem:[%s5787_s17 + $0x28c] ss:$144 sps:$4 sm:$0xff]  }
  0x47   : > { %659 = vmatpush1.bf16.msra.mxu0 %v5459_v49  ;;  %700 = vmatpush1.bf16.msra.mxu1 %v5842_v15  ;;  %v6155_v15 = vld [vmem:[%s5787_s17 + $0x4b8] ss:$144 sps:$4 sm:$0xff]  }
  0x48   : > { %660 = vmatprep.subr.bf16.mxu0 %v5464_v50  ;;  %701 = vmatprep.subr.bf16.mxu1 %v5850_v17  ;;  %v6163_v17 = vld [vmem:[%s5787_s17 + $0x39c] ss:$144 sps:$4 sm:$0xff]   ;;  %v6349_v49 = vld [vmem:[%s5787_s17 + $0x288] ss:$144 sps:$4 sm:$0xff]  }
  0x49   : > { %v6354_v50 = vld [vmem:[%s5787_s17 + $0x16c] ss:$144 sps:$4 sm:$0xff]  }
  0x4b   : > { %661 = vmatpush1.bf16.msra.mxu0 %v5462_v51  ;;  %702 = vmatpush1.bf16.msra.mxu1 %v5858_v19  ;;  %v6173_v19 = vld [vmem:[%s5787_s17 + $0x398] ss:$144 sps:$4 sm:$0xff]  }
  0x4c   : > { %734 = vmatprep.subr.bf16.mxu0 %v5793_v2  ;;  %775 = vmatprep.subr.bf16.mxu1 %v5866_v21  ;;  %v6359_v51 = vld [vmem:[%s5787_s17 + $0x168] ss:$144 sps:$4 sm:$0xff]  }
  0x4e   : > { %4965 = vmatmul.mubr.msk.bf16.vlgmr.msra.gmra.mxu0 %vm425_vm0, %v172_v52  ;;  %4966 = vmatmul.mubr.msk.bf16.vlgmr.msra.gmra.mxu1 %vm425_vm0, %v172_v52 }
  0x4f   : > { %735 = vmatpush1.bf16.msra.mxu0 %v5800_v4  ;;  %776 = vmatpush1.bf16.msra.mxu1 %v5877_v24 }
  0x50   : > { %736 = vmatprep.subr.bf16.mxu0 %v5809_v6  ;;  %777 = vmatprep.subr.bf16.mxu1 %v5885_v26 }
  0x51   : > { %760 = vmatprep.mubr.bf16.mxu0 %v7203_v0  ;;  %801 = vmatprep.mubr.bf16.mxu1 %v7203_v0 }
  0x53   : > { %737 = vmatpush1.bf16.msra.mxu0 %v5816_v8  ;;  %778 = vmatpush1.bf16.msra.mxu1 %v5895_v28 }
  0x54   : > { %738 = vmatprep.subr.bf16.mxu0 %v5823_v10  ;;  %779 = vmatprep.subr.bf16.mxu1 %v5903_v30 }
  0x57   : > { %739 = vmatpush1.bf16.msra.mxu0 %v5829_v12  ;;  %780 = vmatpush1.bf16.msra.mxu1 %v5913_v32 }
  0x58   : > { %740 = vmatprep.subr.bf16.mxu0 %v5839_v14  ;;  %781 = vmatprep.subr.bf16.mxu1 %v5921_v34 }
  0x5b   : > { %741 = vmatpush1.bf16.msra.mxu0 %v5847_v16  ;;  %782 = vmatpush1.bf16.msra.mxu1 %v5929_v36 }
  0x5c   : > { %742 = vmatprep.subr.bf16.mxu0 %v5855_v18  ;;  %783 = vmatprep.subr.bf16.mxu1 %v5937_v38 }
  0x5f   : > { %743 = vmatpush1.bf16.msra.mxu0 %v5861_v20  ;;  %784 = vmatpush1.bf16.msra.mxu1 %v5945_v40 }
  0x60   : > { %1061 = vmatprep.subr.bf16.mxu0 %v5793_v2  ;;  %1102 = vmatprep.subr.bf16.mxu1 %v5866_v21  ;;  %v6090_v2 = vld [vmem:[%s5787_s17 + $0x4b4] ss:$144 sps:$4 sm:$0xff]   ;;  %v6181_v21 = vld [vmem:[%s5787_s17 + $0x27c] ss:$144 sps:$4 sm:$0xff]  }
  0x62   : > { %4967 = vmatmul.mubr.msk.bf16.vlgmr.msra.gmra.mxu0 %vm425_vm0, %v172_v52  ;;  %4968 = vmatmul.mubr.msk.bf16.vlgmr.msra.gmra.mxu1 %vm425_vm0, %v172_v52  ;;  %v6364_v52 = vld [vmem:[%s5787_s17 + $0x4c] ss:$144 sps:$4 sm:$0xff]  }
  0x63   : > { %1062 = vmatpush1.bf16.msra.mxu0 %v5800_v4  ;;  %1103 = vmatpush1.bf16.msra.mxu1 %v5877_v24  ;;  %v6100_v4 = vld [vmem:[%s5787_s17 + $0x394] ss:$144 sps:$4 sm:$0xff]   ;;  %v6191_v24 = vld [vmem:[%s5787_s17 + $0x278] ss:$144 sps:$4 sm:$0xff]  }
  0x64   : > { %1063 = vmatprep.subr.bf16.mxu0 %v5809_v6  ;;  %1104 = vmatprep.subr.bf16.mxu1 %v5885_v26  ;;  %v6112_v6 = vld [vmem:[%s5787_s17 + $0x274] ss:$144 sps:$4 sm:$0xff]   ;;  %v6194_v26 = vld [vmem:[%s5787_s17 + $0x280] ss:$144 sps:$4 sm:$0xff]  }
  0x65   : > { %1087 = vmatprep.mubr.bf16.mxu0 %v7203_v0  ;;  %1128 = vmatprep.mubr.bf16.mxu1 %v7203_v0 }
  0x67   : > { %1064 = vmatpush1.bf16.msra.mxu0 %v5816_v8  ;;  %1105 = vmatpush1.bf16.msra.mxu1 %v5895_v28  ;;  %v6124_v8 = vld [vmem:[%s5787_s17 + $0x154] ss:$144 sps:$4 sm:$0xff]   ;;  %v6199_v28 = vld [vmem:[%s5787_s17 + $0x15c] ss:$144 sps:$4 sm:$0xff]  }
  0x68   : > { %1065 = vmatprep.subr.bf16.mxu0 %v5823_v10  ;;  %1106 = vmatprep.subr.bf16.mxu1 %v5903_v30  ;;  %v6134_v10 = vld [vmem:[%s5787_s17 + $0x34] ss:$144 sps:$4 sm:$0xff]  }
  0x69   : > { %v6202_v30 = vld [vmem:[%s5787_s17 + $0x164] ss:$144 sps:$4 sm:$0xff]  }
  0x6b   : > { %1066 = vmatpush1.bf16.msra.mxu0 %v5829_v12  ;;  %1107 = vmatpush1.bf16.msra.mxu1 %v5913_v32  ;;  %v6144_v12 = vld [vmem:[%s5787_s17 + $0x4bc] ss:$144 sps:$4 sm:$0xff]   ;;  %v6207_v32 = vld [vmem:[%s5787_s17 + $0x158] ss:$144 sps:$4 sm:$0xff]  }
  0x6c   : > { %1067 = vmatprep.subr.bf16.mxu0 %v5839_v14  ;;  %1108 = vmatprep.subr.bf16.mxu1 %v5921_v34  ;;  %v5026_v14 = vld [vmem:[%s7200_s1 + $0x2] sm:$0x3] }
  0x6d   : > { %v6210_v34 = vld [vmem:[%s5787_s17 + $0x160] ss:$144 sps:$4 sm:$0xff]  }
  0x6f   : > { %1068 = vmatpush1.bf16.msra.mxu0 %v5847_v16  ;;  %1109 = vmatpush1.bf16.msra.mxu1 %v5929_v36  ;;  %v6158_v16 = vld [vmem:[%s5787_s17 + $0x4c0] ss:$144 sps:$4 sm:$0xff]   ;;  %v6215_v36 = vld [vmem:[%s5787_s17 + $0x3c] ss:$144 sps:$4 sm:$0xff]  }
  0x70   : > { %1069 = vmatprep.subr.bf16.mxu0 %v5855_v18  ;;  %1110 = vmatprep.subr.bf16.mxu1 %v5937_v38  ;;  %v6166_v18 = vld [vmem:[%s5787_s17 + $0x3a4] ss:$144 sps:$4 sm:$0xff]  }
  0x71   : > { %v6218_v38 = vld [vmem:[%s5787_s17 + $0x44] ss:$144 sps:$4 sm:$0xff]  }
  0x73   : > { %1070 = vmatpush1.bf16.msra.mxu0 %v5861_v20  ;;  %1111 = vmatpush1.bf16.msra.mxu1 %v5945_v40  ;;  %v6176_v20 = vld [vmem:[%s5787_s17 + $0x3a0] ss:$144 sps:$4 sm:$0xff]   ;;  %v6223_v40 = vld [vmem:[%s5787_s17 + $0x38] ss:$144 sps:$4 sm:$0xff]  }
  0x74   : > { %1143 = vmatprep.subr.bf16.mxu0 %v5871_v22  ;;  %1184 = vmatprep.subr.bf16.mxu1 %v6033_v54 }
  0x76   : > { %5010 = vmatmul.mubr.msk.bf16.vlgmr.msra.gmra.mxu0 %vm425_vm0, %v4969_v55  ;;  %5011 = vmatmul.mubr.msk.bf16.vlgmr.msra.gmra.mxu1 %vm425_vm0, %v4969_v55 }
  0x77   : > { %1144 = vmatpush1.bf16.msra.mxu0 %v5880_v25  ;;  %1185 = vmatpush1.bf16.msra.mxu1 %v6041_v56 }
  0x78   : > { %1145 = vmatprep.subr.bf16.mxu0 %v5890_v27  ;;  %1186 = vmatprep.subr.bf16.mxu1 %v6046_v57 }
  0x79   : > { %1169 = vmatprep.mubr.bf16.mxu0 %v7203_v0  ;;  %1210 = vmatprep.mubr.bf16.mxu1 %v7203_v0 }
  0x7b   : > { %1146 = vmatpush1.bf16.msra.mxu0 %v5898_v29  ;;  %1187 = vmatpush1.bf16.msra.mxu1 %v6053_v58 }
  0x7c   : > { %1147 = vmatprep.subr.bf16.mxu0 %v5908_v31  ;;  %1188 = vmatprep.subr.bf16.mxu1 %v6058_v59 }
  0x7f   : > { %1148 = vmatpush1.bf16.msra.mxu0 %v5916_v33  ;;  %1189 = vmatpush1.bf16.msra.mxu1 %v6065_v60 }
  0x80   : > { %1149 = vmatprep.subr.bf16.mxu0 %v5926_v35  ;;  %1190 = vmatprep.subr.bf16.mxu1 %v6070_v61 }
  0x83   : > { %1150 = vmatpush1.bf16.msra.mxu0 %v5932_v37  ;;  %1191 = vmatpush1.bf16.msra.mxu1 %v6075_v62 }
  0x84   : > { %1151 = vmatprep.subr.bf16.mxu0 %v5942_v39  ;;  %1192 = vmatprep.subr.bf16.mxu1 %v6080_v63 }
  0x87   : > { %1152 = vmatpush1.bf16.msra.mxu0 %v5950_v41  ;;  %1193 = vmatpush1.bf16.msra.mxu1 %v6085_v1 }
  0x88   : > { %1604 = vmatprep.subr.bf16.mxu0 %v6033_v54  ;;  %1645 = vmatprep.subr.bf16.mxu1 %v6090_v2 }
  0x8a   : > { %5012 = vmatmul.mubr.msk.bf16.vlgmr.msra.gmra.mxu0 %vm425_vm0, %v4969_v55  ;;  %5013 = vmatmul.mubr.msk.bf16.vlgmr.msra.gmra.mxu1 %vm425_vm0, %v4969_v55  ;;  %v6373_v55 = vld [vmem:[%s5787_s17 + $0x48] ss:$144 sps:$4 sm:$0xff]  }
  0x8b   : > { %1605 = vmatpush1.bf16.msra.mxu0 %v6041_v56  ;;  %1646 = vmatpush1.bf16.msra.mxu1 %v6095_v3 }
  0x8c   : > { %1606 = vmatprep.subr.bf16.mxu0 %v6046_v57  ;;  %1647 = vmatprep.subr.bf16.mxu1 %v6100_v4 }
  0x8d   : > { %1630 = vmatprep.mubr.bf16.mxu0 %v7203_v0  ;;  %1671 = vmatprep.mubr.bf16.mxu1 %v7203_v0 }
  0x8f   : > { %1607 = vmatpush1.bf16.msra.mxu0 %v6053_v58  ;;  %1648 = vmatpush1.bf16.msra.mxu1 %v6107_v5 }
  0x90   : > { %1608 = vmatprep.subr.bf16.mxu0 %v6058_v59  ;;  %1649 = vmatprep.subr.bf16.mxu1 %v6112_v6 }
  0x93   : > { %1609 = vmatpush1.bf16.msra.mxu0 %v6065_v60  ;;  %1650 = vmatpush1.bf16.msra.mxu1 %v6119_v7 }
  0x94   : > { %1610 = vmatprep.subr.bf16.mxu0 %v6070_v61  ;;  %1651 = vmatprep.subr.bf16.mxu1 %v6124_v8 }
  0x97   : > { %1611 = vmatpush1.bf16.msra.mxu0 %v6075_v62  ;;  %1652 = vmatpush1.bf16.msra.mxu1 %v6129_v9 }
  0x98   : > { %1612 = vmatprep.subr.bf16.mxu0 %v6080_v63  ;;  %1653 = vmatprep.subr.bf16.mxu1 %v6134_v10 }
  0x9b   : > { %1613 = vmatpush1.bf16.msra.mxu0 %v6085_v1  ;;  %1654 = vmatpush1.bf16.msra.mxu1 %v6139_v11 }
  0x9c   : > { %1686 = vmatprep.subr.bf16.mxu0 %v6144_v12  ;;  %1727 = vmatprep.subr.bf16.mxu1 %v6147_v13 }
  0x9e   : > { %5067 = vmatmul.mubr.msk.bf16.vlgmr.msra.gmra.mxu0 %vm425_vm0, %v5026_v14  ;;  %5068 = vmatmul.mubr.msk.bf16.vlgmr.msra.gmra.mxu1 %vm425_vm0, %v5026_v14 }
  0x9f   : > { %1687 = vmatpush1.bf16.msra.mxu0 %v6155_v15  ;;  %1728 = vmatpush1.bf16.msra.mxu1 %v6158_v16 }
  0xa0   : > { %1688 = vmatprep.subr.bf16.mxu0 %v6163_v17  ;;  %1729 = vmatprep.subr.bf16.mxu1 %v6166_v18 }
  0xa1   : > { %1712 = vmatprep.mubr.bf16.mxu0 %v7203_v0  ;;  %1753 = vmatprep.mubr.bf16.mxu1 %v7203_v0 }
  0xa3   : > { %1689 = vmatpush1.bf16.msra.mxu0 %v6173_v19  ;;  %1730 = vmatpush1.bf16.msra.mxu1 %v6176_v20 }
  0xa4   : > { %1690 = vmatprep.subr.bf16.mxu0 %v6181_v21  ;;  %1731 = vmatprep.subr.bf16.mxu1 %v6184_v23 }
  0xa7   : > { %1691 = vmatpush1.bf16.msra.mxu0 %v6191_v24  ;;  %1732 = vmatpush1.bf16.msra.mxu1 %v6194_v26 }
  0xa8   : > { %1692 = vmatprep.subr.bf16.mxu0 %v6199_v28  ;;  %1733 = vmatprep.subr.bf16.mxu1 %v6202_v30 }
  0xab   : > { %1693 = vmatpush1.bf16.msra.mxu0 %v6207_v32  ;;  %1734 = vmatpush1.bf16.msra.mxu1 %v6210_v34 }
  0xac   : > { %1694 = vmatprep.subr.bf16.mxu0 %v6215_v36  ;;  %1735 = vmatprep.subr.bf16.mxu1 %v6218_v38 }
  0xaf   : > { %1695 = vmatpush1.bf16.msra.mxu0 %v6223_v40  ;;  %1736 = vmatpush1.bf16.msra.mxu1 %v6226_v42 }
  0xb0   : > { %1821 = vmatprep.subr.bf16.mxu0 %v5871_v22  ;;  %1862 = vmatprep.subr.bf16.mxu1 %v6033_v54  ;;  %v1343_v22 = vld [vmem:[%s7200_s1] sm:$0x3] }
  0xb2   : > { %5069 = vmatmul.mubr.msk.bf16.vlgmr.msra.gmra.mxu0 %vm425_vm0, %v5026_v14  ;;  %5070 = vmatmul.mubr.msk.bf16.vlgmr.msra.gmra.mxu1 %vm425_vm0, %v5026_v14  ;;  %v6444_v14 = vld [vmem:[%s5787_s17 + $0x4dc] ss:$144 sps:$4 sm:$0xff]  }
  0xb3   : > { %1822 = vmatpush1.bf16.msra.mxu0 %v5880_v25  ;;  %1863 = vmatpush1.bf16.msra.mxu1 %v6041_v56 }
  0xb4   : > { %1823 = vmatprep.subr.bf16.mxu0 %v5890_v27  ;;  %1864 = vmatprep.subr.bf16.mxu1 %v6046_v57 }
  0xb5   : > { %1847 = vmatprep.mubr.bf16.mxu0 %v7203_v0  ;;  %1888 = vmatprep.mubr.bf16.mxu1 %v7203_v0 }
  0xb7   : > { %1824 = vmatpush1.bf16.msra.mxu0 %v5898_v29  ;;  %1865 = vmatpush1.bf16.msra.mxu1 %v6053_v58  ;;  %v6382_v58 = vld [vmem:[%s5787_s17 + $0x4d4] ss:$144 sps:$4 sm:$0xff]  }
  0xb8   : > { %1825 = vmatprep.subr.bf16.mxu0 %v5908_v31  ;;  %1866 = vmatprep.subr.bf16.mxu1 %v6058_v59 }
  0xbb   : > { %1826 = vmatpush1.bf16.msra.mxu0 %v5916_v33  ;;  %1867 = vmatpush1.bf16.msra.mxu1 %v6065_v60  ;;  %v6317_v33 = vld [vmem:[%s5787_s17 + $0x4cc] ss:$144 sps:$4 sm:$0xff]  }
  0xbc   : > { %1827 = vmatprep.subr.bf16.mxu0 %v5926_v35  ;;  %1868 = vmatprep.subr.bf16.mxu1 %v6070_v61  ;;  %v6387_v61 = vld [vmem:[%s5787_s17 + $0x4d0] ss:$144 sps:$4 sm:$0xff]  }
  0xbf   : > { %1828 = vmatpush1.bf16.msra.mxu0 %v5932_v37  ;;  %1869 = vmatpush1.bf16.msra.mxu1 %v6075_v62 }
  0xc0   : > { %1829 = vmatprep.subr.bf16.mxu0 %v5942_v39  ;;  %1870 = vmatprep.subr.bf16.mxu1 %v6080_v63  ;;  %v5085_v39 = vld [vmem:[%s7200_s1 + $0x4] sm:$0x3] }
  0xc3   : > { %1830 = vmatpush1.bf16.msra.mxu0 %v5950_v41  ;;  %1871 = vmatpush1.bf16.msra.mxu1 %v6085_v1  ;;  %v6325_v41 = vld [vmem:[%s5787_s17 + $0x4c8] ss:$144 sps:$4 sm:$0xff]   ;;  %v6392_v1 = vld [vmem:[%s5787_s17 + $0x3b4] ss:$144 sps:$4 sm:$0xff]  }
  0xc4   : > { %1903 = vmatprep.subr.bf16.mxu0 %v6090_v2  ;;  %1944 = vmatprep.subr.bf16.mxu1 %v6144_v12 }
  0xc6   : > { %5081 = vmatmul.mubr.msk.bf16.vlgmr.msra.gmra.mxu0 %vm425_vm0, %v1343_v22  ;;  %5082 = vmatmul.mubr.msk.bf16.vlgmr.msra.gmra.mxu1 %vm425_vm0, %v1343_v22 }
  0xc7   : > { %1904 = vmatpush1.bf16.msra.mxu0 %v6095_v3  ;;  %1945 = vmatpush1.bf16.msra.mxu1 %v6155_v15 }
  0xc8   : > { %1905 = vmatprep.subr.bf16.mxu0 %v6100_v4  ;;  %1946 = vmatprep.subr.bf16.mxu1 %v6163_v17 }
  0xc9   : > { %1929 = vmatprep.mubr.bf16.mxu0 %v7203_v0  ;;  %1970 = vmatprep.mubr.bf16.mxu1 %v7203_v0 }
  0xcb   : > { %1906 = vmatpush1.bf16.msra.mxu0 %v6107_v5  ;;  %1947 = vmatpush1.bf16.msra.mxu1 %v6173_v19 }
  0xcc   : > { %1907 = vmatprep.subr.bf16.mxu0 %v6112_v6  ;;  %1948 = vmatprep.subr.bf16.mxu1 %v6181_v21 }
  0xcf   : > { %1908 = vmatpush1.bf16.msra.mxu0 %v6119_v7  ;;  %1949 = vmatpush1.bf16.msra.mxu1 %v6191_v24 }
  0xd0   : > { %1909 = vmatprep.subr.bf16.mxu0 %v6124_v8  ;;  %1950 = vmatprep.subr.bf16.mxu1 %v6199_v28 }
  0xd3   : > { %1910 = vmatpush1.bf16.msra.mxu0 %v6129_v9  ;;  %1951 = vmatpush1.bf16.msra.mxu1 %v6207_v32 }
  0xd4   : > { %1911 = vmatprep.subr.bf16.mxu0 %v6134_v10  ;;  %1952 = vmatprep.subr.bf16.mxu1 %v6215_v36 }
  0xd7   : > { %1912 = vmatpush1.bf16.msra.mxu0 %v6139_v11  ;;  %1953 = vmatpush1.bf16.msra.mxu1 %v6223_v40 }
  0xd8   : > { %2229 = vmatprep.subr.bf16.mxu0 %v6090_v2  ;;  %2270 = vmatprep.subr.bf16.mxu1 %v6144_v12  ;;  %v6399_v2 = vld [vmem:[%s5787_s17 + $0x3b0] ss:$144 sps:$4 sm:$0xff]  }
  0xda   : > { %5083 = vmatmul.mubr.msk.bf16.vlgmr.msra.gmra.mxu0 %vm425_vm0, %v1343_v22  ;;  %5084 = vmatmul.mubr.msk.bf16.vlgmr.msra.gmra.mxu1 %vm425_vm0, %v1343_v22  ;;  %v6473_v22 = vld [vmem:[%s5787_s17 + $0x3b8] ss:$144 sps:$4 sm:$0xff]  }
  0xdb   : > { %2230 = vmatpush1.bf16.msra.mxu0 %v6095_v3  ;;  %2271 = vmatpush1.bf16.msra.mxu1 %v6155_v15  ;;  %v6404_v3 = vld [vmem:[%s5787_s17 + $0x294] ss:$144 sps:$4 sm:$0xff]  }
  0xdc   : > { %2231 = vmatprep.subr.bf16.mxu0 %v6100_v4  ;;  %2272 = vmatprep.subr.bf16.mxu1 %v6163_v17  ;;  %v6411_v4 = vld [vmem:[%s5787_s17 + $0x290] ss:$144 sps:$4 sm:$0xff]   ;;  %v6447_v15 = vld [vmem:[%s5787_s17 + $0x4e4] ss:$144 sps:$4 sm:$0xff]  }
  0xdd   : > { %2255 = vmatprep.mubr.bf16.mxu0 %v7203_v0  ;;  %2296 = vmatprep.mubr.bf16.mxu1 %v7203_v0 }
  0xdf   : > { %2232 = vmatpush1.bf16.msra.mxu0 %v6107_v5  ;;  %2273 = vmatpush1.bf16.msra.mxu1 %v6173_v19  ;;  %v6416_v5 = vld [vmem:[%s5787_s17 + $0x174] ss:$144 sps:$4 sm:$0xff]  }
  0xe0   : > { %2233 = vmatprep.subr.bf16.mxu0 %v6112_v6  ;;  %2274 = vmatprep.subr.bf16.mxu1 %v6181_v21  ;;  %v6421_v6 = vld [vmem:[%s5787_s17 + $0x170] ss:$144 sps:$4 sm:$0xff]  }
  0xe1   : > { %v5142_v21 = vld [vmem:[%s7200_s1 + $0x2] sm:$0x3] }
  0xe3   : > { %2234 = vmatpush1.bf16.msra.mxu0 %v6119_v7  ;;  %2275 = vmatpush1.bf16.msra.mxu1 %v6191_v24  ;;  %v6426_v7 = vld [vmem:[%s5787_s17 + $0x54] ss:$144 sps:$4 sm:$0xff]   ;;  %v6455_v24 = vld [vmem:[%s5787_s17 + $0x4d8] ss:$144 sps:$4 sm:$0xff]  }
  0xe4   : > { %2235 = vmatprep.subr.bf16.mxu0 %v6124_v8  ;;  %2276 = vmatprep.subr.bf16.mxu1 %v6199_v28  ;;  %v6458_v28 = vld [vmem:[%s5787_s17 + $0x4e0] ss:$144 sps:$4 sm:$0xff]  }
  0xe5   : > { %7214 = vst [vmem:[#allocation2_spill] sm:$0xff] %v6458_v28 }
  0xe6   : > { %v6304_v25 = vpop.f32.mrf.mxu0  ;;  %v6306_v27 = vpop.f32.mrf.mxu1 }
  0xe7   : > { %2236 = vmatpush1.bf16.msra.mxu0 %v6129_v9  ;;  %2277 = vmatpush1.bf16.msra.mxu1 %v6207_v32 }
  0xe8   : > { %v6310_v29 = vpop.f32.mrf.mxu0  ;;  %v6312_v31 = vpop.f32.mrf.mxu1  ;;  %2237 = vmatprep.subr.bf16.mxu0 %v6134_v10  ;;  %2278 = vmatprep.subr.bf16.mxu1 %v6215_v36  ;;  %v6435_v10 = vld [vmem:[%s5787_s17 + $0x50] ss:$144 sps:$4 sm:$0xff]  }
  0xea   : > { %v467_v35 = vpop.f32.mrf.mxu0  ;;  %v508_v37 = vpop.f32.mrf.mxu1 }
  0xeb   : > { %2238 = vmatpush1.bf16.msra.mxu0 %v6139_v11  ;;  %2279 = vmatpush1.bf16.msra.mxu1 %v6223_v40  ;;  %v6463_v40 = vld [vmem:[%s5787_s17 + $0x3bc] ss:$144 sps:$4 sm:$0xff]   ;;  %v6476_v35 = vld [vmem:[%s5787_s17 + $0x3c0] ss:$144 sps:$4 sm:$0xff]  }
  0xec   : > { %v468_v44 = vpop.f32.mrf.mxu0  ;;  %v509_v45 = vpop.f32.mrf.mxu1  ;;  %2311 = vmatprep.subr.bf16.mxu0 %v6147_v13  ;;  %2352 = vmatprep.subr.bf16.mxu1 %v6317_v33  ;;  %7216 = vst [vmem:[#allocation4_spill] sm:$0xff] %v6476_v35  ;;  %v6481_v37 = vld [vmem:[%s5787_s17 + $0x29c] ss:$144 sps:$4 sm:$0xff]  }
  0xed   : > { %v6491_v44 = vld [vmem:[%s5787_s17 + $0x298] ss:$144 sps:$4 sm:$0xff]   ;;  %v6494_v45 = vld [vmem:[%s5787_s17 + $0x2a0] ss:$144 sps:$4 sm:$0xff]  }
  0xee   : > { %5126 = vmatmul.mubr.msk.bf16.vlgmr.msra.gmra.mxu0 %vm425_vm0, %v5085_v39  ;;  %5127 = vmatmul.mubr.msk.bf16.vlgmr.msra.gmra.mxu1 %vm425_vm0, %v5085_v39  ;;  %7218 = vst [vmem:[#allocation6_spill] sm:$0xff] %v6494_v45 }
  0xef   : > { %2312 = vmatpush1.bf16.msra.mxu0 %v6158_v16  ;;  %2353 = vmatpush1.bf16.msra.mxu1 %v6325_v41 }
  0xf0   : > { %2313 = vmatprep.subr.bf16.mxu0 %v6166_v18  ;;  %2354 = vmatprep.subr.bf16.mxu1 %v6330_v46 }
  0xf1   : > { %2337 = vmatprep.mubr.bf16.mxu0 %v7203_v0  ;;  %2378 = vmatprep.mubr.bf16.mxu1 %v7203_v0 }
  0xf3   : > { %2314 = vmatpush1.bf16.msra.mxu0 %v6176_v20  ;;  %2355 = vmatpush1.bf16.msra.mxu1 %v6337_v47 }
  0xf4   : > { %2315 = vmatprep.subr.bf16.mxu0 %v6184_v23  ;;  %2356 = vmatprep.subr.bf16.mxu1 %v6342_v48 }
  0xf7   : > { %2316 = vmatpush1.bf16.msra.mxu0 %v6194_v26  ;;  %2357 = vmatpush1.bf16.msra.mxu1 %v6349_v49 }
  0xf8   : > { %2317 = vmatprep.subr.bf16.mxu0 %v6202_v30  ;;  %2358 = vmatprep.subr.bf16.mxu1 %v6354_v50 }
  0xfa   : > { %v6366_v53 = vpop.f32.mrf.mxu0  ;;  %v6368_v54 = vpop.f32.mrf.mxu1 }
  0xfb   : > { %2318 = vmatpush1.bf16.msra.mxu0 %v6210_v34  ;;  %2359 = vmatpush1.bf16.msra.mxu1 %v6359_v51 }
  0xfc   : > { %v6375_v56 = vpop.f32.mrf.mxu0  ;;  %v6377_v57 = vpop.f32.mrf.mxu1  ;;  %2319 = vmatprep.subr.bf16.mxu0 %v6218_v38  ;;  %2360 = vmatprep.subr.bf16.mxu1 %v6364_v52 }
  0xfe   : > { %v549_v59 = vpop.f32.mrf.mxu0  ;;  %v590_v60 = vpop.f32.mrf.mxu1 }
  0xff   : > { %2320 = vmatpush1.bf16.msra.mxu0 %v6226_v42  ;;  %2361 = vmatpush1.bf16.msra.mxu1 %v6373_v55  ;;  %v6499_v59 = vld [vmem:[%s5787_s17 + $0x17c] ss:$144 sps:$4 sm:$0xff]   ;;  %v6502_v60 = vld [vmem:[%s5787_s17 + $0x184] ss:$144 sps:$4 sm:$0xff]  }
 0x100   : > { %v550_v62 = vpop.f32.mrf.mxu0  ;;  %v591_v63 = vpop.f32.mrf.mxu1  ;;  %2772 = vmatprep.subr.bf16.mxu0 %v6317_v33  ;;  %2813 = vmatprep.subr.bf16.mxu1 %v6382_v58  ;;  %7219 = vst [vmem:[#allocation7_spill] sm:$0xff] %v6502_v60 }
 0x101   : > { %v6507_v62 = vld [vmem:[%s5787_s17 + $0x178] ss:$144 sps:$4 sm:$0xff]   ;;  %v6510_v63 = vld [vmem:[%s5787_s17 + $0x180] ss:$144 sps:$4 sm:$0xff]  }
 0x102   : > { %5128 = vmatmul.mubr.msk.bf16.vlgmr.msra.gmra.mxu0 %vm425_vm0, %v5085_v39  ;;  %5129 = vmatmul.mubr.msk.bf16.vlgmr.msra.gmra.mxu1 %vm425_vm0, %v5085_v39  ;;  %v6484_v39 = vld [vmem:[%s5787_s17 + $0x2a4] ss:$144 sps:$4 sm:$0xff]   ;;  %7220 = vst [vmem:[#allocation8_spill] sm:$0xff] %v6510_v63 }
 0x103   : > { %2773 = vmatpush1.bf16.msra.mxu0 %v6325_v41  ;;  %2814 = vmatpush1.bf16.msra.mxu1 %v6387_v61  ;;  %7217 = vst [vmem:[#allocation5_spill] sm:$0xff] %v6484_v39 }
 0x104   : > { %2774 = vmatprep.subr.bf16.mxu0 %v6330_v46  ;;  %2815 = vmatprep.subr.bf16.mxu1 %v6392_v1 }
 0x105   : > { %2798 = vmatprep.mubr.bf16.mxu0 %v7203_v0  ;;  %2839 = vmatprep.mubr.bf16.mxu1 %v7203_v0 }
 0x107   : > { %2775 = vmatpush1.bf16.msra.mxu0 %v6337_v47  ;;  %2816 = vmatpush1.bf16.msra.mxu1 %v6399_v2 }
 0x108   : > { %2776 = vmatprep.subr.bf16.mxu0 %v6342_v48  ;;  %2817 = vmatprep.subr.bf16.mxu1 %v6404_v3 }
 0x10b   : > { %2777 = vmatpush1.bf16.msra.mxu0 %v6349_v49  ;;  %2818 = vmatpush1.bf16.msra.mxu1 %v6411_v4 }
 0x10c   : > { %2778 = vmatprep.subr.bf16.mxu0 %v6354_v50  ;;  %2819 = vmatprep.subr.bf16.mxu1 %v6416_v5 }
 0x10e   : > { %v6428_v8 = vpop.f32.mrf.mxu0  ;;  %v6430_v9 = vpop.f32.mrf.mxu1 }
 0x10f   : > { %2779 = vmatpush1.bf16.msra.mxu0 %v6359_v51  ;;  %2820 = vmatpush1.bf16.msra.mxu1 %v6421_v6 }
 0x110   : > { %v6437_v11 = vpop.f32.mrf.mxu0  ;;  %v6439_v12 = vpop.f32.mrf.mxu1  ;;  %2780 = vmatprep.subr.bf16.mxu0 %v6364_v52  ;;  %2821 = vmatprep.subr.bf16.mxu1 %v6426_v7 }
 0x112   : > { %v684_v17 = vpop.f32.mrf.mxu0  ;;  %v725_v19 = vpop.f32.mrf.mxu1 }
 0x113   : > { %2781 = vmatpush1.bf16.msra.mxu0 %v6373_v55  ;;  %2822 = vmatpush1.bf16.msra.mxu1 %v6435_v10  ;;  %v6515_v17 = vld [vmem:[%s5787_s17 + $0x5c] ss:$144 sps:$4 sm:$0xff]   ;;  %v6518_v19 = vld [vmem:[%s5787_s17 + $0x64] ss:$144 sps:$4 sm:$0xff]  }
 0x114   : > { %v685_v32 = vpop.f32.mrf.mxu0  ;;  %v726_v36 = vpop.f32.mrf.mxu1  ;;  %2854 = vmatprep.subr.bf16.mxu0 %v6444_v14  ;;  %2895 = vmatprep.subr.bf16.mxu1 %v6447_v15 }
 0x116   : > { %5183 = vmatmul.mubr.msk.bf16.vlgmr.msra.gmra.mxu0 %vm425_vm0, %v5142_v21  ;;  %5184 = vmatmul.mubr.msk.bf16.vlgmr.msra.gmra.mxu1 %vm425_vm0, %v5142_v21 }
 0x117   : > { %2855 = vmatpush1.bf16.msra.mxu0 %v6455_v24  ;;  %2896 = vmatpush1.bf16.msra.mxu1 %v6458_v28 }
 0x118   : > { %2856 = vmatprep.subr.bf16.mxu0 %v6463_v40  ;;  %2897 = vmatprep.subr.bf16.mxu1 %v6466_v43 }
 0x119   : > { %2880 = vmatprep.mubr.bf16.mxu0 %v7203_v0  ;;  %2921 = vmatprep.mubr.bf16.mxu1 %v7203_v0  ;;  %v6527_v0 = vld [vmem:[%s5787_s17 + $0x58] ss:$144 sps:$4 sm:$0xff]  }
 0x11b   : > { %2857 = vmatpush1.bf16.msra.mxu0 %v6473_v22  ;;  %2898 = vmatpush1.bf16.msra.mxu1 %v6476_v35 }
 0x11c   : > { %2858 = vmatprep.subr.bf16.mxu0 %v6481_v37  ;;  %2899 = vmatprep.subr.bf16.mxu1 %v6484_v39 }
 0x11f   : > { %2859 = vmatpush1.bf16.msra.mxu0 %v6491_v44  ;;  %2900 = vmatpush1.bf16.msra.mxu1 %v6494_v45  ;;  %v6530_v45 = vld [vmem:[%s5787_s17 + $0x60] ss:$144 sps:$4 sm:$0xff]  }
 0x120   : > { %2860 = vmatprep.subr.bf16.mxu0 %v6499_v59  ;;  %2901 = vmatprep.subr.bf16.mxu1 %v6502_v60 }
 0x122   : > { %v6520_v32 = vpop.f32.mrf.mxu0  ;;  %v6522_v36 = vpop.f32.mrf.mxu1 }
 0x123   : > { %2861 = vmatpush1.bf16.msra.mxu0 %v6507_v62  ;;  %2902 = vmatpush1.bf16.msra.mxu1 %v6510_v63 }
 0x124   : > { %v6532_v39 = vpop.f32.mrf.mxu0  ;;  %v6534_v35 = vpop.f32.mrf.mxu1  ;;  %2862 = vmatprep.subr.bf16.mxu0 %v6515_v17  ;;  %2903 = vmatprep.subr.bf16.mxu1 %v6518_v19 }
 0x126   : > { %v766_v60 = vpop.f32.mrf.mxu0  ;;  %v807_v43 = vpop.f32.mrf.mxu1 }
 0x127   : > { %2863 = vmatpush1.bf16.msra.mxu0 %v6527_v0  ;;  %2904 = vmatpush1.bf16.msra.mxu1 %v6530_v45  ;;  %v3563_v43 = vld [vmem:[%s7201_s2] sm:$0xf] }
 0x128   : > { %v767_v28 = vpop.f32.mrf.mxu0  ;;  %v808_v63 = vpop.f32.mrf.mxu1  ;;  %2989 = vmatprep.subr.bf16.mxu0 %v6147_v13  ;;  %3030 = vmatprep.subr.bf16.mxu1 %v6317_v33  ;;  %v681_v13 = vadd.f32 %v6428_v8, %v6304_v25 }
 0x129   : > { %v7221_v28 = vmov 0   ;;  %3566 = vperm.xlu1 %5389, %v3563_v43   ;;  %v5748_v63 = vmov 1983009808  }
 0x12a   : > { %5185 = vmatmul.mubr.msk.bf16.vlgmr.msra.gmra.mxu0 %vm425_vm0, %v5142_v21  ;;  %5186 = vmatmul.mubr.msk.bf16.vlgmr.msra.gmra.mxu1 %vm425_vm0, %v5142_v21  ;;  %v1308_v43 = vunpack.c.l.s4 %v5748_v63 }
 0x12b   : > { %2990 = vmatpush1.bf16.msra.mxu0 %v6158_v16  ;;  %3031 = vmatpush1.bf16.msra.mxu1 %v6325_v41  ;;  %v722_v16 = vadd.f32 %v6430_v9, %v6306_v27 }
 0x12c   : > { %2991 = vmatprep.subr.bf16.mxu0 %v6166_v18  ;;  %3032 = vmatprep.subr.bf16.mxu1 %v6330_v46  ;;  %v6565_v18 = vpop.permute.xlu0 %1230 }
 0x12d   : > { %3015 = vmatprep.mubr.bf16.mxu0 %v7221_v28  ;;  %3056 = vmatprep.mubr.bf16.mxu1 %v7221_v28 }
 0x12f   : > { %2992 = vmatpush1.bf16.msra.mxu0 %v6176_v20  ;;  %3033 = vmatpush1.bf16.msra.mxu1 %v6337_v47  ;;  %v683_v20 = vadd.f32 %v6437_v11, %v6310_v29 }
 0x130   : > { %2993 = vmatprep.subr.bf16.mxu0 %v6184_v23  ;;  %3034 = vmatprep.subr.bf16.mxu1 %v6342_v48 }
 0x133   : > { %2994 = vmatpush1.bf16.msra.mxu0 %v6194_v26  ;;  %3035 = vmatpush1.bf16.msra.mxu1 %v6349_v49  ;;  %v724_v26 = vadd.f32 %v6439_v12, %v6312_v31 }
 0x134   : > { %2995 = vmatprep.subr.bf16.mxu0 %v6202_v30  ;;  %3036 = vmatprep.subr.bf16.mxu1 %v6354_v50 }
 0x136   : > { %v1089_v23 = vpop.f32.mrf.mxu0  ;;  %v1130_v33 = vpop.f32.mrf.mxu1 }
 0x137   : > { %v1219_v41 = vadd.f32 %v1089_v23, %v681_v13  ;;  %v1221_v30 = vadd.f32 %v1130_v33, %v722_v16  ;;  %2996 = vmatpush1.bf16.msra.mxu0 %v6210_v34  ;;  %3037 = vmatpush1.bf16.msra.mxu1 %v6359_v51  ;;  %v1310_v13 = vlaneseq  ;;  %v763_v16 = vadd.f32 %v6520_v32, %v6366_v53 }
 0x138   : > { %v1091_v25 = vpop.f32.mrf.mxu0  ;;  %v1132_v46 = vpop.f32.mrf.mxu1  ;;  %2997 = vmatprep.subr.bf16.mxu0 %v6218_v38  ;;  %3038 = vmatprep.subr.bf16.mxu1 %v6364_v52  ;;  %v6593_v38 = vld [vmem:[%s7200_s1] sm:$0x3]  ;;  %v1309_v23 = vunpack.c.0.s8 %v1308_v43  ;;  %v806_v53 = vadd.f32 %v6534_v35, %v6377_v57 }
 0x139   : > { %v1220_v27 = vadd.f32 %v1091_v25, %v683_v20  ;;  %v6576_v29 = vadd.f32 %v6565_v18, %v1219_v41  ;;  %v1222_v47 = vadd.f32 %v1132_v46, %v724_v26  ;;  %v6579_v48 = vadd.f32 %v6565_v18, %v1221_v30 }
 0x13a   : > { %v1093_v31 = vpop.f32.mrf.mxu0  ;;  %v1134_v49 = vpop.f32.mrf.mxu1  ;;  %v804_v20 = vadd.f32 %v6522_v36, %v6368_v54  ;;  %v1311_v33 = vshrl.u32 %v1310_v13, 7  ;;  %v765_v30 = vadd.f32 %v6532_v39, %v6375_v56 }
 0x13b   : > { %v6582_v34 = vadd.f32 %v6565_v18, %v1220_v27  ;;  %v1249_v50 = vmin.f32 %v6576_v29, 0.0  ;;  %v6586_v51 = vadd.f32 %v6565_v18, %v1222_v47  ;;  %2998 = vmatpush1.bf16.msra.mxu0 %v6226_v42  ;;  %3039 = vmatpush1.bf16.msra.mxu1 %v6373_v55  ;;  %v1251_v52 = vmin.f32 %v6579_v48, 0.0 }
 0x13c   : > { %v1094_v8 = vpop.f32.mrf.mxu0  ;;  %v1135_v9 = vpop.f32.mrf.mxu1  ;;  %3071 = vmatprep.subr.bf16.mxu0 %v6382_v58  ;;  %3112 = vmatprep.subr.bf16.mxu1 %v6444_v14  ;;  %vm1241_vm1 = vcmp.gt.f32.partialorder %v6576_v29, 0.0  ;;  %vm1243_vm3 = vcmp.gt.f32.partialorder %v6579_v48, 0.0 }
 0x13d   : > { %v1250_v11 = vmin.f32 %v6582_v34, 0.0  ;;  %v1257_v12 = vmul.f32 1.442695, %v1249_v50  ;;  %v1252_v42 = vmin.f32 %v6586_v51, 0.0  ;;  %v1261_v21 = vmul.f32 1.442695, %v1251_v52 }
 0x13e   : > { %5197 = vmatmul.mubr.msk.bf16.vlgmr.msra.gmra.mxu0 %vm425_vm0, %v6593_v38  ;;  %5198 = vmatmul.mubr.msk.bf16.vlgmr.msra.gmra.mxu1 %vm425_vm0, %v6593_v38  ;;  %v6637_v50 = vsub.s32 %v1309_v23, %v1311_v33  ;;  %vm1242_vm2 = vcmp.gt.f32.partialorder %v6582_v34, 0.0  ;;  %vm1244_vm4 = vcmp.gt.f32.partialorder %v6586_v51, 0.0 }
 0x13f   : > { %5675 = vpow2.f32 %v1257_v12  ;;  %v1259_v55 = vmul.f32 1.442695, %v1250_v11  ;;  %3072 = vmatpush1.bf16.msra.mxu0 %v6387_v61  ;;  %3113 = vmatpush1.bf16.msra.mxu1 %v6455_v24  ;;  %v1263_v60 = vmul.f32 1.442695, %v1252_v42 }
 0x140   : > { %5677 = vpow2.f32 %v1261_v21  ;;  %3073 = vmatprep.subr.bf16.mxu0 %v6392_v1  ;;  %3114 = vmatprep.subr.bf16.mxu1 %v6463_v40 }
 0x141   : > { %5679 = vpow2.f32 %v1259_v55  ;;  %3097 = vmatprep.mubr.bf16.mxu0 %v7221_v28  ;;  %3138 = vmatprep.mubr.bf16.mxu1 %v7221_v28 }
 0x142   : > { %5681 = vpow2.f32 %v1263_v60 }
 0x143   : > { %3074 = vmatpush1.bf16.msra.mxu0 %v6399_v2  ;;  %3115 = vmatpush1.bf16.msra.mxu1 %v6473_v22 }
 0x144   : > { %3075 = vmatprep.subr.bf16.mxu0 %v6404_v3  ;;  %3116 = vmatprep.subr.bf16.mxu1 %v6481_v37 }
 0x147   : > { %3076 = vmatpush1.bf16.msra.mxu0 %v6411_v4  ;;  %3117 = vmatpush1.bf16.msra.mxu1 %v6491_v44 }
 0x148   : > { %3077 = vmatprep.subr.bf16.mxu0 %v6416_v5  ;;  %3118 = vmatprep.subr.bf16.mxu1 %v6499_v59 }
 0x14a   : > { %v1171_v26 = vpop.f32.mrf.mxu0  ;;  %v1212_v41 = vpop.f32.mrf.mxu1 }
 0x14b   : > { %v1223_v25 = vadd.f32 %v1171_v26, %v763_v16  ;;  %v1225_v46 = vadd.f32 %v1212_v41, %v804_v20  ;;  %3078 = vmatpush1.bf16.msra.mxu0 %v6421_v6  ;;  %3119 = vmatpush1.bf16.msra.mxu1 %v6507_v62 }
 0x14c   : > { %v5676_v27 = vpop.eup %5675  ;;  %v1173_v32 = vpop.f32.mrf.mxu0  ;;  %3079 = vmatprep.subr.bf16.mxu0 %v6426_v7  ;;  %3120 = vmatprep.subr.bf16.mxu1 %v6515_v17 }
 0x14d   : > { %v1214_v47 = vpop.f32.mrf.mxu1  ;;  %v5678_v54 = vpop.eup %5677  ;;  %v5014_v36 = vadd.f32 -1.0, %v5676_v27  ;;  %v6631_v56 = vadd.f32 %v6565_v18, %v1223_v25  ;;  %v6634_v39 = vadd.f32 %v6565_v18, %v1225_v46  ;;  %v1224_v31 = vadd.f32 %v1173_v32, %v765_v30  ;;  %v6717_v30 = vld [vmem:[%s5787_s17 + $0x3cc] ss:$144 sps:$4 sm:$0xff]   ;;  %v7222_v27 = vld [vmem:[#allocation2_spill] sm:$0xff] }
 0x14e   : > { %v5680_v49 = vpop.eup %5679  ;;  %v5016_v57 = vadd.f32 -1.0, %v5678_v54  ;;  %v1226_v35 = vadd.f32 %v1214_v47, %v806_v53  ;;  %v1175_v52 = vpop.f32.mrf.mxu0  ;;  %v6732_v53 = vld [vmem:[%s5787_s17 + $0x3c8] ss:$144 sps:$4 sm:$0xff]  }
 0x14f   : > { %v1216_v8 = vpop.f32.mrf.mxu1  ;;  %v5682_v9 = vpop.eup %5681  ;;  %v5015_v11 = vadd.f32 -1.0, %v5680_v49  ;;  %v1253_v12 = vmin.f32 %v6631_v56, 0.0  ;;  %3080 = vmatpush1.bf16.msra.mxu0 %v6435_v10  ;;  %3121 = vmatpush1.bf16.msra.mxu1 %v6527_v0  ;;  %v1281_v42 = vsel %vm1241_vm1, %v6576_v29, %v5014_v36  ;;  %v1255_v55 = vmin.f32 %v6634_v39, 0.0  ;;  %v7223_v36 = vld [vmem:[#allocation3_spill] sm:$0xff]  ;;  %v7225_v52 = vld [vmem:[#allocation5_spill] sm:$0xff] }
 0x150   : > { %v5017_v21 = vadd.f32 -1.0, %v5682_v9  ;;  %v1176_v60 = vpop.f32.mrf.mxu0  ;;  %3397 = vmatprep.subr.bf16.mxu0 %v6382_v58  ;;  %3438 = vmatprep.subr.bf16.mxu1 %v6444_v14  ;;  %v6651_v16 = vadd.f32 %v6565_v18, %v1224_v31  ;;  %v6654_v29 = vadd.f32 %v6565_v18, %v1226_v35  ;;  %v1283_v23 = vsel %vm1243_vm3, %v6579_v48, %v5016_v57  ;;  %v7224_v57 = vld [vmem:[#allocation4_spill] sm:$0xff]  ;;  %v6748_v35 = vld [vmem:[%s5787_s17 + $0x2a8] ss:$144 sps:$4 sm:$0xff]   ;;  %v6753_v8 = vld [vmem:[%s5787_s17 + $0x18c] ss:$144 sps:$4 sm:$0xff]  }
 0x151   : > { %v1217_v63 = vpop.f32.mrf.mxu1  ;;  %v1282_v43 = vsel %vm1242_vm2, %v6582_v34, %v5015_v11  ;;  %v1265_v13 = vmul.f32 1.442695, %v1253_v12  ;;  %v1269_v26 = vmul.f32 1.442695, %v1255_v55  ;;  %vm1245_vm5 = vcmp.gt.f32.partialorder %v6631_v56, 0.0  ;;  %v7226_v11 = vld [vmem:[#allocation6_spill] sm:$0xff] }
 0x152   : > { %v5022_v20 = vpack.c.bf16 %v1282_v43, %v1281_v42  ;;  %v1284_v33 = vsel %vm1244_vm4, %v6586_v51, %v5017_v21  ;;  %5199 = vmatmul.mubr.msk.bf16.vlgmr.msra.gmra.mxu0 %vm425_vm0, %v6593_v38  ;;  %5200 = vmatmul.mubr.msk.bf16.vlgmr.msra.gmra.mxu1 %vm425_vm0, %v6593_v38  ;;  %v1254_v14 = vmin.f32 %v6651_v16, 0.0  ;;  %v1256_v48 = vmin.f32 %v6654_v29, 0.0  ;;  %v6759_v12 = vld [vmem:[%s5787_s17 + $0x188] ss:$144 sps:$4 sm:$0xff]   ;;  %v6764_v21 = vld [vmem:[%s5787_s17 + $0x6c] ss:$144 sps:$4 sm:$0xff]  }
 0x153   : > { %v5023_v58 = vpack.c.bf16 %v1284_v33, %v1283_v23  ;;  %5683 = vpow2.f32 %v1265_v13  ;;  %3398 = vmatpush1.bf16.msra.mxu0 %v6387_v61  ;;  %3439 = vmatpush1.bf16.msra.mxu1 %v6455_v24  ;;  %vm1246_vm6 = vcmp.gt.f32.partialorder %v6651_v16, 0.0  ;;  %vm1247_vm7 = vcmp.gt.f32.partialorder %v6634_v39, 0.0  ;;  %v7227_v42 = vld [vmem:[#allocation7_spill] sm:$0xff]  ;;  %v7228_v63 = vld [vmem:[#allocation8_spill] sm:$0xff] }
 0x154   : > { %v1313_v18 = vrot.slane %v5022_v20, %v6637_v50  ;;  %5685 = vpow2.f32 %v1269_v26  ;;  %3399 = vmatprep.subr.bf16.mxu0 %v6392_v1  ;;  %3440 = vmatprep.subr.bf16.mxu1 %v6463_v40  ;;  %v1267_v51 = vmul.f32 1.442695, %v1254_v14  ;;  %v1271_v61 = vmul.f32 1.442695, %v1256_v48  ;;  %v6773_v43 = vld [vmem:[%s5787_s17 + $0x68] ss:$144 sps:$4 sm:$0xff]  }
 0x155   : > { %v1320_v34 = vrot.slane %v5023_v58, %v6637_v50  ;;  %3423 = vmatprep.mubr.bf16.mxu0 %v7221_v28  ;;  %3464 = vmatprep.mubr.bf16.mxu1 %v7221_v28  ;;  %vm1248_vm8 = vcmp.gt.f32.partialorder %v6654_v29, 0.0  ;;  %v6787_v33 = vld [vmem:[%s5787_s17 + $0x4f0] ss:$144 sps:$4 sm:$0xff]   ;;  %v6806_v14 = vld [vmem:[%s5787_s17 + $0x2b4] ss:$144 sps:$4 sm:$0xff]  }
 0x156   : > { %5687 = vpow2.f32 %v1267_v51  ;;  %v6818_v48 = vld [vmem:[%s5787_s17 + $0x194] ss:$144 sps:$4 sm:$0xff]  }
 0x157   : > { %v1321_v24 = vcombine.low %v1313_v18, %v1320_v34  ;;  %3400 = vmatpush1.bf16.msra.mxu0 %v6399_v2  ;;  %3441 = vmatpush1.bf16.msra.mxu1 %v6473_v22  ;;  %5689 = vpow2.f32 %v1271_v61  ;;  %v6813_v18 = vld [vmem:[%s5787_s17 + $0x2b0] ss:$144 sps:$4 sm:$0xff]   ;;  %v6828_v51 = vld [vmem:[%s5787_s17 + $0x74] ss:$144 sps:$4 sm:$0xff]  }
 0x158   : > { %3401 = vmatprep.subr.bf16.mxu0 %v6404_v3  ;;  %3442 = vmatprep.subr.bf16.mxu1 %v6481_v37  ;;  %v6823_v34 = vld [vmem:[%s5787_s17 + $0x190] ss:$144 sps:$4 sm:$0xff]  }
 0x159   : > { %1341 = vst [vmem:[%s6678_s18] sm:$0xff] %v1321_v24 }
 0x15b   : > { %3402 = vmatpush1.bf16.msra.mxu0 %v6411_v4  ;;  %3443 = vmatpush1.bf16.msra.mxu1 %v6491_v44  ;;  %v6702_v4 = vld [vmem:[%s5787_s17 + $0x4ec] ss:$144 sps:$4 sm:$0xff]  }
 0x15c   : > { %3403 = vmatprep.subr.bf16.mxu0 %v6416_v5  ;;  %3444 = vmatprep.subr.bf16.mxu1 %v6499_v59 }
 0x15e   : > { %v6689_v1 = vpop.f32.mrf.mxu0  ;;  %v6691_v2 = vpop.f32.mrf.mxu1 }
 0x15f   : > { %3404 = vmatpush1.bf16.msra.mxu0 %v6421_v6  ;;  %3445 = vmatpush1.bf16.msra.mxu1 %v6507_v62  ;;  %v6709_v6 = vld [vmem:[%s7200_s1 + $0x4] sm:$0x3]  ;;  %v6712_v62 = vld [vmem:[%s5787_s17 + $0x4e8] ss:$144 sps:$4 sm:$0xff]  }
 0x160   : > { %v5684_v3 = vpop.eup %5683  ;;  %v6695_v40 = vpop.f32.mrf.mxu0  ;;  %3405 = vmatprep.subr.bf16.mxu0 %v6426_v7  ;;  %3446 = vmatprep.subr.bf16.mxu1 %v6515_v17 }
 0x161   : > { %v6697_v22 = vpop.f32.mrf.mxu1  ;;  %v5686_v5 = vpop.eup %5685  ;;  %v5018_v59 = vadd.f32 -1.0, %v5684_v3  ;;  %v6837_v3 = vld [vmem:[%s5787_s17 + $0x70] ss:$144 sps:$4 sm:$0xff]  }
 0x162   : > { %v1636_v37 = vpop.f32.mrf.mxu0  ;;  %v5020_v17 = vadd.f32 -1.0, %v5686_v5 }
 0x163   : > { %v1677_v44 = vpop.f32.mrf.mxu1  ;;  %3406 = vmatpush1.bf16.msra.mxu0 %v6435_v10  ;;  %3447 = vmatpush1.bf16.msra.mxu1 %v6527_v0  ;;  %v5688_v7 = vpop.eup %5687 }
 0x164   : > { %v1637_v38 = vpop.f32.mrf.mxu0  ;;  %3479 = vmatprep.subr.bf16.mxu0 %v6447_v15  ;;  %3520 = vmatprep.subr.bf16.mxu1 %v6702_v4  ;;  %v5690_v10 = vpop.eup %5689  ;;  %v5019_v0 = vadd.f32 -1.0, %v5688_v7  ;;  %v1285_v15 = vsel %vm1245_vm5, %v6631_v56, %v5018_v59  ;;  %v1287_v32 = vsel %vm1247_vm7, %v6634_v39, %v5020_v17  ;;  %v6739_v56 = vld [vmem:[%s5787_s17 + $0x2ac] ss:$144 sps:$4 sm:$0xff]   ;;  %v6849_v59 = vld [vmem:[%s5787_s17 + $0x504] ss:$144 sps:$4 sm:$0xff]  }
 0x165   : > { %v1678_v41 = vpop.f32.mrf.mxu1  ;;  %v5021_v25 = vadd.f32 -1.0, %v5690_v10  ;;  %v6846_v44 = vld [vmem:[%s5787_s17 + $0x4fc] ss:$144 sps:$4 sm:$0xff]   ;;  %v5258_v17 = vld [vmem:[%s7200_s1 + $0x2] sm:$0x3] }
 0x166   : > { %5242 = vmatmul.mubr.msk.bf16.vlgmr.msra.gmra.mxu0 %vm425_vm0, %v6709_v6  ;;  %5243 = vmatmul.mubr.msk.bf16.vlgmr.msra.gmra.mxu1 %vm425_vm0, %v6709_v6  ;;  %v1286_v46 = vsel %vm1246_vm6, %v6651_v16, %v5019_v0  ;;  %v6857_v38 = vld [vmem:[%s5787_s17 + $0x4f8] ss:$144 sps:$4 sm:$0xff]   ;;  %v6860_v41 = vld [vmem:[%s5787_s17 + $0x500] ss:$144 sps:$4 sm:$0xff]  }
 0x167   : > { %3480 = vmatpush1.bf16.msra.mxu0 %v7222_v27  ;;  %3521 = vmatpush1.bf16.msra.mxu1 %v6712_v62  ;;  %v5024_v47 = vpack.c.bf16 %v1286_v46, %v1285_v15  ;;  %v1288_v54 = vsel %vm1248_vm8, %v6654_v29, %v5021_v25  ;;  %v6782_v29 = vld [vmem:[%s5787_s17 + $0x4f4] ss:$144 sps:$4 sm:$0xff]   ;;  %v6865_v25 = vld [vmem:[%s5787_s17 + $0x3dc] ss:$144 sps:$4 sm:$0xff]   ;;  %v6875_v46 = vld [vmem:[%s5787_s17 + $0x3d8] ss:$144 sps:$4 sm:$0xff]  }
 0x168   : > { %3481 = vmatprep.subr.bf16.mxu0 %v7223_v36  ;;  %3522 = vmatprep.subr.bf16.mxu1 %v6717_v30  ;;  %v5025_v31 = vpack.c.bf16 %v1288_v54, %v1287_v32  ;;  %v6868_v15 = vld [vmem:[%s5787_s17 + $0x3e4] ss:$144 sps:$4 sm:$0xff]   ;;  %v6878_v27 = vld [vmem:[%s5787_s17 + $0x3e0] ss:$144 sps:$4 sm:$0xff]   ;;  %v6883_v32 = vld [vmem:[%s5787_s17 + $0x2bc] ss:$144 sps:$4 sm:$0xff]  }
 0x169   : > { %3505 = vmatprep.mubr.bf16.mxu0 %v7221_v28  ;;  %3546 = vmatprep.mubr.bf16.mxu1 %v7221_v28  ;;  %v1330_v39 = vrot.slane %v5024_v47, %v6637_v50  ;;  %v6886_v47 = vld [vmem:[%s5787_s17 + $0x2c4] ss:$144 sps:$4 sm:$0xff]   ;;  %v6893_v54 = vld [vmem:[%s5787_s17 + $0x2b8] ss:$144 sps:$4 sm:$0xff]   ;;  %v6896_v36 = vld [vmem:[%s5787_s17 + $0x2c0] ss:$144 sps:$4 sm:$0xff]  }
 0x16a   : > { %v1337_v49 = vrot.slane %v5025_v31, %v6637_v50  ;;  %v6901_v31 = vld [vmem:[%s5787_s17 + $0x19c] ss:$144 sps:$4 sm:$0xff]  }
 0x16b   : > { %3482 = vmatpush1.bf16.msra.mxu0 %v7224_v57  ;;  %3523 = vmatpush1.bf16.msra.mxu1 %v6732_v53  ;;  %v6912_v57 = vld [vmem:[%s5787_s17 + $0x1a0] ss:$144 sps:$4 sm:$0xff]  }
 0x16c   : > { %3483 = vmatprep.subr.bf16.mxu0 %v7225_v52  ;;  %3524 = vmatprep.subr.bf16.mxu1 %v6739_v56  ;;  %v1338_v9 = vcombine.low %v1330_v39, %v1337_v49  ;;  %v6904_v39 = vld [vmem:[%s5787_s17 + $0x1a4] ss:$144 sps:$4 sm:$0xff]   ;;  %v6909_v49 = vld [vmem:[%s5787_s17 + $0x198] ss:$144 sps:$4 sm:$0xff]   ;;  %7230 = vst [vmem:[#allocation3_spill] sm:$0xff] %v6912_v57 }
 0x16d   : > { %7229 = vst [vmem:[#allocation2_spill] sm:$0xff] %v6904_v39  ;;  %v6917_v52 = vld [vmem:[%s5787_s17 + $0x7c] ss:$144 sps:$4 sm:$0xff]  }
 0x16e   : > { %1342 = vst [vmem:[%s6678_s18 + $0x8] sm:$0xff] %v1338_v9  ;;  %v6920_v9 = vld [vmem:[%s5787_s17 + $0x84] ss:$144 sps:$4 sm:$0xff]  }
 0x16f   : > { %3484 = vmatpush1.bf16.msra.mxu0 %v7226_v11  ;;  %3525 = vmatpush1.bf16.msra.mxu1 %v6748_v35  ;;  %v4731_v11 = vld [vmem:[%s7201_s2] sm:$0xf] }
 0x170   : > { %3485 = vmatprep.subr.bf16.mxu0 %v7227_v42  ;;  %3526 = vmatprep.subr.bf16.mxu1 %v6753_v8 }
 0x171   : > { %4734 = vperm.xlu1 %5389, %v4731_v11  }
 0x172   : > { %v6766_v55 = vpop.f32.mrf.mxu0  ;;  %v6768_v60 = vpop.f32.mrf.mxu1 }
 0x173   : > { %3486 = vmatpush1.bf16.msra.mxu0 %v7228_v63  ;;  %3527 = vmatpush1.bf16.msra.mxu1 %v6759_v12 }
 0x174   : > { %v6775_v13 = vpop.f32.mrf.mxu0  ;;  %v6777_v16 = vpop.f32.mrf.mxu1  ;;  %3487 = vmatprep.subr.bf16.mxu0 %v6518_v19  ;;  %3528 = vmatprep.subr.bf16.mxu1 %v6764_v21  ;;  %v6792_v19 = vld [vmem:[%s5787_s17 + $0x3d4] ss:$144 sps:$4 sm:$0xff]  }
 0x176   : > { %v1718_v20 = vpop.f32.mrf.mxu0  ;;  %v1759_v23 = vpop.f32.mrf.mxu1 }
 0x177   : > { %3488 = vmatpush1.bf16.msra.mxu0 %v6530_v45  ;;  %3529 = vmatpush1.bf16.msra.mxu1 %v6773_v43  ;;  %v6801_v45 = vld [vmem:[%s5787_s17 + $0x3d0] ss:$144 sps:$4 sm:$0xff]   ;;  %v6932_v20 = vld [vmem:[%s5787_s17 + $0x78] ss:$144 sps:$4 sm:$0xff]  }
 0x178   : > { %v1719_v26 = vpop.f32.mrf.mxu0  ;;  %v1760_v58 = vpop.f32.mrf.mxu1  ;;  %3940 = vmatprep.subr.bf16.mxu0 %v6702_v4  ;;  %3981 = vmatprep.subr.bf16.mxu1 %v6782_v29  ;;  %v6935_v23 = vld [vmem:[%s5787_s17 + $0x80] ss:$144 sps:$4 sm:$0xff]  }
 0x17a   : > { %5244 = vmatmul.mubr.msk.bf16.vlgmr.msra.gmra.mxu0 %vm425_vm0, %v6709_v6  ;;  %5245 = vmatmul.mubr.msk.bf16.vlgmr.msra.gmra.mxu1 %vm425_vm0, %v6709_v6 }
 0x17b   : > { %3941 = vmatpush1.bf16.msra.mxu0 %v6712_v62  ;;  %3982 = vmatpush1.bf16.msra.mxu1 %v6787_v33 }
 0x17c   : > { %3942 = vmatprep.subr.bf16.mxu0 %v6717_v30  ;;  %3983 = vmatprep.subr.bf16.mxu1 %v6792_v19 }
 0x17d   : > { %3966 = vmatprep.mubr.bf16.mxu0 %v7221_v28  ;;  %4007 = vmatprep.mubr.bf16.mxu1 %v7221_v28 }
 0x17f   : > { %3943 = vmatpush1.bf16.msra.mxu0 %v6732_v53  ;;  %3984 = vmatpush1.bf16.msra.mxu1 %v6801_v45 }
 0x180   : > { %3944 = vmatprep.subr.bf16.mxu0 %v6739_v56  ;;  %3985 = vmatprep.subr.bf16.mxu1 %v6806_v14 }
 0x183   : > { %3945 = vmatpush1.bf16.msra.mxu0 %v6748_v35  ;;  %3986 = vmatpush1.bf16.msra.mxu1 %v6813_v18 }
 0x184   : > { %3946 = vmatprep.subr.bf16.mxu0 %v6753_v8  ;;  %3987 = vmatprep.subr.bf16.mxu1 %v6818_v48 }
 0x186   : > { %v6830_v61 = vpop.f32.mrf.mxu0  ;;  %v6832_v24 = vpop.f32.mrf.mxu1 }
 0x187   : > { %3947 = vmatpush1.bf16.msra.mxu0 %v6759_v12  ;;  %3988 = vmatpush1.bf16.msra.mxu1 %v6823_v34 }
 0x188   : > { %v6839_v5 = vpop.f32.mrf.mxu0  ;;  %v6841_v37 = vpop.f32.mrf.mxu1  ;;  %3948 = vmatprep.subr.bf16.mxu0 %v6764_v21  ;;  %3989 = vmatprep.subr.bf16.mxu1 %v6828_v51 }
 0x18a   : > { %v1853_v6 = vpop.f32.mrf.mxu0  ;;  %v1894_v7 = vpop.f32.mrf.mxu1 }
 0x18b   : > { %3949 = vmatpush1.bf16.msra.mxu0 %v6773_v43  ;;  %3990 = vmatpush1.bf16.msra.mxu1 %v6837_v3  ;;  %v5647_v6 = vld [vmem:[%s5787_s17 + $0x4e4] ss:$144 sps:$4 sm:$0xff]  }
 0x18c   : > { %v1854_v10 = vpop.f32.mrf.mxu0  ;;  %v1895_v0 = vpop.f32.mrf.mxu1  ;;  %4022 = vmatprep.subr.bf16.mxu0 %v6846_v44  ;;  %4063 = vmatprep.subr.bf16.mxu1 %v6849_v59 }
 0x18d   : > { %v5645_v0 = vld [vmem:[%s5787_s17 + $0x4e0] ss:$144 sps:$4 sm:$0xff]  }
 0x18e   : > { %5299 = vmatmul.mubr.msk.bf16.vlgmr.msra.gmra.mxu0 %vm425_vm0, %v5258_v17  ;;  %5300 = vmatmul.mubr.msk.bf16.vlgmr.msra.gmra.mxu1 %vm425_vm0, %v5258_v17 }
 0x18f   : > { %4023 = vmatpush1.bf16.msra.mxu0 %v6857_v38  ;;  %4064 = vmatpush1.bf16.msra.mxu1 %v6860_v41 }
 0x190   : > { %4024 = vmatprep.subr.bf16.mxu0 %v6865_v25  ;;  %4065 = vmatprep.subr.bf16.mxu1 %v6868_v15 }
 0x191   : > { %4048 = vmatprep.mubr.bf16.mxu0 %v7221_v28  ;;  %4089 = vmatprep.mubr.bf16.mxu1 %v7221_v28 }
 0x193   : > { %4025 = vmatpush1.bf16.msra.mxu0 %v6875_v46  ;;  %4066 = vmatpush1.bf16.msra.mxu1 %v6878_v27 }
 0x194   : > { %4026 = vmatprep.subr.bf16.mxu0 %v6883_v32  ;;  %4067 = vmatprep.subr.bf16.mxu1 %v6886_v47 }
 0x197   : > { %4027 = vmatpush1.bf16.msra.mxu0 %v6893_v54  ;;  %4068 = vmatpush1.bf16.msra.mxu1 %v6896_v36 }
 0x198   : > { %4028 = vmatprep.subr.bf16.mxu0 %v6901_v31  ;;  %4069 = vmatprep.subr.bf16.mxu1 %v6904_v39  ;;  %v5650_v39 = vld [vmem:[%s5787_s17 + $0x3c4] ss:$144 sps:$4 sm:$0xff]  }
 0x19a   : > { %v6925_v42 = vpop.f32.mrf.mxu0  ;;  %v6927_v63 = vpop.f32.mrf.mxu1 }
 0x19b   : > { %4029 = vmatpush1.bf16.msra.mxu0 %v6909_v49  ;;  %4070 = vmatpush1.bf16.msra.mxu1 %v6912_v57 }
 0x19c   : > { %v6937_v26 = vpop.f32.mrf.mxu0  ;;  %v6939_v58 = vpop.f32.mrf.mxu1  ;;  %4030 = vmatprep.subr.bf16.mxu0 %v6917_v52  ;;  %4071 = vmatprep.subr.bf16.mxu1 %v6920_v9 }
 0x19e   : > { %v1935_v7 = vpop.f32.mrf.mxu0  ;;  %v1976_v10 = vpop.f32.mrf.mxu1 }
 0x19f   : > { %4031 = vmatpush1.bf16.msra.mxu0 %v6932_v20  ;;  %4072 = vmatpush1.bf16.msra.mxu1 %v6935_v23  ;;  %v5648_v7 = vld [vmem:[%s5787_s17 + $0x3c0] ss:$144 sps:$4 sm:$0xff]  }
 0x1a0   : > { %v1936_v11 = vpop.f32.mrf.mxu0  ;;  %v1977_v57 = vpop.f32.mrf.mxu1  ;;  %4157 = vmatprep.subr.bf16.mxu0 %v5647_v6  ;;  %4198 = vmatprep.subr.bf16.mxu1 %v6702_v4  ;;  %v5651_v4 = vld [vmem:[%s5787_s17 + $0x2a0] ss:$144 sps:$4 sm:$0xff]  }
 0x1a1   : > { %v5653_v57 = vld [vmem:[%s5787_s17 + $0x2a4] ss:$144 sps:$4 sm:$0xff]   ;;  %v6969_v6 = vpop.permute.xlu0 %2398 }
 0x1a2   : > { %5301 = vmatmul.mubr.msk.bf16.vlgmr.msra.gmra.mxu0 %vm425_vm0, %v5258_v17  ;;  %5302 = vmatmul.mubr.msk.bf16.vlgmr.msra.gmra.mxu1 %vm425_vm0, %v5258_v17  ;;  %v5656_v17 = vld [vmem:[%s5787_s17 + $0x184] ss:$144 sps:$4 sm:$0xff]  }
 0x1a3   : > { %4158 = vmatpush1.bf16.msra.mxu0 %v5645_v0  ;;  %4199 = vmatpush1.bf16.msra.mxu1 %v6712_v62  ;;  %v5654_v62 = vld [vmem:[%s5787_s17 + $0x180] ss:$144 sps:$4 sm:$0xff]  }
 0x1a4   : > { %4159 = vmatprep.subr.bf16.mxu0 %v5650_v39  ;;  %4200 = vmatprep.subr.bf16.mxu1 %v6717_v30  ;;  %v5659_v30 = vld [vmem:[%s5787_s17 + $0x64] ss:$144 sps:$4 sm:$0xff]   ;;  %v1850_v39 = vadd.f32 %v6830_v61, %v6689_v1 }
 0x1a5   : > { %4183 = vmatprep.mubr.bf16.mxu0 %v7221_v28  ;;  %4224 = vmatprep.mubr.bf16.mxu1 %v7221_v28 }
 0x1a7   : > { %4160 = vmatpush1.bf16.msra.mxu0 %v5648_v7  ;;  %4201 = vmatpush1.bf16.msra.mxu1 %v6732_v53  ;;  %v1891_v53 = vadd.f32 %v6832_v24, %v6691_v2 }
 0x1a8   : > { %4161 = vmatprep.subr.bf16.mxu0 %v5653_v57  ;;  %4202 = vmatprep.subr.bf16.mxu1 %v6739_v56  ;;  %v1852_v56 = vadd.f32 %v6839_v5, %v6695_v40 }
 0x1ab   : > { %4162 = vmatpush1.bf16.msra.mxu0 %v5651_v4  ;;  %4203 = vmatpush1.bf16.msra.mxu1 %v6748_v35  ;;  %v1893_v35 = vadd.f32 %v6841_v37, %v6697_v22 }
 0x1ac   : > { %4163 = vmatprep.subr.bf16.mxu0 %v5656_v17  ;;  %4204 = vmatprep.subr.bf16.mxu1 %v6753_v8  ;;  %v5657_v8 = vld [vmem:[%s5787_s17 + $0x60] ss:$144 sps:$4 sm:$0xff]  }
 0x1ae   : > { %v2257_v10 = vpop.f32.mrf.mxu0  ;;  %v2298_v0 = vpop.f32.mrf.mxu1 }
 0x1af   : > { %v2387_v11 = vadd.f32 %v2257_v10, %v1850_v39  ;;  %v2389_v7 = vadd.f32 %v2298_v0, %v1891_v53  ;;  %4164 = vmatpush1.bf16.msra.mxu0 %v5654_v62  ;;  %4205 = vmatpush1.bf16.msra.mxu1 %v6759_v12 }
 0x1b0   : > { %v2259_v1 = vpop.f32.mrf.mxu0  ;;  %v2300_v61 = vpop.f32.mrf.mxu1  ;;  %4165 = vmatprep.subr.bf16.mxu0 %v5659_v30  ;;  %4206 = vmatprep.subr.bf16.mxu1 %v6764_v21  ;;  %v6995_v21 = vld [vmem:[%s7200_s1] sm:$0x3] }
 0x1b1   : > { %v2388_v2 = vadd.f32 %v2259_v1, %v1852_v56  ;;  %v6979_v24 = vadd.f32 %v6969_v6, %v2387_v11  ;;  %v2390_v40 = vadd.f32 %v2300_v61, %v1893_v35  ;;  %v6982_v5 = vadd.f32 %v6969_v6, %v2389_v7 }
 0x1b2   : > { %v2261_v22 = vpop.f32.mrf.mxu0  ;;  %v2302_v37 = vpop.f32.mrf.mxu1  ;;  %v1932_v35 = vadd.f32 %v6925_v42, %v6766_v55  ;;  %v1973_v11 = vadd.f32 %v6927_v63, %v6768_v60  ;;  %v1934_v1 = vadd.f32 %v6937_v26, %v6775_v13 }
 0x1b3   : > { %v6985_v57 = vadd.f32 %v6969_v6, %v2388_v2  ;;  %v2417_v12 = vmin.f32 %v6979_v24, 0.0  ;;  %v6989_v4 = vadd.f32 %v6969_v6, %v2390_v40  ;;  %4166 = vmatpush1.bf16.msra.mxu0 %v5657_v8  ;;  %4207 = vmatpush1.bf16.msra.mxu1 %v6773_v43  ;;  %v2419_v17 = vmin.f32 %v6982_v5, 0.0 }
 0x1b4   : > { %v2262_v62 = vpop.f32.mrf.mxu0  ;;  %v2303_v30 = vpop.f32.mrf.mxu1  ;;  %4239 = vmatprep.subr.bf16.mxu0 %v6782_v29  ;;  %4280 = vmatprep.subr.bf16.mxu1 %v6846_v44  ;;  %v1975_v22 = vadd.f32 %v6939_v58, %v6777_v16  ;;  %vm2409_vm9 = vcmp.gt.f32.partialorder %v6979_v24, 0.0  ;;  %vm2411_vm11 = vcmp.gt.f32.partialorder %v6982_v5, 0.0 }
 0x1b5   : > { %v2418_v39 = vmin.f32 %v6985_v57, 0.0  ;;  %v2425_v53 = vmul.f32 1.442695, %v2417_v12  ;;  %v2420_v56 = vmin.f32 %v6989_v4, 0.0  ;;  %v2429_v10 = vmul.f32 1.442695, %v2419_v17 }
 0x1b6   : > { %5313 = vmatmul.mubr.msk.bf16.vlgmr.msra.gmra.mxu0 %vm425_vm0, %v6995_v21  ;;  %5314 = vmatmul.mubr.msk.bf16.vlgmr.msra.gmra.mxu1 %vm425_vm0, %v6995_v21  ;;  %vm2410_vm10 = vcmp.gt.f32.partialorder %v6985_v57, 0.0  ;;  %vm2412_vm12 = vcmp.gt.f32.partialorder %v6989_v4, 0.0 }
 0x1b7   : > { %5691 = vpow2.f32 %v2425_v53  ;;  %v2427_v43 = vmul.f32 1.442695, %v2418_v39  ;;  %4240 = vmatpush1.bf16.msra.mxu0 %v6787_v33  ;;  %4281 = vmatpush1.bf16.msra.mxu1 %v6857_v38  ;;  %v2431_v0 = vmul.f32 1.442695, %v2420_v56 }
 0x1b8   : > { %5693 = vpow2.f32 %v2429_v10  ;;  %4241 = vmatprep.subr.bf16.mxu0 %v6792_v19  ;;  %4282 = vmatprep.subr.bf16.mxu1 %v6865_v25 }
 0x1b9   : > { %5695 = vpow2.f32 %v2427_v43  ;;  %4265 = vmatprep.mubr.bf16.mxu0 %v7221_v28  ;;  %4306 = vmatprep.mubr.bf16.mxu1 %v7221_v28 }
 0x1ba   : > { %5697 = vpow2.f32 %v2431_v0 }
 0x1bb   : > { %4242 = vmatpush1.bf16.msra.mxu0 %v6801_v45  ;;  %4283 = vmatpush1.bf16.msra.mxu1 %v6875_v46 }
 0x1bc   : > { %4243 = vmatprep.subr.bf16.mxu0 %v6806_v14  ;;  %4284 = vmatprep.subr.bf16.mxu1 %v6883_v32 }
 0x1bf   : > { %4244 = vmatpush1.bf16.msra.mxu0 %v6813_v18  ;;  %4285 = vmatpush1.bf16.msra.mxu1 %v6893_v54 }
 0x1c0   : > { %4245 = vmatprep.subr.bf16.mxu0 %v6818_v48  ;;  %4286 = vmatprep.subr.bf16.mxu1 %v6901_v31 }
 0x1c2   : > { %v2339_v7 = vpop.f32.mrf.mxu0  ;;  %v2380_v8 = vpop.f32.mrf.mxu1 }
 0x1c3   : > { %v2391_v61 = vadd.f32 %v2339_v7, %v1932_v35  ;;  %v2393_v2 = vadd.f32 %v2380_v8, %v1973_v11  ;;  %4246 = vmatpush1.bf16.msra.mxu0 %v6823_v34  ;;  %4287 = vmatpush1.bf16.msra.mxu1 %v6909_v49 }
 0x1c4   : > { %v5692_v40 = vpop.eup %5691  ;;  %v2341_v37 = vpop.f32.mrf.mxu0  ;;  %4247 = vmatprep.subr.bf16.mxu0 %v6828_v51  ;;  %4288 = vmatprep.subr.bf16.mxu1 %v6917_v52 }
 0x1c5   : > { %v2382_v55 = vpop.f32.mrf.mxu1  ;;  %v5694_v60 = vpop.eup %5693  ;;  %v5130_v42 = vadd.f32 -1.0, %v5692_v40  ;;  %v7033_v13 = vadd.f32 %v6969_v6, %v2391_v61  ;;  %v7036_v63 = vadd.f32 %v6969_v6, %v2393_v2  ;;  %v2392_v26 = vadd.f32 %v2341_v37, %v1934_v1  ;;  %v5665_v37 = vld [vmem:[%s5787_s17 + $0x3ec] ss:$144 sps:$4 sm:$0xff]  }
 0x1c6   : > { %v5696_v12 = vpop.eup %5695  ;;  %v5132_v17 = vadd.f32 -1.0, %v5694_v60  ;;  %v2394_v16 = vadd.f32 %v2382_v55, %v1975_v22  ;;  %v2343_v58 = vpop.f32.mrf.mxu0 }
 0x1c7   : > { %v2384_v62 = vpop.f32.mrf.mxu1  ;;  %v5698_v30 = vpop.eup %5697  ;;  %v5131_v39 = vadd.f32 -1.0, %v5696_v12  ;;  %v2421_v53 = vmin.f32 %v7033_v13, 0.0  ;;  %4248 = vmatpush1.bf16.msra.mxu0 %v6837_v3  ;;  %4289 = vmatpush1.bf16.msra.mxu1 %v6932_v20  ;;  %v2449_v56 = vsel %vm2409_vm9, %v6979_v24, %v5130_v42  ;;  %v2423_v43 = vmin.f32 %v7036_v63, 0.0  ;;  %v5663_v42 = vld [vmem:[%s5787_s17 + $0x3e8] ss:$144 sps:$4 sm:$0xff]  }
 0x1c8   : > { %v5133_v10 = vadd.f32 -1.0, %v5698_v30  ;;  %v2344_v0 = vpop.f32.mrf.mxu0  ;;  %4565 = vmatprep.subr.bf16.mxu0 %v6782_v29  ;;  %4606 = vmatprep.subr.bf16.mxu1 %v6846_v44  ;;  %v7051_v8 = vadd.f32 %v6969_v6, %v2392_v26  ;;  %v7054_v1 = vadd.f32 %v6969_v6, %v2394_v16  ;;  %v2451_v61 = vsel %vm2411_vm11, %v6982_v5, %v5132_v17  ;;  %v5666_v58 = vld [vmem:[%s5787_s17 + $0x2c8] ss:$144 sps:$4 sm:$0xff]   ;;  %v7231_v30 = vld [vmem:[#allocation2_spill] sm:$0xff] }
 0x1c9   : > { %v2385_v35 = vpop.f32.mrf.mxu1  ;;  %v2450_v11 = vsel %vm2410_vm10, %v6985_v57, %v5131_v39  ;;  %v2433_v7 = vmul.f32 1.442695, %v2421_v53  ;;  %v2437_v40 = vmul.f32 1.442695, %v2423_v43  ;;  %vm2413_vm13 = vcmp.gt.f32.partialorder %v7033_v13, 0.0 }
 0x1ca   : > { %v5138_v24 = vpack.c.bf16 %v2450_v11, %v2449_v56  ;;  %v2452_v2 = vsel %vm2412_vm12, %v6989_v4, %v5133_v10  ;;  %5315 = vmatmul.mubr.msk.bf16.vlgmr.msra.gmra.mxu0 %vm425_vm0, %v6995_v21  ;;  %5316 = vmatmul.mubr.msk.bf16.vlgmr.msra.gmra.mxu1 %vm425_vm0, %v6995_v21  ;;  %v2422_v44 = vmin.f32 %v7051_v8, 0.0  ;;  %v2424_v5 = vmin.f32 %v7054_v1, 0.0  ;;  %v5674_v39 = vld [vmem:[%s5787_s17 + $0x8c] ss:$144 sps:$4 sm:$0xff]  }
 0x1cb   : > { %v5139_v29 = vpack.c.bf16 %v2452_v2, %v2451_v61  ;;  %5699 = vpow2.f32 %v2433_v7  ;;  %4566 = vmatpush1.bf16.msra.mxu0 %v6787_v33  ;;  %4607 = vmatpush1.bf16.msra.mxu1 %v6857_v38  ;;  %vm2414_vm14 = vcmp.gt.f32.partialorder %v7051_v8, 0.0  ;;  %vm2415_vm15 = vcmp.gt.f32.partialorder %v7036_v63, 0.0  ;;  %v7232_v56 = vld [vmem:[#allocation3_spill] sm:$0xff] }
 0x1cc   : > { %v2481_v6 = vrot.slane %v5138_v24, %v6637_v50  ;;  %5701 = vpow2.f32 %v2437_v40  ;;  %4567 = vmatprep.subr.bf16.mxu0 %v6792_v19  ;;  %4608 = vmatprep.subr.bf16.mxu1 %v6865_v25  ;;  %v2435_v4 = vmul.f32 1.442695, %v2422_v44  ;;  %v2439_v33 = vmul.f32 1.442695, %v2424_v5 }
 0x1cd   : > { %v2488_v57 = vrot.slane %v5139_v29, %v6637_v50  ;;  %4591 = vmatprep.mubr.bf16.mxu0 %v7221_v28  ;;  %4632 = vmatprep.mubr.bf16.mxu1 %v7221_v28  ;;  %vm2416_vm1 = vcmp.gt.f32.partialorder %v7054_v1, 0.0 }
 0x1ce   : > { %5703 = vpow2.f32 %v2435_v4 }
 0x1cf   : > { %v2489_v21 = vcombine.low %v2481_v6, %v2488_v57  ;;  %4568 = vmatpush1.bf16.msra.mxu0 %v6801_v45  ;;  %4609 = vmatpush1.bf16.msra.mxu1 %v6875_v46  ;;  %5705 = vpow2.f32 %v2439_v33 }
 0x1d0   : > { %4569 = vmatprep.subr.bf16.mxu0 %v6806_v14  ;;  %4610 = vmatprep.subr.bf16.mxu1 %v6883_v32 }
 0x1d1   : > { %2509 = vst [vmem:[%s6678_s18 + $0x10] sm:$0xff] %v2489_v21 }
 0x1d3   : > { %4570 = vmatpush1.bf16.msra.mxu0 %v6813_v18  ;;  %4611 = vmatpush1.bf16.msra.mxu1 %v6893_v54  ;;  %v5662_v18 = vld [vmem:[%s5787_s17 + $0x50c] ss:$144 sps:$4 sm:$0xff]  }
 0x1d4   : > { %4571 = vmatprep.subr.bf16.mxu0 %v6818_v48  ;;  %4612 = vmatprep.subr.bf16.mxu1 %v6901_v31  ;;  %v5660_v31 = vld [vmem:[%s5787_s17 + $0x508] ss:$144 sps:$4 sm:$0xff]  }
 0x1d6   : > { %v7083_v19 = vpop.f32.mrf.mxu0  ;;  %v7085_v45 = vpop.f32.mrf.mxu1 }
 0x1d7   : > { %4572 = vmatpush1.bf16.msra.mxu0 %v6823_v34  ;;  %4613 = vmatpush1.bf16.msra.mxu1 %v6909_v49  ;;  %v7101_v34 = vld [vmem:[%s7200_s1 + $0x4] sm:$0x3] }
 0x1d8   : > { %v5700_v14 = vpop.eup %5699  ;;  %v7089_v38 = vpop.f32.mrf.mxu0  ;;  %4573 = vmatprep.subr.bf16.mxu0 %v6828_v51  ;;  %4614 = vmatprep.subr.bf16.mxu1 %v6917_v52 }
 0x1d9   : > { %v7091_v25 = vpop.f32.mrf.mxu1  ;;  %v5702_v48 = vpop.eup %5701  ;;  %v5134_v54 = vadd.f32 -1.0, %v5700_v14 }
 0x1da   : > { %v2804_v46 = vpop.f32.mrf.mxu0  ;;  %v5136_v51 = vadd.f32 -1.0, %v5702_v48 }
 0x1db   : > { %v2845_v32 = vpop.f32.mrf.mxu1  ;;  %4574 = vmatpush1.bf16.msra.mxu0 %v6837_v3  ;;  %4615 = vmatpush1.bf16.msra.mxu1 %v6932_v20  ;;  %v5704_v49 = vpop.eup %5703  ;;  %v2453_v20 = vsel %vm2413_vm13, %v7033_v13, %v5134_v54  ;;  %v5668_v13 = vld [vmem:[%s5787_s17 + $0x2cc] ss:$144 sps:$4 sm:$0xff]  }
 0x1dc   : > { %v2805_v22 = vpop.f32.mrf.mxu0  ;;  %4647 = vmatprep.subr.bf16.mxu0 %v6849_v59  ;;  %4688 = vmatprep.subr.bf16.mxu1 %v5662_v18  ;;  %v5706_v55 = vpop.eup %5705  ;;  %v5135_v60 = vadd.f32 -1.0, %v5704_v49  ;;  %v2455_v26 = vsel %vm2415_vm15, %v7036_v63, %v5136_v51 }
 0x1dd   : > { %v2846_v52 = vpop.f32.mrf.mxu1  ;;  %v5137_v3 = vadd.f32 -1.0, %v5706_v55  ;;  %v7153_v18 = vpop.permute.xlu1 %3566 }
 0x1de   : > { %5358 = vmatmul.mubr.msk.bf16.vlgmr.msra.gmra.mxu0 %vm425_vm0, %v7101_v34  ;;  %5359 = vmatmul.mubr.msk.bf16.vlgmr.msra.gmra.mxu1 %vm425_vm0, %v7101_v34  ;;  %v2454_v59 = vsel %vm2414_vm14, %v7051_v8, %v5135_v60 }
 0x1df   : > { %4648 = vmatpush1.bf16.msra.mxu0 %v6860_v41  ;;  %4689 = vmatpush1.bf16.msra.mxu1 %v5660_v31  ;;  %v5140_v12 = vpack.c.bf16 %v2454_v59, %v2453_v20  ;;  %v2456_v17 = vsel %vm2416_vm1, %v7054_v1, %v5137_v3 }
 0x1e0   : > { %4649 = vmatprep.subr.bf16.mxu0 %v6868_v15  ;;  %4690 = vmatprep.subr.bf16.mxu1 %v5665_v37  ;;  %v5141_v16 = vpack.c.bf16 %v2456_v17, %v2455_v26  ;;  %v5671_v15 = vld [vmem:[%s5787_s17 + $0x1ac] ss:$144 sps:$4 sm:$0xff]  }
 0x1e1   : > { %4673 = vmatprep.mubr.bf16.mxu0 %v7221_v28  ;;  %4714 = vmatprep.mubr.bf16.mxu1 %v7221_v28  ;;  %v2498_v41 = vrot.slane %v5140_v12, %v6637_v50  ;;  %v5669_v28 = vld [vmem:[%s5787_s17 + $0x1a8] ss:$144 sps:$4 sm:$0xff]  }
 0x1e2   : > { %v2505_v63 = vrot.slane %v5141_v16, %v6637_v50 }
 0x1e3   : > { %4650 = vmatpush1.bf16.msra.mxu0 %v6878_v27  ;;  %4691 = vmatpush1.bf16.msra.mxu1 %v5663_v42 }
 0x1e4   : > { %4651 = vmatprep.subr.bf16.mxu0 %v6886_v47  ;;  %4692 = vmatprep.subr.bf16.mxu1 %v5668_v13  ;;  %v2506_v62 = vcombine.low %v2498_v41, %v2505_v63  ;;  %v5672_v47 = vld [vmem:[%s5787_s17 + $0x88] ss:$144 sps:$4 sm:$0xff]  }
 0x1e6   : > { %2510 = vst [vmem:[%s6678_s18 + $0x18] sm:$0xff] %v2506_v62 }
 0x1e7   : > { %4652 = vmatpush1.bf16.msra.mxu0 %v6896_v36  ;;  %4693 = vmatpush1.bf16.msra.mxu1 %v5666_v58 }
 0x1e8   : > { %4653 = vmatprep.subr.bf16.mxu0 %v7231_v30  ;;  %4694 = vmatprep.subr.bf16.mxu1 %v5671_v15 }
 0x1ea   : > { %v7135_v53 = vpop.f32.mrf.mxu0  ;;  %v7137_v27 = vpop.f32.mrf.mxu1 }
 0x1eb   : > { %4654 = vmatpush1.bf16.msra.mxu0 %v7232_v56  ;;  %4695 = vmatpush1.bf16.msra.mxu1 %v5669_v28 }
 0x1ec   : > { %v7141_v10 = vpop.f32.mrf.mxu0  ;;  %v7143_v43 = vpop.f32.mrf.mxu1  ;;  %4655 = vmatprep.subr.bf16.mxu0 %v6920_v9  ;;  %4696 = vmatprep.subr.bf16.mxu1 %v5674_v39 }
 0x1ee   : > { %v2886_v36 = vpop.f32.mrf.mxu0  ;;  %v2927_v0 = vpop.f32.mrf.mxu1 }
 0x1ef   : > { %4656 = vmatpush1.bf16.msra.mxu0 %v6935_v23  ;;  %4697 = vmatpush1.bf16.msra.mxu1 %v5672_v47 }
 0x1f0   : > { %v2887_v35 = vpop.f32.mrf.mxu0  ;;  %v2928_v11 = vpop.f32.mrf.mxu1 }
 0x1f2   : > { %5360 = vmatmul.mubr.msk.bf16.vlgmr.msra.gmra.mxu0 %vm425_vm0, %v7101_v34  ;;  %5361 = vmatmul.mubr.msk.bf16.vlgmr.msra.gmra.mxu1 %vm425_vm0, %v7101_v34 }
 0x1fe   : > { %v3017_v7 = vpop.f32.mrf.mxu0  ;;  %v3058_v8 = vpop.f32.mrf.mxu1 }
 0x1ff   : > { %v3018_v21 = vadd.f32 %v3017_v7, %v7083_v19  ;;  %v3059_v14 = vadd.f32 %v3058_v8, %v7085_v45 }
 0x200   : > { %v3019_v1 = vpop.f32.mrf.mxu0  ;;  %v3060_v24 = vpop.f32.mrf.mxu1 }
 0x201   : > { %v3020_v32 = vadd.f32 %v3019_v1, %v7089_v38  ;;  %v3061_v54 = vadd.f32 %v3060_v24, %v7091_v25 }
 0x202   : > { %v3021_v61 = vpop.f32.mrf.mxu0  ;;  %v3062_v9 = vpop.f32.mrf.mxu1 }
 0x204   : > { %v3022_v2 = vpop.f32.mrf.mxu0  ;;  %v3063_v40 = vpop.f32.mrf.mxu1 }
 0x212   : > { %v3099_v29 = vpop.f32.mrf.mxu0  ;;  %v3140_v44 = vpop.f32.mrf.mxu1 }
 0x213   : > { %v3100_v41 = vadd.f32 %v3099_v29, %v7135_v53  ;;  %v3141_v63 = vadd.f32 %v3140_v44, %v7137_v27 }
 0x214   : > { %v3101_v23 = vpop.f32.mrf.mxu0  ;;  %v3142_v6 = vpop.f32.mrf.mxu1 }
 0x215   : > { %v3102_v62 = vadd.f32 %v3101_v23, %v7141_v10  ;;  %v3143_v56 = vadd.f32 %v3142_v6, %v7143_v43 }
 0x216   : > { %v3103_v5 = vpop.f32.mrf.mxu0  ;;  %v3144_v57 = vpop.f32.mrf.mxu1 }
 0x218   : > { %v3104_v4 = vpop.f32.mrf.mxu0  ;;  %v3145_v33 = vpop.f32.mrf.mxu1 }
 0x226   : > { %v3425_v48 = vpop.f32.mrf.mxu0  ;;  %v3466_v46 = vpop.f32.mrf.mxu1 }
 0x227   : > { %v3555_v34 = vadd.f32 %v3425_v48, %v3018_v21  ;;  %v3557_v31 = vadd.f32 %v3466_v46, %v3059_v14 }
 0x228   : > { %v3427_v49 = vpop.f32.mrf.mxu0  ;;  %v3468_v51 = vpop.f32.mrf.mxu1 }
 0x229   : > { %v3556_v22 = vadd.f32 %v3427_v49, %v3020_v32  ;;  %v3569_v52 = vadd.f32 %v7153_v18, %v3555_v34  ;;  %v3558_v37 = vadd.f32 %v3468_v51, %v3061_v54  ;;  %v3571_v19 = vadd.f32 %v7153_v18, %v3557_v31 }
 0x22a   : > { %v3429_v55 = vpop.f32.mrf.mxu0  ;;  %v3470_v45 = vpop.f32.mrf.mxu1 }
 0x22b   : > { %v3570_v60 = vadd.f32 %v7153_v18, %v3556_v22  ;;  %v3585_v3 = vmin.f32 %v3569_v52, 0.0  ;;  %v3572_v20 = vadd.f32 %v7153_v18, %v3558_v37  ;;  %v3587_v38 = vmin.f32 %v3571_v19, 0.0 }
 0x22c   : > { %v3430_v59 = vpop.f32.mrf.mxu0  ;;  %v3471_v25 = vpop.f32.mrf.mxu1  ;;  %vm3577_vm0 = vcmp.gt.f32.partialorder %v3569_v52, 0.0  ;;  %vm3579_vm3 = vcmp.gt.f32.partialorder %v3571_v19, 0.0 }
 0x22d   : > { %v3586_v42 = vmin.f32 %v3570_v60, 0.0  ;;  %v3593_v26 = vmul.f32 1.442695, %v3585_v3  ;;  %v3588_v12 = vmin.f32 %v3572_v20, 0.0  ;;  %v3597_v17 = vmul.f32 1.442695, %v3587_v38 }
 0x22e   : > { %vm3578_vm2 = vcmp.gt.f32.partialorder %v3570_v60, 0.0  ;;  %vm3580_vm4 = vcmp.gt.f32.partialorder %v3572_v20, 0.0 }
 0x22f   : > { %5707 = vpow2.f32 %v3593_v26  ;;  %v3595_v13 = vmul.f32 1.442695, %v3586_v42  ;;  %v3599_v16 = vmul.f32 1.442695, %v3588_v12 }
 0x230   : > { %5709 = vpow2.f32 %v3597_v17 }
 0x231   : > { %5711 = vpow2.f32 %v3595_v13 }
 0x232   : > { %5713 = vpow2.f32 %v3599_v16 }
 0x23a   : > { %v3507_v58 = vpop.f32.mrf.mxu0  ;;  %v3548_v15 = vpop.f32.mrf.mxu1 }
 0x23b   : > { %v3559_v28 = vadd.f32 %v3507_v58, %v3100_v41  ;;  %v3561_v30 = vadd.f32 %v3548_v15, %v3141_v63 }
 0x23c   : > { %v5708_v39 = vpop.eup %5707  ;;  %v3509_v47 = vpop.f32.mrf.mxu0 }
 0x23d   : > { %v3550_v36 = vpop.f32.mrf.mxu1  ;;  %v5710_v0 = vpop.eup %5709  ;;  %v5246_v35 = vadd.f32 -1.0, %v5708_v39  ;;  %v3573_v11 = vadd.f32 %v7153_v18, %v3559_v28  ;;  %v7167_v7 = vadd.f32 %v7153_v18, %v3561_v30  ;;  %v3560_v53 = vadd.f32 %v3509_v47, %v3102_v62 }
 0x23e   : > { %v5712_v27 = vpop.eup %5711  ;;  %v5248_v8 = vadd.f32 -1.0, %v5710_v0  ;;  %v3562_v1 = vadd.f32 %v3550_v36, %v3143_v56  ;;  %v3511_v10 = vpop.f32.mrf.mxu0 }
 0x23f   : > { %v3552_v24 = vpop.f32.mrf.mxu1  ;;  %v5714_v61 = vpop.eup %5713  ;;  %v5247_v9 = vadd.f32 -1.0, %v5712_v27  ;;  %v3589_v43 = vmin.f32 %v3573_v11, 0.0  ;;  %v3617_v2 = vsel %vm3577_vm0, %v3569_v52, %v5246_v35  ;;  %v3591_v29 = vmin.f32 %v7167_v7, 0.0 }
 0x240   : > { %v5249_v40 = vadd.f32 -1.0, %v5714_v61  ;;  %v3512_v44 = vpop.f32.mrf.mxu0  ;;  %v3574_v57 = vadd.f32 %v7153_v18, %v3560_v53  ;;  %v3576_v4 = vadd.f32 %v7153_v18, %v3562_v1  ;;  %v3619_v21 = vsel %vm3579_vm3, %v3571_v19, %v5248_v8 }
 0x241   : > { %v3553_v23 = vpop.f32.mrf.mxu1  ;;  %v3618_v6 = vsel %vm3578_vm2, %v3570_v60, %v5247_v9  ;;  %v3601_v5 = vmul.f32 1.442695, %v3589_v43  ;;  %v3605_v48 = vmul.f32 1.442695, %v3591_v29  ;;  %vm3581_vm5 = vcmp.gt.f32.partialorder %v3573_v11, 0.0 }
 0x242   : > { %v5254_v33 = vpack.c.bf16 %v3618_v6, %v3617_v2  ;;  %v3620_v14 = vsel %vm3580_vm4, %v3572_v20, %v5249_v40  ;;  %v3590_v32 = vmin.f32 %v3574_v57, 0.0  ;;  %v3592_v34 = vmin.f32 %v3576_v4, 0.0 }
 0x243   : > { %v5255_v46 = vpack.c.bf16 %v3620_v14, %v3619_v21  ;;  %5715 = vpow2.f32 %v3601_v5  ;;  %vm3582_vm6 = vcmp.gt.f32.partialorder %v3574_v57, 0.0  ;;  %vm3583_vm7 = vcmp.gt.f32.partialorder %v7167_v7, 0.0 }
 0x244   : > { %v3649_v54 = vrot.slane %v5254_v33, %v6637_v50  ;;  %5717 = vpow2.f32 %v3605_v48  ;;  %v3603_v49 = vmul.f32 1.442695, %v3590_v32  ;;  %v3607_v51 = vmul.f32 1.442695, %v3592_v34  ;;  %v7180_v33 = vpop.permute.xlu1 %4734 }
 0x245   : > { %v3656_v31 = vrot.slane %v5255_v46, %v6637_v50  ;;  %vm3584_vm8 = vcmp.gt.f32.partialorder %v3576_v4, 0.0 }
 0x246   : > { %5719 = vpow2.f32 %v3603_v49 }
 0x247   : > { %v3657_v22 = vcombine.low %v3649_v54, %v3656_v31  ;;  %5721 = vpow2.f32 %v3607_v51 }
 0x249   : > { %3677 = vst [vmem:[%s6678_s18 + $0x20] sm:$0xff] %v3657_v22 }
 0x24e   : > { %v3968_v18 = vpop.f32.mrf.mxu0  ;;  %v4009_v52 = vpop.f32.mrf.mxu1 }
 0x250   : > { %v5716_v37 = vpop.eup %5715  ;;  %v3970_v19 = vpop.f32.mrf.mxu0 }
 0x251   : > { %v4011_v55 = vpop.f32.mrf.mxu1  ;;  %v5718_v45 = vpop.eup %5717  ;;  %v5250_v20 = vadd.f32 -1.0, %v5716_v37 }
 0x252   : > { %v3972_v60 = vpop.f32.mrf.mxu0  ;;  %v5252_v59 = vadd.f32 -1.0, %v5718_v45 }
 0x253   : > { %v4013_v3 = vpop.f32.mrf.mxu1  ;;  %v5720_v38 = vpop.eup %5719  ;;  %v3621_v13 = vsel %vm3581_vm5, %v3573_v11, %v5250_v20 }
 0x254   : > { %v3973_v25 = vpop.f32.mrf.mxu0  ;;  %v5722_v26 = vpop.eup %5721  ;;  %v5251_v12 = vadd.f32 -1.0, %v5720_v38  ;;  %v3623_v41 = vsel %vm3583_vm7, %v7167_v7, %v5252_v59 }
 0x255   : > { %v4014_v42 = vpop.f32.mrf.mxu1  ;;  %v5253_v17 = vadd.f32 -1.0, %v5722_v26 }
 0x256   : > { %v3622_v16 = vsel %vm3582_vm6, %v3574_v57, %v5251_v12 }
 0x257   : > { %v5256_v63 = vpack.c.bf16 %v3622_v16, %v3621_v13  ;;  %v3624_v58 = vsel %vm3584_vm8, %v3576_v4, %v5253_v17 }
 0x258   : > { %v5257_v15 = vpack.c.bf16 %v3624_v58, %v3623_v41 }
 0x259   : > { %v3666_v62 = vrot.slane %v5256_v63, %v6637_v50 }
 0x25a   : > { %v3673_v28 = vrot.slane %v5257_v15, %v6637_v50 }
 0x25c   : > { %v3674_v30 = vcombine.low %v3666_v62, %v3673_v28 }
 0x25e   : > { %3678 = vst [vmem:[%s6678_s18 + $0x28] sm:$0xff] %v3674_v30 }
 0x262   : > { %v4050_v39 = vpop.f32.mrf.mxu0  ;;  %v4091_v56 = vpop.f32.mrf.mxu1 }
 0x264   : > { %v4052_v47 = vpop.f32.mrf.mxu0  ;;  %v4093_v36 = vpop.f32.mrf.mxu1 }
 0x266   : > { %v4054_v0 = vpop.f32.mrf.mxu0  ;;  %v4095_v35 = vpop.f32.mrf.mxu1 }
 0x268   : > { %v4055_v11 = vpop.f32.mrf.mxu0  ;;  %v4096_v53 = vpop.f32.mrf.mxu1 }
 0x276   : > { %v4185_v27 = vpop.f32.mrf.mxu0  ;;  %v4226_v8 = vpop.f32.mrf.mxu1 }
 0x277   : > { %v4186_v57 = vadd.f32 %v4185_v27, %v3968_v18  ;;  %v4227_v4 = vadd.f32 %v4226_v8, %v4009_v52 }
 0x278   : > { %v4187_v7 = vpop.f32.mrf.mxu0  ;;  %v4228_v1 = vpop.f32.mrf.mxu1 }
 0x279   : > { %v4188_v48 = vadd.f32 %v4187_v7, %v3970_v19  ;;  %v4229_v46 = vadd.f32 %v4228_v1, %v4011_v55 }
 0x27a   : > { %v4189_v10 = vpop.f32.mrf.mxu0  ;;  %v4230_v24 = vpop.f32.mrf.mxu1 }
 0x27c   : > { %v4190_v61 = vpop.f32.mrf.mxu0  ;;  %v4231_v9 = vpop.f32.mrf.mxu1 }
 0x28a   : > { %v4267_v43 = vpop.f32.mrf.mxu0  ;;  %v4308_v2 = vpop.f32.mrf.mxu1 }
 0x28b   : > { %v4268_v17 = vadd.f32 %v4267_v43, %v4050_v39  ;;  %v4309_v13 = vadd.f32 %v4308_v2, %v4091_v56 }
 0x28c   : > { %v4269_v40 = vpop.f32.mrf.mxu0  ;;  %v4310_v29 = vpop.f32.mrf.mxu1 }
 0x28d   : > { %v4270_v63 = vadd.f32 %v4269_v40, %v4052_v47  ;;  %v4311_v28 = vadd.f32 %v4310_v29, %v4093_v36 }
 0x28e   : > { %v4271_v44 = vpop.f32.mrf.mxu0  ;;  %v4312_v23 = vpop.f32.mrf.mxu1 }
 0x290   : > { %v4272_v6 = vpop.f32.mrf.mxu0  ;;  %v4313_v5 = vpop.f32.mrf.mxu1 }
 0x29e   : > { %v4593_v21 = vpop.f32.mrf.mxu0  ;;  %v4634_v14 = vpop.f32.mrf.mxu1 }
 0x29f   : > { %v4723_v32 = vadd.f32 %v4593_v21, %v4186_v57  ;;  %v4725_v54 = vadd.f32 %v4634_v14, %v4227_v4 }
 0x2a0   : > { %v4595_v34 = vpop.f32.mrf.mxu0  ;;  %v4636_v31 = vpop.f32.mrf.mxu1 }
 0x2a1   : > { %v4724_v49 = vadd.f32 %v4595_v34, %v4188_v48  ;;  %v4737_v51 = vadd.f32 %v7180_v33, %v4723_v32  ;;  %v4726_v22 = vadd.f32 %v4636_v31, %v4229_v46  ;;  %v4739_v37 = vadd.f32 %v7180_v33, %v4725_v54 }
 0x2a2   : > { %v4597_v45 = vpop.f32.mrf.mxu0  ;;  %v4638_v60 = vpop.f32.mrf.mxu1 }
 0x2a3   : > { %v4738_v18 = vadd.f32 %v7180_v33, %v4724_v49  ;;  %v4753_v52 = vmin.f32 %v4737_v51, 0.0  ;;  %v4740_v3 = vadd.f32 %v7180_v33, %v4726_v22  ;;  %v4755_v20 = vmin.f32 %v4739_v37, 0.0 }
 0x2a4   : > { %v4598_v19 = vpop.f32.mrf.mxu0  ;;  %v4639_v55 = vpop.f32.mrf.mxu1  ;;  %vm4745_vm9 = vcmp.gt.f32.partialorder %v4737_v51, 0.0  ;;  %vm4747_vm11 = vcmp.gt.f32.partialorder %v4739_v37, 0.0 }
 0x2a5   : > { %v4754_v38 = vmin.f32 %v4738_v18, 0.0  ;;  %v4761_v59 = vmul.f32 1.442695, %v4753_v52  ;;  %v4756_v25 = vmin.f32 %v4740_v3, 0.0  ;;  %v4765_v42 = vmul.f32 1.442695, %v4755_v20 }
 0x2a6   : > { %vm4746_vm10 = vcmp.gt.f32.partialorder %v4738_v18, 0.0  ;;  %vm4748_vm12 = vcmp.gt.f32.partialorder %v4740_v3, 0.0 }
 0x2a7   : > { %5723 = vpow2.f32 %v4761_v59  ;;  %v4763_v26 = vmul.f32 1.442695, %v4754_v38  ;;  %v4767_v12 = vmul.f32 1.442695, %v4756_v25 }
 0x2a8   : > { %5725 = vpow2.f32 %v4765_v42 }
 0x2a9   : > { %5727 = vpow2.f32 %v4763_v26 }
 0x2aa   : > { %5729 = vpow2.f32 %v4767_v12 }
 0x2b2   : > { %v4675_v16 = vpop.f32.mrf.mxu0  ;;  %v4716_v41 = vpop.f32.mrf.mxu1 }
 0x2b3   : > { %v4727_v58 = vadd.f32 %v4675_v16, %v4268_v17  ;;  %v4729_v15 = vadd.f32 %v4716_v41, %v4309_v13 }
 0x2b4   : > { %v5724_v62 = vpop.eup %5723  ;;  %v4677_v30 = vpop.f32.mrf.mxu0 }
 0x2b5   : > { %v4718_v0 = vpop.f32.mrf.mxu1  ;;  %v5726_v35 = vpop.eup %5725  ;;  %v5362_v11 = vadd.f32 -1.0, %v5724_v62  ;;  %v4741_v53 = vadd.f32 %v7180_v33, %v4727_v58  ;;  %v4743_v27 = vadd.f32 %v7180_v33, %v4729_v15  ;;  %v4728_v8 = vadd.f32 %v4677_v30, %v4270_v63 }
 0x2b6   : > { %v5728_v7 = vpop.eup %5727  ;;  %v5364_v39 = vadd.f32 -1.0, %v5726_v35  ;;  %v4730_v56 = vadd.f32 %v4718_v0, %v4311_v28  ;;  %v4679_v1 = vpop.f32.mrf.mxu0 }
 0x2b7   : > { %v4720_v10 = vpop.f32.mrf.mxu1  ;;  %v5730_v47 = vpop.eup %5729  ;;  %v5363_v24 = vadd.f32 -1.0, %v5728_v7  ;;  %v4757_v36 = vmin.f32 %v4741_v53, 0.0  ;;  %v4785_v61 = vsel %vm4745_vm9, %v4737_v51, %v5362_v11  ;;  %v4759_v43 = vmin.f32 %v4743_v27, 0.0 }
 0x2b8   : > { %v5365_v9 = vadd.f32 -1.0, %v5730_v47  ;;  %v4680_v2 = vpop.f32.mrf.mxu0  ;;  %v4742_v23 = vadd.f32 %v7180_v33, %v4728_v8  ;;  %v4744_v6 = vadd.f32 %v7180_v33, %v4730_v56  ;;  %v4787_v57 = vsel %vm4747_vm11, %v4739_v37, %v5364_v39 }
 0x2b9   : > { %v4721_v40 = vpop.f32.mrf.mxu1  ;;  %v4786_v29 = vsel %vm4746_vm10, %v4738_v18, %v5363_v24  ;;  %v4769_v44 = vmul.f32 1.442695, %v4757_v36  ;;  %v4773_v21 = vmul.f32 1.442695, %v4759_v43  ;;  %vm4749_vm13 = vcmp.gt.f32.partialorder %v4741_v53, 0.0 }
 0x2ba   : > { %v5370_v5 = vpack.c.bf16 %v4786_v29, %v4785_v61  ;;  %v4788_v4 = vsel %vm4748_vm12, %v4740_v3, %v5365_v9  ;;  %v4758_v48 = vmin.f32 %v4742_v23, 0.0  ;;  %v4760_v32 = vmin.f32 %v4744_v6, 0.0 }
 0x2bb   : > { %v5371_v14 = vpack.c.bf16 %v4788_v4, %v4787_v57  ;;  %5731 = vpow2.f32 %v4769_v44  ;;  %vm4750_vm14 = vcmp.gt.f32.partialorder %v4742_v23, 0.0  ;;  %vm4751_vm15 = vcmp.gt.f32.partialorder %v4743_v27, 0.0 }
 0x2bc   : > { %v4817_v46 = vrot.slane %v5370_v5, %v6637_v50  ;;  %5733 = vpow2.f32 %v4773_v21  ;;  %v4771_v34 = vmul.f32 1.442695, %v4758_v48  ;;  %v4775_v31 = vmul.f32 1.442695, %v4760_v32 }
 0x2bd   : > { %v4824_v54 = vrot.slane %v5371_v14, %v6637_v50  ;;  %vm4752_vm1 = vcmp.gt.f32.partialorder %v4744_v6, 0.0 }
 0x2be   : > { %5735 = vpow2.f32 %v4771_v34 }
 0x2bf   : > { %v4825_v49 = vcombine.low %v4817_v46, %v4824_v54  ;;  %5737 = vpow2.f32 %v4775_v31 }
 0x2c1   : > { %4845 = vst [vmem:[%s6678_s18 + $0x30] sm:$0xff] %v4825_v49 }
 0x2c8   : > { %v5732_v33 = vpop.eup %5731 }
 0x2c9   : > { %v5734_v51 = vpop.eup %5733  ;;  %v5366_v22 = vadd.f32 -1.0, %v5732_v33 }
 0x2ca   : > { %v5368_v45 = vadd.f32 -1.0, %v5734_v51 }
 0x2cb   : > { %v5736_v37 = vpop.eup %5735  ;;  %v4789_v3 = vsel %vm4749_vm13, %v4741_v53, %v5366_v22 }
 0x2cc   : > { %v5738_v60 = vpop.eup %5737  ;;  %v5367_v18 = vadd.f32 -1.0, %v5736_v37  ;;  %v4791_v19 = vsel %vm4751_vm15, %v4743_v27, %v5368_v45 }
 0x2cd   : > { %v5369_v52 = vadd.f32 -1.0, %v5738_v60 }
 0x2ce   : > { %v4790_v20 = vsel %vm4750_vm14, %v4742_v23, %v5367_v18 }
 0x2cf   : > { %v5372_v55 = vpack.c.bf16 %v4790_v20, %v4789_v3  ;;  %v4792_v38 = vsel %vm4752_vm1, %v4744_v6, %v5369_v52 }
 0x2d0   : > { %v5373_v59 = vpack.c.bf16 %v4792_v38, %v4791_v19 }
 0x2d1   : > { %v4834_v25 = vrot.slane %v5372_v55, %v6637_v50 }
 0x2d2   : > { %v4841_v42 = vrot.slane %v5373_v59, %v6637_v50 }
 0x2d4   : > { %v4842_v26 = vcombine.low %v4834_v25, %v4841_v42 }
 0x2d6   : > { %4846 = vst [vmem:[%s6678_s18 + $0x38] sm:$0xff] %v4842_v26 }
 0x2d7 PF: > { %s13_s12 = sadd.s32 1, %s5745_s12  }
 0x2d8   : > { %p10_p4 = scmp.ge.s32.totalorder %s13_s12, 4  }
 0x2da   :  { %12 = sbr.rel (!%p10_p4) target bundleno = 1 (0x1), region = 64 }

// kernel: sunet3d_forward.17
= control target key start
LH: loop header
LB: loop body
LE: loop exit
PB: predicated region body
PF: predicated region fallthrough
CT: control target
= control target key end

     0   :  { %s1452_s12 = smov 0   ;;  %s1609_s0 = inlined_call_operand.vmem [shape: bf16[2,8,4096], index: 0, kind: input, shape index: {}]   ;;  %s1610_s1 = inlined_call_operand.vmem [shape: bf16[1,2,8], index: 1, kind: input, shape index: {}]   ;;  %s1611_s2 = inlined_call_operand.vmem [shape: f32[2,1], index: 2, kind: input, shape index: {}]   ;;  %s1612_s3 = inlined_call_operand.vmem [shape: f32[2,2,4096], index: 3, kind: output, shape index: {}]  }
   0x1 LB: > { %s1301_s13 = sadd.s32 4294967295, %s1428_s12   ;;  %p1305_p0 = scmp.ge.s32.totalorder %s1428_s12, 1  ;;  %s1428_s12 = sphi %s1452_s12, %s13_s12  }
   0x2   : > { %p137_p1 = scmp.lt.s32.totalorder %s1428_s12, 3 }
   0x4   : > { %p138_p2 = pnand %p1305_p0, %p137_p1 }
   0x5   : > { %p161_p3 = scmp.lt.s32.totalorder (!%p138_p2), %s1301_s13, 1 }
   0x6   : > { %141 = sbr.rel (%p138_p2) target bundleno = 283 (0x11b), region = 32 }
   0xb   : > { %v1430_v0 = vmov 0   ;;  %s1614_s13 = smov (!%p161_p3, %s1301_s13), 1  ;;  %v177_v1 = vld [vmem:[%s1611_s2] sm:$0x3]  ;;  %vm207_vm0 = vcmask 1043456   ;;  %vm203_vm1 = vcmask 64512  }
   0xc   : > { %264 = vmatprep.mubr.bf16.mxu0 %v1430_v0  ;;  %305 = vmatprep.mubr.bf16.mxu1 %v1430_v0  ;;  %v715_v2 = vld [vmem:[%s1611_s2] sm:$0x3]  ;;  %s1376_s18 = sshll.u32 %s1614_s13, 7  ;;  %s1377_s7 = sshll.u32 %s1614_s13, 6 }
   0xd   : > { %1388 = vset.pattern.permute.xlu0 %v1430_v0  ;;  %1389 = vset.pattern.permute.xlu1 %v1430_v0  ;;  %v447_v3 = vld [vmem:[%s1611_s2] sm:$0x3]  ;;  %s1479_s23 = scalar_lea.vmem %s1609_s0, %s1376_s18  ;;  %s1582_s10 = scalar_lea.vmem %s1612_s3, %s1377_s7 }
   0xe   : > { %180 = vperm.xlu0 %1388, %v177_v1   ;;  %718 = vperm.xlu1 %1389, %v715_v2   ;;  %v983_v4 = vld [vmem:[%s1611_s2] sm:$0x3]  ;;  %v174_v6 = vld [vmem:[%s1479_s23 + $0x8] sm:$0xff]  ;;  %v175_v7 = vld [vmem:[%s1479_s23 + $0x10] sm:$0xff] }
   0xf   : > { %v173_v5 = vld [vmem:[%s1479_s23] sm:$0xff]  ;;  %v1313_v9 = vcombine.high %v174_v6, %v174_v6  ;;  %v1312_v11 = vcombine.low %v174_v6, %v174_v6  ;;  %v176_v12 = vld [vmem:[%s1479_s23 + $0x18] sm:$0xff]  ;;  %v1315_v13 = vcombine.high %v175_v7, %v175_v7  ;;  %v1314_v15 = vcombine.low %v175_v7, %v175_v7  ;;  %v444_v20 = vld [vmem:[%s1479_s23 + $0x28] sm:$0xff] }
  0x10   : > { %v1311_v8 = vcombine.high %v173_v5, %v173_v5  ;;  %v1310_v10 = vcombine.low %v173_v5, %v173_v5  ;;  %v1317_v14 = vcombine.high %v176_v12, %v176_v12  ;;  %v1316_v16 = vcombine.low %v176_v12, %v176_v12  ;;  %v443_v19 = vld [vmem:[%s1479_s23 + $0x20] sm:$0xff]  ;;  %v445_v28 = vld [vmem:[%s1479_s23 + $0x30] sm:$0xff]  ;;  %v446_v29 = vld [vmem:[%s1479_s23 + $0x38] sm:$0xff] }
  0x11   : > { %1320 = vmatprep.subr.msk.bf16.mxu1 %vm207_vm0, %v1313_v9  ;;  %v215_v18 = vsel %vm207_vm0, %v1312_v11, 0  ;;  %v172_v21 = vld [vmem:[%s1610_s1] sm:$0x1]  ;;  %v221_v22 = vsel %vm207_vm0, %v1314_v15, 0  ;;  %v1327_v24 = vcombine.high %v443_v19, %v443_v19  ;;  %v1329_v25 = vcombine.high %v444_v20, %v444_v20  ;;  %v712_v37 = vld [vmem:[%s1479_s23 + $0x48] sm:$0xff]  ;;  %v713_v45 = vld [vmem:[%s1479_s23 + $0x50] sm:$0xff] }
  0x12   : > { %450 = vperm.xlu0 %1388, %v447_v3   ;;  %986 = vperm.xlu1 %1389, %v983_v4   ;;  %v209_v17 = vsel %vm207_vm0, %v1310_v10, 0  ;;  %v227_v23 = vsel %vm207_vm0, %v1316_v16, 0  ;;  %v1326_v26 = vcombine.low %v443_v19, %v443_v19  ;;  %v1328_v27 = vcombine.low %v444_v20, %v444_v20  ;;  %v711_v36 = vld [vmem:[%s1479_s23 + $0x40] sm:$0xff]  ;;  %v714_v46 = vld [vmem:[%s1479_s23 + $0x58] sm:$0xff]  ;;  %v980_v54 = vld [vmem:[%s1479_s23 + $0x68] sm:$0xff] }
  0x13   : > { %1318 = vmatprep.subr.msk.bf16.mxu0 %vm207_vm0, %v1311_v8  ;;  %288 = vmatpush1.bf16.msra.mxu1 %v215_v18  ;;  %v1331_v32 = vcombine.high %v445_v28, %v445_v28  ;;  %v1333_v33 = vcombine.high %v446_v29, %v446_v29  ;;  %v1330_v34 = vcombine.low %v445_v28, %v445_v28  ;;  %v442_v38 = vld [vmem:[%s1610_s1] sm:$0x1]  ;;  %v981_v62 = vld [vmem:[%s1479_s23 + $0x70] sm:$0xff]  ;;  %v982_v63 = vld [vmem:[%s1479_s23 + $0x78] sm:$0xff]  ;;  %v1431_v10 = vmov 1983009808  }
  0x14   : > { %247 = vmatpush1.bf16.msra.mxu0 %v209_v17  ;;  %1324 = vmatprep.subr.msk.bf16.mxu1 %vm207_vm0, %v1317_v14  ;;  %v477_v30 = vsel %vm207_vm0, %v1326_v26, 0  ;;  %v483_v31 = vsel %vm207_vm0, %v1328_v27, 0  ;;  %v1332_v35 = vcombine.low %v446_v29, %v446_v29  ;;  %v1343_v41 = vcombine.high %v711_v36, %v711_v36  ;;  %v979_v53 = vld [vmem:[%s1479_s23 + $0x60] sm:$0xff] }
  0x15   : > { %1322 = vmatprep.subr.msk.bf16.mxu0 %vm207_vm0, %v1315_v13  ;;  %v489_v39 = vsel %vm207_vm0, %v1330_v34, 0  ;;  %v1345_v42 = vcombine.high %v712_v37, %v712_v37  ;;  %v1342_v43 = vcombine.low %v711_v36, %v711_v36  ;;  %v1344_v44 = vcombine.low %v712_v37, %v712_v37  ;;  %v710_v55 = vld [vmem:[%s1610_s1] sm:$0x1] }
  0x16   : > { %1321 = vmatmul.mubr.msk.bf16.vlgmr.msra.gmra.mxu1 %vm203_vm1, %v172_v21  ;;  %v495_v40 = vsel %vm207_vm0, %v1332_v35, 0  ;;  %v1347_v49 = vcombine.high %v713_v45, %v713_v45  ;;  %v1349_v50 = vcombine.high %v714_v46, %v714_v46  ;;  %v1346_v51 = vcombine.low %v713_v45, %v713_v45  ;;  %v978_v7 = vld [vmem:[%s1610_s1] sm:$0x1] }
  0x17   : > { %1319 = vmatmul.mubr.msk.bf16.vlgmr.msra.gmra.mxu0 %vm203_vm1, %v172_v21  ;;  %370 = vmatpush1.bf16.msra.mxu1 %v227_v23  ;;  %v745_v47 = vsel %vm207_vm0, %v1342_v43, 0  ;;  %v751_v48 = vsel %vm207_vm0, %v1344_v44, 0  ;;  %v1348_v52 = vcombine.low %v714_v46, %v714_v46  ;;  %v1359_v58 = vcombine.high %v979_v53, %v979_v53 }
  0x18   : > { %329 = vmatpush1.bf16.msra.mxu0 %v221_v22  ;;  %346 = vmatprep.mubr.bf16.mxu0 %v1430_v0  ;;  %v757_v56 = vsel %vm207_vm0, %v1346_v51, 0  ;;  %v1361_v59 = vcombine.high %v980_v54, %v980_v54  ;;  %v1358_v60 = vcombine.low %v979_v53, %v979_v53  ;;  %v1360_v61 = vcombine.low %v980_v54, %v980_v54 }
  0x19   : > { %387 = vmatprep.mubr.bf16.mxu1 %v1430_v0  ;;  %1334 = vmatprep.subr.msk.bf16.mxu0 %vm207_vm0, %v1327_v24  ;;  %v763_v57 = vsel %vm207_vm0, %v1348_v52, 0  ;;  %v1363_v3 = vcombine.high %v981_v62, %v981_v62  ;;  %v1365_v4 = vcombine.high %v982_v63, %v982_v63  ;;  %v1362_v5 = vcombine.low %v981_v62, %v981_v62 }
  0x1a   : > { %1336 = vmatprep.subr.msk.bf16.mxu1 %vm207_vm0, %v1329_v25  ;;  %v1013_v1 = vsel %vm207_vm0, %v1358_v60, 0  ;;  %v1019_v2 = vsel %vm207_vm0, %v1360_v61, 0  ;;  %v1364_v6 = vcombine.low %v982_v63, %v982_v63  ;;  %v407_v11 = vunpack.c.l.s4 %v1431_v10 }
  0x1b   : > { %v1025_v8 = vsel %vm207_vm0, %v1362_v5, 0  ;;  %v409_v12 = vlaneseq }
  0x1c   : > { %v1031_v9 = vsel %vm207_vm0, %v1364_v6, 0  ;;  %v408_v13 = vunpack.c.0.s8 %v407_v11 }
  0x1d   : > { %v410_v14 = vshrl.u32 %v409_v12, 7 }
  0x1e   : > { %1325 = vmatmul.mubr.msk.bf16.vlgmr.msra.gmra.mxu1 %vm203_vm1, %v172_v21 }
  0x1f   : > { %1323 = vmatmul.mubr.msk.bf16.vlgmr.msra.gmra.mxu0 %vm203_vm1, %v172_v21  ;;  %556 = vmatpush1.bf16.msra.mxu1 %v483_v31  ;;  %v1574_v19 = vsub.s32 %v408_v13, %v410_v14 }
  0x20   : > { %515 = vmatpush1.bf16.msra.mxu0 %v477_v30  ;;  %532 = vmatprep.mubr.bf16.mxu0 %v1430_v0 }
  0x21   : > { %573 = vmatprep.mubr.bf16.mxu1 %v1430_v0  ;;  %1338 = vmatprep.subr.msk.bf16.mxu0 %vm207_vm0, %v1331_v32 }
  0x22   : > { %1340 = vmatprep.subr.msk.bf16.mxu1 %vm207_vm0, %v1333_v33 }
  0x26   : > { %1337 = vmatmul.mubr.msk.bf16.vlgmr.msra.gmra.mxu1 %vm203_vm1, %v442_v38 }
  0x27   : > { %1335 = vmatmul.mubr.msk.bf16.vlgmr.msra.gmra.mxu0 %vm203_vm1, %v442_v38  ;;  %638 = vmatpush1.bf16.msra.mxu1 %v495_v40 }
  0x28   : > { %597 = vmatpush1.bf16.msra.mxu0 %v489_v39  ;;  %614 = vmatprep.mubr.bf16.mxu0 %v1430_v0 }
  0x29   : > { %655 = vmatprep.mubr.bf16.mxu1 %v1430_v0  ;;  %1350 = vmatprep.subr.msk.bf16.mxu0 %vm207_vm0, %v1343_v41 }
  0x2a   : > { %1352 = vmatprep.subr.msk.bf16.mxu1 %vm207_vm0, %v1345_v42 }
  0x2e   : > { %1341 = vmatmul.mubr.msk.bf16.vlgmr.msra.gmra.mxu1 %vm203_vm1, %v442_v38 }
  0x2f   : > { %1339 = vmatmul.mubr.msk.bf16.vlgmr.msra.gmra.mxu0 %vm203_vm1, %v442_v38  ;;  %824 = vmatpush1.bf16.msra.mxu1 %v751_v48 }
  0x30   : > { %783 = vmatpush1.bf16.msra.mxu0 %v745_v47  ;;  %800 = vmatprep.mubr.bf16.mxu0 %v1430_v0 }
  0x31   : > { %841 = vmatprep.mubr.bf16.mxu1 %v1430_v0  ;;  %1354 = vmatprep.subr.msk.bf16.mxu0 %vm207_vm0, %v1347_v49 }
  0x32   : > { %1356 = vmatprep.subr.msk.bf16.mxu1 %vm207_vm0, %v1349_v50 }
  0x36   : > { %1353 = vmatmul.mubr.msk.bf16.vlgmr.msra.gmra.mxu1 %vm203_vm1, %v710_v55 }
  0x37   : > { %1351 = vmatmul.mubr.msk.bf16.vlgmr.msra.gmra.mxu0 %vm203_vm1, %v710_v55  ;;  %906 = vmatpush1.bf16.msra.mxu1 %v763_v57 }
  0x38   : > { %865 = vmatpush1.bf16.msra.mxu0 %v757_v56  ;;  %882 = vmatprep.mubr.bf16.mxu0 %v1430_v0 }
  0x39   : > { %923 = vmatprep.mubr.bf16.mxu1 %v1430_v0  ;;  %1366 = vmatprep.subr.msk.bf16.mxu0 %vm207_vm0, %v1359_v58 }
  0x3a   : > { %1368 = vmatprep.subr.msk.bf16.mxu1 %vm207_vm0, %v1361_v59 }
  0x3e   : > { %1357 = vmatmul.mubr.msk.bf16.vlgmr.msra.gmra.mxu1 %vm203_vm1, %v710_v55 }
  0x3f   : > { %1355 = vmatmul.mubr.msk.bf16.vlgmr.msra.gmra.mxu0 %vm203_vm1, %v710_v55  ;;  %1092 = vmatpush1.bf16.msra.mxu1 %v1019_v2 }
  0x40   : > { %1051 = vmatpush1.bf16.msra.mxu0 %v1013_v1  ;;  %1068 = vmatprep.mubr.bf16.mxu0 %v1430_v0 }
  0x41   : > { %1109 = vmatprep.mubr.bf16.mxu1 %v1430_v0  ;;  %1370 = vmatprep.subr.msk.bf16.mxu0 %vm207_vm0, %v1363_v3 }
  0x42   : > { %1372 = vmatprep.subr.msk.bf16.mxu1 %vm207_vm0, %v1365_v4 }
  0x46   : > { %1369 = vmatmul.mubr.msk.bf16.vlgmr.msra.gmra.mxu1 %vm203_vm1, %v978_v7 }
  0x47   : > { %1367 = vmatmul.mubr.msk.bf16.vlgmr.msra.gmra.mxu0 %vm203_vm1, %v978_v7  ;;  %1174 = vmatpush1.bf16.msra.mxu1 %v1031_v9 }
  0x48   : > { %1133 = vmatpush1.bf16.msra.mxu0 %v1025_v8  ;;  %1150 = vmatprep.mubr.bf16.mxu0 %v1430_v0 }
  0x49   : > { %1191 = vmatprep.mubr.bf16.mxu1 %v1430_v0 }
  0x4e   : > { %1373 = vmatmul.mubr.msk.bf16.vlgmr.msra.gmra.mxu1 %vm203_vm1, %v978_v7 }
  0x4f   : > { %1371 = vmatmul.mubr.msk.bf16.vlgmr.msra.gmra.mxu0 %vm203_vm1, %v978_v7 }
  0x89   : > { %v181_v15 = vpop.permute.xlu0 %180 }
  0x8d   : > { %v451_v49 = vpop.permute.xlu0 %450 }
  0xd6   : > { %v307_v17 = vpop.f32.mrf.mxu1 }
  0xd7   : > { %v266_v16 = vpop.f32.mrf.mxu0  ;;  %v308_v0 = vadd.f32 %v307_v17, %v181_v15 }
  0xd8   : > { %v309_v20 = vpop.f32.mrf.mxu1  ;;  %v267_v21 = vadd.f32 %v266_v16, %v181_v15 }
  0xd9   : > { %v268_v18 = vpop.f32.mrf.mxu0  ;;  %v310_v23 = vadd.f32 %v309_v20, %v181_v15 }
  0xda   : > { %v269_v22 = vadd.f32 %v268_v18, %v181_v15  ;;  %v311_v25 = vpop.f32.mrf.mxu1 }
  0xdb   : > { %v270_v24 = vpop.f32.mrf.mxu0  ;;  %v405_v27 = vcombine.low %v308_v0, %v310_v23 }
  0xdc   : > { %v404_v26 = vcombine.low %v267_v21, %v269_v22  ;;  %v312_v29 = vpop.f32.mrf.mxu1  ;;  %v719_v22 = vpop.permute.xlu1 %718 }
  0xdd   : > { %v271_v28 = vpop.f32.mrf.mxu0  ;;  %v419_v31 = vrot.slane %v405_v27, %v1574_v19 }
  0xde   : > { %v412_v30 = vrot.slane %v404_v26, %v1574_v19  ;;  %v389_v33 = vpop.f32.mrf.mxu1 }
  0xdf   : > { %v348_v32 = vpop.f32.mrf.mxu0  ;;  %v390_v38 = vadd.f32 %v389_v33, %v181_v15 }
  0xe0   : > { %v420_v34 = vcombine.low %v412_v30, %v419_v31  ;;  %v391_v36 = vpop.f32.mrf.mxu1  ;;  %v349_v37 = vadd.f32 %v348_v32, %v181_v15 }
  0xe1   : > { %v350_v35 = vpop.f32.mrf.mxu0  ;;  %v392_v40 = vadd.f32 %v391_v36, %v181_v15 }
  0xe2   : > { %440 = vst [vmem:[%s1582_s10] sm:$0xff] %v420_v34  ;;  %v351_v39 = vadd.f32 %v350_v35, %v181_v15  ;;  %v393_v42 = vpop.f32.mrf.mxu1 }
  0xe3   : > { %v352_v41 = vpop.f32.mrf.mxu0  ;;  %v422_v44 = vcombine.low %v390_v38, %v392_v40 }
  0xe4   : > { %v421_v43 = vcombine.low %v349_v37, %v351_v39  ;;  %v394_v46 = vpop.f32.mrf.mxu1 }
  0xe5   : > { %v353_v45 = vpop.f32.mrf.mxu0  ;;  %v436_v48 = vrot.slane %v422_v44, %v1574_v19 }
  0xe6   : > { %v429_v47 = vrot.slane %v421_v43, %v1574_v19  ;;  %v575_v51 = vpop.f32.mrf.mxu1 }
  0xe7   : > { %v534_v50 = vpop.f32.mrf.mxu0  ;;  %v576_v57 = vadd.f32 %v575_v51, %v451_v49 }
  0xe8   : > { %v437_v52 = vcombine.low %v429_v47, %v436_v48  ;;  %v577_v54 = vpop.f32.mrf.mxu1  ;;  %v535_v55 = vadd.f32 %v534_v50, %v451_v49 }
  0xe9   : > { %v536_v53 = vpop.f32.mrf.mxu0  ;;  %v578_v58 = vadd.f32 %v577_v54, %v451_v49 }
  0xea   : > { %441 = vst [vmem:[%s1582_s10 + $0x8] sm:$0xff] %v437_v52  ;;  %v537_v56 = vadd.f32 %v536_v53, %v451_v49  ;;  %v579_v60 = vpop.f32.mrf.mxu1 }
  0xeb   : > { %v538_v59 = vpop.f32.mrf.mxu0  ;;  %v673_v62 = vcombine.low %v576_v57, %v578_v58 }
  0xec   : > { %v672_v61 = vcombine.low %v535_v55, %v537_v56  ;;  %v580_v1 = vpop.f32.mrf.mxu1  ;;  %v987_v56 = vpop.permute.xlu1 %986 }
  0xed   : > { %v539_v63 = vpop.f32.mrf.mxu0  ;;  %v687_v3 = vrot.slane %v673_v62, %v1574_v19 }
  0xee   : > { %v680_v2 = vrot.slane %v672_v61, %v1574_v19  ;;  %v657_v5 = vpop.f32.mrf.mxu1 }
  0xef   : > { %v616_v4 = vpop.f32.mrf.mxu0  ;;  %v658_v10 = vadd.f32 %v657_v5, %v451_v49 }
  0xf0   : > { %v688_v6 = vcombine.low %v680_v2, %v687_v3  ;;  %v659_v8 = vpop.f32.mrf.mxu1  ;;  %v617_v9 = vadd.f32 %v616_v4, %v451_v49 }
  0xf1   : > { %v618_v7 = vpop.f32.mrf.mxu0  ;;  %v660_v12 = vadd.f32 %v659_v8, %v451_v49 }
  0xf2   : > { %708 = vst [vmem:[%s1582_s10 + $0x10] sm:$0xff] %v688_v6  ;;  %v619_v11 = vadd.f32 %v618_v7, %v451_v49  ;;  %v661_v14 = vpop.f32.mrf.mxu1 }
  0xf3   : > { %v620_v13 = vpop.f32.mrf.mxu0  ;;  %v690_v16 = vcombine.low %v658_v10, %v660_v12 }
  0xf4   : > { %v689_v15 = vcombine.low %v617_v9, %v619_v11  ;;  %v662_v18 = vpop.f32.mrf.mxu1 }
  0xf5   : > { %v621_v17 = vpop.f32.mrf.mxu0  ;;  %v704_v21 = vrot.slane %v690_v16, %v1574_v19 }
  0xf6   : > { %v697_v20 = vrot.slane %v689_v15, %v1574_v19  ;;  %v843_v23 = vpop.f32.mrf.mxu1 }
  0xf7   : > { %v802_v0 = vpop.f32.mrf.mxu0  ;;  %v844_v29 = vadd.f32 %v843_v23, %v719_v22 }
  0xf8   : > { %v705_v24 = vcombine.low %v697_v20, %v704_v21  ;;  %v845_v26 = vpop.f32.mrf.mxu1  ;;  %v803_v27 = vadd.f32 %v802_v0, %v719_v22 }
  0xf9   : > { %v804_v25 = vpop.f32.mrf.mxu0  ;;  %v846_v30 = vadd.f32 %v845_v26, %v719_v22 }
  0xfa   : > { %709 = vst [vmem:[%s1582_s10 + $0x18] sm:$0xff] %v705_v24  ;;  %v805_v28 = vadd.f32 %v804_v25, %v719_v22  ;;  %v847_v32 = vpop.f32.mrf.mxu1 }
  0xfb   : > { %v806_v31 = vpop.f32.mrf.mxu0  ;;  %v941_v34 = vcombine.low %v844_v29, %v846_v30 }
  0xfc   : > { %v940_v33 = vcombine.low %v803_v27, %v805_v28  ;;  %v848_v36 = vpop.f32.mrf.mxu1 }
  0xfd   : > { %v807_v35 = vpop.f32.mrf.mxu0  ;;  %v955_v38 = vrot.slane %v941_v34, %v1574_v19 }
  0xfe   : > { %v948_v37 = vrot.slane %v940_v33, %v1574_v19  ;;  %v925_v40 = vpop.f32.mrf.mxu1 }
  0xff   : > { %v884_v39 = vpop.f32.mrf.mxu0  ;;  %v926_v45 = vadd.f32 %v925_v40, %v719_v22 }
 0x100   : > { %v956_v41 = vcombine.low %v948_v37, %v955_v38  ;;  %v927_v43 = vpop.f32.mrf.mxu1  ;;  %v885_v44 = vadd.f32 %v884_v39, %v719_v22 }
 0x101   : > { %v886_v42 = vpop.f32.mrf.mxu0  ;;  %v928_v47 = vadd.f32 %v927_v43, %v719_v22 }
 0x102   : > { %976 = vst [vmem:[%s1582_s10 + $0x20] sm:$0xff] %v956_v41  ;;  %v887_v46 = vadd.f32 %v886_v42, %v719_v22  ;;  %v929_v49 = vpop.f32.mrf.mxu1 }
 0x103   : > { %v888_v48 = vpop.f32.mrf.mxu0  ;;  %v958_v51 = vcombine.low %v926_v45, %v928_v47 }
 0x104   : > { %v957_v50 = vcombine.low %v885_v44, %v887_v46  ;;  %v930_v53 = vpop.f32.mrf.mxu1 }
 0x105   : > { %v889_v52 = vpop.f32.mrf.mxu0  ;;  %v972_v55 = vrot.slane %v958_v51, %v1574_v19 }
 0x106   : > { %v965_v54 = vrot.slane %v957_v50, %v1574_v19  ;;  %v1111_v58 = vpop.f32.mrf.mxu1 }
 0x107   : > { %v1070_v57 = vpop.f32.mrf.mxu0  ;;  %v1112_v1 = vadd.f32 %v1111_v58, %v987_v56 }
 0x108   : > { %v973_v59 = vcombine.low %v965_v54, %v972_v55  ;;  %v1113_v61 = vpop.f32.mrf.mxu1  ;;  %v1071_v62 = vadd.f32 %v1070_v57, %v987_v56 }
 0x109   : > { %v1072_v60 = vpop.f32.mrf.mxu0  ;;  %v1114_v2 = vadd.f32 %v1113_v61, %v987_v56 }
 0x10a   : > { %977 = vst [vmem:[%s1582_s10 + $0x28] sm:$0xff] %v973_v59  ;;  %v1073_v63 = vadd.f32 %v1072_v60, %v987_v56  ;;  %v1115_v4 = vpop.f32.mrf.mxu1 }
 0x10b   : > { %v1074_v3 = vpop.f32.mrf.mxu0  ;;  %v1209_v6 = vcombine.low %v1112_v1, %v1114_v2 }
 0x10c   : > { %v1208_v5 = vcombine.low %v1071_v62, %v1073_v63  ;;  %v1116_v8 = vpop.f32.mrf.mxu1 }
 0x10d   : > { %v1075_v7 = vpop.f32.mrf.mxu0  ;;  %v1223_v10 = vrot.slane %v1209_v6, %v1574_v19 }
 0x10e   : > { %v1216_v9 = vrot.slane %v1208_v5, %v1574_v19  ;;  %v1193_v12 = vpop.f32.mrf.mxu1 }
 0x10f   : > { %v1152_v11 = vpop.f32.mrf.mxu0  ;;  %v1194_v17 = vadd.f32 %v1193_v12, %v987_v56 }
 0x110   : > { %v1224_v13 = vcombine.low %v1216_v9, %v1223_v10  ;;  %v1195_v15 = vpop.f32.mrf.mxu1  ;;  %v1153_v16 = vadd.f32 %v1152_v11, %v987_v56 }
 0x111   : > { %v1154_v14 = vpop.f32.mrf.mxu0  ;;  %v1196_v20 = vadd.f32 %v1195_v15, %v987_v56 }
 0x112   : > { %1244 = vst [vmem:[%s1582_s10 + $0x30] sm:$0xff] %v1224_v13  ;;  %v1155_v18 = vadd.f32 %v1154_v14, %v987_v56  ;;  %v1197_v22 = vpop.f32.mrf.mxu1 }
 0x113   : > { %v1156_v21 = vpop.f32.mrf.mxu0  ;;  %v1226_v23 = vcombine.low %v1194_v17, %v1196_v20 }
 0x114   : > { %v1225_v0 = vcombine.low %v1153_v16, %v1155_v18  ;;  %v1198_v25 = vpop.f32.mrf.mxu1 }
 0x115   : > { %v1157_v24 = vpop.f32.mrf.mxu0  ;;  %v1240_v27 = vrot.slane %v1226_v23, %v1574_v19 }
 0x116   : > { %v1233_v26 = vrot.slane %v1225_v0, %v1574_v19 }
 0x118   : > { %v1241_v28 = vcombine.low %v1233_v26, %v1240_v27 }
 0x11a   : > { %1245 = vst [vmem:[%s1582_s10 + $0x38] sm:$0xff] %v1241_v28 }
 0x11b PF: > { %s13_s12 = sadd.s32 1, %s1428_s12  }
 0x11c   : > { %p10_p4 = scmp.ge.s32.totalorder %s13_s12, 4  }
 0x11e   :  { %12 = sbr.rel (!%p10_p4) target bundleno = 1 (0x1), region = 62 }

</bundles_post_ra>
